<compile_context>
chip_gen: v7x
topology: tpu7x:2x2x1
jax: 0.10.0
libtpu: 0.0.40
codegen_flags: <defaults>
</compile_context>

<pallas_src>
import functools

import jax
import jax.numpy as jnp
from jax.experimental import pallas as pl
from jax.experimental.pallas import tpu as pltpu

NUM_POOL = 3
NC = 5
EPS = 1e-5  # F.instance_norm default

# Set to jnp.bfloat16 on v6e/v7x for ~2x MXU rate / half the patch footprint
# (instance-norm statistics and normalization stay f32 either way).
COMPUTE_DTYPE = jnp.float32


# ---------------------------------------------------------------------------
# Pallas kernels
# ---------------------------------------------------------------------------
def _conv3x3_in_relu_kernel(w_ref, p_ref, b_ref, o_ref, *, inv_hw, eps):
    # w_ref: (Cout, 9*Cin) per-sample modulated weights, p_ref: (9*Cin, HW) im2col patches,
    # b_ref: (Cout, 1).  Output (Cout, HW): HW on lanes -> lane-dense stores.
    acc = jnp.dot(w_ref[...], p_ref[...],
                  preferred_element_type=jnp.float32) + b_ref[...]
    # single-pass instance-norm stats in f32 (biased variance, like F.instance_norm)
    mean = jnp.sum(acc, axis=1, keepdims=True) * inv_hw
    ex2 = jnp.sum(acc * acc, axis=1, keepdims=True) * inv_hw
    var = jnp.maximum(ex2 - mean * mean, 0.0)
    y = (acc - mean) * jax.lax.rsqrt(var + eps)
    o_ref[...] = jnp.maximum(y, 0.0)


def _upconv_conv2_residual_kernel(w_ref, p_ref, b_ref, weff_ref, xt_ref, o_ref,
                                  *, inv_hw, eps):
    # Last up ConvBlock + collapsed affine conv2 chain + residual; lane-dense (1, HW) output.
    acc = jnp.dot(w_ref[...], p_ref[...],
                  preferred_element_type=jnp.float32) + b_ref[...]       # (32, HW)
    mean = jnp.sum(acc, axis=1, keepdims=True) * inv_hw
    ex2 = jnp.sum(acc * acc, axis=1, keepdims=True) * inv_hw
    var = jnp.maximum(ex2 - mean * mean, 0.0)
    act = jnp.maximum((acc - mean) * jax.lax.rsqrt(var + eps), 0.0)      # (32, HW)
    img = jnp.dot(weff_ref[...], act, preferred_element_type=jnp.float32)  # (1, HW)
    o_ref[...] = img + xt_ref[...]                                       # + residual (+b_eff)


# ---------------------------------------------------------------------------
# Wrappers around pallas_call (batched over B via a "parallel" grid axis)
# ---------------------------------------------------------------------------
def _im2col3x3(x):
    """(B,C,H,W) -> (B, 9*C, H*W) patches for a 3x3 conv, padding=1 (XLA glue).

    Flat channel index is cin*9 + kh*3 + kw, matching w.reshape(Cout, Cin*9)."""
    B, C, H, W = x.shape
    xp = jnp.pad(x, ((0, 0), (0, 0), (1, 1), (1, 1)))
    cols = [xp[:, :, kh:kh + H, kw:kw + W] for kh in range(3) for kw in range(3)]
    patches = jnp.stack(cols, axis=2)            # (B, C, 9, H, W)
    return patches.reshape(B, C * 9, H * W)


def conv3x3_instnorm_relu(x, w_b, bias):
    """Batched conv2d(k=3, pad=1) -> instance_norm -> relu.

    x: (B,Cin,H,W) f32, w_b: (B,Cout,Cin,3,3) per-sample modulated weights, bias: (Cout,)."""
    B, Cin, H, W = x.shape
    Cout = w_b.shape[1]
    HW = H * W
    patches = _im2col3x3(x).astype(COMPUTE_DTYPE)                  # (B, 9*Cin, HW)
    wmat = w_b.reshape(B, Cout, 9 * Cin).astype(COMPUTE_DTYPE)     # no transpose needed
    bias2 = bias.reshape(Cout, 1).astype(jnp.float32)
    kernel = functools.partial(_conv3x3_in_relu_kernel, inv_hw=1.0 / HW, eps=EPS)
    out = pl.pallas_call(
        kernel,
        grid=(B,),
        out_shape=jax.ShapeDtypeStruct((B, Cout, HW), jnp.float32),
        in_specs=[
            pl.BlockSpec((None, Cout, 9 * Cin), lambda b: (b, 0, 0)),
            pl.BlockSpec((None, 9 * Cin, HW), lambda b: (b, 0, 0)),
            pl.BlockSpec((Cout, 1), lambda b: (0, 0)),
        ],
        out_specs=pl.BlockSpec((None, Cout, HW), lambda b: (b, 0, 0)),
        compiler_params=pltpu.CompilerParams(dimension_semantics=("parallel",)),
        cost_estimate=pl.CostEstimate(
            flops=int(2 * B * HW * 9 * Cin * Cout),
            transcendentals=0,
            bytes_accessed=int(4 * (B * HW * 9 * Cin + B * 9 * Cin * Cout
                                    + Cout + B * HW * Cout))),
    )(wmat, patches, bias2)
    return out.reshape(B, Cout, H, W)


def final_up_conv2_residual(x, w_b, bias, conv2_p, x_img):
    """Last up ConvBlock + conv2 (collapsed affine 1x1 chain) + residual add.

    x: (B,64,H,W), w_b: (B,32,64,3,3), x_img: (B,H,W) cascade input. Returns (B,H,W)."""
    B, Cin, H, W = x.shape
    Cout = w_b.shape[1]
    HW = H * W
    patches = _im2col3x3(x).astype(COMPUTE_DTYPE)
    wmat = w_b.reshape(B, Cout, 9 * Cin).astype(COMPUTE_DTYPE)
    bias2 = bias.reshape(Cout, 1).astype(jnp.float32)
    # conv2 = Conv2d(32,16,1) -> Conv2d(16,1,1) -> Conv2d(1,1,1) with NO nonlinearity in
    # between (verified against the reference) -> collapse to a single affine map.
    W1 = conv2_p['w1'][:, :, 0, 0]                        # (16, 32)
    W2 = conv2_p['w2'][:, :, 0, 0]                        # (1, 16)
    w3 = conv2_p['w3'][0, 0, 0, 0]                        # scalar
    w_eff = (W2 @ W1) * w3                                # (1, 32)
    b_eff = (W2 @ conv2_p['b1'])[0] * w3 + conv2_p['b2'][0] * w3 + conv2_p['b3'][0]
    xt = x_img.reshape(B, 1, HW) + b_eff                  # fold b_eff into the residual row
    kernel = functools.partial(_upconv_conv2_residual_kernel, inv_hw=1.0 / HW, eps=EPS)
    out = pl.pallas_call(
        kernel,
        grid=(B,),
        out_shape=jax.ShapeDtypeStruct((B, 1, HW), jnp.float32),
        in_specs=[
            pl.BlockSpec((None, Cout, 9 * Cin), lambda b: (b, 0, 0)),
            pl.BlockSpec((None, 9 * Cin, HW), lambda b: (b, 0, 0)),
            pl.BlockSpec((Cout, 1), lambda b: (0, 0)),
            pl.BlockSpec((1, Cout), lambda b: (0, 0)),
            pl.BlockSpec((None, 1, HW), lambda b: (b, 0, 0)),
        ],
        out_specs=pl.BlockSpec((None, 1, HW), lambda b: (b, 0, 0)),
        compiler_params=pltpu.CompilerParams(dimension_semantics=("parallel",)),
        cost_estimate=pl.CostEstimate(
            flops=int(2 * B * HW * (9 * Cin * Cout + Cout)),
            transcendentals=0,
            bytes_accessed=int(4 * (B * HW * 9 * Cin + B * 9 * Cin * Cout
                                    + 2 * Cout + 2 * B * HW))),
    )(wmat, patches, bias2, w_eff.astype(jnp.float32), xt.astype(jnp.float32))
    return out.reshape(B, H, W)


# ---------------------------------------------------------------------------
# JAX glue (data movement / FFT), all fused inside the single jit
# ---------------------------------------------------------------------------
def maxpool2(x):  # (B,C,H,W) -> (B,C,H//2,W//2), kernel/stride 2
    B, C, H, W = x.shape
    return jnp.max(x.reshape(B, C, H // 2, 2, W // 2, 2), axis=(3, 5))


def _upsample2_axis(x, axis):
    # PyTorch F.interpolate(scale_factor=2, mode='bilinear', align_corners=False)
    N = x.shape[axis]
    j = jnp.arange(2 * N, dtype=jnp.float32)
    src = jnp.maximum((j + 0.5) * 0.5 - 0.5, 0.0)
    i0 = jnp.floor(src).astype(jnp.int32)
    i1 = jnp.minimum(i0 + 1, N - 1)
    w = src - i0.astype(jnp.float32)
    x0 = jnp.take(x, i0, axis=axis)
    x1 = jnp.take(x, i1, axis=axis)
    shape = [1] * x.ndim
    shape[axis] = 2 * N
    w = w.reshape(shape)
    return x0 * (1.0 - w) + x1 * w


def upsample2_bilinear(x):  # (B,C,H,W) -> (B,C,2H,2W)
    return _upsample2_axis(_upsample2_axis(x, 2), 3)


def data_consistency(pred_bhw, ksp_bhw2, mask_bhw):
    # TODO(synk): fft2/ifft2 have no Pallas primitive; kept as XLA FFT (exact semantics).
    ksp_pred = jnp.fft.fft2(pred_bhw, norm='ortho')
    ksp_us = ksp_bhw2[..., 0] + 1j * ksp_bhw2[..., 1]
    updated = mask_bhw * ksp_us + (1.0 - mask_bhw) * ksp_pred
    return jnp.real(jnp.fft.ifft2(updated, norm='ortho')).astype(jnp.float32)


# ---------------------------------------------------------------------------
# U-Net cascade and full model forward (one jit for the whole thing)
# ---------------------------------------------------------------------------
def _unet_cascade(x_img, ksp, mask, params, mods):
    """One UnetMACReconNetEncDecKM forward, batched. x_img: (B,H,W) -> (B,H,W)."""
    out = x_img[:, None, :, :].astype(jnp.float32)               # (B,1,H,W) NCHW
    skips = []
    for i in range(NUM_POOL):
        w_b = params['down'][i]['w'][None] * mods['down'][i]     # layermodulation, whole batch
        out = conv3x3_instnorm_relu(out, w_b, params['down'][i]['b'])
        skips.append(out)
        out = maxpool2(out)
    w_b = params['latent']['w'][None] * mods['latent']
    out = conv3x3_instnorm_relu(out, w_b, params['latent']['b'])
    for i in range(NUM_POOL - 1):
        out = upsample2_bilinear(out)
        out = jnp.concatenate([out, skips.pop()], axis=1)        # cat([up, skip], C)
        w_b = params['up'][i]['w'][None] * mods['up'][i]
        out = conv3x3_instnorm_relu(out, w_b, params['up'][i]['b'])
    out = upsample2_bilinear(out)
    out = jnp.concatenate([out, skips.pop()], axis=1)
    w_b = params['up'][NUM_POOL - 1]['w'][None] * mods['up'][NUM_POOL - 1]
    pred = final_up_conv2_residual(out, w_b, params['up'][NUM_POOL - 1]['b'],
                                   params['conv2'], x_img)       # (B,H,W)
    return data_consistency(pred, ksp, mask)


@jax.jit
def _forward_impl(us_query_input, ksp_query_imgs, ksp_mask_query,
                  down_mod, lat_mod, up_mod, cascades_params):
    x = us_query_input[:, 0]                                     # (B,H,W)
    mods = {'down': list(down_mod), 'latent': lat_mod, 'up': list(up_mod)}
    for params in cascades_params:                               # nc cascades, sequential
        x = _unet_cascade(x, ksp_query_imgs, ksp_mask_query, params, mods)
    return x[:, None, :, :]                                      # (B,1,H,W)


def dc_cnn_maml_forward(us_query_input, ksp_query_imgs, acc_string, mask_string,
                        dataset_type, ksp_mask_query, down_mod_weights,
                        latent_mod_weights, up_mod_weights, cascades_params):
    """us_query_input: (B,1,H,W); ksp_query_imgs: (B,H,W,2); ksp_mask_query: (B,H,W).
    Modulation weights are layer-major lists of arrays with a leading batch dim
    (PyTorch indexes mods[n][i]; here we index mods[i][n])."""
    # TODO(synk): 'cardiac' F.pad(5,5,5,5)+crop branch not implemented (unused here).
    assert dataset_type != 'cardiac'
    return _forward_impl(us_query_input, ksp_query_imgs, ksp_mask_query,
                         tuple(down_mod_weights), latent_mod_weights,
                         tuple(up_mod_weights), tuple(cascades_params))


# ---------------------------------------------------------------------------
# Deterministic parameter / input construction
# ---------------------------------------------------------------------------
def _conv_init(key, cout, cin, k):
    fan_in = cin * k * k
    bound = 1.0 / float(fan_in) ** 0.5
    kw, kb = jax.random.split(key)
    w = jax.random.uniform(kw, (cout, cin, k, k), jnp.float32, -bound, bound)
    b = jax.random.uniform(kb, (cout,), jnp.float32, -bound, bound)
    return w, b


def init_unet_params(key):
    keys = jax.random.split(key, 10)
    down_defs = [(1, 32), (32, 64), (64, 128)]
    up_defs = [(256, 64), (128, 32), (64, 32)]
    params = {'down': [], 'up': []}
    ki = 0
    for cin, cout in down_defs:
        w, b = _conv_init(keys[ki], cout, cin, 3); ki += 1
        params['down'].append({'w': w, 'b': b})
    w, b = _conv_init(keys[ki], 128, 128, 3); ki += 1
    params['latent'] = {'w': w, 'b': b}
    for cin, cout in up_defs:
        w, b = _conv_init(keys[ki], cout, cin, 3); ki += 1
        params['up'].append({'w': w, 'b': b})
    w1, b1 = _conv_init(keys[ki], 16, 32, 1); ki += 1
    w2, b2 = _conv_init(keys[ki], 1, 16, 1); ki += 1
    w3, b3 = _conv_init(keys[ki], 1, 1, 1); ki += 1
    params['conv2'] = {'w1': w1, 'b1': b1, 'w2': w2, 'b2': b2, 'w3': w3, 'b3': b3}
    return params


def init_mod_weights(key, B):
    shapes_down = [(32, 1, 3, 3), (64, 32, 3, 3), (128, 64, 3, 3)]
    shape_lat = (128, 128, 3, 3)
    shapes_up = [(64, 256, 3, 3), (32, 128, 3, 3), (32, 64, 3, 3)]
    keys = jax.random.split(key, 7)
    down = [1.0 + 0.01 * jax.random.normal(keys[i], (B,) + shapes_down[i], jnp.float32)
            for i in range(3)]
    lat = 1.0 + 0.01 * jax.random.normal(keys[3], (B,) + shape_lat, jnp.float32)
    up = [1.0 + 0.01 * jax.random.normal(keys[4 + i], (B,) + shapes_up[i], jnp.float32)
          for i in range(3)]
    return down, lat, up


if __name__ == "__main__":
    key = jax.random.PRNGKey(0)
    B, H, W = 2, 16, 16
    k_in, k_ksp, k_mask, k_par, k_mod = jax.random.split(key, 5)

    us_query_input = jax.random.normal(k_in, (B, 1, H, W), jnp.float32)
    ksp_query_imgs = jax.random.normal(k_ksp, (B, H, W, 2), jnp.float32)
    ksp_mask_query = (jax.random.uniform(k_mask, (B, H, W)) > 0.6).astype(jnp.float32)

    cascades_params = [init_unet_params(k) for k in jax.random.split(k_par, NC)]
    down_mod, lat_mod, up_mod = init_mod_weights(k_mod, B)

    out = dc_cnn_maml_forward(us_query_input, ksp_query_imgs, 'acc4x', 'cartesian',
                              'mrbrain', ksp_mask_query, down_mod, lat_mod, up_mod,
                              cascades_params)
    out = jax.block_until_ready(out)
    assert out.shape == (B, 1, H, W) and out.dtype == jnp.float32, (out.shape, out.dtype)
    print("KERNEL_OK")
</pallas_src>

<mosaic_0001>
module attributes {stable_mosaic.version = 11 : i64} {
  func.func @_conv3x3_in_relu_kernel(%arg0: i32, %arg1: memref<1x32x9xf32, #tpu.memory_space<vmem>>, %arg2: memref<1x9x256xf32, #tpu.memory_space<vmem>>, %arg3: memref<32x1xf32, #tpu.memory_space<vmem>>, %arg4: memref<1x32x256xf32, #tpu.memory_space<vmem>>) attributes {dimension_semantics = [#tpu.dimension_semantics<parallel>], iteration_bounds = array<i64: 2>, scalar_prefetch = 0 : i64, scratch_operands = 0 : i64, tpu.core_type = #tpu.core_type<tc>, window_params = [{transform_indices = @transform_0, window_bounds = array<i64: 1, 32, 9>}, {transform_indices = @transform_1, window_bounds = array<i64: 1, 9, 256>}, {pipeline_mode = #tpu.pipeline_mode<synchronous>, transform_indices = @transform_2, window_bounds = array<i64: 32, 1>}, {transform_indices = @transform_3, window_bounds = array<i64: 1, 32, 256>}]} {
    %c0 = arith.constant 0 : index
    %c0_0 = arith.constant 0 : index
    %c0_1 = arith.constant 0 : index
    %0 = vector.load %arg1[%c0, %c0_0, %c0_1] : memref<1x32x9xf32, #tpu.memory_space<vmem>>, vector<1x32x9xf32>
    %1 = vector.shape_cast %0 : vector<1x32x9xf32> to vector<32x9xf32>
    %c0_2 = arith.constant 0 : index
    %c0_3 = arith.constant 0 : index
    %c0_4 = arith.constant 0 : index
    %2 = vector.load %arg2[%c0_2, %c0_3, %c0_4] : memref<1x9x256xf32, #tpu.memory_space<vmem>>, vector<1x9x256xf32>
    %3 = vector.shape_cast %2 : vector<1x9x256xf32> to vector<9x256xf32>
    %cst = arith.constant dense<0.000000e+00> : vector<32x256xf32>
    %4 = tpu.matmul %1, %3, %cst {dimension_numbers = #tpu.dot_dimension_numbers<[1], [0], [0], [1], [0, 0, 1, 1], [], []>} : vector<32x9xf32>, vector<9x256xf32>, vector<32x256xf32> -> vector<32x256xf32>
    %c0_5 = arith.constant 0 : index
    %c0_6 = arith.constant 0 : index
    %5 = vector.load %arg3[%c0_5, %c0_6] : memref<32x1xf32, #tpu.memory_space<vmem>>, vector<32x1xf32>
    %6 = vector.broadcast %5 : vector<32x1xf32> to vector<32x256xf32>
    %7 = arith.addf %4, %6 : vector<32x256xf32>
    %cst_7 = arith.constant dense<0.000000e+00> : vector<32xf32>
    %8 = vector.multi_reduction <add>, %7, %cst_7 [1] : vector<32x256xf32> to vector<32xf32>
    %9 = vector.shape_cast %8 : vector<32xf32> to vector<32x1xf32>
    %cst_8 = arith.constant 3.906250e-03 : f32
    %10 = vector.broadcast %cst_8 : f32 to vector<32x1xf32>
    %11 = arith.mulf %9, %10 : vector<32x1xf32>
    %12 = arith.mulf %7, %7 : vector<32x256xf32>
    %cst_9 = arith.constant dense<0.000000e+00> : vector<32xf32>
    %13 = vector.multi_reduction <add>, %12, %cst_9 [1] : vector<32x256xf32> to vector<32xf32>
    %14 = vector.shape_cast %13 : vector<32xf32> to vector<32x1xf32>
    %cst_10 = arith.constant 3.906250e-03 : f32
    %15 = vector.broadcast %cst_10 : f32 to vector<32x1xf32>
    %16 = arith.mulf %14, %15 : vector<32x1xf32>
    %17 = arith.mulf %11, %11 : vector<32x1xf32>
    %18 = arith.subf %16, %17 : vector<32x1xf32>
    %cst_11 = arith.constant 0.000000e+00 : f32
    %19 = vector.broadcast %cst_11 : f32 to vector<32x1xf32>
    %20 = arith.maximumf %18, %19 : vector<32x1xf32>
    %21 = vector.broadcast %11 : vector<32x1xf32> to vector<32x256xf32>
    %22 = arith.subf %7, %21 : vector<32x256xf32>
    %cst_12 = arith.constant 9.99999974E-6 : f32
    %23 = vector.broadcast %cst_12 : f32 to vector<32x1xf32>
    %24 = arith.addf %20, %23 : vector<32x1xf32>
    %25 = math.rsqrt %24 : vector<32x1xf32>
    %26 = vector.broadcast %25 : vector<32x1xf32> to vector<32x256xf32>
    %27 = arith.mulf %22, %26 : vector<32x256xf32>
    %cst_13 = arith.constant 0.000000e+00 : f32
    %28 = vector.broadcast %cst_13 : f32 to vector<32x256xf32>
    %29 = arith.maximumf %27, %28 : vector<32x256xf32>
    %c0_14 = arith.constant 0 : index
    %c0_15 = arith.constant 0 : index
    %c0_16 = arith.constant 0 : index
    %30 = vector.load %arg4[%c0_14, %c0_15, %c0_16] : memref<1x32x256xf32, #tpu.memory_space<vmem>>, vector<1x32x256xf32>
    %31 = vector.shape_cast %30 : vector<1x32x256xf32> to vector<32x256xf32>
    %32 = vector.shape_cast %29 : vector<32x256xf32> to vector<1x32x256xf32>
    tpu.vector_store %arg4[%c0_14, %c0_15, %c0_16], %32 {strides = array<i32>} : memref<1x32x256xf32, #tpu.memory_space<vmem>>, vector<1x32x256xf32>,
    return
  }
  func.func @transform_0(%arg0: i32) -> (i32, i32, i32) {
    %c0_i32 = arith.constant 0 : i32
    %c0_i32_0 = arith.constant 0 : i32
    %c0_i32_1 = arith.constant 0 : i32
    return %arg0, %c0_i32, %c0_i32_0 : i32, i32, i32
  }
  func.func @transform_1(%arg0: i32) -> (i32, i32, i32) {
    %c0_i32 = arith.constant 0 : i32
    %c0_i32_0 = arith.constant 0 : i32
    %c0_i32_1 = arith.constant 0 : i32
    return %arg0, %c0_i32, %c0_i32_0 : i32, i32, i32
  }
  func.func @transform_2(%arg0: i32) -> (i32, i32) {
    %c0_i32 = arith.constant 0 : i32
    %c0_i32_0 = arith.constant 0 : i32
    %c0_i32_1 = arith.constant 0 : i32
    return %c0_i32, %c0_i32_0 : i32, i32
  }
  func.func @transform_3(%arg0: i32) -> (i32, i32, i32) {
    %c0_i32 = arith.constant 0 : i32
    %c0_i32_0 = arith.constant 0 : i32
    %c0_i32_1 = arith.constant 0 : i32
    return %arg0, %c0_i32, %c0_i32_0 : i32, i32, i32
  }
}

module attributes {stable_mosaic.version = 11 : i64} {
  func.func @_conv3x3_in_relu_kernel(%arg0: i32, %arg1: memref<1x64x288xf32, #tpu.memory_space<vmem>>, %arg2: memref<1x288x64xf32, #tpu.memory_space<vmem>>, %arg3: memref<64x1xf32, #tpu.memory_space<vmem>>, %arg4: memref<1x64x64xf32, #tpu.memory_space<vmem>>) attributes {dimension_semantics = [#tpu.dimension_semantics<parallel>], iteration_bounds = array<i64: 2>, scalar_prefetch = 0 : i64, scratch_operands = 0 : i64, tpu.core_type = #tpu.core_type<tc>, window_params = [{transform_indices = @transform_0, window_bounds = array<i64: 1, 64, 288>}, {transform_indices = @transform_1, window_bounds = array<i64: 1, 288, 64>}, {pipeline_mode = #tpu.pipeline_mode<synchronous>, transform_indices = @transform_2, window_bounds = array<i64: 64, 1>}, {transform_indices = @transform_3, window_bounds = array<i64: 1, 64, 64>}]} {
    %c0 = arith.constant 0 : index
    %c0_0 = arith.constant 0 : index
    %c0_1 = arith.constant 0 : index
    %0 = vector.load %arg1[%c0, %c0_0, %c0_1] : memref<1x64x288xf32, #tpu.memory_space<vmem>>, vector<1x64x288xf32>
    %1 = vector.shape_cast %0 : vector<1x64x288xf32> to vector<64x288xf32>
    %c0_2 = arith.constant 0 : index
    %c0_3 = arith.constant 0 : index
    %c0_4 = arith.constant 0 : index
    %2 = vector.load %arg2[%c0_2, %c0_3, %c0_4] : memref<1x288x64xf32, #tpu.memory_space<vmem>>, vector<1x288x64xf32>
    %3 = vector.shape_cast %2 : vector<1x288x64xf32> to vector<288x64xf32>
    %cst = arith.constant dense<0.000000e+00> : vector<64x64xf32>
    %4 = tpu.matmul %1, %3, %cst {dimension_numbers = #tpu.dot_dimension_numbers<[1], [0], [0], [1], [0, 0, 1, 1], [], []>} : vector<64x288xf32>, vector<288x64xf32>, vector<64x64xf32> -> vector<64x64xf32>
    %c0_5 = arith.constant 0 : index
    %c0_6 = arith.constant 0 : index
    %5 = vector.load %arg3[%c0_5, %c0_6] : memref<64x1xf32, #tpu.memory_space<vmem>>, vector<64x1xf32>
    %6 = vector.broadcast %5 : vector<64x1xf32> to vector<64x64xf32>
    %7 = arith.addf %4, %6 : vector<64x64xf32>
    %cst_7 = arith.constant dense<0.000000e+00> : vector<64xf32>
    %8 = vector.multi_reduction <add>, %7, %cst_7 [1] : vector<64x64xf32> to vector<64xf32>
    %9 = vector.shape_cast %8 : vector<64xf32> to vector<64x1xf32>
    %cst_8 = arith.constant 1.562500e-02 : f32
    %10 = vector.broadcast %cst_8 : f32 to vector<64x1xf32>
    %11 = arith.mulf %9, %10 : vector<64x1xf32>
    %12 = arith.mulf %7, %7 : vector<64x64xf32>
    %cst_9 = arith.constant dense<0.000000e+00> : vector<64xf32>
    %13 = vector.multi_reduction <add>, %12, %cst_9 [1] : vector<64x64xf32> to vector<64xf32>
    %14 = vector.shape_cast %13 : vector<64xf32> to vector<64x1xf32>
    %cst_10 = arith.constant 1.562500e-02 : f32
    %15 = vector.broadcast %cst_10 : f32 to vector<64x1xf32>
    %16 = arith.mulf %14, %15 : vector<64x1xf32>
    %17 = arith.mulf %11, %11 : vector<64x1xf32>
    %18 = arith.subf %16, %17 : vector<64x1xf32>
    %cst_11 = arith.constant 0.000000e+00 : f32
    %19 = vector.broadcast %cst_11 : f32 to vector<64x1xf32>
    %20 = arith.maximumf %18, %19 : vector<64x1xf32>
    %21 = vector.broadcast %11 : vector<64x1xf32> to vector<64x64xf32>
    %22 = arith.subf %7, %21 : vector<64x64xf32>
    %cst_12 = arith.constant 9.99999974E-6 : f32
    %23 = vector.broadcast %cst_12 : f32 to vector<64x1xf32>
    %24 = arith.addf %20, %23 : vector<64x1xf32>
    %25 = math.rsqrt %24 : vector<64x1xf32>
    %26 = vector.broadcast %25 : vector<64x1xf32> to vector<64x64xf32>
    %27 = arith.mulf %22, %26 : vector<64x64xf32>
    %cst_13 = arith.constant 0.000000e+00 : f32
    %28 = vector.broadcast %cst_13 : f32 to vector<64x64xf32>
    %29 = arith.maximumf %27, %28 : vector<64x64xf32>
    %c0_14 = arith.constant 0 : index
    %c0_15 = arith.constant 0 : index
    %c0_16 = arith.constant 0 : index
    %30 = vector.load %arg4[%c0_14, %c0_15, %c0_16] : memref<1x64x64xf32, #tpu.memory_space<vmem>>, vector<1x64x64xf32>
    %31 = vector.shape_cast %30 : vector<1x64x64xf32> to vector<64x64xf32>
    %32 = vector.shape_cast %29 : vector<64x64xf32> to vector<1x64x64xf32>
    tpu.vector_store %arg4[%c0_14, %c0_15, %c0_16], %32 {strides = array<i32>} : memref<1x64x64xf32, #tpu.memory_space<vmem>>, vector<1x64x64xf32>,
    return
  }
  func.func @transform_0(%arg0: i32) -> (i32, i32, i32) {
    %c0_i32 = arith.constant 0 : i32
    %c0_i32_0 = arith.constant 0 : i32
    %c0_i32_1 = arith.constant 0 : i32
    return %arg0, %c0_i32, %c0_i32_0 : i32, i32, i32
  }
  func.func @transform_1(%arg0: i32) -> (i32, i32, i32) {
    %c0_i32 = arith.constant 0 : i32
    %c0_i32_0 = arith.constant 0 : i32
    %c0_i32_1 = arith.constant 0 : i32
    return %arg0, %c0_i32, %c0_i32_0 : i32, i32, i32
  }
  func.func @transform_2(%arg0: i32) -> (i32, i32) {
    %c0_i32 = arith.constant 0 : i32
    %c0_i32_0 = arith.constant 0 : i32
    %c0_i32_1 = arith.constant 0 : i32
    return %c0_i32, %c0_i32_0 : i32, i32
  }
  func.func @transform_3(%arg0: i32) -> (i32, i32, i32) {
    %c0_i32 = arith.constant 0 : i32
    %c0_i32_0 = arith.constant 0 : i32
    %c0_i32_1 = arith.constant 0 : i32
    return %arg0, %c0_i32, %c0_i32_0 : i32, i32, i32
  }
}

module attributes {stable_mosaic.version = 11 : i64} {
  func.func @_conv3x3_in_relu_kernel(%arg0: i32, %arg1: memref<1x128x576xf32, #tpu.memory_space<vmem>>, %arg2: memref<1x576x16xf32, #tpu.memory_space<vmem>>, %arg3: memref<128x1xf32, #tpu.memory_space<vmem>>, %arg4: memref<1x128x16xf32, #tpu.memory_space<vmem>>) attributes {dimension_semantics = [#tpu.dimension_semantics<parallel>], iteration_bounds = array<i64: 2>, scalar_prefetch = 0 : i64, scratch_operands = 0 : i64, tpu.core_type = #tpu.core_type<tc>, window_params = [{transform_indices = @transform_0, window_bounds = array<i64: 1, 128, 576>}, {transform_indices = @transform_1, window_bounds = array<i64: 1, 576, 16>}, {pipeline_mode = #tpu.pipeline_mode<synchronous>, transform_indices = @transform_2, window_bounds = array<i64: 128, 1>}, {transform_indices = @transform_3, window_bounds = array<i64: 1, 128, 16>}]} {
    %c0 = arith.constant 0 : index
    %c0_0 = arith.constant 0 : index
    %c0_1 = arith.constant 0 : index
    %0 = vector.load %arg1[%c0, %c0_0, %c0_1] : memref<1x128x576xf32, #tpu.memory_space<vmem>>, vector<1x128x576xf32>
    %1 = vector.shape_cast %0 : vector<1x128x576xf32> to vector<128x576xf32>
    %c0_2 = arith.constant 0 : index
    %c0_3 = arith.constant 0 : index
    %c0_4 = arith.constant 0 : index
    %2 = vector.load %arg2[%c0_2, %c0_3, %c0_4] : memref<1x576x16xf32, #tpu.memory_space<vmem>>, vector<1x576x16xf32>
    %3 = vector.shape_cast %2 : vector<1x576x16xf32> to vector<576x16xf32>
    %cst = arith.constant dense<0.000000e+00> : vector<128x16xf32>
    %4 = tpu.matmul %1, %3, %cst {dimension_numbers = #tpu.dot_dimension_numbers<[1], [0], [0], [1], [0, 0, 1, 1], [], []>} : vector<128x576xf32>, vector<576x16xf32>, vector<128x16xf32> -> vector<128x16xf32>
    %c0_5 = arith.constant 0 : index
    %c0_6 = arith.constant 0 : index
    %5 = vector.load %arg3[%c0_5, %c0_6] : memref<128x1xf32, #tpu.memory_space<vmem>>, vector<128x1xf32>
    %6 = vector.broadcast %5 : vector<128x1xf32> to vector<128x16xf32>
    %7 = arith.addf %4, %6 : vector<128x16xf32>
    %cst_7 = arith.constant dense<0.000000e+00> : vector<128xf32>
    %8 = vector.multi_reduction <add>, %7, %cst_7 [1] : vector<128x16xf32> to vector<128xf32>
    %9 = vector.shape_cast %8 : vector<128xf32> to vector<128x1xf32>
    %cst_8 = arith.constant 6.250000e-02 : f32
    %10 = vector.broadcast %cst_8 : f32 to vector<128x1xf32>
    %11 = arith.mulf %9, %10 : vector<128x1xf32>
    %12 = arith.mulf %7, %7 : vector<128x16xf32>
    %cst_9 = arith.constant dense<0.000000e+00> : vector<128xf32>
    %13 = vector.multi_reduction <add>, %12, %cst_9 [1] : vector<128x16xf32> to vector<128xf32>
    %14 = vector.shape_cast %13 : vector<128xf32> to vector<128x1xf32>
    %cst_10 = arith.constant 6.250000e-02 : f32
    %15 = vector.broadcast %cst_10 : f32 to vector<128x1xf32>
    %16 = arith.mulf %14, %15 : vector<128x1xf32>
    %17 = arith.mulf %11, %11 : vector<128x1xf32>
    %18 = arith.subf %16, %17 : vector<128x1xf32>
    %cst_11 = arith.constant 0.000000e+00 : f32
    %19 = vector.broadcast %cst_11 : f32 to vector<128x1xf32>
    %20 = arith.maximumf %18, %19 : vector<128x1xf32>
    %21 = vector.broadcast %11 : vector<128x1xf32> to vector<128x16xf32>
    %22 = arith.subf %7, %21 : vector<128x16xf32>
    %cst_12 = arith.constant 9.99999974E-6 : f32
    %23 = vector.broadcast %cst_12 : f32 to vector<128x1xf32>
    %24 = arith.addf %20, %23 : vector<128x1xf32>
    %25 = math.rsqrt %24 : vector<128x1xf32>
    %26 = vector.broadcast %25 : vector<128x1xf32> to vector<128x16xf32>
    %27 = arith.mulf %22, %26 : vector<128x16xf32>
    %cst_13 = arith.constant 0.000000e+00 : f32
    %28 = vector.broadcast %cst_13 : f32 to vector<128x16xf32>
    %29 = arith.maximumf %27, %28 : vector<128x16xf32>
    %c0_14 = arith.constant 0 : index
    %c0_15 = arith.constant 0 : index
    %c0_16 = arith.constant 0 : index
    %30 = vector.load %arg4[%c0_14, %c0_15, %c0_16] : memref<1x128x16xf32, #tpu.memory_space<vmem>>, vector<1x128x16xf32>
    %31 = vector.shape_cast %30 : vector<1x128x16xf32> to vector<128x16xf32>
    %32 = vector.shape_cast %29 : vector<128x16xf32> to vector<1x128x16xf32>
    tpu.vector_store %arg4[%c0_14, %c0_15, %c0_16], %32 {strides = array<i32>} : memref<1x128x16xf32, #tpu.memory_space<vmem>>, vector<1x128x16xf32>,
    return
  }
  func.func @transform_0(%arg0: i32) -> (i32, i32, i32) {
    %c0_i32 = arith.constant 0 : i32
    %c0_i32_0 = arith.constant 0 : i32
    %c0_i32_1 = arith.constant 0 : i32
    return %arg0, %c0_i32, %c0_i32_0 : i32, i32, i32
  }
  func.func @transform_1(%arg0: i32) -> (i32, i32, i32) {
    %c0_i32 = arith.constant 0 : i32
    %c0_i32_0 = arith.constant 0 : i32
    %c0_i32_1 = arith.constant 0 : i32
    return %arg0, %c0_i32, %c0_i32_0 : i32, i32, i32
  }
  func.func @transform_2(%arg0: i32) -> (i32, i32) {
    %c0_i32 = arith.constant 0 : i32
    %c0_i32_0 = arith.constant 0 : i32
    %c0_i32_1 = arith.constant 0 : i32
    return %c0_i32, %c0_i32_0 : i32, i32
  }
  func.func @transform_3(%arg0: i32) -> (i32, i32, i32) {
    %c0_i32 = arith.constant 0 : i32
    %c0_i32_0 = arith.constant 0 : i32
    %c0_i32_1 = arith.constant 0 : i32
    return %arg0, %c0_i32, %c0_i32_0 : i32, i32, i32
  }
}

module attributes {stable_mosaic.version = 11 : i64} {
  func.func @_conv3x3_in_relu_kernel(%arg0: i32, %arg1: memref<1x128x1152xf32, #tpu.memory_space<vmem>>, %arg2: memref<1x1152x4xf32, #tpu.memory_space<vmem>>, %arg3: memref<128x1xf32, #tpu.memory_space<vmem>>, %arg4: memref<1x128x4xf32, #tpu.memory_space<vmem>>) attributes {dimension_semantics = [#tpu.dimension_semantics<parallel>], iteration_bounds = array<i64: 2>, scalar_prefetch = 0 : i64, scratch_operands = 0 : i64, tpu.core_type = #tpu.core_type<tc>, window_params = [{transform_indices = @transform_0, window_bounds = array<i64: 1, 128, 1152>}, {transform_indices = @transform_1, window_bounds = array<i64: 1, 1152, 4>}, {pipeline_mode = #tpu.pipeline_mode<synchronous>, transform_indices = @transform_2, window_bounds = array<i64: 128, 1>}, {transform_indices = @transform_3, window_bounds = array<i64: 1, 128, 4>}]} {
    %c0 = arith.constant 0 : index
    %c0_0 = arith.constant 0 : index
    %c0_1 = arith.constant 0 : index
    %0 = vector.load %arg1[%c0, %c0_0, %c0_1] : memref<1x128x1152xf32, #tpu.memory_space<vmem>>, vector<1x128x1152xf32>
    %1 = vector.shape_cast %0 : vector<1x128x1152xf32> to vector<128x1152xf32>
    %c0_2 = arith.constant 0 : index
    %c0_3 = arith.constant 0 : index
    %c0_4 = arith.constant 0 : index
    %2 = vector.load %arg2[%c0_2, %c0_3, %c0_4] : memref<1x1152x4xf32, #tpu.memory_space<vmem>>, vector<1x1152x4xf32>
    %3 = vector.shape_cast %2 : vector<1x1152x4xf32> to vector<1152x4xf32>
    %cst = arith.constant dense<0.000000e+00> : vector<128x4xf32>
    %4 = tpu.matmul %1, %3, %cst {dimension_numbers = #tpu.dot_dimension_numbers<[1], [0], [0], [1], [0, 0, 1, 1], [], []>} : vector<128x1152xf32>, vector<1152x4xf32>, vector<128x4xf32> -> vector<128x4xf32>
    %c0_5 = arith.constant 0 : index
    %c0_6 = arith.constant 0 : index
    %5 = vector.load %arg3[%c0_5, %c0_6] : memref<128x1xf32, #tpu.memory_space<vmem>>, vector<128x1xf32>
    %6 = vector.broadcast %5 : vector<128x1xf32> to vector<128x4xf32>
    %7 = arith.addf %4, %6 : vector<128x4xf32>
    %cst_7 = arith.constant dense<0.000000e+00> : vector<128xf32>
    %8 = vector.multi_reduction <add>, %7, %cst_7 [1] : vector<128x4xf32> to vector<128xf32>
    %9 = vector.shape_cast %8 : vector<128xf32> to vector<128x1xf32>
    %cst_8 = arith.constant 2.500000e-01 : f32
    %10 = vector.broadcast %cst_8 : f32 to vector<128x1xf32>
    %11 = arith.mulf %9, %10 : vector<128x1xf32>
    %12 = arith.mulf %7, %7 : vector<128x4xf32>
    %cst_9 = arith.constant dense<0.000000e+00> : vector<128xf32>
    %13 = vector.multi_reduction <add>, %12, %cst_9 [1] : vector<128x4xf32> to vector<128xf32>
    %14 = vector.shape_cast %13 : vector<128xf32> to vector<128x1xf32>
    %cst_10 = arith.constant 2.500000e-01 : f32
    %15 = vector.broadcast %cst_10 : f32 to vector<128x1xf32>
    %16 = arith.mulf %14, %15 : vector<128x1xf32>
    %17 = arith.mulf %11, %11 : vector<128x1xf32>
    %18 = arith.subf %16, %17 : vector<128x1xf32>
    %cst_11 = arith.constant 0.000000e+00 : f32
    %19 = vector.broadcast %cst_11 : f32 to vector<128x1xf32>
    %20 = arith.maximumf %18, %19 : vector<128x1xf32>
    %21 = vector.broadcast %11 : vector<128x1xf32> to vector<128x4xf32>
    %22 = arith.subf %7, %21 : vector<128x4xf32>
    %cst_12 = arith.constant 9.99999974E-6 : f32
    %23 = vector.broadcast %cst_12 : f32 to vector<128x1xf32>
    %24 = arith.addf %20, %23 : vector<128x1xf32>
    %25 = math.rsqrt %24 : vector<128x1xf32>
    %26 = vector.broadcast %25 : vector<128x1xf32> to vector<128x4xf32>
    %27 = arith.mulf %22, %26 : vector<128x4xf32>
    %cst_13 = arith.constant 0.000000e+00 : f32
    %28 = vector.broadcast %cst_13 : f32 to vector<128x4xf32>
    %29 = arith.maximumf %27, %28 : vector<128x4xf32>
    %c0_14 = arith.constant 0 : index
    %c0_15 = arith.constant 0 : index
    %c0_16 = arith.constant 0 : index
    %30 = vector.load %arg4[%c0_14, %c0_15, %c0_16] : memref<1x128x4xf32, #tpu.memory_space<vmem>>, vector<1x128x4xf32>
    %31 = vector.shape_cast %30 : vector<1x128x4xf32> to vector<128x4xf32>
    %32 = vector.shape_cast %29 : vector<128x4xf32> to vector<1x128x4xf32>
    tpu.vector_store %arg4[%c0_14, %c0_15, %c0_16], %32 {strides = array<i32>} : memref<1x128x4xf32, #tpu.memory_space<vmem>>, vector<1x128x4xf32>,
    return
  }
  func.func @transform_0(%arg0: i32) -> (i32, i32, i32) {
    %c0_i32 = arith.constant 0 : i32
    %c0_i32_0 = arith.constant 0 : i32
    %c0_i32_1 = arith.constant 0 : i32
    return %arg0, %c0_i32, %c0_i32_0 : i32, i32, i32
  }
  func.func @transform_1(%arg0: i32) -> (i32, i32, i32) {
    %c0_i32 = arith.constant 0 : i32
    %c0_i32_0 = arith.constant 0 : i32
    %c0_i32_1 = arith.constant 0 : i32
    return %arg0, %c0_i32, %c0_i32_0 : i32, i32, i32
  }
  func.func @transform_2(%arg0: i32) -> (i32, i32) {
    %c0_i32 = arith.constant 0 : i32
    %c0_i32_0 = arith.constant 0 : i32
    %c0_i32_1 = arith.constant 0 : i32
    return %c0_i32, %c0_i32_0 : i32, i32
  }
  func.func @transform_3(%arg0: i32) -> (i32, i32, i32) {
    %c0_i32 = arith.constant 0 : i32
    %c0_i32_0 = arith.constant 0 : i32
    %c0_i32_1 = arith.constant 0 : i32
    return %arg0, %c0_i32, %c0_i32_0 : i32, i32, i32
  }
}

module attributes {stable_mosaic.version = 11 : i64} {
  func.func @_conv3x3_in_relu_kernel(%arg0: i32, %arg1: memref<1x64x2304xf32, #tpu.memory_space<vmem>>, %arg2: memref<1x2304x16xf32, #tpu.memory_space<vmem>>, %arg3: memref<64x1xf32, #tpu.memory_space<vmem>>, %arg4: memref<1x64x16xf32, #tpu.memory_space<vmem>>) attributes {dimension_semantics = [#tpu.dimension_semantics<parallel>], iteration_bounds = array<i64: 2>, scalar_prefetch = 0 : i64, scratch_operands = 0 : i64, tpu.core_type = #tpu.core_type<tc>, window_params = [{transform_indices = @transform_0, window_bounds = array<i64: 1, 64, 2304>}, {transform_indices = @transform_1, window_bounds = array<i64: 1, 2304, 16>}, {pipeline_mode = #tpu.pipeline_mode<synchronous>, transform_indices = @transform_2, window_bounds = array<i64: 64, 1>}, {transform_indices = @transform_3, window_bounds = array<i64: 1, 64, 16>}]} {
    %c0 = arith.constant 0 : index
    %c0_0 = arith.constant 0 : index
    %c0_1 = arith.constant 0 : index
    %0 = vector.load %arg1[%c0, %c0_0, %c0_1] : memref<1x64x2304xf32, #tpu.memory_space<vmem>>, vector<1x64x2304xf32>
    %1 = vector.shape_cast %0 : vector<1x64x2304xf32> to vector<64x2304xf32>
    %c0_2 = arith.constant 0 : index
    %c0_3 = arith.constant 0 : index
    %c0_4 = arith.constant 0 : index
    %2 = vector.load %arg2[%c0_2, %c0_3, %c0_4] : memref<1x2304x16xf32, #tpu.memory_space<vmem>>, vector<1x2304x16xf32>
    %3 = vector.shape_cast %2 : vector<1x2304x16xf32> to vector<2304x16xf32>
    %cst = arith.constant dense<0.000000e+00> : vector<64x16xf32>
    %4 = tpu.matmul %1, %3, %cst {dimension_numbers = #tpu.dot_dimension_numbers<[1], [0], [0], [1], [0, 0, 1, 1], [], []>} : vector<64x2304xf32>, vector<2304x16xf32>, vector<64x16xf32> -> vector<64x16xf32>
    %c0_5 = arith.constant 0 : index
    %c0_6 = arith.constant 0 : index
    %5 = vector.load %arg3[%c0_5, %c0_6] : memref<64x1xf32, #tpu.memory_space<vmem>>, vector<64x1xf32>
    %6 = vector.broadcast %5 : vector<64x1xf32> to vector<64x16xf32>
    %7 = arith.addf %4, %6 : vector<64x16xf32>
    %cst_7 = arith.constant dense<0.000000e+00> : vector<64xf32>
    %8 = vector.multi_reduction <add>, %7, %cst_7 [1] : vector<64x16xf32> to vector<64xf32>
    %9 = vector.shape_cast %8 : vector<64xf32> to vector<64x1xf32>
    %cst_8 = arith.constant 6.250000e-02 : f32
    %10 = vector.broadcast %cst_8 : f32 to vector<64x1xf32>
    %11 = arith.mulf %9, %10 : vector<64x1xf32>
    %12 = arith.mulf %7, %7 : vector<64x16xf32>
    %cst_9 = arith.constant dense<0.000000e+00> : vector<64xf32>
    %13 = vector.multi_reduction <add>, %12, %cst_9 [1] : vector<64x16xf32> to vector<64xf32>
    %14 = vector.shape_cast %13 : vector<64xf32> to vector<64x1xf32>
    %cst_10 = arith.constant 6.250000e-02 : f32
    %15 = vector.broadcast %cst_10 : f32 to vector<64x1xf32>
    %16 = arith.mulf %14, %15 : vector<64x1xf32>
    %17 = arith.mulf %11, %11 : vector<64x1xf32>
    %18 = arith.subf %16, %17 : vector<64x1xf32>
    %cst_11 = arith.constant 0.000000e+00 : f32
    %19 = vector.broadcast %cst_11 : f32 to vector<64x1xf32>
    %20 = arith.maximumf %18, %19 : vector<64x1xf32>
    %21 = vector.broadcast %11 : vector<64x1xf32> to vector<64x16xf32>
    %22 = arith.subf %7, %21 : vector<64x16xf32>
    %cst_12 = arith.constant 9.99999974E-6 : f32
    %23 = vector.broadcast %cst_12 : f32 to vector<64x1xf32>
    %24 = arith.addf %20, %23 : vector<64x1xf32>
    %25 = math.rsqrt %24 : vector<64x1xf32>
    %26 = vector.broadcast %25 : vector<64x1xf32> to vector<64x16xf32>
    %27 = arith.mulf %22, %26 : vector<64x16xf32>
    %cst_13 = arith.constant 0.000000e+00 : f32
    %28 = vector.broadcast %cst_13 : f32 to vector<64x16xf32>
    %29 = arith.maximumf %27, %28 : vector<64x16xf32>
    %c0_14 = arith.constant 0 : index
    %c0_15 = arith.constant 0 : index
    %c0_16 = arith.constant 0 : index
    %30 = vector.load %arg4[%c0_14, %c0_15, %c0_16] : memref<1x64x16xf32, #tpu.memory_space<vmem>>, vector<1x64x16xf32>
    %31 = vector.shape_cast %30 : vector<1x64x16xf32> to vector<64x16xf32>
    %32 = vector.shape_cast %29 : vector<64x16xf32> to vector<1x64x16xf32>
    tpu.vector_store %arg4[%c0_14, %c0_15, %c0_16], %32 {strides = array<i32>} : memref<1x64x16xf32, #tpu.memory_space<vmem>>, vector<1x64x16xf32>,
    return
  }
  func.func @transform_0(%arg0: i32) -> (i32, i32, i32) {
    %c0_i32 = arith.constant 0 : i32
    %c0_i32_0 = arith.constant 0 : i32
    %c0_i32_1 = arith.constant 0 : i32
    return %arg0, %c0_i32, %c0_i32_0 : i32, i32, i32
  }
  func.func @transform_1(%arg0: i32) -> (i32, i32, i32) {
    %c0_i32 = arith.constant 0 : i32
    %c0_i32_0 = arith.constant 0 : i32
    %c0_i32_1 = arith.constant 0 : i32
    return %arg0, %c0_i32, %c0_i32_0 : i32, i32, i32
  }
  func.func @transform_2(%arg0: i32) -> (i32, i32) {
    %c0_i32 = arith.constant 0 : i32
    %c0_i32_0 = arith.constant 0 : i32
    %c0_i32_1 = arith.constant 0 : i32
    return %c0_i32, %c0_i32_0 : i32, i32
  }
  func.func @transform_3(%arg0: i32) -> (i32, i32, i32) {
    %c0_i32 = arith.constant 0 : i32
    %c0_i32_0 = arith.constant 0 : i32
    %c0_i32_1 = arith.constant 0 : i32
    return %arg0, %c0_i32, %c0_i32_0 : i32, i32, i32
  }
}

module attributes {stable_mosaic.version = 11 : i64} {
  func.func @_conv3x3_in_relu_kernel(%arg0: i32, %arg1: memref<1x32x1152xf32, #tpu.memory_space<vmem>>, %arg2: memref<1x1152x64xf32, #tpu.memory_space<vmem>>, %arg3: memref<32x1xf32, #tpu.memory_space<vmem>>, %arg4: memref<1x32x64xf32, #tpu.memory_space<vmem>>) attributes {dimension_semantics = [#tpu.dimension_semantics<parallel>], iteration_bounds = array<i64: 2>, scalar_prefetch = 0 : i64, scratch_operands = 0 : i64, tpu.core_type = #tpu.core_type<tc>, window_params = [{transform_indices = @transform_0, window_bounds = array<i64: 1, 32, 1152>}, {transform_indices = @transform_1, window_bounds = array<i64: 1, 1152, 64>}, {pipeline_mode = #tpu.pipeline_mode<synchronous>, transform_indices = @transform_2, window_bounds = array<i64: 32, 1>}, {transform_indices = @transform_3, window_bounds = array<i64: 1, 32, 64>}]} {
    %c0 = arith.constant 0 : index
    %c0_0 = arith.constant 0 : index
    %c0_1 = arith.constant 0 : index
    %0 = vector.load %arg1[%c0, %c0_0, %c0_1] : memref<1x32x1152xf32, #tpu.memory_space<vmem>>, vector<1x32x1152xf32>
    %1 = vector.shape_cast %0 : vector<1x32x1152xf32> to vector<32x1152xf32>
    %c0_2 = arith.constant 0 : index
    %c0_3 = arith.constant 0 : index
    %c0_4 = arith.constant 0 : index
    %2 = vector.load %arg2[%c0_2, %c0_3, %c0_4] : memref<1x1152x64xf32, #tpu.memory_space<vmem>>, vector<1x1152x64xf32>
    %3 = vector.shape_cast %2 : vector<1x1152x64xf32> to vector<1152x64xf32>
    %cst = arith.constant dense<0.000000e+00> : vector<32x64xf32>
    %4 = tpu.matmul %1, %3, %cst {dimension_numbers = #tpu.dot_dimension_numbers<[1], [0], [0], [1], [0, 0, 1, 1], [], []>} : vector<32x1152xf32>, vector<1152x64xf32>, vector<32x64xf32> -> vector<32x64xf32>
    %c0_5 = arith.constant 0 : index
    %c0_6 = arith.constant 0 : index
    %5 = vector.load %arg3[%c0_5, %c0_6] : memref<32x1xf32, #tpu.memory_space<vmem>>, vector<32x1xf32>
    %6 = vector.broadcast %5 : vector<32x1xf32> to vector<32x64xf32>
    %7 = arith.addf %4, %6 : vector<32x64xf32>
    %cst_7 = arith.constant dense<0.000000e+00> : vector<32xf32>
    %8 = vector.multi_reduction <add>, %7, %cst_7 [1] : vector<32x64xf32> to vector<32xf32>
    %9 = vector.shape_cast %8 : vector<32xf32> to vector<32x1xf32>
    %cst_8 = arith.constant 1.562500e-02 : f32
    %10 = vector.broadcast %cst_8 : f32 to vector<32x1xf32>
    %11 = arith.mulf %9, %10 : vector<32x1xf32>
    %12 = arith.mulf %7, %7 : vector<32x64xf32>
    %cst_9 = arith.constant dense<0.000000e+00> : vector<32xf32>
    %13 = vector.multi_reduction <add>, %12, %cst_9 [1] : vector<32x64xf32> to vector<32xf32>
    %14 = vector.shape_cast %13 : vector<32xf32> to vector<32x1xf32>
    %cst_10 = arith.constant 1.562500e-02 : f32
    %15 = vector.broadcast %cst_10 : f32 to vector<32x1xf32>
    %16 = arith.mulf %14, %15 : vector<32x1xf32>
    %17 = arith.mulf %11, %11 : vector<32x1xf32>
    %18 = arith.subf %16, %17 : vector<32x1xf32>
    %cst_11 = arith.constant 0.000000e+00 : f32
    %19 = vector.broadcast %cst_11 : f32 to vector<32x1xf32>
    %20 = arith.maximumf %18, %19 : vector<32x1xf32>
    %21 = vector.broadcast %11 : vector<32x1xf32> to vector<32x64xf32>
    %22 = arith.subf %7, %21 : vector<32x64xf32>
    %cst_12 = arith.constant 9.99999974E-6 : f32
    %23 = vector.broadcast %cst_12 : f32 to vector<32x1xf32>
    %24 = arith.addf %20, %23 : vector<32x1xf32>
    %25 = math.rsqrt %24 : vector<32x1xf32>
    %26 = vector.broadcast %25 : vector<32x1xf32> to vector<32x64xf32>
    %27 = arith.mulf %22, %26 : vector<32x64xf32>
    %cst_13 = arith.constant 0.000000e+00 : f32
    %28 = vector.broadcast %cst_13 : f32 to vector<32x64xf32>
    %29 = arith.maximumf %27, %28 : vector<32x64xf32>
    %c0_14 = arith.constant 0 : index
    %c0_15 = arith.constant 0 : index
    %c0_16 = arith.constant 0 : index
    %30 = vector.load %arg4[%c0_14, %c0_15, %c0_16] : memref<1x32x64xf32, #tpu.memory_space<vmem>>, vector<1x32x64xf32>
    %31 = vector.shape_cast %30 : vector<1x32x64xf32> to vector<32x64xf32>
    %32 = vector.shape_cast %29 : vector<32x64xf32> to vector<1x32x64xf32>
    tpu.vector_store %arg4[%c0_14, %c0_15, %c0_16], %32 {strides = array<i32>} : memref<1x32x64xf32, #tpu.memory_space<vmem>>, vector<1x32x64xf32>,
    return
  }
  func.func @transform_0(%arg0: i32) -> (i32, i32, i32) {
    %c0_i32 = arith.constant 0 : i32
    %c0_i32_0 = arith.constant 0 : i32
    %c0_i32_1 = arith.constant 0 : i32
    return %arg0, %c0_i32, %c0_i32_0 : i32, i32, i32
  }
  func.func @transform_1(%arg0: i32) -> (i32, i32, i32) {
    %c0_i32 = arith.constant 0 : i32
    %c0_i32_0 = arith.constant 0 : i32
    %c0_i32_1 = arith.constant 0 : i32
    return %arg0, %c0_i32, %c0_i32_0 : i32, i32, i32
  }
  func.func @transform_2(%arg0: i32) -> (i32, i32) {
    %c0_i32 = arith.constant 0 : i32
    %c0_i32_0 = arith.constant 0 : i32
    %c0_i32_1 = arith.constant 0 : i32
    return %c0_i32, %c0_i32_0 : i32, i32
  }
  func.func @transform_3(%arg0: i32) -> (i32, i32, i32) {
    %c0_i32 = arith.constant 0 : i32
    %c0_i32_0 = arith.constant 0 : i32
    %c0_i32_1 = arith.constant 0 : i32
    return %arg0, %c0_i32, %c0_i32_0 : i32, i32, i32
  }
}

module attributes {stable_mosaic.version = 11 : i64} {
  func.func @_upconv_conv2_residual_kernel(%arg0: i32, %arg1: memref<1x32x576xf32, #tpu.memory_space<vmem>>, %arg2: memref<1x576x256xf32, #tpu.memory_space<vmem>>, %arg3: memref<32x1xf32, #tpu.memory_space<vmem>>, %arg4: memref<1x32xf32, #tpu.memory_space<vmem>>, %arg5: memref<1x1x256xf32, #tpu.memory_space<vmem>>, %arg6: memref<1x1x256xf32, #tpu.memory_space<vmem>>) attributes {dimension_semantics = [#tpu.dimension_semantics<parallel>], iteration_bounds = array<i64: 2>, scalar_prefetch = 0 : i64, scratch_operands = 0 : i64, tpu.core_type = #tpu.core_type<tc>, window_params = [{transform_indices = @transform_0, window_bounds = array<i64: 1, 32, 576>}, {transform_indices = @transform_1, window_bounds = array<i64: 1, 576, 256>}, {pipeline_mode = #tpu.pipeline_mode<synchronous>, transform_indices = @transform_2, window_bounds = array<i64: 32, 1>}, {pipeline_mode = #tpu.pipeline_mode<synchronous>, transform_indices = @transform_3, window_bounds = array<i64: 1, 32>}, {transform_indices = @transform_4, window_bounds = array<i64: 1, 1, 256>}, {transform_indices = @transform_5, window_bounds = array<i64: 1, 1, 256>}]} {
    %c0 = arith.constant 0 : index
    %c0_0 = arith.constant 0 : index
    %c0_1 = arith.constant 0 : index
    %0 = vector.load %arg1[%c0, %c0_0, %c0_1] : memref<1x32x576xf32, #tpu.memory_space<vmem>>, vector<1x32x576xf32>
    %1 = vector.shape_cast %0 : vector<1x32x576xf32> to vector<32x576xf32>
    %c0_2 = arith.constant 0 : index
    %c0_3 = arith.constant 0 : index
    %c0_4 = arith.constant 0 : index
    %2 = vector.load %arg2[%c0_2, %c0_3, %c0_4] : memref<1x576x256xf32, #tpu.memory_space<vmem>>, vector<1x576x256xf32>
    %3 = vector.shape_cast %2 : vector<1x576x256xf32> to vector<576x256xf32>
    %cst = arith.constant dense<0.000000e+00> : vector<32x256xf32>
    %4 = tpu.matmul %1, %3, %cst {dimension_numbers = #tpu.dot_dimension_numbers<[1], [0], [0], [1], [0, 0, 1, 1], [], []>} : vector<32x576xf32>, vector<576x256xf32>, vector<32x256xf32> -> vector<32x256xf32>
    %c0_5 = arith.constant 0 : index
    %c0_6 = arith.constant 0 : index
    %5 = vector.load %arg3[%c0_5, %c0_6] : memref<32x1xf32, #tpu.memory_space<vmem>>, vector<32x1xf32>
    %6 = vector.broadcast %5 : vector<32x1xf32> to vector<32x256xf32>
    %7 = arith.addf %4, %6 : vector<32x256xf32>
    %cst_7 = arith.constant dense<0.000000e+00> : vector<32xf32>
    %8 = vector.multi_reduction <add>, %7, %cst_7 [1] : vector<32x256xf32> to vector<32xf32>
    %9 = vector.shape_cast %8 : vector<32xf32> to vector<32x1xf32>
    %cst_8 = arith.constant 3.906250e-03 : f32
    %10 = vector.broadcast %cst_8 : f32 to vector<32x1xf32>
    %11 = arith.mulf %9, %10 : vector<32x1xf32>
    %12 = arith.mulf %7, %7 : vector<32x256xf32>
    %cst_9 = arith.constant dense<0.000000e+00> : vector<32xf32>
    %13 = vector.multi_reduction <add>, %12, %cst_9 [1] : vector<32x256xf32> to vector<32xf32>
    %14 = vector.shape_cast %13 : vector<32xf32> to vector<32x1xf32>
    %cst_10 = arith.constant 3.906250e-03 : f32
    %15 = vector.broadcast %cst_10 : f32 to vector<32x1xf32>
    %16 = arith.mulf %14, %15 : vector<32x1xf32>
    %17 = arith.mulf %11, %11 : vector<32x1xf32>
    %18 = arith.subf %16, %17 : vector<32x1xf32>
    %cst_11 = arith.constant 0.000000e+00 : f32
    %19 = vector.broadcast %cst_11 : f32 to vector<32x1xf32>
    %20 = arith.maximumf %18, %19 : vector<32x1xf32>
    %21 = vector.broadcast %11 : vector<32x1xf32> to vector<32x256xf32>
    %22 = arith.subf %7, %21 : vector<32x256xf32>
    %cst_12 = arith.constant 9.99999974E-6 : f32
    %23 = vector.broadcast %cst_12 : f32 to vector<32x1xf32>
    %24 = arith.addf %20, %23 : vector<32x1xf32>
    %25 = math.rsqrt %24 : vector<32x1xf32>
    %26 = vector.broadcast %25 : vector<32x1xf32> to vector<32x256xf32>
    %27 = arith.mulf %22, %26 : vector<32x256xf32>
    %cst_13 = arith.constant 0.000000e+00 : f32
    %28 = vector.broadcast %cst_13 : f32 to vector<32x256xf32>
    %29 = arith.maximumf %27, %28 : vector<32x256xf32>
    %c0_14 = arith.constant 0 : index
    %c0_15 = arith.constant 0 : index
    %30 = vector.load %arg4[%c0_14, %c0_15] : memref<1x32xf32, #tpu.memory_space<vmem>>, vector<1x32xf32>
    %cst_16 = arith.constant dense<0.000000e+00> : vector<1x256xf32>
    %31 = tpu.matmul %30, %29, %cst_16 {dimension_numbers = #tpu.dot_dimension_numbers<[1], [0], [0], [1], [0, 0, 1, 1], [], []>} : vector<1x32xf32>, vector<32x256xf32>, vector<1x256xf32> -> vector<1x256xf32>
    %c0_17 = arith.constant 0 : index
    %c0_18 = arith.constant 0 : index
    %c0_19 = arith.constant 0 : index
    %32 = vector.load %arg5[%c0_17, %c0_18, %c0_19] : memref<1x1x256xf32, #tpu.memory_space<vmem>>, vector<1x1x256xf32>
    %33 = vector.shape_cast %32 : vector<1x1x256xf32> to vector<1x256xf32>
    %34 = arith.addf %31, %33 : vector<1x256xf32>
    %c0_20 = arith.constant 0 : index
    %c0_21 = arith.constant 0 : index
    %c0_22 = arith.constant 0 : index
    %35 = vector.load %arg6[%c0_20, %c0_21, %c0_22] : memref<1x1x256xf32, #tpu.memory_space<vmem>>, vector<1x1x256xf32>
    %36 = vector.shape_cast %35 : vector<1x1x256xf32> to vector<1x256xf32>
    %37 = vector.shape_cast %34 : vector<1x256xf32> to vector<1x1x256xf32>
    tpu.vector_store %arg6[%c0_20, %c0_21, %c0_22], %37 {strides = array<i32>} : memref<1x1x256xf32, #tpu.memory_space<vmem>>, vector<1x1x256xf32>,
    return
  }
  func.func @transform_0(%arg0: i32) -> (i32, i32, i32) {
    %c0_i32 = arith.constant 0 : i32
    %c0_i32_0 = arith.constant 0 : i32
    %c0_i32_1 = arith.constant 0 : i32
    return %arg0, %c0_i32, %c0_i32_0 : i32, i32, i32
  }
  func.func @transform_1(%arg0: i32) -> (i32, i32, i32) {
    %c0_i32 = arith.constant 0 : i32
    %c0_i32_0 = arith.constant 0 : i32
    %c0_i32_1 = arith.constant 0 : i32
    return %arg0, %c0_i32, %c0_i32_0 : i32, i32, i32
  }
  func.func @transform_2(%arg0: i32) -> (i32, i32) {
    %c0_i32 = arith.constant 0 : i32
    %c0_i32_0 = arith.constant 0 : i32
    %c0_i32_1 = arith.constant 0 : i32
    return %c0_i32, %c0_i32_0 : i32, i32
  }
  func.func @transform_3(%arg0: i32) -> (i32, i32) {
    %c0_i32 = arith.constant 0 : i32
    %c0_i32_0 = arith.constant 0 : i32
    %c0_i32_1 = arith.constant 0 : i32
    return %c0_i32, %c0_i32_0 : i32, i32
  }
  func.func @transform_4(%arg0: i32) -> (i32, i32, i32) {
    %c0_i32 = arith.constant 0 : i32
    %c0_i32_0 = arith.constant 0 : i32
    %c0_i32_1 = arith.constant 0 : i32
    return %arg0, %c0_i32, %c0_i32_0 : i32, i32, i32
  }
  func.func @transform_5(%arg0: i32) -> (i32, i32, i32) {
    %c0_i32 = arith.constant 0 : i32
    %c0_i32_0 = arith.constant 0 : i32
    %c0_i32_1 = arith.constant 0 : i32
    return %arg0, %c0_i32, %c0_i32_0 : i32, i32, i32
  }
}

</mosaic_0001>

<bundles_post_ra>
// kernel: _forward_impl.35
= control target key start
LH: loop header
LB: loop body
LE: loop exit
PB: predicated region body
PF: predicated region fallthrough
CT: control target
= control target key end

     0   :  { %s573_s12 = smov 0   ;;  %s667_s0 = inlined_call_operand.vmem [shape: f32[2,32,9], index: 0, kind: input, shape index: {}]   ;;  %s668_s1 = inlined_call_operand.vmem [shape: f32[2,9,256], index: 1, kind: input, shape index: {}]   ;;  %s669_s2 = inlined_call_operand.vmem [shape: f32[32,1], index: 2, kind: input, shape index: {}]   ;;  %s670_s3 = inlined_call_operand.vmem [shape: f32[2,32,256], index: 3, kind: output, shape index: {}]  }
   0x1 LB: > { %s491_s13 = sadd.s32 4294967295, %s548_s12   ;;  %p495_p0 = scmp.ge.s32.totalorder %s548_s12, 1  ;;  %s548_s12 = sphi %s573_s12, %s13_s12  }
   0x2   : > { %p147_p1 = scmp.lt.s32.totalorder %s548_s12, 3 }
   0x4   : > { %p148_p2 = pnand %p495_p0, %p147_p1 }
   0x5   : > { %p176_p3 = scmp.lt.s32.totalorder (!%p148_p2), %s491_s13, 1  ;;  %v199_v0 = vld [vmem:[%s669_s2] sm:$0xff] (!%p148_p2)  ;;  %v550_v1 = vmov (!%p148_p2), 0.0   ;;  %v201_v2 = vld [vmem:[%s669_s2 + $0x10] sm:$0xff] (!%p148_p2)  ;;  %vm236_vm0 = vcmask (!%p148_p2), 1040384   ;;  %v551_v3 = vmov (!%p148_p2), 0  }
   0x6   : > { %151 = sbr.rel (%p148_p2) target bundleno = 422 (0x1a6), region = 32  ;;  %307 = vmatprep.mubr.f32.mxu0 (!%p148_p2), %v550_v1  ;;  %319 = vmatprep.mubr.f32.mxu1 (!%p148_p2), %v550_v1  ;;  %v200_v4 = vld [vmem:[%s669_s2 + $0x8] sm:$0xff] (!%p148_p2)  ;;  %v202_v5 = vld [vmem:[%s669_s2 + $0x18] sm:$0xff] (!%p148_p2)  ;;  %vm552_vm1 = vmmov (!%p148_p2), 1   ;;  %vm223_vm3 = vcmask (!%p148_p2), 72704  }
   0x7   : > { %532 = vset.pattern.permute.xlu0 (!%p148_p2), %v551_v3  ;;  %533 = vset.pattern.permute.xlu1 (!%p148_p2), %v551_v3  ;;  %vm514_vm2 = vmpackc.low (!%p148_p2), %vm236_vm0, %vm552_vm1 }
   0x8   : > { %205 = vperm.xlu0 (!%p148_p2), %532, %v199_v0   ;;  %215 = vperm.xlu1 (!%p148_p2), %533, %v201_v2  }
   0xc   : > { %210 = vperm.xlu0 (!%p148_p2), %532, %v200_v4   ;;  %220 = vperm.xlu1 (!%p148_p2), %533, %v202_v5  }
   0xd   : > { %s672_s13 = smov (!%p176_p3, %s491_s13), 1 }
   0xe   : > { %s510_s18 = sshll.u32 %s672_s13, 5  ;;  %s512_s29 = sshll.u32 %s672_s13, 6 }
   0xf   : > { %s185_s25 = scalar_lea.vmem %s668_s1, %s510_s18  ;;  %s180_s28 = scalar_lea.vmem %s667_s0, %s510_s18 }
  0x10   : > { %v196_v6 = vld [vmem:[%s185_s25 + $0x8] sm:$0xff]  ;;  %v198_v7 = vld [vmem:[%s185_s25 + $0x18] sm:$0x1]  ;;  %v195_v8 = vld [vmem:[%s185_s25] sm:$0xff]  ;;  %s648_s5 = scalar_lea.vmem %s670_s3, %s512_s29 }
  0x11   : > { %v513_v9 = vpack.c.bf16 %v198_v7, %v196_v6  ;;  %v197_v10 = vld [vmem:[%s185_s25 + $0x10] sm:$0x1]  ;;  %v191_v12 = vld [vmem:[%s180_s28] sm:$0xff]  ;;  %v192_v14 = vld [vmem:[%s180_s28 + $0x8] sm:$0xff] }
  0x12   : > { %v516_v11 = vpack.c.bf16 %v197_v10, %v195_v8  ;;  %v193_v13 = vld [vmem:[%s180_s28 + $0x10] sm:$0xff]  ;;  %v194_v15 = vld [vmem:[%s180_s28 + $0x18] sm:$0xff] }
  0x13   : > { %515 = vmatprep.subr.msk.bf16.mxu0 %vm514_vm2, %v513_v9  ;;  %519 = vmatprep.subr.msk.bf16.mxu1 %vm514_vm2, %v513_v9 }
  0x14   : > { %518 = vmatpush1.bf16.msk.msra.mxu0 %vm514_vm2, %v516_v11  ;;  %520 = vmatpush1.bf16.msk.msra.mxu1 %vm514_vm2, %v516_v11 }
  0x17   : > { %504 = vmatmul.mubr.msk.f32.vlgmr.msra.gmra.mrb[0].mxu0 %vm223_vm3, %v191_v12  ;;  %506 = vmatmul.mubr.msk.f32.vlgmr.msra.gmra.mrb[0].mxu1 %vm223_vm3, %v193_v13 }
  0x18   : > { %313 = vmatprep.mubr.f32.mxu0 %v550_v1  ;;  %325 = vmatprep.mubr.f32.mxu1 %v550_v1 }
  0x1b   : > { %505 = vmatmul.mubr.msk.f32.gmra.mrb[2].mxu0 %vm223_vm3, %v192_v14  ;;  %507 = vmatmul.mubr.msk.f32.gmra.mrb[2].mxu1 %vm223_vm3, %v194_v15 }
  0x87   : > { %v206_v16 = vpop.permute.xlu0 %205  ;;  %v216_v17 = vpop.permute.xlu1 %215 }
  0x8b   : > { %v211_v26 = vpop.permute.xlu0 %210  ;;  %v221_v27 = vpop.permute.xlu1 %220 }
  0xea   : > { %v309_v18 = vpop.f32.mrb[0].mxu0  ;;  %v321_v19 = vpop.f32.mrb[0].mxu1 }
  0xeb   : > { %v602_v20 = vadd.f32 %v309_v18, %v206_v16  ;;  %v311_v21 = vpop.f32.mrb[1].mxu0  ;;  %v323_v22 = vpop.f32.mrb[1].mxu1  ;;  %v606_v24 = vadd.f32 %v321_v19, %v216_v17 }
  0xec   : > { %v604_v23 = vadd.f32 %v311_v21, %v206_v16  ;;  %v608_v25 = vadd.f32 %v323_v22, %v216_v17 }
  0xed   : > { %v348_v28 = vmul.f32 %v602_v20, %v602_v20  ;;  %v352_v42 = vmul.f32 %v606_v24, %v606_v24 }
  0xee   : > { %v315_v29 = vpop.f32.mrb[2].mxu0  ;;  %v327_v30 = vpop.f32.mrb[2].mxu1  ;;  %v332_v31 = vadd.f32 %v604_v23, %v602_v20  ;;  %v349_v32 = vmul.f32 %v604_v23, %v604_v23  ;;  %v338_v38 = vadd.f32 %v608_v25, %v606_v24  ;;  %v353_v43 = vmul.f32 %v608_v25, %v608_v25 }
  0xef   : > { %v317_v33 = vpop.f32.mrb[3].mxu0  ;;  %v329_v34 = vpop.f32.mrb[3].mxu1  ;;  %v616_v35 = vadd.f32 %v315_v29, %v211_v26  ;;  %v622_v39 = vadd.f32 %v327_v30, %v221_v27 }
  0xf0   : > { %v618_v36 = vadd.f32 %v317_v33, %v211_v26  ;;  %333 = vadd.xlane.f32.xlu0 %v332_v31  ;;  %v356_v37 = vadd.f32 %v349_v32, %v348_v28  ;;  %v624_v40 = vadd.f32 %v329_v34, %v221_v27  ;;  %v362_v47 = vadd.f32 %v353_v43, %v352_v42 }
  0xf1   : > { %v350_v45 = vmul.f32 %v616_v35, %v616_v35  ;;  %v354_v49 = vmul.f32 %v622_v39, %v622_v39 }
  0xf2   : > { %357 = vadd.xlane.f32.xlu1 %v356_v37  ;;  %v335_v41 = vadd.f32 %v618_v36, %v616_v35  ;;  %v341_v44 = vadd.f32 %v624_v40, %v622_v39  ;;  %v351_v46 = vmul.f32 %v618_v36, %v618_v36  ;;  %v355_v50 = vmul.f32 %v624_v40, %v624_v40 }
  0xf4   : > { %339 = vadd.xlane.f32.xlu0 %v338_v38  ;;  %v359_v48 = vadd.f32 %v351_v46, %v350_v45  ;;  %v365_v51 = vadd.f32 %v355_v50, %v354_v49 }
  0xf6   : > { %336 = vadd.xlane.f32.xlu1 %v335_v41 }
  0xf8   : > { %342 = vadd.xlane.f32.xlu0 %v341_v44 }
  0xfa   : > { %363 = vadd.xlane.f32.xlu1 %v362_v47 }
  0xfc   : > { %360 = vadd.xlane.f32.xlu0 %v359_v48 }
 0x100   : > { %366 = vadd.xlane.f32.xlu0 %v365_v51 }
 0x17d   : > { %v334_v52 = vpop.xlane.xlu0 %333 }
 0x17e   : > { %v344_v53 = vmul.f32 0.00390625, %v334_v52 }
 0x17f   : > { %v358_v54 = vpop.xlane.xlu1 %357 }
 0x180   : > { %v368_v55 = vmul.f32 0.00390625, %v358_v54  ;;  %v372_v56 = vmul.f32 %v344_v53, %v344_v53  ;;  %v384_v18 = vsub.f32 %v602_v20, %v344_v53  ;;  %v385_v19 = vsub.f32 %v604_v23, %v344_v53 }
 0x181   : > { %v340_v57 = vpop.xlane.xlu0 %339 }
 0x182   : > { %v376_v58 = vsub.f32 %v368_v55, %v372_v56  ;;  %v346_v61 = vmul.f32 0.00390625, %v340_v57 }
 0x183   : > { %v337_v59 = vpop.xlane.xlu1 %336 }
 0x184   : > { %v380_v60 = vmax.f32 %v376_v58, 0.0  ;;  %v345_v0 = vmul.f32 0.00390625, %v337_v59  ;;  %v374_v3 = vmul.f32 %v346_v61, %v346_v61  ;;  %v388_v20 = vsub.f32 %v606_v24, %v346_v61 }
 0x185   : > { %v343_v62 = vpop.xlane.xlu0 %342  ;;  %v389_v23 = vsub.f32 %v608_v25, %v346_v61 }
 0x186   : > { %v392_v63 = vadd.f32 1e-05, %v380_v60  ;;  %v347_v5 = vmul.f32 0.00390625, %v343_v62  ;;  %v373_v7 = vmul.f32 %v345_v0, %v345_v0  ;;  %v386_v32 = vsub.f32 %v616_v35, %v345_v0 }
 0x187   : > { %v364_v1 = vpop.xlane.xlu1 %363  ;;  %v387_v33 = vsub.f32 %v618_v36, %v345_v0 }
 0x188   : > { %534 = vrsqrt.f32 %v392_v63  ;;  %v370_v2 = vmul.f32 0.00390625, %v364_v1  ;;  %v375_v14 = vmul.f32 %v347_v5, %v347_v5  ;;  %v390_v24 = vsub.f32 %v622_v39, %v347_v5 }
 0x189   : > { %v361_v4 = vpop.xlane.xlu0 %360  ;;  %v391_v25 = vsub.f32 %v624_v40, %v347_v5 }
 0x18a   : > { %v378_v6 = vsub.f32 %v370_v2, %v374_v3  ;;  %v369_v8 = vmul.f32 0.00390625, %v361_v4 }
 0x18c   : > { %v382_v9 = vmax.f32 %v378_v6, 0.0  ;;  %v377_v10 = vsub.f32 %v369_v8, %v373_v7 }
 0x18d   : > { %v367_v11 = vpop.xlane.xlu0 %366 }
 0x18e   : > { %v394_v12 = vadd.f32 1e-05, %v382_v9  ;;  %v381_v13 = vmax.f32 %v377_v10, 0.0  ;;  %v371_v15 = vmul.f32 0.00390625, %v367_v11 }
 0x190   : > { %536 = vrsqrt.f32 %v394_v12  ;;  %v393_v16 = vadd.f32 1e-05, %v381_v13  ;;  %v379_v17 = vsub.f32 %v371_v15, %v375_v14 }
 0x192   : > { %v535_v21 = vpop.eup %534  ;;  %538 = vrsqrt.f32 %v393_v16  ;;  %v383_v22 = vmax.f32 %v379_v17, 0.0 }
 0x193   : > { %v400_v26 = vmul.f32 %v535_v21, %v384_v18  ;;  %v401_v27 = vmul.f32 %v535_v21, %v385_v19 }
 0x194   : > { %v395_v28 = vadd.f32 1e-05, %v383_v22 }
 0x195   : > { %v408_v29 = vmax.f32 %v400_v26, 0.0  ;;  %v409_v30 = vmax.f32 %v401_v27, 0.0 }
 0x196   : > { %540 = vrsqrt.f32 %v395_v28 }
 0x197   : > { %416 = vst [vmem:[%s648_s5] sm:$0xff] %v408_v29  ;;  %417 = vst [vmem:[%s648_s5 + $0x8] sm:$0xff] %v409_v30 }
 0x19a   : > { %v537_v31 = vpop.eup %536 }
 0x19b   : > { %v404_v34 = vmul.f32 %v537_v31, %v388_v20  ;;  %v405_v37 = vmul.f32 %v537_v31, %v389_v23 }
 0x19c   : > { %v539_v38 = vpop.eup %538 }
 0x19d   : > { %v412_v41 = vmax.f32 %v404_v34, 0.0  ;;  %v413_v42 = vmax.f32 %v405_v37, 0.0  ;;  %v402_v43 = vmul.f32 %v539_v38, %v386_v32  ;;  %v403_v44 = vmul.f32 %v539_v38, %v387_v33 }
 0x19f   : > { %420 = vst [vmem:[%s648_s5 + $0x20] sm:$0xff] %v412_v41  ;;  %421 = vst [vmem:[%s648_s5 + $0x28] sm:$0xff] %v413_v42  ;;  %v410_v35 = vmax.f32 %v402_v43, 0.0  ;;  %v411_v45 = vmax.f32 %v403_v44, 0.0 }
 0x1a0   : > { %v541_v46 = vpop.eup %540 }
 0x1a1   : > { %418 = vst [vmem:[%s648_s5 + $0x10] sm:$0xff] %v410_v35  ;;  %419 = vst [vmem:[%s648_s5 + $0x18] sm:$0xff] %v411_v45  ;;  %v406_v36 = vmul.f32 %v541_v46, %v390_v24  ;;  %v407_v47 = vmul.f32 %v541_v46, %v391_v25 }
 0x1a3   : > { %v414_v48 = vmax.f32 %v406_v36, 0.0  ;;  %v415_v49 = vmax.f32 %v407_v47, 0.0 }
 0x1a5   : > { %422 = vst [vmem:[%s648_s5 + $0x30] sm:$0xff] %v414_v48  ;;  %423 = vst [vmem:[%s648_s5 + $0x38] sm:$0xff] %v415_v49 }
 0x1a6 PF: > { %s13_s12 = sadd.s32 1, %s548_s12  }
 0x1a7   : > { %p10_p4 = scmp.ge.s32.totalorder %s13_s12, 4  }
 0x1a9   :  { %12 = sbr.rel (!%p10_p4) target bundleno = 1 (0x1), region = 65 }

// kernel: _forward_impl.36
= control target key start
LH: loop header
LB: loop body
LE: loop exit
PB: predicated region body
PF: predicated region fallthrough
CT: control target
= control target key end

     0   :  { %s968_s12 = smov 0   ;;  %s1186_s0 = inlined_call_operand.vmem [shape: f32[2,64,288], index: 0, kind: input, shape index: {}]   ;;  %s1187_s1 = inlined_call_operand.vmem [shape: f32[2,288,64], index: 1, kind: input, shape index: {}]   ;;  %s1188_s2 = inlined_call_operand.vmem [shape: f32[64,1], index: 2, kind: input, shape index: {}]   ;;  %s1189_s3 = inlined_call_operand.vmem [shape: f32[2,64,64], index: 3, kind: output, shape index: {}]  }
   0x1 LB: > { %s746_s13 = sadd.s32 4294967295, %s945_s12   ;;  %p750_p0 = scmp.ge.s32.totalorder %s945_s12, 1  ;;  %s945_s12 = sphi %s968_s12, %s13_s12  }
   0x2   : > { %p147_p1 = scmp.lt.s32.totalorder %s945_s12, 3 }
   0x4   : > { %p148_p2 = pnand %p750_p0, %p147_p1 }
   0x5   : > { %p176_p3 = scmp.lt.s32.totalorder (!%p148_p2), %s746_s13, 1  ;;  %v251_v0 = vld [vmem:[%s1188_s2] sm:$0xff] (!%p148_p2)  ;;  %v253_v1 = vld [vmem:[%s1188_s2 + $0x10] sm:$0xff] (!%p148_p2)  ;;  %v947_v2 = vmov (!%p148_p2), 0   ;;  %v252_v3 = vld [vmem:[%s1188_s2 + $0x8] sm:$0xff] (!%p148_p2)  ;;  %vm299_vm0 = vcmask (!%p148_p2), 261120  }
   0x6   : > { %151 = sbr.rel (%p148_p2) target bundleno = 475 (0x1db), region = 32  ;;  %921 = vset.pattern.permute.xlu0 (!%p148_p2), %v947_v2  ;;  %922 = vset.pattern.permute.xlu1 (!%p148_p2), %v947_v2  ;;  %v254_v4 = vld [vmem:[%s1188_s2 + $0x18] sm:$0xff] (!%p148_p2)  ;;  %v255_v18 = vld [vmem:[%s1188_s2 + $0x20] sm:$0xff] (!%p148_p2)  ;;  %v256_v19 = vld [vmem:[%s1188_s2 + $0x28] sm:$0xff] (!%p148_p2)  ;;  %vm534_vm1 = vcmask (!%p148_p2), 523264  }
   0x7   : > { %261 = vperm.xlu0 (!%p148_p2), %921, %v251_v0   ;;  %271 = vperm.xlu1 (!%p148_p2), %922, %v253_v1   ;;  %v257_v26 = vld [vmem:[%s1188_s2 + $0x30] sm:$0xff] (!%p148_p2)  ;;  %v258_v27 = vld [vmem:[%s1188_s2 + $0x38] sm:$0xff] (!%p148_p2) }
   0xb   : > { %266 = vperm.xlu0 (!%p148_p2), %921, %v252_v3   ;;  %276 = vperm.xlu1 (!%p148_p2), %922, %v254_v4  }
   0xd   : > { %s1191_s13 = smov (!%p176_p3, %s746_s13), 1 }
   0xe   : > { %s911_s22 = smul.u32 288, %s1191_s13  ;;  %s765_s11 = sshll.u32 %s1191_s13, 6 }
   0xf   : > { %s910_s26 = smul.u32 192, %s1191_s13  ;;  %281 = vperm.xlu0 %921, %v255_v18   ;;  %286 = vperm.xlu1 %922, %v256_v19   ;;  %s1156_s16 = scalar_lea.vmem %s1189_s3, %s765_s11 }
  0x10   : > { %s994_s25 = scalar_lea.vmem %s1187_s1, %s911_s22 }
  0x11   : > { %v231_v5 = vld [vmem:[%s994_s25 + $0x80] sm:$0xff]  ;;  %v232_v6 = vld [vmem:[%s994_s25 + $0x88] sm:$0xff]  ;;  %v233_v10 = vld [vmem:[%s994_s25 + $0x90] sm:$0xff]  ;;  %s1020_s6 = scalar_lea.vmem %s1186_s0, %s910_s26 }
  0x12   : > { %v215_v7 = vld [vmem:[%s994_s25] sm:$0xff]  ;;  %v854_v8 = vpack.c.bf16 %v232_v6, %v231_v5  ;;  %v216_v9 = vld [vmem:[%s994_s25 + $0x8] sm:$0xff]  ;;  %v234_v11 = vld [vmem:[%s994_s25 + $0x98] sm:$0xff] }
  0x13   : > { %v856_v12 = vpack.c.bf16 %v216_v9, %v215_v7  ;;  %v858_v13 = vpack.c.bf16 %v234_v11, %v233_v10  ;;  %v217_v14 = vld [vmem:[%s994_s25 + $0x10] sm:$0xff]  ;;  %v218_v15 = vld [vmem:[%s994_s25 + $0x18] sm:$0xff]  ;;  %v235_v16 = vld [vmem:[%s994_s25 + $0xa0] sm:$0xff]  ;;  %291 = vperm.xlu0 %921, %v257_v26   ;;  %296 = vperm.xlu1 %922, %v258_v27  }
  0x14   : > { %855 = vmatprep.subr.bf16.mxu0 %v854_v8  ;;  %894 = vmatprep.subr.bf16.mxu1 %v854_v8  ;;  %v236_v17 = vld [vmem:[%s994_s25 + $0xa8] sm:$0xff]  ;;  %v860_v20 = vpack.c.bf16 %v218_v15, %v217_v14  ;;  %v219_v22 = vld [vmem:[%s994_s25 + $0x20] sm:$0xff]  ;;  %v237_v24 = vld [vmem:[%s994_s25 + $0xb0] sm:$0xff] }
  0x15   : > { %857 = vmatpush3.bf16.msra.mxu0 %v856_v12  ;;  %902 = vmatpush3.bf16.msra.mxu1 %v856_v12  ;;  %v862_v21 = vpack.c.bf16 %v236_v17, %v235_v16  ;;  %v220_v23 = vld [vmem:[%s994_s25 + $0x28] sm:$0xff]  ;;  %v238_v25 = vld [vmem:[%s994_s25 + $0xb8] sm:$0xff]  ;;  %v221_v30 = vld [vmem:[%s994_s25 + $0x30] sm:$0xff] }
  0x16   : > { %859 = vmatprep.subr.bf16.mxu0 %v858_v13  ;;  %895 = vmatprep.subr.bf16.mxu1 %v858_v13  ;;  %v864_v28 = vpack.c.bf16 %v220_v23, %v219_v22  ;;  %v866_v29 = vpack.c.bf16 %v238_v25, %v237_v24  ;;  %v222_v31 = vld [vmem:[%s994_s25 + $0x38] sm:$0xff]  ;;  %v239_v32 = vld [vmem:[%s994_s25 + $0xc0] sm:$0xff]  ;;  %v240_v33 = vld [vmem:[%s994_s25 + $0xc8] sm:$0xff] }
  0x17   : > { %v192_v34 = vld [vmem:[%s1020_s6 + $0x8] sm:$0xff]  ;;  %v210_v35 = vld [vmem:[%s1020_s6 + $0x98] sm:$0xff]  ;;  %v868_v36 = vpack.c.bf16 %v222_v31, %v221_v30  ;;  %v870_v37 = vpack.c.bf16 %v240_v33, %v239_v32  ;;  %v223_v38 = vld [vmem:[%s994_s25 + $0x40] sm:$0xff] }
  0x18   : > { %388 = vmatprep.mubr.f32.mxu0 %v192_v34  ;;  %v224_v39 = vld [vmem:[%s994_s25 + $0x48] sm:$0xff]  ;;  %v241_v40 = vld [vmem:[%s994_s25 + $0xd0] sm:$0xff]  ;;  %v242_v41 = vld [vmem:[%s994_s25 + $0xd8] sm:$0xff]  ;;  %418 = vmatprep.mubr.f32.mxu1 %v210_v35 }
  0x19   : > { %861 = vmatpush3.bf16.msra.mxu0 %v860_v20  ;;  %903 = vmatpush3.bf16.msra.mxu1 %v860_v20  ;;  %v872_v42 = vpack.c.bf16 %v224_v39, %v223_v38  ;;  %v874_v43 = vpack.c.bf16 %v242_v41, %v241_v40  ;;  %v225_v44 = vld [vmem:[%s994_s25 + $0x50] sm:$0xff]  ;;  %v226_v45 = vld [vmem:[%s994_s25 + $0x58] sm:$0xff]  ;;  %v243_v46 = vld [vmem:[%s994_s25 + $0xe0] sm:$0xff] }
  0x1a   : > { %863 = vmatprep.subr.bf16.mxu0 %v862_v21  ;;  %896 = vmatprep.subr.bf16.mxu1 %v862_v21  ;;  %v244_v47 = vld [vmem:[%s994_s25 + $0xe8] sm:$0xff]  ;;  %v876_v48 = vpack.c.bf16 %v226_v45, %v225_v44  ;;  %v227_v50 = vld [vmem:[%s994_s25 + $0x60] sm:$0xff]  ;;  %v245_v52 = vld [vmem:[%s994_s25 + $0xf0] sm:$0xff] }
  0x1b   : > { %v878_v49 = vpack.c.bf16 %v244_v47, %v243_v46  ;;  %v228_v51 = vld [vmem:[%s994_s25 + $0x68] sm:$0xff]  ;;  %v246_v53 = vld [vmem:[%s994_s25 + $0xf8] sm:$0xff]  ;;  %v229_v56 = vld [vmem:[%s994_s25 + $0x70] sm:$0xff] }
  0x1c   : > { %v880_v54 = vpack.c.bf16 %v228_v51, %v227_v50  ;;  %v882_v55 = vpack.c.bf16 %v246_v53, %v245_v52  ;;  %v230_v57 = vld [vmem:[%s994_s25 + $0x78] sm:$0xff]  ;;  %v247_v58 = vld [vmem:[%s994_s25 + $0x100] sm:$0xff]  ;;  %v248_v59 = vld [vmem:[%s994_s25 + $0x108] sm:$0xff] }
  0x1d   : > { %865 = vmatpush3.bf16.msra.mxu0 %v864_v28  ;;  %904 = vmatpush3.bf16.msra.mxu1 %v864_v28  ;;  %v884_v60 = vpack.c.bf16 %v230_v57, %v229_v56  ;;  %v886_v61 = vpack.c.bf16 %v248_v59, %v247_v58  ;;  %v249_v62 = vld [vmem:[%s994_s25 + $0x110] sm:$0xff]  ;;  %v250_v63 = vld [vmem:[%s994_s25 + $0x118] sm:$0xff]  ;;  %v191_v0 = vld [vmem:[%s1020_s6] sm:$0xff] }
  0x1e   : > { %867 = vmatprep.subr.bf16.mxu0 %v866_v29  ;;  %897 = vmatprep.subr.bf16.mxu1 %v866_v29  ;;  %v209_v1 = vld [vmem:[%s1020_s6 + $0x90] sm:$0xff]  ;;  %v195_v2 = vld [vmem:[%s1020_s6 + $0x20] sm:$0xff]  ;;  %v890_v3 = vpack.c.bf16 %v250_v63, %v249_v62  ;;  %v194_v5 = vld [vmem:[%s1020_s6 + $0x18] sm:$0xff] }
  0x1f   : > { %v213_v4 = vld [vmem:[%s1020_s6 + $0xb0] sm:$0xff]  ;;  %v212_v6 = vld [vmem:[%s1020_s6 + $0xa8] sm:$0xff]  ;;  %v198_v7 = vld [vmem:[%s1020_s6 + $0x38] sm:$0xff] }
  0x20   : > { %v193_v8 = vld [vmem:[%s1020_s6 + $0x10] sm:$0xff]  ;;  %v196_v10 = vld [vmem:[%s1020_s6 + $0x28] sm:$0xff]  ;;  %v199_v12 = vld [vmem:[%s1020_s6 + $0x40] sm:$0xff] }
  0x21   : > { %869 = vmatpush3.bf16.msra.mxu0 %v868_v36  ;;  %905 = vmatpush3.bf16.msra.mxu1 %v868_v36  ;;  %v197_v9 = vld [vmem:[%s1020_s6 + $0x30] sm:$0xff]  ;;  %v200_v13 = vld [vmem:[%s1020_s6 + $0x48] sm:$0xff]  ;;  %v202_v14 = vld [vmem:[%s1020_s6 + $0x58] sm:$0xff] }
  0x22   : > { %871 = vmatprep.subr.bf16.mxu0 %v870_v37  ;;  %898 = vmatprep.subr.bf16.mxu1 %v870_v37  ;;  %v201_v11 = vld [vmem:[%s1020_s6 + $0x50] sm:$0xff]  ;;  %v204_v15 = vld [vmem:[%s1020_s6 + $0x68] sm:$0xff]  ;;  %v203_v17 = vld [vmem:[%s1020_s6 + $0x60] sm:$0xff] }
  0x23   : > { %v205_v16 = vld [vmem:[%s1020_s6 + $0x70] sm:$0xff]  ;;  %v208_v18 = vld [vmem:[%s1020_s6 + $0x88] sm:$0xff]  ;;  %v207_v19 = vld [vmem:[%s1020_s6 + $0x80] sm:$0xff] }
  0x24   : > { %v211_v20 = vld [vmem:[%s1020_s6 + $0xa0] sm:$0xff]  ;;  %v206_v21 = vld [vmem:[%s1020_s6 + $0x78] sm:$0xff] }
  0x25   : > { %873 = vmatpush3.bf16.msra.mxu0 %v872_v42  ;;  %906 = vmatpush3.bf16.msra.mxu1 %v872_v42  ;;  %v214_v22 = vld [vmem:[%s1020_s6 + $0xb8] sm:$0xff] }
  0x26   : > { %875 = vmatprep.subr.bf16.mxu0 %v874_v43  ;;  %899 = vmatprep.subr.bf16.mxu1 %v874_v43 }
  0x29   : > { %877 = vmatpush3.bf16.msra.mxu0 %v876_v48  ;;  %907 = vmatpush3.bf16.msra.mxu1 %v876_v48 }
  0x2a   : > { %879 = vmatprep.subr.bf16.mxu0 %v878_v49  ;;  %900 = vmatprep.subr.bf16.mxu1 %v878_v49 }
  0x2d   : > { %881 = vmatpush3.bf16.msra.mxu0 %v880_v54  ;;  %908 = vmatpush3.bf16.msra.mxu1 %v880_v54 }
  0x2e   : > { %883 = vmatprep.subr.bf16.mxu0 %v882_v55  ;;  %901 = vmatprep.subr.bf16.mxu1 %v882_v55 }
  0x31   : > { %885 = vmatpush3.bf16.msra.mxu0 %v884_v60  ;;  %909 = vmatpush3.bf16.msra.mxu1 %v884_v60 }
  0x32   : > { %887 = vmatprep.subr.bf16.mxu1 %v886_v61 }
  0x34   : > { %389 = vmatmul.mubr.f32.vlgmr.msra.gmra.mrb[0].mxu0 %v191_v0  ;;  %419 = vmatmul.mubr.f32.vlgmr.msra.gmra.mrb[0].mxu1 %v209_v1 }
  0x35   : > { %889 = vmatpush3.bf16.msra.mxu1 %v886_v61  ;;  %393 = vmatprep.mubr.f32.mxu0 %v195_v2 }
  0x36   : > { %423 = vmatprep.mubr.f32.mxu1 %v213_v4  ;;  %891 = vmatprep.subr.bf16.mxu1 %v890_v3 }
  0x38   : > { %394 = vmatmul.mubr.f32.gmra.mrb[2].mxu0 %v194_v5  ;;  %424 = vmatmul.mubr.f32.gmra.mrb[2].mxu1 %v212_v6 }
  0x39   : > { %893 = vmatpush3.bf16.msra.mxu1 %v890_v3  ;;  %398 = vmatprep.mubr.f32.mxu0 %v198_v7 }
  0x3a   : > { %842 = vmatprep.mubr.msk.f32.mxu1 %vm299_vm0, %v193_v8 }
  0x3c   : > { %399 = vmatmul.mubr.f32.gmra.mrb[4].mxu0 %v197_v9  ;;  %843 = vmatmul.mubr.msk.f32.vlgmr.msra.gmra.mrb[4].mxu1 %vm299_vm0, %v196_v10 }
  0x3d   : > { %403 = vmatprep.mubr.f32.mxu0 %v201_v11  ;;  %845 = vmatprep.mubr.msk.f32.mxu1 %vm299_vm0, %v199_v12 }
  0x40   : > { %404 = vmatmul.mubr.f32.gmra.mrb[6].mxu0 %v200_v13  ;;  %846 = vmatmul.mubr.msk.f32.gmra.mrb[6].mxu1 %vm299_vm0, %v202_v14 }
  0x41   : > { %408 = vmatprep.mubr.f32.mxu0 %v204_v15  ;;  %848 = vmatprep.mubr.msk.f32.mxu1 %vm299_vm0, %v205_v16 }
  0x44   : > { %409 = vmatmul.mubr.f32.gmra.mrb[8].mxu0 %v203_v17  ;;  %849 = vmatmul.mubr.msk.f32.gmra.mrb[8].mxu1 %vm299_vm0, %v208_v18 }
  0x45   : > { %413 = vmatprep.mubr.f32.mxu0 %v207_v19  ;;  %851 = vmatprep.mubr.msk.f32.mxu1 %vm299_vm0, %v211_v20 }
  0x48   : > { %414 = vmatmul.mubr.f32.gmra.mrb[10].mxu0 %v206_v21  ;;  %852 = vmatmul.mubr.msk.f32.gmra.mrb[10].mxu1 %vm299_vm0, %v214_v22 }
  0x86   : > { %v262_v23 = vpop.permute.xlu0 %261  ;;  %v272_v24 = vpop.permute.xlu1 %271 }
  0x8a   : > { %v267_v25 = vpop.permute.xlu0 %266  ;;  %v277_v26 = vpop.permute.xlu1 %276 }
  0x8e   : > { %v282_v39 = vpop.permute.xlu0 %281  ;;  %v287_v40 = vpop.permute.xlu1 %286 }
  0x92   : > { %v292_v61 = vpop.permute.xlu0 %291  ;;  %v297_v62 = vpop.permute.xlu1 %296 }
 0x107   : > { %v816_v27 = vpop.f32.mrb[0].mxu1  ;;  %v798_v28 = vpop.f32.mrb[0].mxu0 }
 0x108   : > { %v817_v29 = vpop.f32.mrb[1].mxu1  ;;  %v799_v30 = vpop.f32.mrb[1].mxu0 }
 0x109   : > { %v818_v31 = vadd.f32 %v817_v29, %v816_v27  ;;  %v800_v32 = vadd.f32 %v799_v30, %v798_v28 }
 0x10b   : > { %v801_v33 = vpop.f32.mrb[2].mxu0  ;;  %v819_v34 = vpop.f32.mrb[2].mxu1  ;;  %v391_v43 = vadd.f32 %v800_v32, %v262_v23  ;;  %v421_v12 = vadd.f32 %v818_v31, %v292_v61 }
 0x10c   : > { %v802_v35 = vpop.f32.mrb[3].mxu0  ;;  %v820_v36 = vpop.f32.mrb[3].mxu1 }
 0x10d   : > { %v803_v37 = vadd.f32 %v802_v35, %v801_v33  ;;  %v821_v38 = vadd.f32 %v820_v36, %v819_v34 }
 0x10f   : > { %v396_v41 = vadd.f32 %v803_v37, %v267_v25  ;;  %v844_v42 = vpop.f32.mrb[4].mxu1  ;;  %v804_v44 = vpop.f32.mrb[4].mxu0  ;;  %v426_v11 = vadd.f32 %v821_v38, %v297_v62 }
 0x110   : > { %v495_v45 = vpop.f32.mrb[5].mxu1  ;;  %v805_v46 = vpop.f32.mrb[5].mxu0 }
 0x111   : > { %v1082_v47 = vadd.f32 %v844_v42, %v396_v41  ;;  %v1084_v48 = vadd.f32 %v495_v45, %v391_v43  ;;  %v806_v49 = vadd.f32 %v805_v46, %v804_v44 }
 0x113   : > { %v807_v50 = vpop.f32.mrb[6].mxu0  ;;  %v538_v51 = vsel %vm534_vm1, %v1082_v47, 0.0  ;;  %v535_v52 = vsel %vm534_vm1, %v1084_v48, 0.0  ;;  %v847_v53 = vpop.f32.mrb[6].mxu1  ;;  %v401_v54 = vadd.f32 %v806_v49, %v272_v24  ;;  %v567_v55 = vmul.f32 %v1084_v48, %v1084_v48 }
 0x114   : > { %v808_v56 = vpop.f32.mrb[7].mxu0  ;;  %539 = vadd.xlane.f32.xlu1 %v538_v51  ;;  %536 = vadd.xlane.f32.xlu0 %v535_v52  ;;  %v505_v57 = vpop.f32.mrb[7].mxu1  ;;  %v568_v58 = vmul.f32 %v1082_v47, %v1082_v47 }
 0x115   : > { %v809_v59 = vadd.f32 %v808_v56, %v807_v50  ;;  %v1094_v60 = vadd.f32 %v505_v57, %v401_v54  ;;  %v575_v1 = vsel %vm534_vm1, %v567_v55, 0.0 }
 0x116   : > { %v578_v2 = vsel %vm534_vm1, %v568_v58, 0.0 }
 0x117   : > { %v406_v63 = vadd.f32 %v809_v59, %v277_v26  ;;  %v810_v0 = vpop.f32.mrb[8].mxu0  ;;  %v850_v3 = vpop.f32.mrb[8].mxu1  ;;  %v569_v4 = vmul.f32 %v1094_v60, %v1094_v60  ;;  %v541_v10 = vsel %vm534_vm1, %v1094_v60, 0.0 }
 0x118   : > { %v811_v5 = vpop.f32.mrb[9].mxu0  ;;  %576 = vadd.xlane.f32.xlu1 %v575_v1  ;;  %579 = vadd.xlane.f32.xlu0 %v578_v2  ;;  %v515_v6 = vpop.f32.mrb[9].mxu1 }
 0x119   : > { %v1100_v7 = vadd.f32 %v847_v53, %v406_v63  ;;  %v812_v8 = vadd.f32 %v811_v5, %v810_v0  ;;  %v581_v9 = vsel %vm534_vm1, %v569_v4, 0.0 }
 0x11b   : > { %v411_v13 = vadd.f32 %v812_v8, %v282_v39  ;;  %v813_v14 = vpop.f32.mrb[10].mxu0  ;;  %v853_v15 = vpop.f32.mrb[10].mxu1  ;;  %v544_v24 = vsel %vm534_vm1, %v1100_v7, 0.0  ;;  %v570_v25 = vmul.f32 %v1100_v7, %v1100_v7 }
 0x11c   : > { %v1105_v16 = vadd.f32 %v853_v15, %v426_v11  ;;  %v814_v17 = vpop.f32.mrb[11].mxu0  ;;  %v525_v18 = vpop.f32.mrb[11].mxu1  ;;  %582 = vadd.xlane.f32.xlu1 %v581_v9  ;;  %542 = vadd.xlane.f32.xlu0 %v541_v10 }
 0x11d   : > { %v1107_v19 = vadd.f32 %v515_v6, %v411_v13  ;;  %v815_v20 = vadd.f32 %v814_v17, %v813_v14  ;;  %v1109_v21 = vadd.f32 %v525_v18, %v421_v12  ;;  %v584_v28 = vsel %vm534_vm1, %v570_v25, 0.0 }
 0x11e   : > { %v556_v31 = vsel %vm534_vm1, %v1105_v16, 0.0  ;;  %v574_v37 = vmul.f32 %v1105_v16, %v1105_v16 }
 0x11f   : > { %v416_v22 = vadd.f32 %v815_v20, %v287_v40  ;;  %v547_v23 = vsel %vm534_vm1, %v1107_v19, 0.0  ;;  %v553_v27 = vsel %vm534_vm1, %v1109_v21, 0.0  ;;  %v571_v29 = vmul.f32 %v1107_v19, %v1107_v19 }
 0x120   : > { %548 = vadd.xlane.f32.xlu1 %v547_v23  ;;  %545 = vadd.xlane.f32.xlu0 %v544_v24  ;;  %v573_v32 = vmul.f32 %v1109_v21, %v1109_v21  ;;  %v596_v38 = vsel %vm534_vm1, %v574_v37, 0.0 }
 0x121   : > { %v1117_v26 = vadd.f32 %v850_v3, %v416_v22  ;;  %v587_v30 = vsel %vm534_vm1, %v571_v29, 0.0 }
 0x122   : > { %v593_v33 = vsel %vm534_vm1, %v573_v32, 0.0 }
 0x123   : > { %v550_v34 = vsel %vm534_vm1, %v1117_v26, 0.0  ;;  %v572_v35 = vmul.f32 %v1117_v26, %v1117_v26 }
 0x124   : > { %554 = vadd.xlane.f32.xlu1 %v553_v27  ;;  %585 = vadd.xlane.f32.xlu0 %v584_v28 }
 0x125   : > { %v590_v36 = vsel %vm534_vm1, %v572_v35, 0.0 }
 0x128   : > { %588 = vadd.xlane.f32.xlu1 %v587_v30  ;;  %557 = vadd.xlane.f32.xlu0 %v556_v31 }
 0x12c   : > { %594 = vadd.xlane.f32.xlu1 %v593_v33  ;;  %551 = vadd.xlane.f32.xlu0 %v550_v34 }
 0x130   : > { %591 = vadd.xlane.f32.xlu0 %v590_v36 }
 0x134   : > { %597 = vadd.xlane.f32.xlu0 %v596_v38 }
 0x1a1   : > { %v540_v39 = vpop.xlane.xlu1 %539  ;;  %v537_v40 = vpop.xlane.xlu0 %536 }
 0x1a2   : > { %v560_v41 = vmul.f32 0.015625, %v540_v39  ;;  %v559_v42 = vmul.f32 0.015625, %v537_v40 }
 0x1a4   : > { %v608_v45 = vmul.f32 %v560_v41, %v560_v41  ;;  %v607_v46 = vmul.f32 %v559_v42, %v559_v42  ;;  %v631_v20 = vsub.f32 %v1084_v48, %v559_v42  ;;  %v632_v23 = vsub.f32 %v1082_v47, %v560_v41 }
 0x1a5   : > { %v577_v43 = vpop.xlane.xlu1 %576  ;;  %v580_v44 = vpop.xlane.xlu0 %579 }
 0x1a6   : > { %v599_v49 = vmul.f32 0.015625, %v577_v43  ;;  %v600_v50 = vmul.f32 0.015625, %v580_v44 }
 0x1a8   : > { %v615_v51 = vsub.f32 %v599_v49, %v607_v46  ;;  %v616_v52 = vsub.f32 %v600_v50, %v608_v45 }
 0x1a9   : > { %v583_v53 = vpop.xlane.xlu1 %582  ;;  %v543_v54 = vpop.xlane.xlu0 %542 }
 0x1aa   : > { %v623_v55 = vmax.f32 %v615_v51, 0.0  ;;  %v624_v56 = vmax.f32 %v616_v52, 0.0  ;;  %v601_v57 = vmul.f32 0.015625, %v583_v53  ;;  %v561_v58 = vmul.f32 0.015625, %v543_v54 }
 0x1ac   : > { %v639_v59 = vadd.f32 1e-05, %v623_v55  ;;  %v640_v61 = vadd.f32 1e-05, %v624_v56  ;;  %v609_v62 = vmul.f32 %v561_v58, %v561_v58  ;;  %v633_v38 = vsub.f32 %v1094_v60, %v561_v58 }
 0x1ad   : > { %v549_v63 = vpop.xlane.xlu1 %548  ;;  %v546_v0 = vpop.xlane.xlu0 %545 }
 0x1ae   : > { %923 = vrsqrt.f32 %v639_v59  ;;  %v617_v1 = vsub.f32 %v601_v57, %v609_v62  ;;  %v1138_v2 = vmul.f32 0.015625, %v546_v0  ;;  %v1140_v8 = vmul.f32 0.015625, %v549_v63 }
 0x1af   : > { %925 = vrsqrt.f32 %v640_v61 }
 0x1b0   : > { %v625_v3 = vmax.f32 %v617_v1, 0.0  ;;  %v610_v9 = vmul.f32 %v1138_v2, %v1138_v2  ;;  %v611_v15 = vmul.f32 %v1140_v8, %v1140_v8  ;;  %v634_v54 = vsub.f32 %v1100_v7, %v1138_v2 }
 0x1b1   : > { %v555_v4 = vpop.xlane.xlu1 %554  ;;  %v586_v5 = vpop.xlane.xlu0 %585  ;;  %v635_v61 = vsub.f32 %v1107_v19, %v1140_v8 }
 0x1b2   : > { %v641_v6 = vadd.f32 1e-05, %v625_v3  ;;  %v602_v10 = vmul.f32 0.015625, %v586_v5  ;;  %v1144_v12 = vmul.f32 0.015625, %v555_v4 }
 0x1b4   : > { %927 = vrsqrt.f32 %v641_v6  ;;  %v618_v11 = vsub.f32 %v602_v10, %v610_v9  ;;  %v613_v29 = vmul.f32 %v1144_v12, %v1144_v12  ;;  %v637_v7 = vsub.f32 %v1109_v21, %v1144_v12 }
 0x1b5   : > { %v589_v13 = vpop.xlane.xlu1 %588  ;;  %v558_v14 = vpop.xlane.xlu0 %557 }
 0x1b6   : > { %v626_v17 = vmax.f32 %v618_v11, 0.0  ;;  %v603_v18 = vmul.f32 0.015625, %v589_v13  ;;  %v566_v39 = vmul.f32 0.015625, %v558_v14 }
 0x1b8   : > { %v924_v22 = vpop.eup %923  ;;  %v642_v24 = vadd.f32 1e-05, %v626_v17  ;;  %v619_v25 = vsub.f32 %v603_v18, %v611_v15  ;;  %v614_v52 = vmul.f32 %v566_v39, %v566_v39  ;;  %v638_v9 = vsub.f32 %v1105_v16, %v566_v39 }
 0x1b9   : > { %v926_v27 = vpop.eup %925  ;;  %v655_v28 = vmul.f32 %v924_v22, %v631_v20  ;;  %v595_v30 = vpop.xlane.xlu1 %594 }
 0x1ba   : > { %v552_v31 = vpop.xlane.xlu0 %551  ;;  %v656_v48 = vmul.f32 %v926_v27, %v632_v23  ;;  %929 = vrsqrt.f32 %v642_v24  ;;  %v627_v32 = vmax.f32 %v619_v25, 0.0  ;;  %v605_v47 = vmul.f32 0.015625, %v595_v30 }
 0x1bb   : > { %v663_v33 = vmax.f32 %v655_v28, 0.0  ;;  %v564_v34 = vmul.f32 0.015625, %v552_v31 }
 0x1bc   : > { %v664_v35 = vmax.f32 %v656_v48, 0.0  ;;  %v643_v36 = vadd.f32 1e-05, %v627_v32  ;;  %v621_v37 = vsub.f32 %v605_v47, %v613_v29 }
 0x1bd   : > { %671 = vst.msk [vmem:[%s1156_s16] sm:$0xff] %vm534_vm1, %v663_v33  ;;  %v612_v43 = vmul.f32 %v564_v34, %v564_v34  ;;  %v636_v19 = vsub.f32 %v1117_v26, %v564_v34 }
 0x1be   : > { %v592_v40 = vpop.xlane.xlu0 %591  ;;  %v928_v41 = vpop.eup %927  ;;  %672 = vst.msk [vmem:[%s1156_s16 + $0x8] sm:$0xff] %vm534_vm1, %v664_v35  ;;  %931 = vrsqrt.f32 %v643_v36  ;;  %v629_v42 = vmax.f32 %v621_v37, 0.0 }
 0x1bf   : > { %v604_v44 = vmul.f32 0.015625, %v592_v40  ;;  %v657_v45 = vmul.f32 %v928_v41, %v633_v38 }
 0x1c0   : > { %v645_v46 = vadd.f32 1e-05, %v629_v42 }
 0x1c1   : > { %v620_v49 = vsub.f32 %v604_v44, %v612_v43  ;;  %v665_v50 = vmax.f32 %v657_v45, 0.0 }
 0x1c2   : > { %v598_v51 = vpop.xlane.xlu0 %597  ;;  %933 = vrsqrt.f32 %v645_v46 }
 0x1c3   : > { %v628_v53 = vmax.f32 %v620_v49, 0.0  ;;  %v606_v60 = vmul.f32 0.015625, %v598_v51  ;;  %673 = vst.msk [vmem:[%s1156_s16 + $0x10] sm:$0xff] %vm534_vm1, %v665_v50 }
 0x1c4   : > { %v930_v55 = vpop.eup %929 }
 0x1c5   : > { %v644_v56 = vadd.f32 1e-05, %v628_v53  ;;  %v622_v57 = vsub.f32 %v606_v60, %v614_v52  ;;  %v658_v58 = vmul.f32 %v930_v55, %v634_v54 }
 0x1c7   : > { %935 = vrsqrt.f32 %v644_v56  ;;  %v630_v59 = vmax.f32 %v622_v57, 0.0  ;;  %v666_v62 = vmax.f32 %v658_v58, 0.0 }
 0x1c8   : > { %v932_v63 = vpop.eup %931 }
 0x1c9   : > { %v646_v0 = vadd.f32 1e-05, %v630_v59  ;;  %674 = vst.msk [vmem:[%s1156_s16 + $0x18] sm:$0xff] %vm534_vm1, %v666_v62  ;;  %v659_v1 = vmul.f32 %v932_v63, %v635_v61 }
 0x1cb   : > { %937 = vrsqrt.f32 %v646_v0  ;;  %v667_v2 = vmax.f32 %v659_v1, 0.0 }
 0x1cc   : > { %v934_v3 = vpop.eup %933 }
 0x1cd   : > { %675 = vst.msk [vmem:[%s1156_s16 + $0x20] sm:$0xff] %vm534_vm1, %v667_v2  ;;  %v661_v4 = vmul.f32 %v934_v3, %v637_v7 }
 0x1cf   : > { %v669_v5 = vmax.f32 %v661_v4, 0.0 }
 0x1d1   : > { %v936_v6 = vpop.eup %935  ;;  %677 = vst.msk [vmem:[%s1156_s16 + $0x30] sm:$0xff] %vm534_vm1, %v669_v5 }
 0x1d2   : > { %v660_v8 = vmul.f32 %v936_v6, %v636_v19 }
 0x1d4   : > { %v668_v10 = vmax.f32 %v660_v8, 0.0 }
 0x1d5   : > { %v938_v11 = vpop.eup %937 }
 0x1d6   : > { %676 = vst.msk [vmem:[%s1156_s16 + $0x28] sm:$0xff] %vm534_vm1, %v668_v10  ;;  %v662_v21 = vmul.f32 %v938_v11, %v638_v9 }
 0x1d8   : > { %v670_v12 = vmax.f32 %v662_v21, 0.0 }
 0x1da   : > { %678 = vst.msk [vmem:[%s1156_s16 + $0x38] sm:$0xff] %vm534_vm1, %v670_v12 }
 0x1db PF: > { %s13_s12 = sadd.s32 1, %s945_s12  }
 0x1dc   : > { %p10_p4 = scmp.ge.s32.totalorder %s13_s12, 4  }
 0x1de   :  { %12 = sbr.rel (!%p10_p4) target bundleno = 1 (0x1), region = 65 }

// kernel: _forward_impl.37
= control target key start
LH: loop header
LB: loop body
LE: loop exit
PB: predicated region body
PF: predicated region fallthrough
CT: control target
= control target key end

     0   :  { %s1693_s12 = smov 0   ;;  %s2187_s0 = inlined_call_operand.vmem [shape: f32[2,128,576], index: 0, kind: input, shape index: {}]   ;;  %s2188_s1 = inlined_call_operand.vmem [shape: f32[2,576,16], index: 1, kind: input, shape index: {}]   ;;  %s2189_s2 = inlined_call_operand.vmem [shape: f32[128,1], index: 2, kind: input, shape index: {}]   ;;  %s2190_s3 = inlined_call_operand.vmem [shape: f32[2,128,16], index: 3, kind: output, shape index: {}]  }
   0x1 LB: > { %s1279_s13 = sadd.s32 4294967295, %s1670_s12   ;;  %p1283_p0 = scmp.ge.s32.totalorder %s1670_s12, 1  ;;  %s1670_s12 = sphi %s1693_s12, %s13_s12  }
   0x2   : > { %p147_p1 = scmp.lt.s32.totalorder %s1670_s12, 3 }
   0x4   : > { %p148_p2 = pnand %p1283_p0, %p147_p1 }
   0x5   : > { %p176_p3 = scmp.lt.s32.totalorder (!%p148_p2), %s1279_s13, 1  ;;  %v343_v0 = vld [vmem:[%s2189_s2] sm:$0xff] (!%p148_p2)  ;;  %v345_v1 = vld [vmem:[%s2189_s2 + $0x10] sm:$0xff] (!%p148_p2)  ;;  %v1672_v2 = vmov (!%p148_p2), 0   ;;  %v344_v3 = vld [vmem:[%s2189_s2 + $0x8] sm:$0xff] (!%p148_p2)  ;;  %vm439_vm0 = vcmask (!%p148_p2), 523264  }
   0x6   : > { %151 = sbr.rel (%p148_p2) target bundleno = 564 (0x234), region = 32  ;;  %1630 = vset.pattern.permute.xlu0 (!%p148_p2), %v1672_v2  ;;  %1631 = vset.pattern.permute.xlu1 (!%p148_p2), %v1672_v2  ;;  %v346_v4 = vld [vmem:[%s2189_s2 + $0x18] sm:$0xff] (!%p148_p2)  ;;  %v347_v5 = vld [vmem:[%s2189_s2 + $0x20] sm:$0xff] (!%p148_p2)  ;;  %v348_v8 = vld [vmem:[%s2189_s2 + $0x28] sm:$0xff] (!%p148_p2)  ;;  %vm923_vm1 = vcmask (!%p148_p2), 130048  }
   0x7   : > { %361 = vperm.xlu0 (!%p148_p2), %1630, %v343_v0   ;;  %371 = vperm.xlu1 (!%p148_p2), %1631, %v345_v1   ;;  %v349_v21 = vld [vmem:[%s2189_s2 + $0x30] sm:$0xff] (!%p148_p2)  ;;  %v350_v22 = vld [vmem:[%s2189_s2 + $0x38] sm:$0xff] (!%p148_p2)  ;;  %v352_v41 = vld [vmem:[%s2189_s2 + $0x48] sm:$0xff] (!%p148_p2) }
   0x8   : > { %v351_v42 = vld [vmem:[%s2189_s2 + $0x40] sm:$0xff] (!%p148_p2)  ;;  %v354_v0 = vld [vmem:[%s2189_s2 + $0x58] sm:$0xff] (!%p148_p2)  ;;  %v353_v1 = vld [vmem:[%s2189_s2 + $0x50] sm:$0xff] (!%p148_p2) }
   0xb   : > { %366 = vperm.xlu0 (!%p148_p2), %1630, %v344_v3   ;;  %376 = vperm.xlu1 (!%p148_p2), %1631, %v346_v4  }
   0xd   : > { %s2192_s13 = smov (!%p176_p3, %s1279_s13), 1 }
   0xe   : > { %s1619_s22 = smul.u32 640, %s2192_s13 }
   0xf   : > { %s1620_s23 = smul.u32 576, %s2192_s13  ;;  %381 = vperm.xlu0 %1630, %v347_v5   ;;  %386 = vperm.xlu1 %1631, %v348_v8  }
  0x10   : > { %s1720_s26 = scalar_lea.vmem %s2187_s0, %s1619_s22 }
  0x11   : > { %s1728_s4 = scalar_lea.vmem %s2188_s1, %s1620_s23  ;;  %v192_v6 = vld [vmem:[%s1720_s26 + $0x8] sm:$0xff]  ;;  %v194_v7 = vld [vmem:[%s1720_s26 + $0x18] sm:$0xff] }
  0x12   : > { %v287_v9 = vld [vmem:[%s1728_s4 + $0x80] sm:$0xff]  ;;  %v288_v10 = vld [vmem:[%s1728_s4 + $0x88] sm:$0xff]  ;;  %552 = vmatprep.mubr.f32.mxu0 %v192_v6  ;;  %697 = vmatprep.mubr.f32.mxu1 %v194_v7  ;;  %v289_v20 = vld [vmem:[%s1728_s4 + $0x90] sm:$0xff] }
  0x13   : > { %v319_v11 = vld [vmem:[%s1728_s4 + $0x180] sm:$0xff]  ;;  %v1531_v12 = vpack.c.bf16 %v288_v10, %v287_v9  ;;  %v320_v13 = vld [vmem:[%s1728_s4 + $0x188] sm:$0xff]  ;;  %v290_v24 = vld [vmem:[%s1728_s4 + $0x98] sm:$0xff]  ;;  %391 = vperm.xlu0 %1630, %v349_v21   ;;  %396 = vperm.xlu1 %1631, %v350_v22  }
  0x14   : > { %v271_v14 = vld [vmem:[%s1728_s4] sm:$0xff]  ;;  %v272_v15 = vld [vmem:[%s1728_s4 + $0x8] sm:$0xff]  ;;  %v1563_v16 = vpack.c.bf16 %v320_v13, %v319_v11  ;;  %v321_v25 = vld [vmem:[%s1728_s4 + $0x190] sm:$0xff]  ;;  %v1535_v27 = vpack.c.bf16 %v290_v24, %v289_v20 }
  0x15   : > { %v1533_v17 = vpack.c.bf16 %v272_v15, %v271_v14  ;;  %v303_v18 = vld [vmem:[%s1728_s4 + $0x100] sm:$0xff]  ;;  %v304_v19 = vld [vmem:[%s1728_s4 + $0x108] sm:$0xff]  ;;  %1532 = vmatprep.subr.bf16.mxu0 %v1531_v12  ;;  %v322_v26 = vld [vmem:[%s1728_s4 + $0x198] sm:$0xff] }
  0x16   : > { %v1565_v23 = vpack.c.bf16 %v304_v19, %v303_v18  ;;  %1564 = vmatprep.subr.bf16.mxu1 %v1563_v16  ;;  %v1567_v28 = vpack.c.bf16 %v322_v26, %v321_v25  ;;  %v273_v29 = vld [vmem:[%s1728_s4 + $0x10] sm:$0xff]  ;;  %v274_v30 = vld [vmem:[%s1728_s4 + $0x18] sm:$0xff]  ;;  %v291_v34 = vld [vmem:[%s1728_s4 + $0xa0] sm:$0xff] }
  0x17   : > { %1534 = vmatpush3.bf16.msra.mxu0 %v1533_v17  ;;  %v305_v31 = vld [vmem:[%s1728_s4 + $0x110] sm:$0xff]  ;;  %v1537_v32 = vpack.c.bf16 %v274_v30, %v273_v29  ;;  %v306_v33 = vld [vmem:[%s1728_s4 + $0x118] sm:$0xff]  ;;  %v292_v35 = vld [vmem:[%s1728_s4 + $0xa8] sm:$0xff]  ;;  %406 = vperm.xlu1 %1631, %v352_v41  }
  0x18   : > { %1566 = vmatpush3.bf16.msra.mxu1 %v1565_v23  ;;  %1536 = vmatprep.subr.bf16.mxu0 %v1535_v27  ;;  %v1569_v36 = vpack.c.bf16 %v306_v33, %v305_v31  ;;  %v1539_v37 = vpack.c.bf16 %v292_v35, %v291_v34  ;;  %v323_v38 = vld [vmem:[%s1728_s4 + $0x1a0] sm:$0xff]  ;;  %v324_v39 = vld [vmem:[%s1728_s4 + $0x1a8] sm:$0xff]  ;;  %v293_v48 = vld [vmem:[%s1728_s4 + $0xb0] sm:$0xff] }
  0x19   : > { %1568 = vmatprep.subr.bf16.mxu1 %v1567_v28  ;;  %v275_v40 = vld [vmem:[%s1728_s4 + $0x20] sm:$0xff]  ;;  %v1571_v43 = vpack.c.bf16 %v324_v39, %v323_v38  ;;  %v276_v44 = vld [vmem:[%s1728_s4 + $0x28] sm:$0xff]  ;;  %v294_v49 = vld [vmem:[%s1728_s4 + $0xb8] sm:$0xff]  ;;  %401 = vperm.xlu0 %1630, %v351_v42  }
  0x1a   : > { %v307_v45 = vld [vmem:[%s1728_s4 + $0x120] sm:$0xff]  ;;  %v308_v46 = vld [vmem:[%s1728_s4 + $0x128] sm:$0xff]  ;;  %v1541_v47 = vpack.c.bf16 %v276_v44, %v275_v40  ;;  %v325_v50 = vld [vmem:[%s1728_s4 + $0x1b0] sm:$0xff]  ;;  %v1543_v52 = vpack.c.bf16 %v294_v49, %v293_v48 }
  0x1b   : > { %1538 = vmatpush3.bf16.msra.mxu0 %v1537_v32  ;;  %v1573_v51 = vpack.c.bf16 %v308_v46, %v307_v45  ;;  %v326_v53 = vld [vmem:[%s1728_s4 + $0x1b8] sm:$0xff]  ;;  %v277_v54 = vld [vmem:[%s1728_s4 + $0x30] sm:$0xff]  ;;  %v295_v59 = vld [vmem:[%s1728_s4 + $0xc0] sm:$0xff]  ;;  %416 = vperm.xlu1 %1631, %v354_v0  }
  0x1c   : > { %1570 = vmatpush3.bf16.msra.mxu1 %v1569_v36  ;;  %1540 = vmatprep.subr.bf16.mxu0 %v1539_v37  ;;  %v278_v55 = vld [vmem:[%s1728_s4 + $0x38] sm:$0xff]  ;;  %v1575_v56 = vpack.c.bf16 %v326_v53, %v325_v50  ;;  %v309_v57 = vld [vmem:[%s1728_s4 + $0x130] sm:$0xff]  ;;  %v296_v60 = vld [vmem:[%s1728_s4 + $0xc8] sm:$0xff] }
  0x1d   : > { %1572 = vmatprep.subr.bf16.mxu1 %v1571_v43  ;;  %v310_v58 = vld [vmem:[%s1728_s4 + $0x138] sm:$0xff]  ;;  %v327_v61 = vld [vmem:[%s1728_s4 + $0x1c0] sm:$0xff]  ;;  %v328_v62 = vld [vmem:[%s1728_s4 + $0x1c8] sm:$0xff]  ;;  %v1545_v63 = vpack.c.bf16 %v278_v55, %v277_v54  ;;  %v1547_v3 = vpack.c.bf16 %v296_v60, %v295_v59  ;;  %411 = vperm.xlu0 %1630, %v353_v1  }
  0x1e   : > { %v1577_v2 = vpack.c.bf16 %v310_v58, %v309_v57  ;;  %v279_v4 = vld [vmem:[%s1728_s4 + $0x40] sm:$0xff]  ;;  %v280_v5 = vld [vmem:[%s1728_s4 + $0x48] sm:$0xff]  ;;  %v1579_v7 = vpack.c.bf16 %v328_v62, %v327_v61  ;;  %v297_v9 = vld [vmem:[%s1728_s4 + $0xd0] sm:$0xff] }
  0x1f   : > { %1542 = vmatpush3.bf16.msra.mxu0 %v1541_v47  ;;  %v311_v6 = vld [vmem:[%s1728_s4 + $0x140] sm:$0xff]  ;;  %v312_v8 = vld [vmem:[%s1728_s4 + $0x148] sm:$0xff]  ;;  %v298_v10 = vld [vmem:[%s1728_s4 + $0xd8] sm:$0xff]  ;;  %v1549_v13 = vpack.c.bf16 %v280_v5, %v279_v4 }
  0x20   : > { %1574 = vmatpush3.bf16.msra.mxu1 %v1573_v51  ;;  %1544 = vmatprep.subr.bf16.mxu0 %v1543_v52  ;;  %v329_v11 = vld [vmem:[%s1728_s4 + $0x1d0] sm:$0xff]  ;;  %v330_v12 = vld [vmem:[%s1728_s4 + $0x1d8] sm:$0xff]  ;;  %v356_v14 = vld [vmem:[%s2189_s2 + $0x68] sm:$0xff]  ;;  %v1581_v16 = vpack.c.bf16 %v312_v8, %v311_v6  ;;  %v1551_v17 = vpack.c.bf16 %v298_v10, %v297_v9 }
  0x21   : > { %1576 = vmatprep.subr.bf16.mxu1 %v1575_v56  ;;  %v355_v15 = vld [vmem:[%s2189_s2 + $0x60] sm:$0xff]  ;;  %v281_v18 = vld [vmem:[%s1728_s4 + $0x50] sm:$0xff]  ;;  %v282_v19 = vld [vmem:[%s1728_s4 + $0x58] sm:$0xff]  ;;  %v1583_v21 = vpack.c.bf16 %v330_v12, %v329_v11  ;;  %426 = vperm.xlu1 %1631, %v356_v14  }
  0x22   : > { %v313_v20 = vld [vmem:[%s1728_s4 + $0x150] sm:$0xff]  ;;  %v314_v22 = vld [vmem:[%s1728_s4 + $0x158] sm:$0xff]  ;;  %v299_v23 = vld [vmem:[%s1728_s4 + $0xe0] sm:$0xff]  ;;  %421 = vperm.xlu0 %1630, %v355_v15   ;;  %v1553_v27 = vpack.c.bf16 %v282_v19, %v281_v18 }
  0x23   : > { %1546 = vmatpush3.bf16.msra.mxu0 %v1545_v63  ;;  %v300_v24 = vld [vmem:[%s1728_s4 + $0xe8] sm:$0xff]  ;;  %v331_v25 = vld [vmem:[%s1728_s4 + $0x1e0] sm:$0xff]  ;;  %v358_v28 = vld [vmem:[%s2189_s2 + $0x78] sm:$0xff]  ;;  %v1585_v30 = vpack.c.bf16 %v314_v22, %v313_v20 }
  0x24   : > { %1578 = vmatpush3.bf16.msra.mxu1 %v1577_v2  ;;  %1548 = vmatprep.subr.bf16.mxu0 %v1547_v3  ;;  %v332_v26 = vld [vmem:[%s1728_s4 + $0x1e8] sm:$0xff]  ;;  %v357_v29 = vld [vmem:[%s2189_s2 + $0x70] sm:$0xff]  ;;  %v1555_v31 = vpack.c.bf16 %v300_v24, %v299_v23  ;;  %v283_v32 = vld [vmem:[%s1728_s4 + $0x60] sm:$0xff] }
  0x25   : > { %1580 = vmatprep.subr.bf16.mxu1 %v1579_v7  ;;  %v284_v33 = vld [vmem:[%s1728_s4 + $0x68] sm:$0xff]  ;;  %v315_v34 = vld [vmem:[%s1728_s4 + $0x160] sm:$0xff]  ;;  %v1587_v35 = vpack.c.bf16 %v332_v26, %v331_v25  ;;  %v301_v37 = vld [vmem:[%s1728_s4 + $0xf0] sm:$0xff]  ;;  %436 = vperm.xlu1 %1631, %v358_v28  }
  0x26   : > { %v316_v36 = vld [vmem:[%s1728_s4 + $0x168] sm:$0xff]  ;;  %v302_v38 = vld [vmem:[%s1728_s4 + $0xf8] sm:$0xff]  ;;  %v333_v39 = vld [vmem:[%s1728_s4 + $0x1f0] sm:$0xff]  ;;  %431 = vperm.xlu0 %1630, %v357_v29   ;;  %v1557_v41 = vpack.c.bf16 %v284_v33, %v283_v32 }
  0x27   : > { %1550 = vmatpush3.bf16.msra.mxu0 %v1549_v13  ;;  %v334_v40 = vld [vmem:[%s1728_s4 + $0x1f8] sm:$0xff]  ;;  %v1589_v42 = vpack.c.bf16 %v316_v36, %v315_v34  ;;  %v1559_v43 = vpack.c.bf16 %v302_v38, %v301_v37  ;;  %v285_v44 = vld [vmem:[%s1728_s4 + $0x70] sm:$0xff]  ;;  %v335_v49 = vld [vmem:[%s1728_s4 + $0x200] sm:$0xff] }
  0x28   : > { %1582 = vmatpush3.bf16.msra.mxu1 %v1581_v16  ;;  %1552 = vmatprep.subr.bf16.mxu0 %v1551_v17  ;;  %v286_v45 = vld [vmem:[%s1728_s4 + $0x78] sm:$0xff]  ;;  %v317_v46 = vld [vmem:[%s1728_s4 + $0x170] sm:$0xff]  ;;  %v1591_v47 = vpack.c.bf16 %v334_v40, %v333_v39  ;;  %v336_v50 = vld [vmem:[%s1728_s4 + $0x208] sm:$0xff] }
  0x29   : > { %1584 = vmatprep.subr.bf16.mxu1 %v1583_v21  ;;  %v318_v48 = vld [vmem:[%s1728_s4 + $0x178] sm:$0xff]  ;;  %v1561_v51 = vpack.c.bf16 %v286_v45, %v285_v44  ;;  %v1595_v53 = vpack.c.bf16 %v336_v50, %v335_v49  ;;  %v337_v54 = vld [vmem:[%s1728_s4 + $0x210] sm:$0xff]  ;;  %v191_v56 = vld [vmem:[%s1720_s26] sm:$0xff] }
  0x2a   : > { %v1593_v52 = vpack.c.bf16 %v318_v48, %v317_v46  ;;  %v338_v55 = vld [vmem:[%s1728_s4 + $0x218] sm:$0xff]  ;;  %v193_v57 = vld [vmem:[%s1720_s26 + $0x10] sm:$0xff]  ;;  %v199_v59 = vld [vmem:[%s1720_s26 + $0x40] sm:$0xff] }
  0x2b   : > { %1554 = vmatpush3.bf16.msra.mxu0 %v1553_v27  ;;  %v197_v58 = vld [vmem:[%s1720_s26 + $0x30] sm:$0xff]  ;;  %v1599_v60 = vpack.c.bf16 %v338_v55, %v337_v54  ;;  %v339_v61 = vld [vmem:[%s1728_s4 + $0x220] sm:$0xff]  ;;  %v340_v62 = vld [vmem:[%s1728_s4 + $0x228] sm:$0xff] }
  0x2c   : > { %1586 = vmatpush3.bf16.msra.mxu1 %v1585_v30  ;;  %1556 = vmatprep.subr.bf16.mxu0 %v1555_v31  ;;  %v196_v63 = vld [vmem:[%s1720_s26 + $0x28] sm:$0xff]  ;;  %v198_v0 = vld [vmem:[%s1720_s26 + $0x38] sm:$0xff]  ;;  %v1603_v3 = vpack.c.bf16 %v340_v62, %v339_v61  ;;  %v341_v4 = vld [vmem:[%s1728_s4 + $0x230] sm:$0xff] }
  0x2d   : > { %1588 = vmatprep.subr.bf16.mxu1 %v1587_v35  ;;  %v202_v1 = vld [vmem:[%s1720_s26 + $0x58] sm:$0xff]  ;;  %v204_v2 = vld [vmem:[%s1720_s26 + $0x68] sm:$0xff]  ;;  %v201_v5 = vld [vmem:[%s1720_s26 + $0x50] sm:$0xff] }
  0x2e   : > { %v342_v6 = vld [vmem:[%s1728_s4 + $0x238] sm:$0xff]  ;;  %v203_v7 = vld [vmem:[%s1720_s26 + $0x60] sm:$0xff]  ;;  %v209_v9 = vld [vmem:[%s1720_s26 + $0x90] sm:$0xff] }
  0x2f   : > { %1558 = vmatpush3.bf16.msra.mxu0 %v1557_v41  ;;  %v207_v8 = vld [vmem:[%s1720_s26 + $0x80] sm:$0xff]  ;;  %v1607_v10 = vpack.c.bf16 %v342_v6, %v341_v4  ;;  %v206_v11 = vld [vmem:[%s1720_s26 + $0x78] sm:$0xff]  ;;  %v208_v12 = vld [vmem:[%s1720_s26 + $0x88] sm:$0xff] }
  0x30   : > { %1590 = vmatpush3.bf16.msra.mxu1 %v1589_v42  ;;  %1560 = vmatprep.subr.bf16.mxu0 %v1559_v43  ;;  %v212_v13 = vld [vmem:[%s1720_s26 + $0xa8] sm:$0xff]  ;;  %v214_v14 = vld [vmem:[%s1720_s26 + $0xb8] sm:$0xff]  ;;  %v211_v15 = vld [vmem:[%s1720_s26 + $0xa0] sm:$0xff] }
  0x31   : > { %1592 = vmatprep.subr.bf16.mxu1 %v1591_v47  ;;  %v213_v16 = vld [vmem:[%s1720_s26 + $0xb0] sm:$0xff]  ;;  %v219_v18 = vld [vmem:[%s1720_s26 + $0xe0] sm:$0xff]  ;;  %v216_v19 = vld [vmem:[%s1720_s26 + $0xc8] sm:$0xff] }
  0x32   : > { %v217_v17 = vld [vmem:[%s1720_s26 + $0xd0] sm:$0xff]  ;;  %v218_v20 = vld [vmem:[%s1720_s26 + $0xd8] sm:$0xff]  ;;  %v224_v22 = vld [vmem:[%s1720_s26 + $0x108] sm:$0xff] }
  0x33   : > { %1562 = vmatpush3.bf16.msra.mxu0 %v1561_v51  ;;  %v222_v21 = vld [vmem:[%s1720_s26 + $0xf8] sm:$0xff]  ;;  %v221_v23 = vld [vmem:[%s1720_s26 + $0xf0] sm:$0xff]  ;;  %v223_v24 = vld [vmem:[%s1720_s26 + $0x100] sm:$0xff] }
  0x34   : > { %1594 = vmatpush3.bf16.msra.mxu1 %v1593_v52  ;;  %1596 = vmatprep.subr.bf16.mxu0 %v1595_v53  ;;  %v227_v25 = vld [vmem:[%s1720_s26 + $0x120] sm:$0xff]  ;;  %v229_v26 = vld [vmem:[%s1720_s26 + $0x130] sm:$0xff]  ;;  %v226_v27 = vld [vmem:[%s1720_s26 + $0x118] sm:$0xff] }
  0x35   : > { %1611 = vmatprep.subr.bf16.mxu1 %v1595_v53  ;;  %v228_v28 = vld [vmem:[%s1720_s26 + $0x128] sm:$0xff]  ;;  %v234_v30 = vld [vmem:[%s1720_s26 + $0x158] sm:$0xff]  ;;  %v231_v31 = vld [vmem:[%s1720_s26 + $0x140] sm:$0xff] }
  0x36   : > { %553 = vmatmul.mubr.f32.vlgmr.msra.gmra.mrb[0].mxu0 %v191_v56  ;;  %v232_v29 = vld [vmem:[%s1720_s26 + $0x148] sm:$0xff]  ;;  %v233_v32 = vld [vmem:[%s1720_s26 + $0x150] sm:$0xff]  ;;  %v239_v34 = vld [vmem:[%s1720_s26 + $0x180] sm:$0xff] }
  0x37   : > { %698 = vmatmul.mubr.f32.vlgmr.msra.gmra.mrb[0].mxu1 %v193_v57  ;;  %557 = vmatprep.mubr.f32.mxu0 %v197_v58  ;;  %v237_v33 = vld [vmem:[%s1720_s26 + $0x170] sm:$0xff]  ;;  %v236_v35 = vld [vmem:[%s1720_s26 + $0x168] sm:$0xff]  ;;  %v238_v36 = vld [vmem:[%s1720_s26 + $0x178] sm:$0xff] }
  0x38   : > { %1615 = vmatpush3.bf16.msra.mxu1 %v1595_v53  ;;  %702 = vmatprep.mubr.f32.mxu1 %v199_v59  ;;  %v242_v37 = vld [vmem:[%s1720_s26 + $0x198] sm:$0xff]  ;;  %v244_v38 = vld [vmem:[%s1720_s26 + $0x1a8] sm:$0xff]  ;;  %v241_v39 = vld [vmem:[%s1720_s26 + $0x190] sm:$0xff] }
  0x39   : > { %1598 = vmatpush3.bf16.msra.mxu0 %v1595_v53  ;;  %1612 = vmatprep.subr.bf16.mxu1 %v1599_v60  ;;  %v243_v40 = vld [vmem:[%s1720_s26 + $0x1a0] sm:$0xff]  ;;  %v249_v42 = vld [vmem:[%s1720_s26 + $0x1d0] sm:$0xff]  ;;  %v246_v43 = vld [vmem:[%s1720_s26 + $0x1b8] sm:$0xff] }
  0x3a   : > { %558 = vmatmul.mubr.f32.gmra.mrb[2].mxu0 %v196_v63  ;;  %1600 = vmatprep.subr.bf16.mxu0 %v1599_v60  ;;  %v247_v41 = vld [vmem:[%s1720_s26 + $0x1c0] sm:$0xff]  ;;  %v248_v44 = vld [vmem:[%s1720_s26 + $0x1c8] sm:$0xff]  ;;  %v254_v46 = vld [vmem:[%s1720_s26 + $0x1f8] sm:$0xff] }
  0x3b   : > { %703 = vmatmul.mubr.f32.gmra.mrb[2].mxu1 %v198_v0  ;;  %562 = vmatprep.mubr.f32.mxu0 %v202_v1  ;;  %v252_v45 = vld [vmem:[%s1720_s26 + $0x1e8] sm:$0xff]  ;;  %v251_v47 = vld [vmem:[%s1720_s26 + $0x1e0] sm:$0xff]  ;;  %v253_v48 = vld [vmem:[%s1720_s26 + $0x1f0] sm:$0xff] }
  0x3c   : > { %707 = vmatprep.mubr.f32.mxu1 %v204_v2  ;;  %1616 = vmatpush3.bf16.msra.mxu1 %v1599_v60  ;;  %v257_v49 = vld [vmem:[%s1720_s26 + $0x210] sm:$0xff]  ;;  %v259_v50 = vld [vmem:[%s1720_s26 + $0x220] sm:$0xff]  ;;  %v256_v51 = vld [vmem:[%s1720_s26 + $0x208] sm:$0xff] }
  0x3d   : > { %1602 = vmatpush3.bf16.msra.mxu0 %v1599_v60  ;;  %1613 = vmatprep.subr.bf16.mxu1 %v1603_v3  ;;  %v258_v52 = vld [vmem:[%s1720_s26 + $0x218] sm:$0xff]  ;;  %v264_v54 = vld [vmem:[%s1720_s26 + $0x248] sm:$0xff]  ;;  %v261_v55 = vld [vmem:[%s1720_s26 + $0x230] sm:$0xff] }
  0x3e   : > { %563 = vmatmul.mubr.f32.gmra.mrb[4].mxu0 %v201_v5  ;;  %1604 = vmatprep.subr.bf16.mxu0 %v1603_v3  ;;  %v262_v53 = vld [vmem:[%s1720_s26 + $0x238] sm:$0xff]  ;;  %v263_v56 = vld [vmem:[%s1720_s26 + $0x240] sm:$0xff]  ;;  %v269_v58 = vld [vmem:[%s1720_s26 + $0x270] sm:$0xff] }
  0x3f   : > { %708 = vmatmul.mubr.f32.gmra.mrb[4].mxu1 %v203_v7  ;;  %567 = vmatprep.mubr.f32.mxu0 %v207_v8  ;;  %v267_v57 = vld [vmem:[%s1720_s26 + $0x260] sm:$0xff]  ;;  %v266_v59 = vld [vmem:[%s1720_s26 + $0x258] sm:$0xff]  ;;  %v268_v60 = vld [vmem:[%s1720_s26 + $0x268] sm:$0xff] }
  0x40   : > { %712 = vmatprep.mubr.f32.mxu1 %v209_v9  ;;  %1617 = vmatpush3.bf16.msra.mxu1 %v1603_v3  ;;  %v195_v61 = vld [vmem:[%s1720_s26 + $0x20] sm:$0xff]  ;;  %v200_v63 = vld [vmem:[%s1720_s26 + $0x48] sm:$0xff]  ;;  %v205_v1 = vld [vmem:[%s1720_s26 + $0x70] sm:$0xff] }
  0x41   : > { %1606 = vmatpush3.bf16.msra.mxu0 %v1603_v3  ;;  %1614 = vmatprep.subr.bf16.mxu1 %v1607_v10  ;;  %v235_v62 = vld [vmem:[%s1720_s26 + $0x160] sm:$0xff]  ;;  %v240_v0 = vld [vmem:[%s1720_s26 + $0x188] sm:$0xff]  ;;  %v245_v2 = vld [vmem:[%s1720_s26 + $0x1b0] sm:$0xff] }
  0x42   : > { %568 = vmatmul.mubr.f32.gmra.mrb[6].mxu0 %v206_v11  ;;  %1608 = vmatprep.subr.bf16.mxu0 %v1607_v10  ;;  %v210_v3 = vld [vmem:[%s1720_s26 + $0x98] sm:$0xff]  ;;  %v215_v5 = vld [vmem:[%s1720_s26 + $0xc0] sm:$0xff]  ;;  %v220_v7 = vld [vmem:[%s1720_s26 + $0xe8] sm:$0xff] }
  0x43   : > { %713 = vmatmul.mubr.f32.gmra.mrb[6].mxu1 %v208_v12  ;;  %572 = vmatprep.mubr.f32.mxu0 %v212_v13  ;;  %v250_v4 = vld [vmem:[%s1720_s26 + $0x1d8] sm:$0xff]  ;;  %v255_v6 = vld [vmem:[%s1720_s26 + $0x200] sm:$0xff]  ;;  %v260_v8 = vld [vmem:[%s1720_s26 + $0x228] sm:$0xff] }
  0x44   : > { %717 = vmatprep.mubr.f32.mxu1 %v214_v14  ;;  %1618 = vmatpush3.bf16.msra.mxu1 %v1607_v10  ;;  %v225_v9 = vld [vmem:[%s1720_s26 + $0x110] sm:$0xff]  ;;  %v230_v11 = vld [vmem:[%s1720_s26 + $0x138] sm:$0xff] }
  0x45   : > { %1610 = vmatpush3.bf16.msra.mxu0 %v1607_v10  ;;  %v265_v10 = vld [vmem:[%s1720_s26 + $0x250] sm:$0xff]  ;;  %v270_v12 = vld [vmem:[%s1720_s26 + $0x278] sm:$0xff]  ;;  %s1306_s26 = sshll.u32 %s2192_s13, 7 }
  0x46   : > { %573 = vmatmul.mubr.f32.gmra.mrb[8].mxu0 %v211_v15  ;;  %s2096_s4 = scalar_lea.vmem %s2190_s3, %s1306_s26 }
  0x47   : > { %718 = vmatmul.mubr.f32.gmra.mrb[8].mxu1 %v213_v16  ;;  %577 = vmatprep.mubr.f32.mxu0 %v217_v17 }
  0x48   : > { %722 = vmatprep.mubr.f32.mxu1 %v219_v18 }
  0x4a   : > { %578 = vmatmul.mubr.f32.gmra.mrb[10].mxu0 %v216_v19 }
  0x4b   : > { %723 = vmatmul.mubr.f32.gmra.mrb[10].mxu1 %v218_v20  ;;  %582 = vmatprep.mubr.f32.mxu0 %v222_v21 }
  0x4c   : > { %727 = vmatprep.mubr.f32.mxu1 %v224_v22 }
  0x4e   : > { %583 = vmatmul.mubr.f32.gmra.mrb[12].mxu0 %v221_v23 }
  0x4f   : > { %728 = vmatmul.mubr.f32.gmra.mrb[12].mxu1 %v223_v24  ;;  %587 = vmatprep.mubr.f32.mxu0 %v227_v25 }
  0x50   : > { %732 = vmatprep.mubr.f32.mxu1 %v229_v26 }
  0x52   : > { %588 = vmatmul.mubr.f32.gmra.mrb[14].mxu0 %v226_v27 }
  0x53   : > { %733 = vmatmul.mubr.f32.gmra.mrb[14].mxu1 %v228_v28  ;;  %592 = vmatprep.mubr.f32.mxu0 %v232_v29 }
  0x54   : > { %737 = vmatprep.mubr.f32.mxu1 %v234_v30 }
  0x56   : > { %593 = vmatmul.mubr.f32.gmra.mrb[16].mxu0 %v231_v31 }
  0x57   : > { %738 = vmatmul.mubr.f32.gmra.mrb[16].mxu1 %v233_v32  ;;  %597 = vmatprep.mubr.f32.mxu0 %v237_v33 }
  0x58   : > { %742 = vmatprep.mubr.f32.mxu1 %v239_v34 }
  0x5a   : > { %598 = vmatmul.mubr.f32.gmra.mrb[18].mxu0 %v236_v35 }
  0x5b   : > { %743 = vmatmul.mubr.f32.gmra.mrb[18].mxu1 %v238_v36  ;;  %602 = vmatprep.mubr.f32.mxu0 %v242_v37 }
  0x5c   : > { %747 = vmatprep.mubr.f32.mxu1 %v244_v38 }
  0x5e   : > { %603 = vmatmul.mubr.f32.gmra.mrb[20].mxu0 %v241_v39 }
  0x5f   : > { %748 = vmatmul.mubr.f32.gmra.mrb[20].mxu1 %v243_v40  ;;  %607 = vmatprep.mubr.f32.mxu0 %v247_v41 }
  0x60   : > { %752 = vmatprep.mubr.f32.mxu1 %v249_v42 }
  0x62   : > { %608 = vmatmul.mubr.f32.gmra.mrb[22].mxu0 %v246_v43 }
  0x63   : > { %753 = vmatmul.mubr.f32.gmra.mrb[22].mxu1 %v248_v44  ;;  %612 = vmatprep.mubr.f32.mxu0 %v252_v45 }
  0x64   : > { %757 = vmatprep.mubr.f32.mxu1 %v254_v46 }
  0x66   : > { %613 = vmatmul.mubr.f32.gmra.mrb[24].mxu0 %v251_v47 }
  0x67   : > { %758 = vmatmul.mubr.f32.gmra.mrb[24].mxu1 %v253_v48  ;;  %617 = vmatprep.mubr.f32.mxu0 %v257_v49 }
  0x68   : > { %762 = vmatprep.mubr.f32.mxu1 %v259_v50 }
  0x6a   : > { %618 = vmatmul.mubr.f32.gmra.mrb[26].mxu0 %v256_v51 }
  0x6b   : > { %763 = vmatmul.mubr.f32.gmra.mrb[26].mxu1 %v258_v52  ;;  %622 = vmatprep.mubr.f32.mxu0 %v262_v53 }
  0x6c   : > { %767 = vmatprep.mubr.f32.mxu1 %v264_v54 }
  0x6e   : > { %623 = vmatmul.mubr.f32.gmra.mrb[28].mxu0 %v261_v55 }
  0x6f   : > { %768 = vmatmul.mubr.f32.gmra.mrb[28].mxu1 %v263_v56  ;;  %627 = vmatprep.mubr.f32.mxu0 %v267_v57 }
  0x70   : > { %772 = vmatprep.mubr.f32.mxu1 %v269_v58 }
  0x72   : > { %628 = vmatmul.mubr.f32.gmra.mrb[30].mxu0 %v266_v59 }
  0x73   : > { %773 = vmatmul.mubr.f32.gmra.mrb[30].mxu1 %v268_v60  ;;  %1507 = vmatprep.mubr.msk.f32.mxu0 %vm439_vm0, %v195_v61 }
  0x74   : > { %1519 = vmatprep.mubr.msk.f32.mxu1 %vm439_vm0, %v235_v62 }
  0x76   : > { %1508 = vmatmul.mubr.msk.f32.vlgmr.msra.gmra.mrb[32].mxu0 %vm439_vm0, %v200_v63 }
  0x77   : > { %1520 = vmatmul.mubr.msk.f32.vlgmr.msra.gmra.mrb[32].mxu1 %vm439_vm0, %v240_v0  ;;  %1510 = vmatprep.mubr.msk.f32.mxu0 %vm439_vm0, %v205_v1 }
  0x78   : > { %1522 = vmatprep.mubr.msk.f32.mxu1 %vm439_vm0, %v245_v2 }
  0x7a   : > { %1511 = vmatmul.mubr.msk.f32.gmra.mrb[34].mxu0 %vm439_vm0, %v210_v3 }
  0x7b   : > { %1523 = vmatmul.mubr.msk.f32.gmra.mrb[34].mxu1 %vm439_vm0, %v250_v4  ;;  %1513 = vmatprep.mubr.msk.f32.mxu0 %vm439_vm0, %v215_v5 }
  0x7c   : > { %1525 = vmatprep.mubr.msk.f32.mxu1 %vm439_vm0, %v255_v6 }
  0x7e   : > { %1514 = vmatmul.mubr.msk.f32.gmra.mrb[36].mxu0 %vm439_vm0, %v220_v7 }
  0x7f   : > { %1526 = vmatmul.mubr.msk.f32.gmra.mrb[36].mxu1 %vm439_vm0, %v260_v8  ;;  %1516 = vmatprep.mubr.msk.f32.mxu0 %vm439_vm0, %v225_v9 }
  0x80   : > { %1528 = vmatprep.mubr.msk.f32.mxu1 %vm439_vm0, %v265_v10 }
  0x82   : > { %1517 = vmatmul.mubr.msk.f32.gmra.mrb[38].mxu0 %vm439_vm0, %v230_v11 }
  0x83   : > { %1529 = vmatmul.mubr.msk.f32.gmra.mrb[38].mxu1 %vm439_vm0, %v270_v12 }
  0x86   : > { %v362_v13 = vpop.permute.xlu0 %361  ;;  %v372_v27 = vpop.permute.xlu1 %371 }
  0x8a   : > { %v367_v22 = vpop.permute.xlu0 %366  ;;  %v377_v40 = vpop.permute.xlu1 %376 }
  0x8e   : > { %v382_v49 = vpop.permute.xlu0 %381  ;;  %v387_v58 = vpop.permute.xlu1 %386 }
  0x92   : > { %v392_v3 = vpop.permute.xlu0 %391 }
 0x109   : > { %v1339_v14 = vpop.f32.mrb[0].mxu0 }
 0x10a   : > { %v1419_v15 = vpop.f32.mrb[0].mxu1  ;;  %v1340_v16 = vpop.f32.mrb[1].mxu0 }
 0x10b   : > { %v1341_v17 = vadd.f32 %v1340_v16, %v1339_v14  ;;  %v1420_v18 = vpop.f32.mrb[1].mxu1 }
 0x10c   : > { %v1421_v19 = vadd.f32 %v1420_v18, %v1419_v15 }
 0x10d   : > { %v555_v20 = vadd.f32 %v1341_v17, %v362_v13  ;;  %v1342_v21 = vpop.f32.mrb[2].mxu0  ;;  %v397_v17 = vpop.permute.xlu1 %396 }
 0x10e   : > { %v1422_v23 = vpop.f32.mrb[2].mxu1  ;;  %v1343_v24 = vpop.f32.mrb[3].mxu0 }
 0x10f   : > { %v1344_v25 = vadd.f32 %v1343_v24, %v1342_v21  ;;  %v1423_v26 = vpop.f32.mrb[3].mxu1  ;;  %v1931_v28 = vadd.f32 %v1421_v19, %v555_v20  ;;  %v402_v21 = vpop.permute.xlu0 %401 }
 0x110   : > { %v1424_v29 = vadd.f32 %v1423_v26, %v1422_v23 }
 0x111   : > { %v560_v30 = vadd.f32 %v1344_v25, %v367_v22  ;;  %v1345_v31 = vpop.f32.mrb[4].mxu0 }
 0x112   : > { %v1425_v32 = vpop.f32.mrb[4].mxu1  ;;  %v1346_v33 = vpop.f32.mrb[5].mxu0 }
 0x113   : > { %v1347_v34 = vadd.f32 %v1346_v33, %v1345_v31  ;;  %v1426_v35 = vpop.f32.mrb[5].mxu1  ;;  %v1933_v36 = vadd.f32 %v1424_v29, %v560_v30 }
 0x114   : > { %v1427_v37 = vadd.f32 %v1426_v35, %v1425_v32 }
 0x115   : > { %v565_v38 = vadd.f32 %v1347_v34, %v372_v27  ;;  %v1348_v39 = vpop.f32.mrb[6].mxu0 }
 0x116   : > { %v1428_v41 = vpop.f32.mrb[6].mxu1  ;;  %v1349_v42 = vpop.f32.mrb[7].mxu0 }
 0x117   : > { %v1350_v43 = vadd.f32 %v1349_v42, %v1348_v39  ;;  %v1429_v44 = vpop.f32.mrb[7].mxu1  ;;  %v1935_v45 = vadd.f32 %v1427_v37, %v565_v38  ;;  %v407_v37 = vpop.permute.xlu1 %406 }
 0x118   : > { %v1430_v46 = vadd.f32 %v1429_v44, %v1428_v41  ;;  %v412_v41 = vpop.permute.xlu0 %411 }
 0x119   : > { %v570_v47 = vadd.f32 %v1350_v43, %v377_v40  ;;  %v1351_v48 = vpop.f32.mrb[8].mxu0 }
 0x11a   : > { %v1431_v50 = vpop.f32.mrb[8].mxu1  ;;  %v1352_v51 = vpop.f32.mrb[9].mxu0 }
 0x11b   : > { %v1353_v52 = vadd.f32 %v1352_v51, %v1351_v48  ;;  %v1432_v53 = vpop.f32.mrb[9].mxu1  ;;  %v1937_v54 = vadd.f32 %v1430_v46, %v570_v47 }
 0x11c   : > { %v1433_v55 = vadd.f32 %v1432_v53, %v1431_v50 }
 0x11d   : > { %v575_v56 = vadd.f32 %v1353_v52, %v382_v49  ;;  %v1354_v57 = vpop.f32.mrb[10].mxu0 }
 0x11e   : > { %v1434_v59 = vpop.f32.mrb[10].mxu1  ;;  %v1355_v60 = vpop.f32.mrb[11].mxu0 }
 0x11f   : > { %v1356_v61 = vadd.f32 %v1355_v60, %v1354_v57  ;;  %v1435_v62 = vpop.f32.mrb[11].mxu1  ;;  %v1939_v63 = vadd.f32 %v1433_v55, %v575_v56  ;;  %v417_v57 = vpop.permute.xlu1 %416 }
 0x120   : > { %v1436_v0 = vadd.f32 %v1435_v62, %v1434_v59 }
 0x121   : > { %v580_v1 = vadd.f32 %v1356_v61, %v387_v58  ;;  %v1357_v2 = vpop.f32.mrb[12].mxu0  ;;  %v422_v61 = vpop.permute.xlu0 %421 }
 0x122   : > { %v1437_v4 = vpop.f32.mrb[12].mxu1  ;;  %v1358_v5 = vpop.f32.mrb[13].mxu0 }
 0x123   : > { %v1359_v6 = vadd.f32 %v1358_v5, %v1357_v2  ;;  %v1438_v7 = vpop.f32.mrb[13].mxu1  ;;  %v1941_v8 = vadd.f32 %v1436_v0, %v580_v1 }
 0x124   : > { %v1439_v9 = vadd.f32 %v1438_v7, %v1437_v4 }
 0x125   : > { %v585_v10 = vadd.f32 %v1359_v6, %v392_v3  ;;  %v1360_v11 = vpop.f32.mrb[14].mxu0 }
 0x126   : > { %v1440_v12 = vpop.f32.mrb[14].mxu1  ;;  %v1361_v13 = vpop.f32.mrb[15].mxu0 }
 0x127   : > { %v1362_v14 = vadd.f32 %v1361_v13, %v1360_v11  ;;  %v1441_v15 = vpop.f32.mrb[15].mxu1  ;;  %v1943_v16 = vadd.f32 %v1439_v9, %v585_v10  ;;  %v427_v13 = vpop.permute.xlu1 %426 }
 0x128   : > { %v1442_v18 = vadd.f32 %v1441_v15, %v1440_v12 }
 0x129   : > { %v590_v19 = vadd.f32 %v1362_v14, %v397_v17  ;;  %v1363_v20 = vpop.f32.mrb[16].mxu0 }
 0x12a   : > { %v1443_v22 = vpop.f32.mrb[16].mxu1  ;;  %v1364_v23 = vpop.f32.mrb[17].mxu0 }
 0x12b   : > { %v1365_v24 = vadd.f32 %v1364_v23, %v1363_v20  ;;  %v1444_v25 = vpop.f32.mrb[17].mxu1  ;;  %v1945_v26 = vadd.f32 %v1442_v18, %v590_v19  ;;  %v432_v23 = vpop.permute.xlu0 %431 }
 0x12c   : > { %v1445_v27 = vadd.f32 %v1444_v25, %v1443_v22 }
 0x12d   : > { %v595_v29 = vadd.f32 %v1365_v24, %v402_v21  ;;  %v1366_v30 = vpop.f32.mrb[18].mxu0 }
 0x12e   : > { %v1446_v31 = vpop.f32.mrb[18].mxu1  ;;  %v1367_v32 = vpop.f32.mrb[19].mxu0 }
 0x12f   : > { %v1368_v33 = vadd.f32 %v1367_v32, %v1366_v30  ;;  %v1447_v34 = vpop.f32.mrb[19].mxu1  ;;  %v1947_v35 = vadd.f32 %v1445_v27, %v595_v29 }
 0x130   : > { %v1448_v38 = vadd.f32 %v1447_v34, %v1446_v31  ;;  %v437_v34 = vpop.permute.xlu1 %436 }
 0x131   : > { %v600_v39 = vadd.f32 %v1368_v33, %v407_v37  ;;  %v1369_v40 = vpop.f32.mrb[20].mxu0 }
 0x132   : > { %v1449_v42 = vpop.f32.mrb[20].mxu1  ;;  %v1370_v43 = vpop.f32.mrb[21].mxu0 }
 0x133   : > { %v1371_v44 = vadd.f32 %v1370_v43, %v1369_v40  ;;  %v1450_v46 = vpop.f32.mrb[21].mxu1  ;;  %v745_v47 = vadd.f32 %v1448_v38, %v600_v39 }
 0x134   : > { %v1451_v48 = vadd.f32 %v1450_v46, %v1449_v42 }
 0x135   : > { %v605_v49 = vadd.f32 %v1371_v44, %v412_v41  ;;  %v1372_v50 = vpop.f32.mrb[22].mxu0 }
 0x136   : > { %v1452_v51 = vpop.f32.mrb[22].mxu1  ;;  %v1373_v52 = vpop.f32.mrb[23].mxu0 }
 0x137   : > { %v1374_v53 = vadd.f32 %v1373_v52, %v1372_v50  ;;  %v1453_v55 = vpop.f32.mrb[23].mxu1  ;;  %v750_v56 = vadd.f32 %v1451_v48, %v605_v49 }
 0x138   : > { %v1454_v58 = vadd.f32 %v1453_v55, %v1452_v51 }
 0x139   : > { %v610_v59 = vadd.f32 %v1374_v53, %v417_v57  ;;  %v1375_v60 = vpop.f32.mrb[24].mxu0 }
 0x13a   : > { %v1455_v62 = vpop.f32.mrb[24].mxu1  ;;  %v1376_v0 = vpop.f32.mrb[25].mxu0 }
 0x13b   : > { %v1377_v1 = vadd.f32 %v1376_v0, %v1375_v60  ;;  %v1456_v2 = vpop.f32.mrb[25].mxu1  ;;  %v755_v3 = vadd.f32 %v1454_v58, %v610_v59 }
 0x13c   : > { %v1457_v4 = vadd.f32 %v1456_v2, %v1455_v62 }
 0x13d   : > { %v615_v5 = vadd.f32 %v1377_v1, %v422_v61  ;;  %v1378_v6 = vpop.f32.mrb[26].mxu0 }
 0x13e   : > { %v1458_v7 = vpop.f32.mrb[26].mxu1  ;;  %v1379_v9 = vpop.f32.mrb[27].mxu0 }
 0x13f   : > { %v1380_v10 = vadd.f32 %v1379_v9, %v1378_v6  ;;  %v1459_v11 = vpop.f32.mrb[27].mxu1  ;;  %v760_v12 = vadd.f32 %v1457_v4, %v615_v5 }
 0x140   : > { %v1460_v14 = vadd.f32 %v1459_v11, %v1458_v7 }
 0x141   : > { %v620_v15 = vadd.f32 %v1380_v10, %v427_v13  ;;  %v1381_v17 = vpop.f32.mrb[28].mxu0 }
 0x142   : > { %v1461_v18 = vpop.f32.mrb[28].mxu1  ;;  %v1382_v19 = vpop.f32.mrb[29].mxu0 }
 0x143   : > { %v1383_v20 = vadd.f32 %v1382_v19, %v1381_v17  ;;  %v1462_v21 = vpop.f32.mrb[29].mxu1  ;;  %v765_v22 = vadd.f32 %v1460_v14, %v620_v15 }
 0x144   : > { %v1463_v24 = vadd.f32 %v1462_v21, %v1461_v18 }
 0x145   : > { %v625_v25 = vadd.f32 %v1383_v20, %v432_v23  ;;  %v1384_v27 = vpop.f32.mrb[30].mxu0 }
 0x146   : > { %v1464_v29 = vpop.f32.mrb[30].mxu1  ;;  %v1385_v30 = vpop.f32.mrb[31].mxu0 }
 0x147   : > { %v1386_v31 = vadd.f32 %v1385_v30, %v1384_v27  ;;  %v1465_v32 = vpop.f32.mrb[31].mxu1  ;;  %v770_v33 = vadd.f32 %v1463_v24, %v625_v25 }
 0x148   : > { %v1466_v37 = vadd.f32 %v1465_v32, %v1464_v29 }
 0x149   : > { %v630_v38 = vadd.f32 %v1386_v31, %v437_v34  ;;  %v1509_v39 = vpop.f32.mrb[32].mxu0 }
 0x14a   : > { %v1950_v40 = vadd.f32 %v1509_v39, %v1933_v36  ;;  %v1521_v41 = vpop.f32.mrb[32].mxu1  ;;  %v844_v42 = vpop.f32.mrb[33].mxu0 }
 0x14b   : > { %v1952_v43 = vadd.f32 %v1521_v41, %v745_v47  ;;  %v1955_v44 = vadd.f32 %v844_v42, %v1931_v28  ;;  %v884_v46 = vpop.f32.mrb[33].mxu1  ;;  %v775_v48 = vadd.f32 %v1466_v37, %v630_v38 }
 0x14c   : > { %v1958_v49 = vadd.f32 %v884_v46, %v1947_v35  ;;  %v927_v50 = vsel %vm923_vm1, %v1950_v40, 0.0  ;;  %v989_v61 = vmul.f32 %v1950_v40, %v1950_v40 }
 0x14d   : > { %v1512_v51 = vpop.f32.mrb[34].mxu0  ;;  %v951_v36 = vsel %vm923_vm1, %v1952_v43, 0.0  ;;  %928 = vadd.xlane.f32.xlu1 %v927_v50  ;;  %v988_v59 = vmul.f32 %v1955_v44, %v1955_v44  ;;  %v997_v7 = vmul.f32 %v1952_v43, %v1952_v43 }
 0x14e   : > { %v1965_v52 = vadd.f32 %v1512_v51, %v1937_v54  ;;  %v1524_v47 = vpop.f32.mrb[34].mxu1  ;;  %952 = vadd.xlane.f32.xlu0 %v951_v36  ;;  %v854_v28 = vpop.f32.mrb[35].mxu0  ;;  %v948_v58 = vsel %vm923_vm1, %v1958_v49, 0.0  ;;  %v924_v54 = vsel %vm923_vm1, %v1955_v44, 0.0  ;;  %v996_v5 = vmul.f32 %v1958_v49, %v1958_v49 }
 0x14f   : > { %v1967_v53 = vadd.f32 %v1524_v47, %v755_v3  ;;  %v1970_v55 = vadd.f32 %v854_v28, %v1935_v45  ;;  %v894_v35 = vpop.f32.mrb[35].mxu1  ;;  %v1004_v4 = vsel %vm923_vm1, %v988_v59, 0.0  ;;  %v1031_v17 = vsel %vm923_vm1, %v997_v7, 0.0 }
 0x150   : > { %v1972_v57 = vadd.f32 %v894_v35, %v750_v56  ;;  %v1028_v15 = vsel %vm923_vm1, %v996_v5, 0.0  ;;  %v991_v24 = vmul.f32 %v1965_v52, %v1965_v52 }
 0x151   : > { %v1515_v60 = vpop.f32.mrb[36].mxu0  ;;  %949 = vadd.xlane.f32.xlu1 %v948_v58  ;;  %v990_v18 = vmul.f32 %v1970_v55, %v1970_v55  ;;  %v957_v21 = vsel %vm923_vm1, %v1967_v53, 0.0  ;;  %v930_v23 = vsel %vm923_vm1, %v1970_v55, 0.0  ;;  %v999_v29 = vmul.f32 %v1967_v53, %v1967_v53 }
 0x152   : > { %v1983_v45 = vadd.f32 %v1515_v60, %v1941_v8  ;;  %v1527_v62 = vpop.f32.mrb[36].mxu1  ;;  %925 = vadd.xlane.f32.xlu0 %v924_v54  ;;  %v864_v56 = vpop.f32.mrb[37].mxu0  ;;  %v1007_v8 = vsel %vm923_vm1, %v989_v61, 0.0  ;;  %v998_v20 = vmul.f32 %v1972_v57, %v1972_v57  ;;  %v1013_v27 = vsel %vm923_vm1, %v991_v24, 0.0 }
 0x153   : > { %v1985_v0 = vadd.f32 %v1527_v62, %v765_v22  ;;  %v1988_v1 = vadd.f32 %v864_v56, %v1939_v63  ;;  %v904_v2 = vpop.f32.mrb[37].mxu1  ;;  %v1010_v19 = vsel %vm923_vm1, %v990_v18, 0.0  ;;  %v1037_v32 = vsel %vm923_vm1, %v999_v29, 0.0 }
 0x154   : > { %v1990_v3 = vadd.f32 %v904_v2, %v760_v12  ;;  %v1034_v22 = vsel %vm923_vm1, %v998_v20, 0.0  ;;  %v939_v37 = vsel %vm923_vm1, %v1983_v45, 0.0  ;;  %v993_v41 = vmul.f32 %v1983_v45, %v1983_v45 }
 0x155   : > { %v1518_v6 = vpop.f32.mrb[38].mxu0  ;;  %1005 = vadd.xlane.f32.xlu1 %v1004_v4  ;;  %v936_v25 = vsel %vm923_vm1, %v1988_v1, 0.0  ;;  %v992_v31 = vmul.f32 %v1988_v1, %v1988_v1  ;;  %v963_v39 = vsel %vm923_vm1, %v1985_v0, 0.0 }
 0x156   : > { %v1999_v9 = vadd.f32 %v1518_v6, %v1945_v26  ;;  %v1530_v63 = vpop.f32.mrb[38].mxu1  ;;  %1008 = vadd.xlane.f32.xlu0 %v1007_v8  ;;  %v874_v10 = vpop.f32.mrb[39].mxu0  ;;  %v954_v26 = vsel %vm923_vm1, %v1972_v57, 0.0  ;;  %v960_v30 = vsel %vm923_vm1, %v1990_v3, 0.0  ;;  %v1000_v34 = vmul.f32 %v1990_v3, %v1990_v3 }
 0x157   : > { %v2001_v11 = vadd.f32 %v1530_v63, %v775_v48  ;;  %v2004_v12 = vadd.f32 %v874_v10, %v1943_v16  ;;  %v914_v13 = vpop.f32.mrb[39].mxu1  ;;  %v933_v16 = vsel %vm923_vm1, %v1965_v52, 0.0  ;;  %v1019_v46 = vsel %vm923_vm1, %v993_v41, 0.0 }
 0x158   : > { %v2006_v14 = vadd.f32 %v914_v13, %v770_v33  ;;  %v1016_v33 = vsel %vm923_vm1, %v992_v31, 0.0  ;;  %v1040_v38 = vsel %vm923_vm1, %v1000_v34, 0.0  ;;  %v1001_v48 = vmul.f32 %v1985_v0, %v1985_v0 }
 0x159   : > { %1029 = vadd.xlane.f32.xlu1 %v1028_v15  ;;  %v942_v42 = vsel %vm923_vm1, %v2004_v12, 0.0  ;;  %v994_v51 = vmul.f32 %v2004_v12, %v2004_v12  ;;  %v945_v35 = vsel %vm923_vm1, %v1999_v9, 0.0  ;;  %v969_v59 = vsel %vm923_vm1, %v2001_v11, 0.0 }
 0x15a   : > { %1032 = vadd.xlane.f32.xlu0 %v1031_v17  ;;  %v966_v50 = vsel %vm923_vm1, %v2006_v14, 0.0  ;;  %v1043_v36 = vsel %vm923_vm1, %v1001_v48, 0.0  ;;  %v1002_v28 = vmul.f32 %v2006_v14, %v2006_v14  ;;  %v995_v60 = vmul.f32 %v1999_v9, %v1999_v9 }
 0x15b   : > { %v1022_v47 = vsel %vm923_vm1, %v994_v51, 0.0  ;;  %v1003_v61 = vmul.f32 %v2001_v11, %v2001_v11 }
 0x15c   : > { %v1046_v58 = vsel %vm923_vm1, %v1002_v28, 0.0  ;;  %v1025_v54 = vsel %vm923_vm1, %v995_v60, 0.0 }
 0x15d   : > { %955 = vadd.xlane.f32.xlu1 %v954_v26  ;;  %v1049_v62 = vsel %vm923_vm1, %v1003_v61, 0.0 }
 0x15e   : > { %934 = vadd.xlane.f32.xlu0 %v933_v16 }
 0x161   : > { %1011 = vadd.xlane.f32.xlu1 %v1010_v19 }
 0x162   : > { %958 = vadd.xlane.f32.xlu0 %v957_v21 }
 0x165   : > { %1035 = vadd.xlane.f32.xlu1 %v1034_v22 }
 0x166   : > { %931 = vadd.xlane.f32.xlu0 %v930_v23 }
 0x169   : > { %937 = vadd.xlane.f32.xlu1 %v936_v25 }
 0x16a   : > { %1014 = vadd.xlane.f32.xlu0 %v1013_v27 }
 0x16d   : > { %961 = vadd.xlane.f32.xlu1 %v960_v30 }
 0x16e   : > { %1038 = vadd.xlane.f32.xlu0 %v1037_v32 }
 0x171   : > { %1017 = vadd.xlane.f32.xlu1 %v1016_v33 }
 0x172   : > { %940 = vadd.xlane.f32.xlu0 %v939_v37 }
 0x175   : > { %1041 = vadd.xlane.f32.xlu1 %v1040_v38 }
 0x176   : > { %964 = vadd.xlane.f32.xlu0 %v963_v39 }
 0x179   : > { %943 = vadd.xlane.f32.xlu1 %v942_v42 }
 0x17a   : > { %1020 = vadd.xlane.f32.xlu0 %v1019_v46 }
 0x17d   : > { %967 = vadd.xlane.f32.xlu1 %v966_v50 }
 0x17e   : > { %1044 = vadd.xlane.f32.xlu0 %v1043_v36 }
 0x181   : > { %1023 = vadd.xlane.f32.xlu1 %v1022_v47 }
 0x182   : > { %946 = vadd.xlane.f32.xlu0 %v945_v35 }
 0x185   : > { %1047 = vadd.xlane.f32.xlu1 %v1046_v58 }
 0x186   : > { %970 = vadd.xlane.f32.xlu0 %v969_v59 }
 0x18a   : > { %1026 = vadd.xlane.f32.xlu0 %v1025_v54 }
 0x18e   : > { %1050 = vadd.xlane.f32.xlu0 %v1049_v62 }
 0x1da   : > { %v929_v56 = vpop.xlane.xlu1 %928 }
 0x1db   : > { %v953_v2 = vpop.xlane.xlu0 %952  ;;  %v973_v6 = vmul.f32 0.0625, %v929_v56 }
 0x1dc   : > { %v2072_v17 = vmul.f32 0.0625, %v953_v2 }
 0x1dd   : > { %v1069_v26 = vmul.f32 %v973_v6, %v973_v6  ;;  %v1117_v54 = vsub.f32 %v1950_v40, %v973_v6 }
 0x1de   : > { %v950_v4 = vpop.xlane.xlu1 %949  ;;  %v1077_v25 = vmul.f32 %v2072_v17, %v2072_v17 }
 0x1df   : > { %v926_v5 = vpop.xlane.xlu0 %925  ;;  %v2070_v63 = vmul.f32 0.0625, %v950_v4 }
 0x1e0   : > { %v972_v8 = vmul.f32 0.0625, %v926_v5 }
 0x1e1   : > { %v1076_v21 = vmul.f32 %v2070_v63, %v2070_v63 }
 0x1e2   : > { %v1006_v7 = vpop.xlane.xlu1 %1005  ;;  %v1068_v10 = vmul.f32 %v972_v8, %v972_v8  ;;  %v1116_v35 = vsub.f32 %v1955_v44, %v972_v8 }
 0x1e3   : > { %v1052_v13 = vmul.f32 0.0625, %v1006_v7  ;;  %v1009_v15 = vpop.xlane.xlu0 %1008  ;;  %v1124_v7 = vsub.f32 %v1958_v49, %v2070_v63  ;;  %v1125_v49 = vsub.f32 %v1952_v43, %v2072_v17 }
 0x1e4   : > { %v1053_v18 = vmul.f32 0.0625, %v1009_v15 }
 0x1e5   : > { %v1084_v16 = vsub.f32 %v1052_v13, %v1068_v10 }
 0x1e6   : > { %v1085_v19 = vsub.f32 %v1053_v18, %v1069_v26  ;;  %v1030_v20 = vpop.xlane.xlu1 %1029 }
 0x1e7   : > { %v1100_v22 = vmax.f32 %v1084_v16, 0.0  ;;  %v1060_v23 = vmul.f32 0.0625, %v1030_v20  ;;  %v1033_v24 = vpop.xlane.xlu0 %1032 }
 0x1e8   : > { %v1101_v27 = vmax.f32 %v1085_v19, 0.0  ;;  %v1061_v29 = vmul.f32 0.0625, %v1033_v24 }
 0x1e9   : > { %v1132_v30 = vadd.f32 1e-05, %v1100_v22  ;;  %v1092_v31 = vsub.f32 %v1060_v23, %v1076_v21 }
 0x1ea   : > { %v1133_v32 = vadd.f32 1e-05, %v1101_v27  ;;  %v1093_v33 = vsub.f32 %v1061_v29, %v1077_v25  ;;  %v956_v34 = vpop.xlane.xlu1 %955 }
 0x1eb   : > { %1632 = vrsqrt.f32 %v1132_v30  ;;  %v1108_v37 = vmax.f32 %v1092_v31, 0.0  ;;  %v935_v38 = vpop.xlane.xlu0 %934  ;;  %v2078_v48 = vmul.f32 0.0625, %v956_v34 }
 0x1ec   : > { %1634 = vrsqrt.f32 %v1133_v32  ;;  %v1109_v39 = vmax.f32 %v1093_v33, 0.0  ;;  %v2084_v58 = vmul.f32 0.0625, %v935_v38 }
 0x1ed   : > { %v1140_v41 = vadd.f32 1e-05, %v1108_v37  ;;  %v1078_v36 = vmul.f32 %v2078_v48, %v2078_v48 }
 0x1ee   : > { %v1141_v42 = vadd.f32 1e-05, %v1109_v39  ;;  %v1012_v46 = vpop.xlane.xlu1 %1011  ;;  %v1071_v13 = vmul.f32 %v2084_v58, %v2084_v58 }
 0x1ef   : > { %1636 = vrsqrt.f32 %v1140_v41  ;;  %v959_v50 = vpop.xlane.xlu0 %958  ;;  %v1054_v2 = vmul.f32 0.0625, %v1012_v46 }
 0x1f0   : > { %1638 = vrsqrt.f32 %v1141_v42  ;;  %v2098_v8 = vmul.f32 0.0625, %v959_v50 }
 0x1f2   : > { %v1036_v51 = vpop.xlane.xlu1 %1035  ;;  %v1079_v25 = vmul.f32 %v2098_v8, %v2098_v8 }
 0x1f3   : > { %v1062_v47 = vmul.f32 0.0625, %v1036_v51  ;;  %v932_v28 = vpop.xlane.xlu0 %931 }
 0x1f4   : > { %v2086_v59 = vmul.f32 0.0625, %v932_v28 }
 0x1f5   : > { %v1633_v60 = vpop.eup %1632  ;;  %v1094_v61 = vsub.f32 %v1062_v47, %v1078_v36 }
 0x1f6   : > { %v1635_v62 = vpop.eup %1634  ;;  %v1164_v56 = vmul.f32 %v1633_v60, %v1116_v35  ;;  %v1070_v4 = vmul.f32 %v2086_v59, %v2086_v59  ;;  %v938_v5 = vpop.xlane.xlu1 %937 }
 0x1f7   : > { %v1165_v44 = vmul.f32 %v1635_v62, %v1117_v54  ;;  %v1110_v40 = vmax.f32 %v1094_v61, 0.0  ;;  %v1015_v6 = vpop.xlane.xlu0 %1014  ;;  %v2110_v27 = vmul.f32 0.0625, %v938_v5  ;;  %v1126_v54 = vsub.f32 %v1972_v57, %v2078_v48 }
 0x1f8   : > { %v1180_v10 = vmax.f32 %v1164_v56, 0.0  ;;  %v1086_v15 = vsub.f32 %v1054_v2, %v1070_v4  ;;  %v1055_v26 = vmul.f32 0.0625, %v1015_v6 }
 0x1f9   : > { %v1637_v18 = vpop.eup %1636  ;;  %v1181_v63 = vmax.f32 %v1165_v44, 0.0  ;;  %v1142_v16 = vadd.f32 1e-05, %v1110_v40  ;;  %v1072_v38 = vmul.f32 %v2110_v27, %v2110_v27 }
 0x1fa   : > { %v1639_v19 = vpop.eup %1638  ;;  %1196 = vst.msk [vmem:[%s2096_s4] sm:$0xff] %vm923_vm1, %v1180_v10  ;;  %v1172_v20 = vmul.f32 %v1637_v18, %v1124_v7  ;;  %v1102_v21 = vmax.f32 %v1086_v15, 0.0  ;;  %v1087_v22 = vsub.f32 %v1055_v26, %v1071_v13  ;;  %v962_v23 = vpop.xlane.xlu1 %961  ;;  %v1118_v7 = vsub.f32 %v1970_v55, %v2086_v59 }
 0x1fb   : > { %1197 = vst.msk [vmem:[%s2096_s4 + $0x8] sm:$0xff] %vm923_vm1, %v1181_v63  ;;  %v1173_v24 = vmul.f32 %v1639_v19, %v1125_v49  ;;  %1640 = vrsqrt.f32 %v1142_v16  ;;  %v1039_v43 = vpop.xlane.xlu0 %1038  ;;  %v2118_v39 = vmul.f32 0.0625, %v962_v23  ;;  %v1119_v15 = vsub.f32 %v1965_v52, %v2084_v58 }
 0x1fc   : > { %v1188_v17 = vmax.f32 %v1172_v20, 0.0  ;;  %v1134_v29 = vadd.f32 1e-05, %v1102_v21  ;;  %v1103_v30 = vmax.f32 %v1087_v22, 0.0  ;;  %v1063_v31 = vmul.f32 0.0625, %v1039_v43 }
 0x1fd   : > { %v1189_v32 = vmax.f32 %v1173_v24, 0.0  ;;  %v1080_v47 = vmul.f32 %v2118_v39, %v2118_v39  ;;  %v1127_v58 = vsub.f32 %v1967_v53, %v2098_v8  ;;  %v1120_v53 = vsub.f32 %v1988_v1, %v2110_v27 }
 0x1fe   : > { %1204 = vst.msk [vmem:[%s2096_s4 + $0x40] sm:$0xff] %vm923_vm1, %v1188_v17  ;;  %1642 = vrsqrt.f32 %v1134_v29  ;;  %v1135_v33 = vadd.f32 1e-05, %v1103_v30  ;;  %v1095_v34 = vsub.f32 %v1063_v31, %v1079_v25  ;;  %v1018_v37 = vpop.xlane.xlu1 %1017  ;;  %v1128_v1 = vsub.f32 %v1990_v3, %v2118_v39 }
 0x1ff   : > { %1205 = vst.msk [vmem:[%s2096_s4 + $0x48] sm:$0xff] %vm923_vm1, %v1189_v32  ;;  %v1056_v41 = vmul.f32 0.0625, %v1018_v37  ;;  %v941_v42 = vpop.xlane.xlu0 %940 }
 0x200   : > { %1644 = vrsqrt.f32 %v1135_v33  ;;  %v1111_v46 = vmax.f32 %v1095_v34, 0.0  ;;  %v2124_v61 = vmul.f32 0.0625, %v941_v42 }
 0x201   : > { %v1088_v50 = vsub.f32 %v1056_v41, %v1072_v38 }
 0x202   : > { %v1143_v51 = vadd.f32 1e-05, %v1111_v46  ;;  %v1042_v36 = vpop.xlane.xlu1 %1041  ;;  %v1073_v57 = vmul.f32 %v2124_v61, %v2124_v61  ;;  %v1121_v3 = vsub.f32 %v1983_v45, %v2124_v61 }
 0x203   : > { %v1104_v28 = vmax.f32 %v1088_v50, 0.0  ;;  %v1064_v35 = vmul.f32 0.0625, %v1042_v36  ;;  %v965_v60 = vpop.xlane.xlu0 %964 }
 0x204   : > { %1646 = vrsqrt.f32 %v1143_v51  ;;  %v2130_v48 = vmul.f32 0.0625, %v965_v60 }
 0x205   : > { %v1641_v62 = vpop.eup %1640  ;;  %v1136_v56 = vadd.f32 1e-05, %v1104_v28  ;;  %v1096_v2 = vsub.f32 %v1064_v35, %v1080_v47 }
 0x206   : > { %v1174_v4 = vmul.f32 %v1641_v62, %v1126_v54  ;;  %v944_v5 = vpop.xlane.xlu1 %943  ;;  %v1081_v21 = vmul.f32 %v2130_v48, %v2130_v48 }
 0x207   : > { %1648 = vrsqrt.f32 %v1136_v56  ;;  %v1112_v44 = vmax.f32 %v1096_v2, 0.0  ;;  %v1021_v40 = vpop.xlane.xlu0 %1020  ;;  %v2136_v19 = vmul.f32 0.0625, %v944_v5 }
 0x208   : > { %v1643_v6 = vpop.eup %1642  ;;  %v1190_v10 = vmax.f32 %v1174_v4, 0.0  ;;  %v1057_v13 = vmul.f32 0.0625, %v1021_v40 }
 0x209   : > { %v1166_v26 = vmul.f32 %v1643_v6, %v1118_v7  ;;  %v1144_v18 = vadd.f32 1e-05, %v1112_v44  ;;  %v1074_v30 = vmul.f32 %v2136_v19, %v2136_v19 }
 0x20a   : > { %v1645_v49 = vpop.eup %1644  ;;  %1206 = vst.msk [vmem:[%s2096_s4 + $0x50] sm:$0xff] %vm923_vm1, %v1190_v10  ;;  %v1089_v55 = vsub.f32 %v1057_v13, %v1073_v57  ;;  %v968_v59 = vpop.xlane.xlu1 %967 }
 0x20b   : > { %v1182_v63 = vmax.f32 %v1166_v26, 0.0  ;;  %v1167_v16 = vmul.f32 %v1645_v49, %v1119_v15  ;;  %1650 = vrsqrt.f32 %v1144_v18  ;;  %v1045_v20 = vpop.xlane.xlu0 %1044  ;;  %v2148_v31 = vmul.f32 0.0625, %v968_v59 }
 0x20c   : > { %v1105_v22 = vmax.f32 %v1089_v55, 0.0  ;;  %v1065_v52 = vmul.f32 0.0625, %v1045_v20  ;;  %v1129_v18 = vsub.f32 %v1985_v0, %v2130_v48 }
 0x20d   : > { %1198 = vst.msk [vmem:[%s2096_s4 + $0x10] sm:$0xff] %vm923_vm1, %v1182_v63  ;;  %v1183_v23 = vmax.f32 %v1167_v16, 0.0  ;;  %v1082_v50 = vmul.f32 %v2148_v31, %v2148_v31  ;;  %v1122_v63 = vsub.f32 %v2004_v12, %v2136_v19  ;;  %v1130_v0 = vsub.f32 %v2006_v14, %v2148_v31 }
 0x20e   : > { %v1647_v24 = vpop.eup %1646  ;;  %v1137_v25 = vadd.f32 1e-05, %v1105_v22  ;;  %v1097_v43 = vsub.f32 %v1065_v52, %v1081_v21  ;;  %v1024_v17 = vpop.xlane.xlu1 %1023 }
 0x20f   : > { %1199 = vst.msk [vmem:[%s2096_s4 + $0x18] sm:$0xff] %vm923_vm1, %v1183_v23  ;;  %v1175_v29 = vmul.f32 %v1647_v24, %v1127_v58  ;;  %v1058_v32 = vmul.f32 0.0625, %v1024_v17  ;;  %v947_v33 = vpop.xlane.xlu0 %946 }
 0x210   : > { %1652 = vrsqrt.f32 %v1137_v25  ;;  %v1113_v8 = vmax.f32 %v1097_v43, 0.0  ;;  %v979_v28 = vmul.f32 0.0625, %v947_v33 }
 0x211   : > { %v1649_v34 = vpop.eup %1648  ;;  %v1191_v37 = vmax.f32 %v1175_v29, 0.0  ;;  %v1090_v38 = vsub.f32 %v1058_v32, %v1074_v30 }
 0x212   : > { %v1168_v41 = vmul.f32 %v1649_v34, %v1120_v53  ;;  %v1145_v42 = vadd.f32 1e-05, %v1113_v8  ;;  %v1048_v46 = vpop.xlane.xlu1 %1047  ;;  %v1075_v5 = vmul.f32 %v979_v28, %v979_v28  ;;  %v1123_v23 = vsub.f32 %v1999_v9, %v979_v28 }
 0x213   : > { %1207 = vst.msk [vmem:[%s2096_s4 + $0x58] sm:$0xff] %vm923_vm1, %v1191_v37  ;;  %v1106_v51 = vmax.f32 %v1090_v38, 0.0  ;;  %v1066_v36 = vmul.f32 0.0625, %v1048_v46  ;;  %v971_v47 = vpop.xlane.xlu0 %970 }
 0x214   : > { %v1184_v27 = vmax.f32 %v1168_v41, 0.0  ;;  %1654 = vrsqrt.f32 %v1145_v42  ;;  %v987_v7 = vmul.f32 0.0625, %v971_v47 }
 0x215   : > { %v1651_v35 = vpop.eup %1650  ;;  %v1138_v60 = vadd.f32 1e-05, %v1106_v51  ;;  %v1098_v54 = vsub.f32 %v1066_v36, %v1082_v50 }
 0x216   : > { %1200 = vst.msk [vmem:[%s2096_s4 + $0x20] sm:$0xff] %vm923_vm1, %v1184_v27  ;;  %v1176_v62 = vmul.f32 %v1651_v35, %v1128_v1  ;;  %v1083_v13 = vmul.f32 %v987_v7, %v987_v7  ;;  %v1131_v43 = vsub.f32 %v2001_v11, %v987_v7 }
 0x217   : > { %1656 = vrsqrt.f32 %v1138_v60  ;;  %v1114_v56 = vmax.f32 %v1098_v54, 0.0  ;;  %v1027_v2 = vpop.xlane.xlu0 %1026 }
 0x218   : > { %v1192_v4 = vmax.f32 %v1176_v62, 0.0  ;;  %v1059_v44 = vmul.f32 0.0625, %v1027_v2 }
 0x219   : > { %v1146_v39 = vadd.f32 1e-05, %v1114_v56 }
 0x21a   : > { %v1653_v40 = vpop.eup %1652  ;;  %1208 = vst.msk [vmem:[%s2096_s4 + $0x60] sm:$0xff] %vm923_vm1, %v1192_v4  ;;  %v1091_v6 = vsub.f32 %v1059_v44, %v1075_v5 }
 0x21b   : > { %v1169_v10 = vmul.f32 %v1653_v40, %v1121_v3  ;;  %1658 = vrsqrt.f32 %v1146_v39  ;;  %v1051_v57 = vpop.xlane.xlu0 %1050 }
 0x21c   : > { %v1107_v15 = vmax.f32 %v1091_v6, 0.0  ;;  %v1067_v26 = vmul.f32 0.0625, %v1051_v57 }
 0x21d   : > { %v1185_v49 = vmax.f32 %v1169_v10, 0.0 }
 0x21e   : > { %v1655_v55 = vpop.eup %1654  ;;  %v1139_v59 = vadd.f32 1e-05, %v1107_v15  ;;  %v1099_v45 = vsub.f32 %v1067_v26, %v1083_v13 }
 0x21f   : > { %1201 = vst.msk [vmem:[%s2096_s4 + $0x28] sm:$0xff] %vm923_vm1, %v1185_v49  ;;  %v1177_v61 = vmul.f32 %v1655_v55, %v1129_v18 }
 0x220   : > { %1660 = vrsqrt.f32 %v1139_v59  ;;  %v1115_v16 = vmax.f32 %v1099_v45, 0.0 }
 0x221   : > { %v1657_v20 = vpop.eup %1656  ;;  %v1193_v21 = vmax.f32 %v1177_v61, 0.0 }
 0x222   : > { %v1170_v22 = vmul.f32 %v1657_v20, %v1122_v63  ;;  %v1147_v52 = vadd.f32 1e-05, %v1115_v16 }
 0x223   : > { %1209 = vst.msk [vmem:[%s2096_s4 + $0x68] sm:$0xff] %vm923_vm1, %v1193_v21 }
 0x224   : > { %v1186_v48 = vmax.f32 %v1170_v22, 0.0  ;;  %1662 = vrsqrt.f32 %v1147_v52 }
 0x225   : > { %v1659_v58 = vpop.eup %1658 }
 0x226   : > { %1202 = vst.msk [vmem:[%s2096_s4 + $0x30] sm:$0xff] %vm923_vm1, %v1186_v48  ;;  %v1178_v12 = vmul.f32 %v1659_v58, %v1130_v0 }
 0x228   : > { %v1194_v19 = vmax.f32 %v1178_v12, 0.0 }
 0x22a   : > { %v1661_v24 = vpop.eup %1660  ;;  %1210 = vst.msk [vmem:[%s2096_s4 + $0x70] sm:$0xff] %vm923_vm1, %v1194_v19 }
 0x22b   : > { %v1171_v25 = vmul.f32 %v1661_v24, %v1123_v23 }
 0x22d   : > { %v1187_v17 = vmax.f32 %v1171_v25, 0.0 }
 0x22e   : > { %v1663_v29 = vpop.eup %1662 }
 0x22f   : > { %1203 = vst.msk [vmem:[%s2096_s4 + $0x38] sm:$0xff] %vm923_vm1, %v1187_v17  ;;  %v1179_v14 = vmul.f32 %v1663_v29, %v1131_v43 }
 0x231   : > { %v1195_v30 = vmax.f32 %v1179_v14, 0.0 }
 0x233   : > { %1211 = vst.msk [vmem:[%s2096_s4 + $0x78] sm:$0xff] %vm923_vm1, %v1195_v30 }
 0x234 PF: > { %s13_s12 = sadd.s32 1, %s1670_s12  }
 0x235   : > { %p10_p4 = scmp.ge.s32.totalorder %s13_s12, 4  }
 0x237   :  { %12 = sbr.rel (!%p10_p4) target bundleno = 1 (0x1), region = 65 }

// kernel: _forward_impl.38
= control target key start
LH: loop header
LB: loop body
LE: loop exit
PB: predicated region body
PF: predicated region fallthrough
CT: control target
= control target key end

     0   :  { %s2325_s12 = smov 0   ;;  %s2993_s0 = inlined_call_operand.vmem [shape: f32[2,128,1152], index: 0, kind: input, shape index: {}]   ;;  %s2994_s1 = inlined_call_operand.vmem [shape: f32[2,1152,4], index: 1, kind: input, shape index: {}]   ;;  %s2995_s2 = inlined_call_operand.vmem [shape: f32[128,1], index: 2, kind: input, shape index: {}]   ;;  %s2996_s3 = inlined_call_operand.vmem [shape: f32[2,128,4], index: 3, kind: output, shape index: {}]  }
   0x1 LB: > { %s1656_s13 = sadd.s32 4294967295, %s2302_s12   ;;  %p1660_p0 = scmp.ge.s32.totalorder %s2302_s12, 1  ;;  %s2302_s12 = sphi %s2325_s12, %s13_s12  }
   0x2   : > { %p147_p1 = scmp.lt.s32.totalorder %s2302_s12, 3 }
   0x4   : > { %p148_p2 = pnand %p1660_p0, %p147_p1 }
   0x5   : > { %p176_p3 = scmp.lt.s32.totalorder (!%p148_p2), %s1656_s13, 1  ;;  %v479_v0 = vld [vmem:[%s2995_s2] sm:$0xff] (!%p148_p2)  ;;  %v2304_v1 = vmov (!%p148_p2), 0   ;;  %v480_v2 = vld [vmem:[%s2995_s2 + $0x8] sm:$0xff] (!%p148_p2)  ;;  %vm1300_vm0 = vcmask (!%p148_p2), 31744  }
   0x6   : > { %151 = sbr.rel (%p148_p2) target bundleno = 627 (0x273), region = 32  ;;  %2262 = vset.pattern.permute.xlu0 (!%p148_p2), %v2304_v1  ;;  %2263 = vset.pattern.permute.xlu1 (!%p148_p2), %v2304_v1 }
   0x7   : > { %497 = vperm.xlu0 (!%p148_p2), %2262, %v479_v0  }
   0xb   : > { %502 = vperm.xlu0 (!%p148_p2), %2262, %v480_v2  }
   0xd   : > { %s2998_s13 = smov (!%p176_p3, %s1656_s13), 1 }
   0xe   : > { %s2252_s18 = smul.u32 1152, %s2998_s13 }
  0x10   : > { %s2347_s21 = scalar_lea.vmem %s2994_s1, %s2252_s18  ;;  %s2404_s24 = scalar_lea.vmem %s2993_s0, %s2252_s18 }
  0x11   : > { %v351_v3 = vld [vmem:[%s2347_s21 + $0x80] sm:$0xff]  ;;  %v352_v4 = vld [vmem:[%s2347_s21 + $0x88] sm:$0xff]  ;;  %v353_v14 = vld [vmem:[%s2347_s21 + $0x90] sm:$0xff] }
  0x12   : > { %v383_v5 = vld [vmem:[%s2347_s21 + $0x180] sm:$0xff]  ;;  %v2076_v6 = vpack.c.bf16 %v352_v4, %v351_v3  ;;  %v384_v7 = vld [vmem:[%s2347_s21 + $0x188] sm:$0xff]  ;;  %v354_v16 = vld [vmem:[%s2347_s21 + $0x98] sm:$0xff] }
  0x13   : > { %v335_v8 = vld [vmem:[%s2347_s21] sm:$0xff]  ;;  %v336_v9 = vld [vmem:[%s2347_s21 + $0x8] sm:$0xff]  ;;  %v2108_v10 = vpack.c.bf16 %v384_v7, %v383_v5  ;;  %v385_v17 = vld [vmem:[%s2347_s21 + $0x190] sm:$0xff]  ;;  %v2080_v19 = vpack.c.bf16 %v354_v16, %v353_v14 }
  0x14   : > { %v2078_v11 = vpack.c.bf16 %v336_v9, %v335_v8  ;;  %v367_v12 = vld [vmem:[%s2347_s21 + $0x100] sm:$0xff]  ;;  %v368_v13 = vld [vmem:[%s2347_s21 + $0x108] sm:$0xff]  ;;  %2077 = vmatprep.subr.bf16.mxu0 %v2076_v6  ;;  %v386_v18 = vld [vmem:[%s2347_s21 + $0x198] sm:$0xff] }
  0x15   : > { %v2110_v15 = vpack.c.bf16 %v368_v13, %v367_v12  ;;  %2109 = vmatprep.subr.bf16.mxu1 %v2108_v10  ;;  %v2112_v20 = vpack.c.bf16 %v386_v18, %v385_v17  ;;  %v337_v21 = vld [vmem:[%s2347_s21 + $0x10] sm:$0xff]  ;;  %v338_v22 = vld [vmem:[%s2347_s21 + $0x18] sm:$0xff]  ;;  %v355_v26 = vld [vmem:[%s2347_s21 + $0xa0] sm:$0xff] }
  0x16   : > { %2079 = vmatpush3.bf16.msra.mxu0 %v2078_v11  ;;  %v369_v23 = vld [vmem:[%s2347_s21 + $0x110] sm:$0xff]  ;;  %v2082_v24 = vpack.c.bf16 %v338_v22, %v337_v21  ;;  %v370_v25 = vld [vmem:[%s2347_s21 + $0x118] sm:$0xff]  ;;  %v356_v27 = vld [vmem:[%s2347_s21 + $0xa8] sm:$0xff] }
  0x17   : > { %2111 = vmatpush3.bf16.msra.mxu1 %v2110_v15  ;;  %2081 = vmatprep.subr.bf16.mxu0 %v2080_v19  ;;  %v2114_v28 = vpack.c.bf16 %v370_v25, %v369_v23  ;;  %v2084_v29 = vpack.c.bf16 %v356_v27, %v355_v26  ;;  %v387_v30 = vld [vmem:[%s2347_s21 + $0x1a0] sm:$0xff]  ;;  %v388_v31 = vld [vmem:[%s2347_s21 + $0x1a8] sm:$0xff]  ;;  %v357_v38 = vld [vmem:[%s2347_s21 + $0xb0] sm:$0xff] }
  0x18   : > { %2113 = vmatprep.subr.bf16.mxu1 %v2112_v20  ;;  %v339_v32 = vld [vmem:[%s2347_s21 + $0x20] sm:$0xff]  ;;  %v2116_v33 = vpack.c.bf16 %v388_v31, %v387_v30  ;;  %v340_v34 = vld [vmem:[%s2347_s21 + $0x28] sm:$0xff]  ;;  %v358_v39 = vld [vmem:[%s2347_s21 + $0xb8] sm:$0xff] }
  0x19   : > { %v371_v35 = vld [vmem:[%s2347_s21 + $0x120] sm:$0xff]  ;;  %v372_v36 = vld [vmem:[%s2347_s21 + $0x128] sm:$0xff]  ;;  %v2086_v37 = vpack.c.bf16 %v340_v34, %v339_v32  ;;  %v389_v40 = vld [vmem:[%s2347_s21 + $0x1b0] sm:$0xff]  ;;  %v2088_v42 = vpack.c.bf16 %v358_v39, %v357_v38 }
  0x1a   : > { %2083 = vmatpush3.bf16.msra.mxu0 %v2082_v24  ;;  %v2118_v41 = vpack.c.bf16 %v372_v36, %v371_v35  ;;  %v390_v43 = vld [vmem:[%s2347_s21 + $0x1b8] sm:$0xff]  ;;  %v341_v44 = vld [vmem:[%s2347_s21 + $0x30] sm:$0xff]  ;;  %v359_v49 = vld [vmem:[%s2347_s21 + $0xc0] sm:$0xff] }
  0x1b   : > { %2115 = vmatpush3.bf16.msra.mxu1 %v2114_v28  ;;  %2085 = vmatprep.subr.bf16.mxu0 %v2084_v29  ;;  %v342_v45 = vld [vmem:[%s2347_s21 + $0x38] sm:$0xff]  ;;  %v2120_v46 = vpack.c.bf16 %v390_v43, %v389_v40  ;;  %v373_v47 = vld [vmem:[%s2347_s21 + $0x130] sm:$0xff]  ;;  %v360_v50 = vld [vmem:[%s2347_s21 + $0xc8] sm:$0xff] }
  0x1c   : > { %2117 = vmatprep.subr.bf16.mxu1 %v2116_v33  ;;  %v374_v48 = vld [vmem:[%s2347_s21 + $0x138] sm:$0xff]  ;;  %v391_v51 = vld [vmem:[%s2347_s21 + $0x1c0] sm:$0xff]  ;;  %v392_v52 = vld [vmem:[%s2347_s21 + $0x1c8] sm:$0xff]  ;;  %v2090_v53 = vpack.c.bf16 %v342_v45, %v341_v44  ;;  %v2092_v55 = vpack.c.bf16 %v360_v50, %v359_v49 }
  0x1d   : > { %v2122_v54 = vpack.c.bf16 %v374_v48, %v373_v47  ;;  %v343_v56 = vld [vmem:[%s2347_s21 + $0x40] sm:$0xff]  ;;  %v344_v57 = vld [vmem:[%s2347_s21 + $0x48] sm:$0xff]  ;;  %v2124_v59 = vpack.c.bf16 %v392_v52, %v391_v51  ;;  %v361_v61 = vld [vmem:[%s2347_s21 + $0xd0] sm:$0xff] }
  0x1e   : > { %2087 = vmatpush3.bf16.msra.mxu0 %v2086_v37  ;;  %v375_v58 = vld [vmem:[%s2347_s21 + $0x140] sm:$0xff]  ;;  %v376_v60 = vld [vmem:[%s2347_s21 + $0x148] sm:$0xff]  ;;  %v362_v62 = vld [vmem:[%s2347_s21 + $0xd8] sm:$0xff]  ;;  %v2094_v1 = vpack.c.bf16 %v344_v57, %v343_v56 }
  0x1f   : > { %2119 = vmatpush3.bf16.msra.mxu1 %v2118_v41  ;;  %2089 = vmatprep.subr.bf16.mxu0 %v2088_v42  ;;  %v393_v63 = vld [vmem:[%s2347_s21 + $0x1d0] sm:$0xff]  ;;  %v394_v0 = vld [vmem:[%s2347_s21 + $0x1d8] sm:$0xff]  ;;  %v2126_v2 = vpack.c.bf16 %v376_v60, %v375_v58  ;;  %v2096_v3 = vpack.c.bf16 %v362_v62, %v361_v61  ;;  %v363_v9 = vld [vmem:[%s2347_s21 + $0xe0] sm:$0xff] }
  0x20   : > { %2121 = vmatprep.subr.bf16.mxu1 %v2120_v46  ;;  %v345_v4 = vld [vmem:[%s2347_s21 + $0x50] sm:$0xff]  ;;  %v346_v5 = vld [vmem:[%s2347_s21 + $0x58] sm:$0xff]  ;;  %v2128_v7 = vpack.c.bf16 %v394_v0, %v393_v63  ;;  %v364_v10 = vld [vmem:[%s2347_s21 + $0xe8] sm:$0xff] }
  0x21   : > { %v377_v6 = vld [vmem:[%s2347_s21 + $0x150] sm:$0xff]  ;;  %v378_v8 = vld [vmem:[%s2347_s21 + $0x158] sm:$0xff]  ;;  %v395_v11 = vld [vmem:[%s2347_s21 + $0x1e0] sm:$0xff]  ;;  %v2098_v13 = vpack.c.bf16 %v346_v5, %v345_v4  ;;  %v2100_v17 = vpack.c.bf16 %v364_v10, %v363_v9 }
  0x22   : > { %2091 = vmatpush3.bf16.msra.mxu0 %v2090_v53  ;;  %v396_v12 = vld [vmem:[%s2347_s21 + $0x1e8] sm:$0xff]  ;;  %v347_v14 = vld [vmem:[%s2347_s21 + $0x60] sm:$0xff]  ;;  %v2130_v16 = vpack.c.bf16 %v378_v8, %v377_v6  ;;  %v194_v20 = vld [vmem:[%s2404_s24 + $0x18] sm:$0xff] }
  0x23   : > { %2123 = vmatpush3.bf16.msra.mxu1 %v2122_v54  ;;  %2093 = vmatprep.subr.bf16.mxu0 %v2092_v55  ;;  %v348_v15 = vld [vmem:[%s2347_s21 + $0x68] sm:$0xff]  ;;  %v379_v18 = vld [vmem:[%s2347_s21 + $0x160] sm:$0xff]  ;;  %v2132_v21 = vpack.c.bf16 %v396_v12, %v395_v11  ;;  %v365_v23 = vld [vmem:[%s2347_s21 + $0xf0] sm:$0xff] }
  0x24   : > { %2125 = vmatprep.subr.bf16.mxu1 %v2124_v59  ;;  %v192_v19 = vld [vmem:[%s2404_s24 + $0x8] sm:$0xff]  ;;  %v366_v24 = vld [vmem:[%s2347_s21 + $0xf8] sm:$0xff]  ;;  %v397_v25 = vld [vmem:[%s2347_s21 + $0x1f0] sm:$0xff]  ;;  %784 = vmatprep.mubr.f32.mxu1 %v194_v20  ;;  %v2102_v27 = vpack.c.bf16 %v348_v15, %v347_v14 }
  0x25   : > { %v380_v22 = vld [vmem:[%s2347_s21 + $0x168] sm:$0xff]  ;;  %639 = vmatprep.mubr.f32.mxu0 %v192_v19  ;;  %v398_v26 = vld [vmem:[%s2347_s21 + $0x1f8] sm:$0xff]  ;;  %v2104_v29 = vpack.c.bf16 %v366_v24, %v365_v23  ;;  %v349_v30 = vld [vmem:[%s2347_s21 + $0x70] sm:$0xff] }
  0x26   : > { %2095 = vmatpush3.bf16.msra.mxu0 %v2094_v1  ;;  %v2134_v28 = vpack.c.bf16 %v380_v22, %v379_v18  ;;  %v350_v31 = vld [vmem:[%s2347_s21 + $0x78] sm:$0xff]  ;;  %v381_v32 = vld [vmem:[%s2347_s21 + $0x170] sm:$0xff]  ;;  %v2136_v33 = vpack.c.bf16 %v398_v26, %v397_v25  ;;  %v415_v35 = vld [vmem:[%s2347_s21 + $0x280] sm:$0xff] }
  0x27   : > { %2127 = vmatpush3.bf16.msra.mxu1 %v2126_v2  ;;  %2097 = vmatprep.subr.bf16.mxu0 %v2096_v3  ;;  %v382_v34 = vld [vmem:[%s2347_s21 + $0x178] sm:$0xff]  ;;  %v416_v36 = vld [vmem:[%s2347_s21 + $0x288] sm:$0xff]  ;;  %v447_v37 = vld [vmem:[%s2347_s21 + $0x380] sm:$0xff]  ;;  %v2106_v39 = vpack.c.bf16 %v350_v31, %v349_v30 }
  0x28   : > { %2129 = vmatprep.subr.bf16.mxu1 %v2128_v7  ;;  %v448_v38 = vld [vmem:[%s2347_s21 + $0x388] sm:$0xff]  ;;  %v2138_v40 = vpack.c.bf16 %v382_v34, %v381_v32  ;;  %v2140_v41 = vpack.c.bf16 %v416_v36, %v415_v35  ;;  %v431_v43 = vld [vmem:[%s2347_s21 + $0x300] sm:$0xff]  ;;  %v449_v47 = vld [vmem:[%s2347_s21 + $0x390] sm:$0xff] }
  0x29   : > { %v2172_v42 = vpack.c.bf16 %v448_v38, %v447_v37  ;;  %v432_v44 = vld [vmem:[%s2347_s21 + $0x308] sm:$0xff]  ;;  %v399_v45 = vld [vmem:[%s2347_s21 + $0x200] sm:$0xff]  ;;  %v450_v48 = vld [vmem:[%s2347_s21 + $0x398] sm:$0xff] }
  0x2a   : > { %2099 = vmatpush3.bf16.msra.mxu0 %v2098_v13  ;;  %v400_v46 = vld [vmem:[%s2347_s21 + $0x208] sm:$0xff]  ;;  %v191_v49 = vld [vmem:[%s2404_s24] sm:$0xff]  ;;  %v417_v50 = vld [vmem:[%s2347_s21 + $0x290] sm:$0xff]  ;;  %v2174_v53 = vpack.c.bf16 %v432_v44, %v431_v43  ;;  %v2176_v57 = vpack.c.bf16 %v450_v48, %v449_v47 }
  0x2b   : > { %2131 = vmatpush3.bf16.msra.mxu1 %v2130_v16  ;;  %2101 = vmatprep.subr.bf16.mxu0 %v2100_v17  ;;  %v418_v51 = vld [vmem:[%s2347_s21 + $0x298] sm:$0xff]  ;;  %v193_v52 = vld [vmem:[%s2404_s24 + $0x10] sm:$0xff]  ;;  %v203_v55 = vld [vmem:[%s2404_s24 + $0x60] sm:$0xff]  ;;  %v2142_v56 = vpack.c.bf16 %v400_v46, %v399_v45 }
  0x2c   : > { %2133 = vmatprep.subr.bf16.mxu1 %v2132_v21  ;;  %v201_v54 = vld [vmem:[%s2404_s24 + $0x50] sm:$0xff]  ;;  %v434_v59 = vld [vmem:[%s2347_s21 + $0x318] sm:$0xff]  ;;  %v2144_v61 = vpack.c.bf16 %v418_v51, %v417_v50  ;;  %v451_v63 = vld [vmem:[%s2347_s21 + $0x3a0] sm:$0xff] }
  0x2d   : > { %v433_v58 = vld [vmem:[%s2347_s21 + $0x310] sm:$0xff]  ;;  %v402_v62 = vld [vmem:[%s2347_s21 + $0x218] sm:$0xff]  ;;  %v452_v0 = vld [vmem:[%s2347_s21 + $0x3a8] sm:$0xff] }
  0x2e   : > { %2103 = vmatpush3.bf16.msra.mxu0 %v2102_v27  ;;  %v401_v60 = vld [vmem:[%s2347_s21 + $0x210] sm:$0xff]  ;;  %v200_v1 = vld [vmem:[%s2404_s24 + $0x48] sm:$0xff]  ;;  %v419_v2 = vld [vmem:[%s2347_s21 + $0x2a0] sm:$0xff]  ;;  %v2178_v7 = vpack.c.bf16 %v434_v59, %v433_v58  ;;  %v2180_v9 = vpack.c.bf16 %v452_v0, %v451_v63 }
  0x2f   : > { %2135 = vmatpush3.bf16.msra.mxu1 %v2134_v28  ;;  %2105 = vmatprep.subr.bf16.mxu0 %v2104_v29  ;;  %v420_v3 = vld [vmem:[%s2347_s21 + $0x2a8] sm:$0xff]  ;;  %v202_v4 = vld [vmem:[%s2404_s24 + $0x58] sm:$0xff]  ;;  %v2146_v8 = vpack.c.bf16 %v402_v62, %v401_v60  ;;  %v435_v10 = vld [vmem:[%s2347_s21 + $0x320] sm:$0xff] }
  0x30   : > { %2137 = vmatprep.subr.bf16.mxu1 %v2136_v33  ;;  %v210_v5 = vld [vmem:[%s2404_s24 + $0x98] sm:$0xff]  ;;  %v212_v6 = vld [vmem:[%s2404_s24 + $0xa8] sm:$0xff]  ;;  %v403_v12 = vld [vmem:[%s2347_s21 + $0x220] sm:$0xff]  ;;  %v2148_v13 = vpack.c.bf16 %v420_v3, %v419_v2 }
  0x31   : > { %v436_v11 = vld [vmem:[%s2347_s21 + $0x328] sm:$0xff]  ;;  %v453_v15 = vld [vmem:[%s2347_s21 + $0x3b0] sm:$0xff]  ;;  %v454_v16 = vld [vmem:[%s2347_s21 + $0x3b8] sm:$0xff] }
  0x32   : > { %2107 = vmatpush3.bf16.msra.mxu0 %v2106_v39  ;;  %v404_v14 = vld [vmem:[%s2347_s21 + $0x228] sm:$0xff]  ;;  %v209_v17 = vld [vmem:[%s2404_s24 + $0x90] sm:$0xff]  ;;  %v211_v19 = vld [vmem:[%s2404_s24 + $0xa0] sm:$0xff]  ;;  %v2182_v21 = vpack.c.bf16 %v436_v11, %v435_v10  ;;  %v2184_v25 = vpack.c.bf16 %v454_v16, %v453_v15 }
  0x33   : > { %2139 = vmatpush3.bf16.msra.mxu1 %v2138_v40  ;;  %2141 = vmatprep.subr.bf16.mxu0 %v2140_v41  ;;  %v421_v18 = vld [vmem:[%s2347_s21 + $0x2b0] sm:$0xff]  ;;  %v219_v20 = vld [vmem:[%s2404_s24 + $0xe0] sm:$0xff]  ;;  %v422_v22 = vld [vmem:[%s2347_s21 + $0x2b8] sm:$0xff]  ;;  %v2150_v24 = vpack.c.bf16 %v404_v14, %v403_v12 }
  0x34   : > { %2173 = vmatprep.subr.bf16.mxu1 %v2172_v42  ;;  %v221_v23 = vld [vmem:[%s2404_s24 + $0xf0] sm:$0xff]  ;;  %v438_v27 = vld [vmem:[%s2347_s21 + $0x338] sm:$0xff]  ;;  %v2152_v29 = vpack.c.bf16 %v422_v22, %v421_v18  ;;  %v220_v32 = vld [vmem:[%s2404_s24 + $0xe8] sm:$0xff] }
  0x35   : > { %640 = vmatmul.mubr.f32.vlgmr.msra.gmra.mrb[0].mxu0 %v191_v49  ;;  %v437_v26 = vld [vmem:[%s2347_s21 + $0x330] sm:$0xff]  ;;  %v218_v28 = vld [vmem:[%s2404_s24 + $0xd8] sm:$0xff]  ;;  %v455_v33 = vld [vmem:[%s2347_s21 + $0x3c0] sm:$0xff] }
  0x36   : > { %785 = vmatmul.mubr.f32.vlgmr.msra.gmra.mrb[0].mxu1 %v193_v52  ;;  %644 = vmatprep.mubr.f32.mxu0 %v201_v54  ;;  %v405_v30 = vld [vmem:[%s2347_s21 + $0x230] sm:$0xff]  ;;  %v406_v31 = vld [vmem:[%s2347_s21 + $0x238] sm:$0xff]  ;;  %v456_v34 = vld [vmem:[%s2347_s21 + $0x3c8] sm:$0xff]  ;;  %v2186_v37 = vpack.c.bf16 %v438_v27, %v437_v26 }
  0x37   : > { %2175 = vmatpush3.bf16.msra.mxu1 %v2174_v53  ;;  %789 = vmatprep.mubr.f32.mxu1 %v203_v55  ;;  %v228_v35 = vld [vmem:[%s2404_s24 + $0x128] sm:$0xff]  ;;  %v230_v36 = vld [vmem:[%s2404_s24 + $0x138] sm:$0xff]  ;;  %v439_v38 = vld [vmem:[%s2347_s21 + $0x340] sm:$0xff]  ;;  %v2154_v39 = vpack.c.bf16 %v406_v31, %v405_v30  ;;  %v2188_v40 = vpack.c.bf16 %v456_v34, %v455_v33 }
  0x38   : > { %2143 = vmatpush3.bf16.msra.mxu0 %v2142_v56  ;;  %2177 = vmatprep.subr.bf16.mxu1 %v2176_v57  ;;  %v440_v41 = vld [vmem:[%s2347_s21 + $0x348] sm:$0xff]  ;;  %v423_v42 = vld [vmem:[%s2347_s21 + $0x2c0] sm:$0xff]  ;;  %v229_v48 = vld [vmem:[%s2404_s24 + $0x130] sm:$0xff] }
  0x39   : > { %645 = vmatmul.mubr.f32.gmra.mrb[2].mxu0 %v200_v1  ;;  %2145 = vmatprep.subr.bf16.mxu0 %v2144_v61  ;;  %v424_v43 = vld [vmem:[%s2347_s21 + $0x2c8] sm:$0xff]  ;;  %v407_v45 = vld [vmem:[%s2347_s21 + $0x240] sm:$0xff]  ;;  %v237_v49 = vld [vmem:[%s2404_s24 + $0x170] sm:$0xff]  ;;  %v2190_v50 = vpack.c.bf16 %v440_v41, %v439_v38 }
  0x3a   : > { %790 = vmatmul.mubr.f32.gmra.mrb[2].mxu1 %v202_v4  ;;  %649 = vmatprep.mubr.f32.mxu0 %v210_v5  ;;  %v2156_v44 = vpack.c.bf16 %v424_v43, %v423_v42  ;;  %v408_v46 = vld [vmem:[%s2347_s21 + $0x248] sm:$0xff]  ;;  %v227_v47 = vld [vmem:[%s2404_s24 + $0x120] sm:$0xff]  ;;  %v457_v51 = vld [vmem:[%s2347_s21 + $0x3d0] sm:$0xff] }
  0x3b   : > { %794 = vmatprep.mubr.f32.mxu1 %v212_v6  ;;  %2179 = vmatpush3.bf16.msra.mxu1 %v2178_v7  ;;  %v458_v52 = vld [vmem:[%s2347_s21 + $0x3d8] sm:$0xff]  ;;  %v239_v53 = vld [vmem:[%s2404_s24 + $0x180] sm:$0xff]  ;;  %v2158_v54 = vpack.c.bf16 %v408_v46, %v407_v45  ;;  %v441_v56 = vld [vmem:[%s2347_s21 + $0x350] sm:$0xff] }
  0x3c   : > { %2147 = vmatpush3.bf16.msra.mxu0 %v2146_v8  ;;  %2181 = vmatprep.subr.bf16.mxu1 %v2180_v9  ;;  %v2192_v55 = vpack.c.bf16 %v458_v52, %v457_v51  ;;  %v442_v57 = vld [vmem:[%s2347_s21 + $0x358] sm:$0xff]  ;;  %v425_v58 = vld [vmem:[%s2347_s21 + $0x2d0] sm:$0xff]  ;;  %v236_v60 = vld [vmem:[%s2404_s24 + $0x168] sm:$0xff] }
  0x3d   : > { %650 = vmatmul.mubr.f32.gmra.mrb[4].mxu0 %v209_v17  ;;  %2149 = vmatprep.subr.bf16.mxu0 %v2148_v13  ;;  %v426_v59 = vld [vmem:[%s2347_s21 + $0x2d8] sm:$0xff]  ;;  %v409_v62 = vld [vmem:[%s2347_s21 + $0x250] sm:$0xff]  ;;  %v2194_v1 = vpack.c.bf16 %v442_v57, %v441_v56  ;;  %v248_v3 = vld [vmem:[%s2404_s24 + $0x1c8] sm:$0xff] }
  0x3e   : > { %795 = vmatmul.mubr.f32.gmra.mrb[4].mxu1 %v211_v19  ;;  %654 = vmatprep.mubr.f32.mxu0 %v219_v20  ;;  %v2160_v61 = vpack.c.bf16 %v426_v59, %v425_v58  ;;  %v238_v63 = vld [vmem:[%s2404_s24 + $0x178] sm:$0xff]  ;;  %v459_v5 = vld [vmem:[%s2347_s21 + $0x3e0] sm:$0xff]  ;;  %v460_v6 = vld [vmem:[%s2347_s21 + $0x3e8] sm:$0xff] }
  0x3f   : > { %799 = vmatprep.mubr.f32.mxu1 %v221_v23  ;;  %2183 = vmatpush3.bf16.msra.mxu1 %v2182_v21  ;;  %v246_v0 = vld [vmem:[%s2404_s24 + $0x1b8] sm:$0xff]  ;;  %v443_v7 = vld [vmem:[%s2347_s21 + $0x360] sm:$0xff]  ;;  %v444_v8 = vld [vmem:[%s2347_s21 + $0x368] sm:$0xff]  ;;  %v2196_v10 = vpack.c.bf16 %v460_v6, %v459_v5 }
  0x40   : > { %2151 = vmatpush3.bf16.msra.mxu0 %v2150_v24  ;;  %2185 = vmatprep.subr.bf16.mxu1 %v2184_v25  ;;  %v410_v2 = vld [vmem:[%s2347_s21 + $0x258] sm:$0xff]  ;;  %v245_v9 = vld [vmem:[%s2404_s24 + $0x1b0] sm:$0xff]  ;;  %v427_v11 = vld [vmem:[%s2347_s21 + $0x2e0] sm:$0xff]  ;;  %v2198_v14 = vpack.c.bf16 %v444_v8, %v443_v7 }
  0x41   : > { %655 = vmatmul.mubr.f32.gmra.mrb[6].mxu0 %v218_v28  ;;  %2153 = vmatprep.subr.bf16.mxu0 %v2152_v29  ;;  %v2162_v4 = vpack.c.bf16 %v410_v2, %v409_v62  ;;  %v247_v12 = vld [vmem:[%s2404_s24 + $0x1c0] sm:$0xff]  ;;  %v428_v15 = vld [vmem:[%s2347_s21 + $0x2e8] sm:$0xff]  ;;  %v257_v16 = vld [vmem:[%s2404_s24 + $0x210] sm:$0xff] }
  0x42   : > { %800 = vmatmul.mubr.f32.gmra.mrb[6].mxu1 %v220_v32  ;;  %659 = vmatprep.mubr.f32.mxu0 %v228_v35  ;;  %v255_v13 = vld [vmem:[%s2404_s24 + $0x200] sm:$0xff]  ;;  %v2164_v17 = vpack.c.bf16 %v428_v15, %v427_v11  ;;  %v412_v19 = vld [vmem:[%s2347_s21 + $0x268] sm:$0xff]  ;;  %v254_v20 = vld [vmem:[%s2404_s24 + $0x1f8] sm:$0xff] }
  0x43   : > { %804 = vmatprep.mubr.f32.mxu1 %v230_v36  ;;  %2187 = vmatpush3.bf16.msra.mxu1 %v2186_v37  ;;  %v411_v18 = vld [vmem:[%s2347_s21 + $0x260] sm:$0xff]  ;;  %v461_v21 = vld [vmem:[%s2347_s21 + $0x3f0] sm:$0xff]  ;;  %v462_v22 = vld [vmem:[%s2347_s21 + $0x3f8] sm:$0xff] }
  0x44   : > { %2155 = vmatpush3.bf16.msra.mxu0 %v2154_v39  ;;  %2189 = vmatprep.subr.bf16.mxu1 %v2188_v40  ;;  %v445_v23 = vld [vmem:[%s2347_s21 + $0x370] sm:$0xff]  ;;  %v256_v24 = vld [vmem:[%s2404_s24 + $0x208] sm:$0xff]  ;;  %v2166_v26 = vpack.c.bf16 %v412_v19, %v411_v18  ;;  %v2200_v27 = vpack.c.bf16 %v462_v22, %v461_v21  ;;  %v446_v28 = vld [vmem:[%s2347_s21 + $0x378] sm:$0xff] }
  0x45   : > { %660 = vmatmul.mubr.f32.gmra.mrb[8].mxu0 %v227_v47  ;;  %2157 = vmatprep.subr.bf16.mxu0 %v2156_v44  ;;  %v264_v25 = vld [vmem:[%s2404_s24 + $0x248] sm:$0xff]  ;;  %v266_v29 = vld [vmem:[%s2404_s24 + $0x258] sm:$0xff]  ;;  %v2202_v30 = vpack.c.bf16 %v446_v28, %v445_v23  ;;  %v429_v31 = vld [vmem:[%s2347_s21 + $0x2f0] sm:$0xff] }
  0x46   : > { %805 = vmatmul.mubr.f32.gmra.mrb[8].mxu1 %v229_v48  ;;  %664 = vmatprep.mubr.f32.mxu0 %v237_v49  ;;  %v430_v32 = vld [vmem:[%s2347_s21 + $0x2f8] sm:$0xff]  ;;  %v413_v34 = vld [vmem:[%s2347_s21 + $0x270] sm:$0xff]  ;;  %v263_v36 = vld [vmem:[%s2404_s24 + $0x240] sm:$0xff] }
  0x47   : > { %809 = vmatprep.mubr.f32.mxu1 %v239_v53  ;;  %2191 = vmatpush3.bf16.msra.mxu1 %v2190_v50  ;;  %v2168_v33 = vpack.c.bf16 %v430_v32, %v429_v31  ;;  %v414_v35 = vld [vmem:[%s2347_s21 + $0x278] sm:$0xff]  ;;  %v265_v37 = vld [vmem:[%s2404_s24 + $0x250] sm:$0xff]  ;;  %v463_v40 = vld [vmem:[%s2347_s21 + $0x400] sm:$0xff] }
  0x48   : > { %2159 = vmatpush3.bf16.msra.mxu0 %v2158_v54  ;;  %2193 = vmatprep.subr.bf16.mxu1 %v2192_v55  ;;  %v273_v38 = vld [vmem:[%s2404_s24 + $0x290] sm:$0xff]  ;;  %v2170_v39 = vpack.c.bf16 %v414_v35, %v413_v34  ;;  %v464_v41 = vld [vmem:[%s2347_s21 + $0x408] sm:$0xff]  ;;  %v275_v42 = vld [vmem:[%s2404_s24 + $0x2a0] sm:$0xff] }
  0x49   : > { %665 = vmatmul.mubr.f32.gmra.mrb[10].mxu0 %v236_v60  ;;  %2161 = vmatprep.subr.bf16.mxu0 %v2160_v61  ;;  %v2524_v43 = vpack.c.bf16 %v464_v41, %v463_v40  ;;  %v272_v44 = vld [vmem:[%s2404_s24 + $0x288] sm:$0xff]  ;;  %v274_v45 = vld [vmem:[%s2404_s24 + $0x298] sm:$0xff]  ;;  %v281_v48 = vld [vmem:[%s2404_s24 + $0x2d0] sm:$0xff] }
  0x4a   : > { %810 = vmatmul.mubr.f32.gmra.mrb[10].mxu1 %v238_v63  ;;  %669 = vmatprep.mubr.f32.mxu0 %v246_v0  ;;  %v282_v46 = vld [vmem:[%s2404_s24 + $0x2d8] sm:$0xff]  ;;  %v284_v47 = vld [vmem:[%s2404_s24 + $0x2e8] sm:$0xff]  ;;  %v283_v49 = vld [vmem:[%s2404_s24 + $0x2e0] sm:$0xff] }
  0x4b   : > { %814 = vmatprep.mubr.f32.mxu1 %v248_v3  ;;  %2195 = vmatpush3.bf16.msra.mxu1 %v2194_v1  ;;  %v291_v50 = vld [vmem:[%s2404_s24 + $0x320] sm:$0xff]  ;;  %v293_v51 = vld [vmem:[%s2404_s24 + $0x330] sm:$0xff]  ;;  %v290_v52 = vld [vmem:[%s2404_s24 + $0x318] sm:$0xff] }
  0x4c   : > { %2163 = vmatpush3.bf16.msra.mxu0 %v2162_v4  ;;  %2197 = vmatprep.subr.bf16.mxu1 %v2196_v10  ;;  %v292_v53 = vld [vmem:[%s2404_s24 + $0x328] sm:$0xff]  ;;  %v481_v55 = vld [vmem:[%s2995_s2 + $0x10] sm:$0xff]  ;;  %v302_v56 = vld [vmem:[%s2404_s24 + $0x378] sm:$0xff] }
  0x4d   : > { %670 = vmatmul.mubr.f32.gmra.mrb[12].mxu0 %v245_v9  ;;  %2165 = vmatprep.subr.bf16.mxu0 %v2164_v17  ;;  %v300_v54 = vld [vmem:[%s2404_s24 + $0x368] sm:$0xff]  ;;  %v482_v57 = vld [vmem:[%s2995_s2 + $0x18] sm:$0xff]  ;;  %v299_v58 = vld [vmem:[%s2404_s24 + $0x360] sm:$0xff] }
  0x4e   : > { %815 = vmatmul.mubr.f32.gmra.mrb[12].mxu1 %v247_v12  ;;  %674 = vmatprep.mubr.f32.mxu0 %v255_v13  ;;  %v301_v59 = vld [vmem:[%s2404_s24 + $0x370] sm:$0xff]  ;;  %v483_v61 = vld [vmem:[%s2995_s2 + $0x20] sm:$0xff]  ;;  %v484_v63 = vld [vmem:[%s2995_s2 + $0x28] sm:$0xff] }
  0x4f   : > { %819 = vmatprep.mubr.f32.mxu1 %v257_v16  ;;  %2199 = vmatpush3.bf16.msra.mxu1 %v2198_v14  ;;  %v309_v60 = vld [vmem:[%s2404_s24 + $0x3b0] sm:$0xff]  ;;  %v311_v62 = vld [vmem:[%s2404_s24 + $0x3c0] sm:$0xff]  ;;  %v308_v0 = vld [vmem:[%s2404_s24 + $0x3a8] sm:$0xff] }
  0x50   : > { %2201 = vmatprep.subr.bf16.mxu1 %v2200_v27  ;;  %2167 = vmatpush3.bf16.msra.mxu0 %v2166_v26  ;;  %v310_v1 = vld [vmem:[%s2404_s24 + $0x3b8] sm:$0xff]  ;;  %v485_v3 = vld [vmem:[%s2995_s2 + $0x30] sm:$0xff]  ;;  %v320_v4 = vld [vmem:[%s2404_s24 + $0x408] sm:$0xff] }
  0x51   : > { %675 = vmatmul.mubr.f32.gmra.mrb[14].mxu0 %v254_v20  ;;  %2169 = vmatprep.subr.bf16.mxu0 %v2168_v33  ;;  %v318_v2 = vld [vmem:[%s2404_s24 + $0x3f8] sm:$0xff]  ;;  %v317_v6 = vld [vmem:[%s2404_s24 + $0x3f0] sm:$0xff]  ;;  %v319_v7 = vld [vmem:[%s2404_s24 + $0x400] sm:$0xff] }
  0x52   : > { %820 = vmatmul.mubr.f32.gmra.mrb[14].mxu1 %v256_v24  ;;  %679 = vmatprep.mubr.f32.mxu0 %v264_v25  ;;  %v486_v5 = vld [vmem:[%s2995_s2 + $0x38] sm:$0xff]  ;;  %v327_v8 = vld [vmem:[%s2404_s24 + $0x440] sm:$0xff]  ;;  %v329_v10 = vld [vmem:[%s2404_s24 + $0x450] sm:$0xff] }
  0x53   : > { %824 = vmatprep.mubr.f32.mxu1 %v266_v29  ;;  %2203 = vmatpush3.bf16.msra.mxu1 %v2202_v30  ;;  %v487_v9 = vld [vmem:[%s2995_s2 + $0x40] sm:$0xff]  ;;  %v488_v11 = vld [vmem:[%s2995_s2 + $0x48] sm:$0xff]  ;;  %v326_v12 = vld [vmem:[%s2404_s24 + $0x438] sm:$0xff] }
  0x54   : > { %2171 = vmatpush3.bf16.msra.mxu0 %v2170_v39  ;;  %2236 = vmatprep.subr.bf16.mxu1 %v2524_v43  ;;  %v328_v13 = vld [vmem:[%s2404_s24 + $0x448] sm:$0xff]  ;;  %v489_v15 = vld [vmem:[%s2995_s2 + $0x50] sm:$0xff]  ;;  %v198_v16 = vld [vmem:[%s2404_s24 + $0x38] sm:$0xff] }
  0x55   : > { %680 = vmatmul.mubr.f32.gmra.mrb[16].mxu0 %v263_v36  ;;  %2205 = vmatprep.subr.bf16.mxu0 %v2524_v43  ;;  %v196_v14 = vld [vmem:[%s2404_s24 + $0x28] sm:$0xff]  ;;  %v465_v17 = vld [vmem:[%s2347_s21 + $0x410] sm:$0xff]  ;;  %v466_v18 = vld [vmem:[%s2347_s21 + $0x418] sm:$0xff] }
  0x56   : > { %825 = vmatmul.mubr.f32.gmra.mrb[16].mxu1 %v265_v37  ;;  %684 = vmatprep.mubr.f32.mxu0 %v273_v38  ;;  %v490_v19 = vld [vmem:[%s2995_s2 + $0x58] sm:$0xff]  ;;  %v195_v20 = vld [vmem:[%s2404_s24 + $0x20] sm:$0xff]  ;;  %v197_v22 = vld [vmem:[%s2404_s24 + $0x30] sm:$0xff]  ;;  %v2208_v25 = vpack.c.bf16 %v466_v18, %v465_v17 }
  0x57   : > { %829 = vmatprep.mubr.f32.mxu1 %v275_v42  ;;  %507 = vperm.xlu1 %2263, %v481_v55   ;;  %v491_v21 = vld [vmem:[%s2995_s2 + $0x60] sm:$0xff]  ;;  %v205_v23 = vld [vmem:[%s2404_s24 + $0x70] sm:$0xff]  ;;  %v468_v27 = vld [vmem:[%s2347_s21 + $0x428] sm:$0xff] }
  0x58   : > { %517 = vperm.xlu0 %2262, %v483_v61   ;;  %v207_v24 = vld [vmem:[%s2404_s24 + $0x80] sm:$0xff]  ;;  %v204_v28 = vld [vmem:[%s2404_s24 + $0x68] sm:$0xff]  ;;  %v206_v29 = vld [vmem:[%s2404_s24 + $0x78] sm:$0xff] }
  0x59   : > { %685 = vmatmul.mubr.f32.gmra.mrb[18].mxu0 %v272_v44  ;;  %v467_v26 = vld [vmem:[%s2347_s21 + $0x420] sm:$0xff]  ;;  %v214_v30 = vld [vmem:[%s2404_s24 + $0xb8] sm:$0xff]  ;;  %v216_v31 = vld [vmem:[%s2404_s24 + $0xc8] sm:$0xff] }
  0x5a   : > { %830 = vmatmul.mubr.f32.gmra.mrb[18].mxu1 %v274_v45  ;;  %689 = vmatprep.mubr.f32.mxu0 %v282_v46  ;;  %v2212_v32 = vpack.c.bf16 %v468_v27, %v467_v26  ;;  %v469_v33 = vld [vmem:[%s2347_s21 + $0x430] sm:$0xff]  ;;  %v470_v34 = vld [vmem:[%s2347_s21 + $0x438] sm:$0xff]  ;;  %v215_v36 = vld [vmem:[%s2404_s24 + $0xc0] sm:$0xff] }
  0x5b   : > { %834 = vmatprep.mubr.f32.mxu1 %v284_v47  ;;  %512 = vperm.xlu1 %2263, %v482_v57   ;;  %v213_v35 = vld [vmem:[%s2404_s24 + $0xb0] sm:$0xff]  ;;  %v223_v37 = vld [vmem:[%s2404_s24 + $0x100] sm:$0xff]  ;;  %v2216_v39 = vpack.c.bf16 %v470_v34, %v469_v33  ;;  %v472_v41 = vld [vmem:[%s2347_s21 + $0x448] sm:$0xff] }
  0x5c   : > { %527 = vperm.xlu0 %2262, %v485_v3   ;;  %v225_v38 = vld [vmem:[%s2404_s24 + $0x110] sm:$0xff]  ;;  %v471_v40 = vld [vmem:[%s2347_s21 + $0x440] sm:$0xff]  ;;  %v222_v42 = vld [vmem:[%s2404_s24 + $0xf8] sm:$0xff] }
  0x5d   : > { %690 = vmatmul.mubr.f32.gmra.mrb[20].mxu0 %v281_v48  ;;  %v232_v44 = vld [vmem:[%s2404_s24 + $0x148] sm:$0xff]  ;;  %v234_v45 = vld [vmem:[%s2404_s24 + $0x158] sm:$0xff]  ;;  %v2220_v46 = vpack.c.bf16 %v472_v41, %v471_v40  ;;  %v473_v47 = vld [vmem:[%s2347_s21 + $0x450] sm:$0xff] }
  0x5e   : > { %835 = vmatmul.mubr.f32.gmra.mrb[20].mxu1 %v283_v49  ;;  %694 = vmatprep.mubr.f32.mxu0 %v291_v50  ;;  %v474_v48 = vld [vmem:[%s2347_s21 + $0x458] sm:$0xff]  ;;  %v231_v49 = vld [vmem:[%s2404_s24 + $0x140] sm:$0xff]  ;;  %v233_v50 = vld [vmem:[%s2404_s24 + $0x150] sm:$0xff] }
  0x5f   : > { %839 = vmatprep.mubr.f32.mxu1 %v293_v51  ;;  %522 = vperm.xlu1 %2263, %v484_v63   ;;  %v241_v51 = vld [vmem:[%s2404_s24 + $0x190] sm:$0xff]  ;;  %v476_v55 = vld [vmem:[%s2347_s21 + $0x468] sm:$0xff]  ;;  %v242_v57 = vld [vmem:[%s2404_s24 + $0x198] sm:$0xff] }
  0x60   : > { %537 = vperm.xlu0 %2262, %v487_v9   ;;  %v477_v61 = vld [vmem:[%s2347_s21 + $0x470] sm:$0xff]  ;;  %v267_v9 = vld [vmem:[%s2404_s24 + $0x260] sm:$0xff]  ;;  %v286_v17 = vld [vmem:[%s2404_s24 + $0x2f8] sm:$0xff] }
  0x61   : > { %695 = vmatmul.mubr.f32.gmra.mrb[22].mxu0 %v290_v52  ;;  %v243_v52 = vld [vmem:[%s2404_s24 + $0x1a0] sm:$0xff]  ;;  %v249_v63 = vld [vmem:[%s2404_s24 + $0x1d0] sm:$0xff]  ;;  %v288_v18 = vld [vmem:[%s2404_s24 + $0x308] sm:$0xff] }
  0x62   : > { %840 = vmatmul.mubr.f32.gmra.mrb[22].mxu1 %v292_v53  ;;  %699 = vmatprep.mubr.f32.mxu0 %v300_v54  ;;  %v2224_v53 = vpack.c.bf16 %v474_v48, %v473_v47  ;;  %v475_v54 = vld [vmem:[%s2347_s21 + $0x460] sm:$0xff]  ;;  %v306_v26 = vld [vmem:[%s2404_s24 + $0x398] sm:$0xff]  ;;  %v324_v34 = vld [vmem:[%s2404_s24 + $0x428] sm:$0xff] }
  0x63   : > { %844 = vmatprep.mubr.f32.mxu1 %v302_v56  ;;  %532 = vperm.xlu1 %2263, %v486_v5   ;;  %v240_v56 = vld [vmem:[%s2404_s24 + $0x188] sm:$0xff]  ;;  %v303_v27 = vld [vmem:[%s2404_s24 + $0x380] sm:$0xff]  ;;  %v322_v33 = vld [vmem:[%s2404_s24 + $0x418] sm:$0xff] }
  0x64   : > { %547 = vperm.xlu0 %2262, %v489_v15   ;;  %v260_v5 = vld [vmem:[%s2404_s24 + $0x228] sm:$0xff]  ;;  %v199_v41 = vld [vmem:[%s2404_s24 + $0x40] sm:$0xff]  ;;  %v226_v47 = vld [vmem:[%s2404_s24 + $0x118] sm:$0xff] }
  0x65   : > { %700 = vmatmul.mubr.f32.gmra.mrb[24].mxu0 %v299_v58  ;;  %v250_v58 = vld [vmem:[%s2404_s24 + $0x1d8] sm:$0xff]  ;;  %v276_v15 = vld [vmem:[%s2404_s24 + $0x2a8] sm:$0xff] }
  0x66   : > { %845 = vmatmul.mubr.f32.gmra.mrb[24].mxu1 %v301_v59  ;;  %704 = vmatprep.mubr.f32.mxu0 %v309_v60  ;;  %v252_v59 = vld [vmem:[%s2404_s24 + $0x1e8] sm:$0xff]  ;;  %v2228_v60 = vpack.c.bf16 %v476_v55, %v475_v54  ;;  %v298_v48 = vld [vmem:[%s2404_s24 + $0x358] sm:$0xff]  ;;  %v325_v54 = vld [vmem:[%s2404_s24 + $0x430] sm:$0xff] }
  0x67   : > { %849 = vmatprep.mubr.f32.mxu1 %v311_v62  ;;  %542 = vperm.xlu1 %2263, %v488_v11   ;;  %v478_v62 = vld [vmem:[%s2347_s21 + $0x478] sm:$0xff]  ;;  %v269_v11 = vld [vmem:[%s2404_s24 + $0x270] sm:$0xff]  ;;  %v332_v40 = vld [vmem:[%s2404_s24 + $0x468] sm:$0xff] }
  0x68   : > { %557 = vperm.xlu0 %2262, %v491_v21   ;;  %v2232_v3 = vpack.c.bf16 %v478_v62, %v477_v61  ;;  %v295_v21 = vld [vmem:[%s2404_s24 + $0x340] sm:$0xff]  ;;  %v262_v55 = vld [vmem:[%s2404_s24 + $0x238] sm:$0xff] }
  0x69   : > { %705 = vmatmul.mubr.f32.gmra.mrb[26].mxu0 %v308_v0  ;;  %v251_v0 = vld [vmem:[%s2404_s24 + $0x1e0] sm:$0xff] }
  0x6a   : > { %850 = vmatmul.mubr.f32.gmra.mrb[26].mxu1 %v310_v1  ;;  %709 = vmatprep.mubr.f32.mxu0 %v318_v2  ;;  %v259_v1 = vld [vmem:[%s2404_s24 + $0x220] sm:$0xff]  ;;  %v261_v2 = vld [vmem:[%s2404_s24 + $0x230] sm:$0xff] }
  0x6b   : > { %854 = vmatprep.mubr.f32.mxu1 %v320_v4  ;;  %552 = vperm.xlu1 %2263, %v490_v19   ;;  %v258_v4 = vld [vmem:[%s2404_s24 + $0x218] sm:$0xff]  ;;  %v285_v19 = vld [vmem:[%s2404_s24 + $0x2f0] sm:$0xff] }
  0x6d   : > { %710 = vmatmul.mubr.f32.gmra.mrb[28].mxu0 %v317_v6  ;;  %v268_v6 = vld [vmem:[%s2404_s24 + $0x268] sm:$0xff] }
  0x6e   : > { %855 = vmatmul.mubr.f32.gmra.mrb[28].mxu1 %v319_v7  ;;  %714 = vmatprep.mubr.f32.mxu0 %v327_v8  ;;  %v270_v7 = vld [vmem:[%s2404_s24 + $0x278] sm:$0xff]  ;;  %v492_v8 = vld [vmem:[%s2995_s2 + $0x68] sm:$0xff] }
  0x6f   : > { %859 = vmatprep.mubr.f32.mxu1 %v329_v10  ;;  %v493_v10 = vld [vmem:[%s2995_s2 + $0x70] sm:$0xff]  ;;  %562 = vperm.xlu1 %2263, %v492_v8  }
  0x70   : > { %567 = vperm.xlu0 %2262, %v493_v10  }
  0x71   : > { %715 = vmatmul.mubr.f32.gmra.mrb[30].mxu0 %v326_v12  ;;  %v277_v12 = vld [vmem:[%s2404_s24 + $0x2b0] sm:$0xff] }
  0x72   : > { %860 = vmatmul.mubr.f32.gmra.mrb[30].mxu1 %v328_v13  ;;  %929 = vmatprep.mubr.f32.mxu0 %v196_v14  ;;  %v279_v13 = vld [vmem:[%s2404_s24 + $0x2c0] sm:$0xff]  ;;  %v494_v14 = vld [vmem:[%s2995_s2 + $0x78] sm:$0xff] }
  0x73   : > { %1074 = vmatprep.mubr.f32.mxu1 %v198_v16  ;;  %v278_v16 = vld [vmem:[%s2404_s24 + $0x2b8] sm:$0xff]  ;;  %572 = vperm.xlu1 %2263, %v494_v14  }
  0x75   : > { %930 = vmatmul.mubr.f32.vlgmr.msra.gmra.mrb[32].mxu0 %v195_v20  ;;  %v287_v20 = vld [vmem:[%s2404_s24 + $0x300] sm:$0xff] }
  0x76   : > { %1075 = vmatmul.mubr.f32.vlgmr.msra.gmra.mrb[32].mxu1 %v197_v22  ;;  %934 = vmatprep.mubr.f32.mxu0 %v205_v23  ;;  %v297_v22 = vld [vmem:[%s2404_s24 + $0x350] sm:$0xff]  ;;  %v294_v23 = vld [vmem:[%s2404_s24 + $0x338] sm:$0xff] }
  0x77   : > { %2244 = vmatpush3.bf16.msra.mxu1 %v2524_v43  ;;  %1079 = vmatprep.mubr.f32.mxu1 %v207_v24  ;;  %v296_v24 = vld [vmem:[%s2404_s24 + $0x348] sm:$0xff] }
  0x78   : > { %2207 = vmatpush3.bf16.msra.mxu0 %v2524_v43  ;;  %2237 = vmatprep.subr.bf16.mxu1 %v2208_v25  ;;  %v224_v43 = vld [vmem:[%s2404_s24 + $0x108] sm:$0xff] }
  0x79   : > { %935 = vmatmul.mubr.f32.gmra.mrb[34].mxu0 %v204_v28  ;;  %2209 = vmatprep.subr.bf16.mxu0 %v2208_v25  ;;  %v305_v28 = vld [vmem:[%s2404_s24 + $0x390] sm:$0xff] }
  0x7a   : > { %1080 = vmatmul.mubr.f32.gmra.mrb[34].mxu1 %v206_v29  ;;  %939 = vmatprep.mubr.f32.mxu0 %v214_v30  ;;  %v313_v29 = vld [vmem:[%s2404_s24 + $0x3d0] sm:$0xff]  ;;  %v315_v30 = vld [vmem:[%s2404_s24 + $0x3e0] sm:$0xff] }
  0x7b   : > { %1084 = vmatprep.mubr.f32.mxu1 %v216_v31  ;;  %2245 = vmatpush3.bf16.msra.mxu1 %v2208_v25  ;;  %v312_v31 = vld [vmem:[%s2404_s24 + $0x3c8] sm:$0xff] }
  0x7c   : > { %2211 = vmatpush3.bf16.msra.mxu0 %v2208_v25  ;;  %2238 = vmatprep.subr.bf16.mxu1 %v2212_v32  ;;  %v304_v25 = vld [vmem:[%s2404_s24 + $0x388] sm:$0xff] }
  0x7d   : > { %940 = vmatmul.mubr.f32.gmra.mrb[36].mxu0 %v213_v35  ;;  %2213 = vmatprep.subr.bf16.mxu0 %v2212_v32  ;;  %v321_v35 = vld [vmem:[%s2404_s24 + $0x410] sm:$0xff] }
  0x7e   : > { %1085 = vmatmul.mubr.f32.gmra.mrb[36].mxu1 %v215_v36  ;;  %944 = vmatprep.mubr.f32.mxu0 %v223_v37  ;;  %v323_v36 = vld [vmem:[%s2404_s24 + $0x420] sm:$0xff] }
  0x7f   : > { %1089 = vmatprep.mubr.f32.mxu1 %v225_v38  ;;  %2246 = vmatpush3.bf16.msra.mxu1 %v2212_v32  ;;  %v331_v37 = vld [vmem:[%s2404_s24 + $0x460] sm:$0xff]  ;;  %v333_v38 = vld [vmem:[%s2404_s24 + $0x470] sm:$0xff] }
  0x80   : > { %2215 = vmatpush3.bf16.msra.mxu0 %v2212_v32  ;;  %2239 = vmatprep.subr.bf16.mxu1 %v2216_v39  ;;  %v314_v32 = vld [vmem:[%s2404_s24 + $0x3d8] sm:$0xff] }
  0x81   : > { %945 = vmatmul.mubr.f32.gmra.mrb[38].mxu0 %v222_v42  ;;  %2217 = vmatprep.subr.bf16.mxu0 %v2216_v39  ;;  %v271_v42 = vld [vmem:[%s2404_s24 + $0x280] sm:$0xff] }
  0x82   : > { %1090 = vmatmul.mubr.f32.gmra.mrb[38].mxu1 %v224_v43  ;;  %949 = vmatprep.mubr.f32.mxu0 %v232_v44  ;;  %v208_v43 = vld [vmem:[%s2404_s24 + $0x88] sm:$0xff] }
  0x83   : > { %1094 = vmatprep.mubr.f32.mxu1 %v234_v45  ;;  %2247 = vmatpush3.bf16.msra.mxu1 %v2216_v39  ;;  %v280_v44 = vld [vmem:[%s2404_s24 + $0x2c8] sm:$0xff]  ;;  %v217_v45 = vld [vmem:[%s2404_s24 + $0xd0] sm:$0xff] }
  0x84   : > { %2219 = vmatpush3.bf16.msra.mxu0 %v2216_v39  ;;  %2240 = vmatprep.subr.bf16.mxu1 %v2220_v46  ;;  %v330_v39 = vld [vmem:[%s2404_s24 + $0x458] sm:$0xff] }
  0x85   : > { %950 = vmatmul.mubr.f32.gmra.mrb[40].mxu0 %v231_v49  ;;  %2221 = vmatprep.subr.bf16.mxu0 %v2220_v46  ;;  %v235_v49 = vld [vmem:[%s2404_s24 + $0x160] sm:$0xff] }
  0x86   : > { %1095 = vmatmul.mubr.f32.gmra.mrb[40].mxu1 %v233_v50  ;;  %954 = vmatprep.mubr.f32.mxu0 %v241_v51  ;;  %v307_v50 = vld [vmem:[%s2404_s24 + $0x3a0] sm:$0xff]  ;;  %v244_v51 = vld [vmem:[%s2404_s24 + $0x1a8] sm:$0xff] }
  0x87   : > { %1099 = vmatprep.mubr.f32.mxu1 %v243_v52  ;;  %2248 = vmatpush3.bf16.msra.mxu1 %v2220_v46  ;;  %v316_v52 = vld [vmem:[%s2404_s24 + $0x3e8] sm:$0xff] }
  0x88   : > { %2223 = vmatpush3.bf16.msra.mxu0 %v2220_v46  ;;  %2241 = vmatprep.subr.bf16.mxu1 %v2224_v53  ;;  %v289_v46 = vld [vmem:[%s2404_s24 + $0x310] sm:$0xff] }
  0x89   : > { %955 = vmatmul.mubr.f32.gmra.mrb[42].mxu0 %v240_v56  ;;  %2225 = vmatprep.subr.bf16.mxu0 %v2224_v53  ;;  %v334_v56 = vld [vmem:[%s2404_s24 + $0x478] sm:$0xff] }
  0x8a   : > { %1100 = vmatmul.mubr.f32.gmra.mrb[42].mxu1 %v242_v57  ;;  %959 = vmatprep.mubr.f32.mxu0 %v250_v58  ;;  %v498_v57 = vpop.permute.xlu0 %497 }
  0x8b   : > { %1104 = vmatprep.mubr.f32.mxu1 %v252_v59  ;;  %2249 = vmatpush3.bf16.msra.mxu1 %v2224_v53 }
  0x8c   : > { %2227 = vmatpush3.bf16.msra.mxu0 %v2224_v53  ;;  %2242 = vmatprep.subr.bf16.mxu1 %v2228_v60  ;;  %v253_v53 = vld [vmem:[%s2404_s24 + $0x1f0] sm:$0xff]  ;;  %s1667_s24 = sshll.u32 %s2998_s13, 7 }
  0x8d   : > { %960 = vmatmul.mubr.f32.gmra.mrb[44].mxu0 %v249_v63  ;;  %2229 = vmatprep.subr.bf16.mxu0 %v2228_v60  ;;  %s2902_s30 = scalar_lea.vmem %s2996_s3, %s1667_s24 }
  0x8e   : > { %1105 = vmatmul.mubr.f32.gmra.mrb[44].mxu1 %v251_v0  ;;  %964 = vmatprep.mubr.f32.mxu0 %v259_v1 }
  0x8f   : > { %1109 = vmatprep.mubr.f32.mxu1 %v261_v2  ;;  %2250 = vmatpush3.bf16.msra.mxu1 %v2228_v60  ;;  %v503_v2 = vpop.permute.xlu0 %502 }
  0x90   : > { %2231 = vmatpush3.bf16.msra.mxu0 %v2228_v60  ;;  %2243 = vmatprep.subr.bf16.mxu1 %v2232_v3 }
  0x91   : > { %965 = vmatmul.mubr.f32.gmra.mrb[46].mxu0 %v258_v4  ;;  %2233 = vmatprep.subr.bf16.mxu0 %v2232_v3 }
  0x92   : > { %1110 = vmatmul.mubr.f32.gmra.mrb[46].mxu1 %v260_v5  ;;  %969 = vmatprep.mubr.f32.mxu0 %v268_v6 }
  0x93   : > { %1114 = vmatprep.mubr.f32.mxu1 %v270_v7  ;;  %2251 = vmatpush3.bf16.msra.mxu1 %v2232_v3 }
  0x94   : > { %2235 = vmatpush3.bf16.msra.mxu0 %v2232_v3 }
  0x95   : > { %970 = vmatmul.mubr.f32.gmra.mrb[48].mxu0 %v267_v9 }
  0x96   : > { %1115 = vmatmul.mubr.f32.gmra.mrb[48].mxu1 %v269_v11  ;;  %974 = vmatprep.mubr.f32.mxu0 %v277_v12 }
  0x97   : > { %1119 = vmatprep.mubr.f32.mxu1 %v279_v13 }
  0x99   : > { %975 = vmatmul.mubr.f32.gmra.mrb[50].mxu0 %v276_v15 }
  0x9a   : > { %1120 = vmatmul.mubr.f32.gmra.mrb[50].mxu1 %v278_v16  ;;  %979 = vmatprep.mubr.f32.mxu0 %v286_v17 }
  0x9b   : > { %1124 = vmatprep.mubr.f32.mxu1 %v288_v18 }
  0x9d   : > { %980 = vmatmul.mubr.f32.gmra.mrb[52].mxu0 %v285_v19 }
  0x9e   : > { %1125 = vmatmul.mubr.f32.gmra.mrb[52].mxu1 %v287_v20  ;;  %984 = vmatprep.mubr.f32.mxu0 %v295_v21 }
  0x9f   : > { %1129 = vmatprep.mubr.f32.mxu1 %v297_v22 }
  0xa1   : > { %985 = vmatmul.mubr.f32.gmra.mrb[54].mxu0 %v294_v23 }
  0xa2   : > { %1130 = vmatmul.mubr.f32.gmra.mrb[54].mxu1 %v296_v24  ;;  %989 = vmatprep.mubr.f32.mxu0 %v304_v25 }
  0xa3   : > { %1134 = vmatprep.mubr.f32.mxu1 %v306_v26 }
  0xa5   : > { %990 = vmatmul.mubr.f32.gmra.mrb[56].mxu0 %v303_v27 }
  0xa6   : > { %1135 = vmatmul.mubr.f32.gmra.mrb[56].mxu1 %v305_v28  ;;  %994 = vmatprep.mubr.f32.mxu0 %v313_v29 }
  0xa7   : > { %1139 = vmatprep.mubr.f32.mxu1 %v315_v30 }
  0xa9   : > { %995 = vmatmul.mubr.f32.gmra.mrb[58].mxu0 %v312_v31 }
  0xaa   : > { %1140 = vmatmul.mubr.f32.gmra.mrb[58].mxu1 %v314_v32  ;;  %999 = vmatprep.mubr.f32.mxu0 %v322_v33 }
  0xab   : > { %1144 = vmatprep.mubr.f32.mxu1 %v324_v34 }
  0xad   : > { %1000 = vmatmul.mubr.f32.gmra.mrb[60].mxu0 %v321_v35 }
  0xae   : > { %1145 = vmatmul.mubr.f32.gmra.mrb[60].mxu1 %v323_v36  ;;  %1004 = vmatprep.mubr.f32.mxu0 %v331_v37 }
  0xaf   : > { %1149 = vmatprep.mubr.f32.mxu1 %v333_v38 }
  0xb1   : > { %1005 = vmatmul.mubr.f32.gmra.mrb[62].mxu0 %v330_v39 }
  0xb2   : > { %1150 = vmatmul.mubr.f32.gmra.mrb[62].mxu1 %v332_v40  ;;  %2052 = vmatprep.mubr.f32.mxu0 %v199_v41 }
  0xb3   : > { %2064 = vmatprep.mubr.f32.mxu1 %v271_v42 }
  0xb5   : > { %2053 = vmatmul.mubr.f32.vlgmr.msra.gmra.mrb[64].mxu0 %v208_v43 }
  0xb6   : > { %2065 = vmatmul.mubr.f32.vlgmr.msra.gmra.mrb[64].mxu1 %v280_v44  ;;  %2055 = vmatprep.mubr.f32.mxu0 %v217_v45 }
  0xb7   : > { %2067 = vmatprep.mubr.f32.mxu1 %v289_v46 }
  0xb9   : > { %2056 = vmatmul.mubr.f32.gmra.mrb[66].mxu0 %v226_v47 }
  0xba   : > { %2068 = vmatmul.mubr.f32.gmra.mrb[66].mxu1 %v298_v48  ;;  %2058 = vmatprep.mubr.f32.mxu0 %v235_v49 }
  0xbb   : > { %2070 = vmatprep.mubr.f32.mxu1 %v307_v50 }
  0xbd   : > { %2059 = vmatmul.mubr.f32.gmra.mrb[68].mxu0 %v244_v51 }
  0xbe   : > { %2071 = vmatmul.mubr.f32.gmra.mrb[68].mxu1 %v316_v52  ;;  %2061 = vmatprep.mubr.f32.mxu0 %v253_v53 }
  0xbf   : > { %2073 = vmatprep.mubr.f32.mxu1 %v325_v54 }
  0xc1   : > { %2062 = vmatmul.mubr.f32.gmra.mrb[70].mxu0 %v262_v55 }
  0xc2   : > { %2074 = vmatmul.mubr.f32.gmra.mrb[70].mxu1 %v334_v56 }
  0xd6   : > { %v508_v8 = vpop.permute.xlu1 %507 }
  0xd7   : > { %v518_v29 = vpop.permute.xlu0 %517 }
  0xda   : > { %v513_v20 = vpop.permute.xlu1 %512 }
  0xdb   : > { %v528_v47 = vpop.permute.xlu0 %527 }
  0xde   : > { %v523_v38 = vpop.permute.xlu1 %522 }
  0xe2   : > { %v533_v56 = vpop.permute.xlu1 %532 }
 0x108   : > { %v1700_v58 = vpop.f32.mrb[0].mxu0 }
 0x109   : > { %v1780_v59 = vpop.f32.mrb[0].mxu1  ;;  %v1701_v60 = vpop.f32.mrb[1].mxu0 }
 0x10a   : > { %v1702_v61 = vadd.f32 %v1701_v60, %v1700_v58  ;;  %v1781_v62 = vpop.f32.mrb[1].mxu1 }
 0x10b   : > { %v1782_v63 = vadd.f32 %v1781_v62, %v1780_v59 }
 0x10c   : > { %v642_v0 = vadd.f32 %v1702_v61, %v498_v57  ;;  %v1703_v1 = vpop.f32.mrb[2].mxu0 }
 0x10d   : > { %v1783_v3 = vpop.f32.mrb[2].mxu1  ;;  %v1704_v4 = vpop.f32.mrb[3].mxu0 }
 0x10e   : > { %v2692_v5 = vadd.f32 %v1782_v63, %v642_v0  ;;  %v1705_v6 = vadd.f32 %v1704_v4, %v1703_v1  ;;  %v1784_v7 = vpop.f32.mrb[3].mxu1  ;;  %v538_v1 = vpop.permute.xlu0 %537 }
 0x10f   : > { %v1785_v9 = vadd.f32 %v1784_v7, %v1783_v3 }
 0x110   : > { %v647_v10 = vadd.f32 %v1705_v6, %v503_v2  ;;  %v1706_v11 = vpop.f32.mrb[4].mxu0 }
 0x111   : > { %v1786_v12 = vpop.f32.mrb[4].mxu1  ;;  %v1707_v13 = vpop.f32.mrb[5].mxu0 }
 0x112   : > { %v2694_v14 = vadd.f32 %v1785_v9, %v647_v10  ;;  %v1708_v15 = vadd.f32 %v1707_v13, %v1706_v11  ;;  %v1787_v16 = vpop.f32.mrb[5].mxu1  ;;  %v543_v11 = vpop.permute.xlu1 %542 }
 0x113   : > { %v1788_v17 = vadd.f32 %v1787_v16, %v1786_v12 }
 0x114   : > { %v652_v18 = vadd.f32 %v1708_v15, %v508_v8  ;;  %v1709_v19 = vpop.f32.mrb[6].mxu0 }
 0x115   : > { %v1789_v21 = vpop.f32.mrb[6].mxu1  ;;  %v1710_v22 = vpop.f32.mrb[7].mxu0 }
 0x116   : > { %v2696_v23 = vadd.f32 %v1788_v17, %v652_v18  ;;  %v1711_v24 = vadd.f32 %v1710_v22, %v1709_v19  ;;  %v1790_v25 = vpop.f32.mrb[7].mxu1 }
 0x117   : > { %v1791_v26 = vadd.f32 %v1790_v25, %v1789_v21  ;;  %v548_v21 = vpop.permute.xlu0 %547 }
 0x118   : > { %v657_v27 = vadd.f32 %v1711_v24, %v513_v20  ;;  %v1712_v28 = vpop.f32.mrb[8].mxu0 }
 0x119   : > { %v1792_v30 = vpop.f32.mrb[8].mxu1  ;;  %v1713_v31 = vpop.f32.mrb[9].mxu0 }
 0x11a   : > { %v2698_v32 = vadd.f32 %v1791_v26, %v657_v27  ;;  %v1714_v33 = vadd.f32 %v1713_v31, %v1712_v28  ;;  %v1793_v34 = vpop.f32.mrb[9].mxu1  ;;  %v553_v31 = vpop.permute.xlu1 %552 }
 0x11b   : > { %v1794_v35 = vadd.f32 %v1793_v34, %v1792_v30 }
 0x11c   : > { %v662_v36 = vadd.f32 %v1714_v33, %v518_v29  ;;  %v1715_v37 = vpop.f32.mrb[10].mxu0 }
 0x11d   : > { %v1795_v39 = vpop.f32.mrb[10].mxu1  ;;  %v1716_v40 = vpop.f32.mrb[11].mxu0 }
 0x11e   : > { %v2700_v41 = vadd.f32 %v1794_v35, %v662_v36  ;;  %v1717_v42 = vadd.f32 %v1716_v40, %v1715_v37  ;;  %v1796_v43 = vpop.f32.mrb[11].mxu1 }
 0x11f   : > { %v1797_v44 = vadd.f32 %v1796_v43, %v1795_v39 }
 0x120   : > { %v667_v45 = vadd.f32 %v1717_v42, %v523_v38  ;;  %v1718_v46 = vpop.f32.mrb[12].mxu0  ;;  %v558_v42 = vpop.permute.xlu0 %557 }
 0x121   : > { %v1798_v48 = vpop.f32.mrb[12].mxu1  ;;  %v1719_v49 = vpop.f32.mrb[13].mxu0 }
 0x122   : > { %v2702_v50 = vadd.f32 %v1797_v44, %v667_v45  ;;  %v1720_v51 = vadd.f32 %v1719_v49, %v1718_v46  ;;  %v1799_v52 = vpop.f32.mrb[13].mxu1 }
 0x123   : > { %v1800_v53 = vadd.f32 %v1799_v52, %v1798_v48  ;;  %v563_v52 = vpop.permute.xlu1 %562 }
 0x124   : > { %v672_v54 = vadd.f32 %v1720_v51, %v528_v47  ;;  %v1721_v55 = vpop.f32.mrb[14].mxu0 }
 0x125   : > { %v1801_v57 = vpop.f32.mrb[14].mxu1  ;;  %v1722_v58 = vpop.f32.mrb[15].mxu0 }
 0x126   : > { %v2704_v59 = vadd.f32 %v1800_v53, %v672_v54  ;;  %v1723_v60 = vadd.f32 %v1722_v58, %v1721_v55  ;;  %v1802_v61 = vpop.f32.mrb[15].mxu1 }
 0x127   : > { %v1803_v62 = vadd.f32 %v1802_v61, %v1801_v57 }
 0x128   : > { %v677_v63 = vadd.f32 %v1723_v60, %v533_v56  ;;  %v1724_v0 = vpop.f32.mrb[16].mxu0 }
 0x129   : > { %v1804_v2 = vpop.f32.mrb[16].mxu1  ;;  %v1725_v3 = vpop.f32.mrb[17].mxu0 }
 0x12a   : > { %v2706_v4 = vadd.f32 %v1803_v62, %v677_v63  ;;  %v1726_v6 = vadd.f32 %v1725_v3, %v1724_v0  ;;  %v1805_v7 = vpop.f32.mrb[17].mxu1  ;;  %v568_v62 = vpop.permute.xlu0 %567 }
 0x12b   : > { %v1806_v8 = vadd.f32 %v1805_v7, %v1804_v2 }
 0x12c   : > { %v682_v9 = vadd.f32 %v1726_v6, %v538_v1  ;;  %v1727_v10 = vpop.f32.mrb[18].mxu0 }
 0x12d   : > { %v1807_v12 = vpop.f32.mrb[18].mxu1  ;;  %v1728_v13 = vpop.f32.mrb[19].mxu0 }
 0x12e   : > { %v2708_v15 = vadd.f32 %v1806_v8, %v682_v9  ;;  %v1729_v16 = vadd.f32 %v1728_v13, %v1727_v10  ;;  %v1808_v17 = vpop.f32.mrb[19].mxu1  ;;  %v573_v9 = vpop.permute.xlu1 %572 }
 0x12f   : > { %v1809_v18 = vadd.f32 %v1808_v17, %v1807_v12 }
 0x130   : > { %v687_v19 = vadd.f32 %v1729_v16, %v543_v11  ;;  %v1730_v20 = vpop.f32.mrb[20].mxu0 }
 0x131   : > { %v1810_v22 = vpop.f32.mrb[20].mxu1  ;;  %v1731_v24 = vpop.f32.mrb[21].mxu0 }
 0x132   : > { %v2710_v25 = vadd.f32 %v1809_v18, %v687_v19  ;;  %v1732_v26 = vadd.f32 %v1731_v24, %v1730_v20  ;;  %v1811_v27 = vpop.f32.mrb[21].mxu1 }
 0x133   : > { %v1812_v28 = vadd.f32 %v1811_v27, %v1810_v22 }
 0x134   : > { %v692_v29 = vadd.f32 %v1732_v26, %v548_v21  ;;  %v1733_v30 = vpop.f32.mrb[22].mxu0 }
 0x135   : > { %v1813_v33 = vpop.f32.mrb[22].mxu1  ;;  %v1734_v34 = vpop.f32.mrb[23].mxu0 }
 0x136   : > { %v2712_v35 = vadd.f32 %v1812_v28, %v692_v29  ;;  %v1735_v36 = vadd.f32 %v1734_v34, %v1733_v30  ;;  %v1814_v37 = vpop.f32.mrb[23].mxu1 }
 0x137   : > { %v1815_v38 = vadd.f32 %v1814_v37, %v1813_v33 }
 0x138   : > { %v697_v39 = vadd.f32 %v1735_v36, %v553_v31  ;;  %v1736_v40 = vpop.f32.mrb[24].mxu0 }
 0x139   : > { %v1816_v43 = vpop.f32.mrb[24].mxu1  ;;  %v1737_v44 = vpop.f32.mrb[25].mxu0 }
 0x13a   : > { %v2714_v45 = vadd.f32 %v1815_v38, %v697_v39  ;;  %v1738_v46 = vadd.f32 %v1737_v44, %v1736_v40  ;;  %v1817_v47 = vpop.f32.mrb[25].mxu1 }
 0x13b   : > { %v1818_v48 = vadd.f32 %v1817_v47, %v1816_v43 }
 0x13c   : > { %v702_v49 = vadd.f32 %v1738_v46, %v558_v42  ;;  %v1739_v51 = vpop.f32.mrb[26].mxu0 }
 0x13d   : > { %v1819_v53 = vpop.f32.mrb[26].mxu1  ;;  %v1740_v54 = vpop.f32.mrb[27].mxu0 }
 0x13e   : > { %v2716_v55 = vadd.f32 %v1818_v48, %v702_v49  ;;  %v1741_v56 = vadd.f32 %v1740_v54, %v1739_v51  ;;  %v1820_v57 = vpop.f32.mrb[27].mxu1 }
 0x13f   : > { %v1821_v58 = vadd.f32 %v1820_v57, %v1819_v53 }
 0x140   : > { %v707_v60 = vadd.f32 %v1741_v56, %v563_v52  ;;  %v1742_v61 = vpop.f32.mrb[28].mxu0 }
 0x141   : > { %v1822_v63 = vpop.f32.mrb[28].mxu1  ;;  %v1743_v0 = vpop.f32.mrb[29].mxu0 }
 0x142   : > { %v2718_v1 = vadd.f32 %v1821_v58, %v707_v60  ;;  %v1744_v2 = vadd.f32 %v1743_v0, %v1742_v61  ;;  %v1823_v3 = vpop.f32.mrb[29].mxu1 }
 0x143   : > { %v1824_v6 = vadd.f32 %v1823_v3, %v1822_v63 }
 0x144   : > { %v712_v7 = vadd.f32 %v1744_v2, %v568_v62  ;;  %v1745_v8 = vpop.f32.mrb[30].mxu0 }
 0x145   : > { %v1825_v10 = vpop.f32.mrb[30].mxu1  ;;  %v1746_v11 = vpop.f32.mrb[31].mxu0 }
 0x146   : > { %v2720_v12 = vadd.f32 %v1824_v6, %v712_v7  ;;  %v1747_v13 = vadd.f32 %v1746_v11, %v1745_v8  ;;  %v1826_v16 = vpop.f32.mrb[31].mxu1 }
 0x147   : > { %v1827_v17 = vadd.f32 %v1826_v16, %v1825_v10 }
 0x148   : > { %v717_v18 = vadd.f32 %v1747_v13, %v573_v9  ;;  %v1860_v19 = vpop.f32.mrb[32].mxu0 }
 0x149   : > { %v1940_v20 = vpop.f32.mrb[32].mxu1  ;;  %v1861_v21 = vpop.f32.mrb[33].mxu0 }
 0x14a   : > { %v2722_v22 = vadd.f32 %v1827_v17, %v717_v18  ;;  %v1862_v24 = vadd.f32 %v1861_v21, %v1860_v19  ;;  %v1941_v26 = vpop.f32.mrb[33].mxu1 }
 0x14b   : > { %v1942_v27 = vadd.f32 %v1941_v26, %v1940_v20 }
 0x14c   : > { %v932_v28 = vadd.f32 %v1862_v24, %v2692_v5  ;;  %v1863_v29 = vpop.f32.mrb[34].mxu0 }
 0x14d   : > { %v1943_v30 = vpop.f32.mrb[34].mxu1  ;;  %v1864_v31 = vpop.f32.mrb[35].mxu0 }
 0x14e   : > { %v1865_v33 = vadd.f32 %v1864_v31, %v1863_v29  ;;  %v1944_v34 = vpop.f32.mrb[35].mxu1  ;;  %v2725_v36 = vadd.f32 %v1942_v27, %v932_v28 }
 0x14f   : > { %v1945_v37 = vadd.f32 %v1944_v34, %v1943_v30 }
 0x150   : > { %v937_v38 = vadd.f32 %v1865_v33, %v2694_v14  ;;  %v1866_v39 = vpop.f32.mrb[36].mxu0 }
 0x151   : > { %v1946_v40 = vpop.f32.mrb[36].mxu1  ;;  %v1867_v42 = vpop.f32.mrb[37].mxu0 }
 0x152   : > { %v1868_v43 = vadd.f32 %v1867_v42, %v1866_v39  ;;  %v1947_v44 = vpop.f32.mrb[37].mxu1  ;;  %v2728_v46 = vadd.f32 %v1945_v37, %v937_v38 }
 0x153   : > { %v1948_v47 = vadd.f32 %v1947_v44, %v1946_v40 }
 0x154   : > { %v942_v5 = vadd.f32 %v1868_v43, %v2696_v23  ;;  %v1869_v48 = vpop.f32.mrb[38].mxu0 }
 0x155   : > { %v1949_v49 = vpop.f32.mrb[38].mxu1  ;;  %v1870_v51 = vpop.f32.mrb[39].mxu0 }
 0x156   : > { %v1871_v52 = vadd.f32 %v1870_v51, %v1869_v48  ;;  %v1950_v53 = vpop.f32.mrb[39].mxu1  ;;  %v2731_v54 = vadd.f32 %v1948_v47, %v942_v5 }
 0x157   : > { %v1951_v56 = vadd.f32 %v1950_v53, %v1949_v49 }
 0x158   : > { %v947_v14 = vadd.f32 %v1871_v52, %v2698_v32  ;;  %v1872_v57 = vpop.f32.mrb[40].mxu0 }
 0x159   : > { %v1952_v58 = vpop.f32.mrb[40].mxu1  ;;  %v1873_v60 = vpop.f32.mrb[41].mxu0 }
 0x15a   : > { %v1874_v61 = vadd.f32 %v1873_v60, %v1872_v57  ;;  %v1953_v62 = vpop.f32.mrb[41].mxu1  ;;  %v2734_v63 = vadd.f32 %v1951_v56, %v947_v14 }
 0x15b   : > { %v1954_v0 = vadd.f32 %v1953_v62, %v1952_v58 }
 0x15c   : > { %v952_v23 = vadd.f32 %v1874_v61, %v2700_v41  ;;  %v1875_v2 = vpop.f32.mrb[42].mxu0 }
 0x15d   : > { %v1955_v3 = vpop.f32.mrb[42].mxu1  ;;  %v1876_v6 = vpop.f32.mrb[43].mxu0 }
 0x15e   : > { %v1877_v7 = vadd.f32 %v1876_v6, %v1875_v2  ;;  %v1956_v8 = vpop.f32.mrb[43].mxu1  ;;  %v2737_v9 = vadd.f32 %v1954_v0, %v952_v23 }
 0x15f   : > { %v1957_v10 = vadd.f32 %v1956_v8, %v1955_v3 }
 0x160   : > { %v957_v32 = vadd.f32 %v1877_v7, %v2702_v50  ;;  %v1878_v11 = vpop.f32.mrb[44].mxu0 }
 0x161   : > { %v1958_v13 = vpop.f32.mrb[44].mxu1  ;;  %v1879_v16 = vpop.f32.mrb[45].mxu0 }
 0x162   : > { %v1880_v17 = vadd.f32 %v1879_v16, %v1878_v11  ;;  %v1959_v18 = vpop.f32.mrb[45].mxu1  ;;  %v2740_v19 = vadd.f32 %v1957_v10, %v957_v32 }
 0x163   : > { %v1960_v20 = vadd.f32 %v1959_v18, %v1958_v13 }
 0x164   : > { %v962_v41 = vadd.f32 %v1880_v17, %v2704_v59  ;;  %v1881_v21 = vpop.f32.mrb[46].mxu0 }
 0x165   : > { %v1961_v24 = vpop.f32.mrb[46].mxu1  ;;  %v1882_v26 = vpop.f32.mrb[47].mxu0 }
 0x166   : > { %v1883_v27 = vadd.f32 %v1882_v26, %v1881_v21  ;;  %v1962_v28 = vpop.f32.mrb[47].mxu1  ;;  %v2743_v29 = vadd.f32 %v1960_v20, %v962_v41 }
 0x167   : > { %v1963_v30 = vadd.f32 %v1962_v28, %v1961_v24 }
 0x168   : > { %v967_v50 = vadd.f32 %v1883_v27, %v2706_v4  ;;  %v1884_v31 = vpop.f32.mrb[48].mxu0 }
 0x169   : > { %v1964_v33 = vpop.f32.mrb[48].mxu1  ;;  %v1885_v34 = vpop.f32.mrb[49].mxu0 }
 0x16a   : > { %v1886_v37 = vadd.f32 %v1885_v34, %v1884_v31  ;;  %v1965_v38 = vpop.f32.mrb[49].mxu1  ;;  %v2746_v39 = vadd.f32 %v1963_v30, %v967_v50 }
 0x16b   : > { %v1966_v40 = vadd.f32 %v1965_v38, %v1964_v33 }
 0x16c   : > { %v972_v59 = vadd.f32 %v1886_v37, %v2708_v15  ;;  %v1887_v42 = vpop.f32.mrb[50].mxu0 }
 0x16d   : > { %v1967_v43 = vpop.f32.mrb[50].mxu1  ;;  %v1888_v44 = vpop.f32.mrb[51].mxu0 }
 0x16e   : > { %v1889_v47 = vadd.f32 %v1888_v44, %v1887_v42  ;;  %v1968_v5 = vpop.f32.mrb[51].mxu1  ;;  %v1117_v48 = vadd.f32 %v1966_v40, %v972_v59 }
 0x16f   : > { %v1969_v49 = vadd.f32 %v1968_v5, %v1967_v43 }
 0x170   : > { %v977_v51 = vadd.f32 %v1889_v47, %v2710_v25  ;;  %v1890_v4 = vpop.f32.mrb[52].mxu0 }
 0x171   : > { %v1970_v52 = vpop.f32.mrb[52].mxu1  ;;  %v1891_v53 = vpop.f32.mrb[53].mxu0 }
 0x172   : > { %v1892_v56 = vadd.f32 %v1891_v53, %v1890_v4  ;;  %v1971_v14 = vpop.f32.mrb[53].mxu1  ;;  %v1122_v57 = vadd.f32 %v1969_v49, %v977_v51 }
 0x173   : > { %v1972_v58 = vadd.f32 %v1971_v14, %v1970_v52 }
 0x174   : > { %v982_v60 = vadd.f32 %v1892_v56, %v2712_v35  ;;  %v1893_v61 = vpop.f32.mrb[54].mxu0 }
 0x175   : > { %v1973_v15 = vpop.f32.mrb[54].mxu1  ;;  %v1894_v62 = vpop.f32.mrb[55].mxu0 }
 0x176   : > { %v1895_v0 = vadd.f32 %v1894_v62, %v1893_v61  ;;  %v1974_v23 = vpop.f32.mrb[55].mxu1  ;;  %v1127_v2 = vadd.f32 %v1972_v58, %v982_v60 }
 0x177   : > { %v1975_v3 = vadd.f32 %v1974_v23, %v1973_v15 }
 0x178   : > { %v987_v6 = vadd.f32 %v1895_v0, %v2714_v45  ;;  %v1896_v7 = vpop.f32.mrb[56].mxu0 }
 0x179   : > { %v1976_v25 = vpop.f32.mrb[56].mxu1  ;;  %v1897_v8 = vpop.f32.mrb[57].mxu0 }
 0x17a   : > { %v1898_v10 = vadd.f32 %v1897_v8, %v1896_v7  ;;  %v1977_v32 = vpop.f32.mrb[57].mxu1  ;;  %v1132_v11 = vadd.f32 %v1975_v3, %v987_v6 }
 0x17b   : > { %v1978_v13 = vadd.f32 %v1977_v32, %v1976_v25 }
 0x17c   : > { %v992_v16 = vadd.f32 %v1898_v10, %v2716_v55  ;;  %v1899_v17 = vpop.f32.mrb[58].mxu0 }
 0x17d   : > { %v1979_v35 = vpop.f32.mrb[58].mxu1  ;;  %v1900_v18 = vpop.f32.mrb[59].mxu0 }
 0x17e   : > { %v1901_v20 = vadd.f32 %v1900_v18, %v1899_v17  ;;  %v1980_v41 = vpop.f32.mrb[59].mxu1  ;;  %v1137_v21 = vadd.f32 %v1978_v13, %v992_v16 }
 0x17f   : > { %v1981_v24 = vadd.f32 %v1980_v41, %v1979_v35 }
 0x180   : > { %v997_v26 = vadd.f32 %v1901_v20, %v2718_v1  ;;  %v1902_v27 = vpop.f32.mrb[60].mxu0 }
 0x181   : > { %v1982_v45 = vpop.f32.mrb[60].mxu1  ;;  %v1903_v28 = vpop.f32.mrb[61].mxu0 }
 0x182   : > { %v1904_v30 = vadd.f32 %v1903_v28, %v1902_v27  ;;  %v1983_v50 = vpop.f32.mrb[61].mxu1  ;;  %v1142_v31 = vadd.f32 %v1981_v24, %v997_v26 }
 0x183   : > { %v1984_v33 = vadd.f32 %v1983_v50, %v1982_v45 }
 0x184   : > { %v1002_v34 = vadd.f32 %v1904_v30, %v2720_v12  ;;  %v1905_v37 = vpop.f32.mrb[62].mxu0 }
 0x185   : > { %v1985_v55 = vpop.f32.mrb[62].mxu1  ;;  %v1906_v38 = vpop.f32.mrb[63].mxu0 }
 0x186   : > { %v1907_v40 = vadd.f32 %v1906_v38, %v1905_v37  ;;  %v1986_v59 = vpop.f32.mrb[63].mxu1  ;;  %v1147_v42 = vadd.f32 %v1984_v33, %v1002_v34 }
 0x187   : > { %v1987_v43 = vadd.f32 %v1986_v59, %v1985_v55 }
 0x188   : > { %v1007_v44 = vadd.f32 %v1907_v40, %v2722_v22  ;;  %v2054_v47 = vpop.f32.mrb[64].mxu0 }
 0x189   : > { %v2757_v1 = vadd.f32 %v2054_v47, %v2728_v46  ;;  %v2066_v5 = vpop.f32.mrb[64].mxu1  ;;  %v1221_v49 = vpop.f32.mrb[65].mxu0 }
 0x18a   : > { %v2759_v51 = vadd.f32 %v2066_v5, %v1122_v57  ;;  %v2762_v12 = vadd.f32 %v1221_v49, %v2725_v36  ;;  %v1261_v4 = vpop.f32.mrb[65].mxu1  ;;  %v1152_v52 = vadd.f32 %v1987_v43, %v1007_v44 }
 0x18b   : > { %v2764_v53 = vadd.f32 %v1261_v4, %v1117_v48  ;;  %v1304_v56 = vsel %vm1300_vm0, %v2757_v1, 0.0  ;;  %v1366_v23 = vmul.f32 %v2757_v1, %v2757_v1 }
 0x18c   : > { %v2057_v22 = vpop.f32.mrb[66].mxu0  ;;  %v1328_v14 = vsel %vm1300_vm0, %v2759_v51, 0.0  ;;  %1305 = vadd.xlane.f32.xlu1 %v1304_v56  ;;  %v1365_v62 = vmul.f32 %v2762_v12, %v2762_v12  ;;  %v1374_v13 = vmul.f32 %v2759_v51, %v2759_v51 }
 0x18d   : > { %v2771_v46 = vadd.f32 %v2057_v22, %v2734_v63  ;;  %v2069_v57 = vpop.f32.mrb[66].mxu1  ;;  %1329 = vadd.xlane.f32.xlu0 %v1328_v14  ;;  %v1231_v58 = vpop.f32.mrb[67].mxu0  ;;  %v1325_v15 = vsel %vm1300_vm0, %v2764_v53, 0.0  ;;  %v1301_v63 = vsel %vm1300_vm0, %v2762_v12, 0.0  ;;  %v1373_v32 = vmul.f32 %v2764_v53, %v2764_v53 }
 0x18e   : > { %v2773_v36 = vadd.f32 %v2069_v57, %v1132_v11  ;;  %v2776_v60 = vadd.f32 %v1231_v58, %v2731_v54  ;;  %v1271_v48 = vpop.f32.mrb[67].mxu1  ;;  %v1381_v10 = vsel %vm1300_vm0, %v1365_v62, 0.0  ;;  %v1408_v24 = vsel %vm1300_vm0, %v1374_v13, 0.0 }
 0x18f   : > { %v2778_v61 = vadd.f32 %v1271_v48, %v1127_v2 }
 0x190   : > { %v2060_v0 = vpop.f32.mrb[68].mxu0  ;;  %1326 = vadd.xlane.f32.xlu1 %v1325_v15  ;;  %v1367_v26 = vmul.f32 %v2776_v60, %v2776_v60  ;;  %v1334_v28 = vsel %vm1300_vm0, %v2773_v36, 0.0  ;;  %v1307_v50 = vsel %vm1300_vm0, %v2776_v60, 0.0  ;;  %v1376_v37 = vmul.f32 %v2773_v36, %v2773_v36 }
 0x191   : > { %v2789_v54 = vadd.f32 %v2060_v0, %v2740_v19  ;;  %v2072_v3 = vpop.f32.mrb[68].mxu1  ;;  %1302 = vadd.xlane.f32.xlu0 %v1301_v63  ;;  %v1241_v2 = vpop.f32.mrb[69].mxu0  ;;  %v1384_v19 = vsel %vm1300_vm0, %v1366_v23, 0.0  ;;  %v1375_v45 = vmul.f32 %v2778_v61, %v2778_v61 }
 0x192   : > { %v2791_v6 = vadd.f32 %v2072_v3, %v1142_v31  ;;  %v2794_v7 = vadd.f32 %v1241_v2, %v2737_v9  ;;  %v1281_v25 = vpop.f32.mrb[69].mxu1  ;;  %v1387_v27 = vsel %vm1300_vm0, %v1367_v26, 0.0  ;;  %v1368_v31 = vmul.f32 %v2771_v46, %v2771_v46 }
 0x193   : > { %v2796_v8 = vadd.f32 %v1281_v25, %v1137_v21  ;;  %v1405_v21 = vsel %vm1300_vm0, %v1373_v32, 0.0  ;;  %v1411_v30 = vsel %vm1300_vm0, %v1375_v45, 0.0  ;;  %v1414_v40 = vsel %vm1300_vm0, %v1376_v37, 0.0 }
 0x194   : > { %v2063_v11 = vpop.f32.mrb[70].mxu0  ;;  %1382 = vadd.xlane.f32.xlu1 %v1381_v10  ;;  %v1313_v33 = vsel %vm1300_vm0, %v2794_v7, 0.0  ;;  %v1390_v34 = vsel %vm1300_vm0, %v1368_v31, 0.0  ;;  %v1369_v38 = vmul.f32 %v2794_v7, %v2794_v7  ;;  %v1316_v43 = vsel %vm1300_vm0, %v2789_v54, 0.0 }
 0x195   : > { %v2805_v16 = vadd.f32 %v2063_v11, %v2746_v39  ;;  %v2075_v9 = vpop.f32.mrb[70].mxu1  ;;  %1385 = vadd.xlane.f32.xlu0 %v1384_v19  ;;  %v1251_v17 = vpop.f32.mrb[71].mxu0  ;;  %v1331_v39 = vsel %vm1300_vm0, %v2778_v61, 0.0  ;;  %v1337_v55 = vsel %vm1300_vm0, %v2796_v8, 0.0  ;;  %v1340_v47 = vsel %vm1300_vm0, %v2791_v6, 0.0 }
 0x196   : > { %v2807_v35 = vadd.f32 %v2075_v9, %v1152_v52  ;;  %v2810_v18 = vadd.f32 %v1251_v17, %v2743_v29  ;;  %v1291_v20 = vpop.f32.mrb[71].mxu1  ;;  %v1310_v29 = vsel %vm1300_vm0, %v2771_v46, 0.0  ;;  %v1393_v59 = vsel %vm1300_vm0, %v1369_v38, 0.0 }
 0x197   : > { %v2812_v41 = vadd.f32 %v1291_v20, %v1147_v42  ;;  %v1377_v42 = vmul.f32 %v2796_v8, %v2796_v8  ;;  %v1370_v5 = vmul.f32 %v2789_v54, %v2789_v54  ;;  %v1378_v52 = vmul.f32 %v2791_v6, %v2791_v6 }
 0x198   : > { %1406 = vadd.xlane.f32.xlu1 %v1405_v21  ;;  %v1319_v49 = vsel %vm1300_vm0, %v2810_v18, 0.0  ;;  %v1371_v22 = vmul.f32 %v2810_v18, %v2810_v18  ;;  %v1322_v48 = vsel %vm1300_vm0, %v2805_v16, 0.0  ;;  %v1346_v62 = vsel %vm1300_vm0, %v2807_v35, 0.0 }
 0x199   : > { %1409 = vadd.xlane.f32.xlu0 %v1408_v24  ;;  %v1417_v44 = vsel %vm1300_vm0, %v1377_v42, 0.0  ;;  %v1396_v4 = vsel %vm1300_vm0, %v1370_v5, 0.0  ;;  %v1343_v56 = vsel %vm1300_vm0, %v2812_v41, 0.0  ;;  %v1420_v14 = vsel %vm1300_vm0, %v1378_v52, 0.0 }
 0x19a   : > { %v1399_v57 = vsel %vm1300_vm0, %v1371_v22, 0.0  ;;  %v1379_v58 = vmul.f32 %v2812_v41, %v2812_v41  ;;  %v1372_v0 = vmul.f32 %v2805_v16, %v2805_v16  ;;  %v1380_v23 = vmul.f32 %v2807_v35, %v2807_v35 }
 0x19c   : > { %1332 = vadd.xlane.f32.xlu1 %v1331_v39  ;;  %v1423_v15 = vsel %vm1300_vm0, %v1379_v58, 0.0  ;;  %v1402_v63 = vsel %vm1300_vm0, %v1372_v0, 0.0  ;;  %v1426_v3 = vsel %vm1300_vm0, %v1380_v23, 0.0 }
 0x19d   : > { %1311 = vadd.xlane.f32.xlu0 %v1310_v29 }
 0x1a0   : > { %1388 = vadd.xlane.f32.xlu1 %v1387_v27 }
 0x1a1   : > { %1335 = vadd.xlane.f32.xlu0 %v1334_v28 }
 0x1a4   : > { %1412 = vadd.xlane.f32.xlu1 %v1411_v30 }
 0x1a5   : > { %1308 = vadd.xlane.f32.xlu0 %v1307_v50 }
 0x1a8   : > { %1314 = vadd.xlane.f32.xlu1 %v1313_v33 }
 0x1a9   : > { %1391 = vadd.xlane.f32.xlu0 %v1390_v34 }
 0x1ac   : > { %1338 = vadd.xlane.f32.xlu1 %v1337_v55 }
 0x1ad   : > { %1415 = vadd.xlane.f32.xlu0 %v1414_v40 }
 0x1b0   : > { %1394 = vadd.xlane.f32.xlu1 %v1393_v59 }
 0x1b1   : > { %1317 = vadd.xlane.f32.xlu0 %v1316_v43 }
 0x1b4   : > { %1418 = vadd.xlane.f32.xlu1 %v1417_v44 }
 0x1b5   : > { %1341 = vadd.xlane.f32.xlu0 %v1340_v47 }
 0x1b8   : > { %1320 = vadd.xlane.f32.xlu1 %v1319_v49 }
 0x1b9   : > { %1397 = vadd.xlane.f32.xlu0 %v1396_v4 }
 0x1bc   : > { %1344 = vadd.xlane.f32.xlu1 %v1343_v56 }
 0x1bd   : > { %1421 = vadd.xlane.f32.xlu0 %v1420_v14 }
 0x1c0   : > { %1400 = vadd.xlane.f32.xlu1 %v1399_v57 }
 0x1c1   : > { %1323 = vadd.xlane.f32.xlu0 %v1322_v48 }
 0x1c4   : > { %1424 = vadd.xlane.f32.xlu1 %v1423_v15 }
 0x1c5   : > { %1347 = vadd.xlane.f32.xlu0 %v1346_v62 }
 0x1c9   : > { %1403 = vadd.xlane.f32.xlu0 %v1402_v63 }
 0x1cd   : > { %1427 = vadd.xlane.f32.xlu0 %v1426_v3 }
 0x219   : > { %v1306_v2 = vpop.xlane.xlu1 %1305 }
 0x21a   : > { %v1330_v25 = vpop.xlane.xlu0 %1329  ;;  %v1350_v11 = vmul.f32 0.25, %v1306_v2 }
 0x21b   : > { %v2878_v24 = vmul.f32 0.25, %v1330_v25 }
 0x21c   : > { %v1446_v39 = vmul.f32 %v1350_v11, %v1350_v11  ;;  %v1494_v63 = vsub.f32 %v2757_v1, %v1350_v11 }
 0x21d   : > { %v1327_v10 = vpop.xlane.xlu1 %1326  ;;  %v1454_v33 = vmul.f32 %v2878_v24, %v2878_v24 }
 0x21e   : > { %v1303_v32 = vpop.xlane.xlu0 %1302  ;;  %v2876_v9 = vmul.f32 0.25, %v1327_v10 }
 0x21f   : > { %v1349_v19 = vmul.f32 0.25, %v1303_v32 }
 0x220   : > { %v1453_v28 = vmul.f32 %v2876_v9, %v2876_v9 }
 0x221   : > { %v1383_v13 = vpop.xlane.xlu1 %1382  ;;  %v1445_v17 = vmul.f32 %v1349_v19, %v1349_v19  ;;  %v1493_v48 = vsub.f32 %v2762_v12, %v1349_v19 }
 0x222   : > { %v1429_v20 = vmul.f32 0.25, %v1383_v13  ;;  %v1386_v21 = vpop.xlane.xlu0 %1385  ;;  %v1501_v13 = vsub.f32 %v2764_v53, %v2876_v9  ;;  %v1502_v53 = vsub.f32 %v2759_v51, %v2878_v24 }
 0x223   : > { %v1430_v26 = vmul.f32 0.25, %v1386_v21 }
 0x224   : > { %v1461_v29 = vsub.f32 %v1429_v20, %v1445_v17 }
 0x225   : > { %v1462_v27 = vsub.f32 %v1430_v26, %v1446_v39  ;;  %v1407_v45 = vpop.xlane.xlu1 %1406 }
 0x226   : > { %v1477_v30 = vmax.f32 %v1461_v29, 0.0  ;;  %v1437_v50 = vmul.f32 0.25, %v1407_v45  ;;  %v1410_v31 = vpop.xlane.xlu0 %1409 }
 0x227   : > { %v1478_v34 = vmax.f32 %v1462_v27, 0.0  ;;  %v1438_v37 = vmul.f32 0.25, %v1410_v31 }
 0x228   : > { %v1509_v55 = vadd.f32 1e-05, %v1477_v30  ;;  %v1469_v38 = vsub.f32 %v1437_v50, %v1453_v28 }
 0x229   : > { %v1510_v40 = vadd.f32 1e-05, %v1478_v34  ;;  %v1470_v59 = vsub.f32 %v1438_v37, %v1454_v33  ;;  %v1333_v42 = vpop.xlane.xlu1 %1332 }
 0x22a   : > { %2264 = vrsqrt.f32 %v1509_v55  ;;  %v1485_v43 = vmax.f32 %v1469_v38, 0.0  ;;  %v1312_v44 = vpop.xlane.xlu0 %1311  ;;  %v2884_v52 = vmul.f32 0.25, %v1333_v42 }
 0x22b   : > { %2266 = vrsqrt.f32 %v1510_v40  ;;  %v1486_v47 = vmax.f32 %v1470_v59, 0.0  ;;  %v2890_v15 = vmul.f32 0.25, %v1312_v44 }
 0x22c   : > { %v1517_v5 = vadd.f32 1e-05, %v1485_v43  ;;  %v1455_v14 = vmul.f32 %v2884_v52, %v2884_v52 }
 0x22d   : > { %v1518_v49 = vadd.f32 1e-05, %v1486_v47  ;;  %v1389_v4 = vpop.xlane.xlu1 %1388  ;;  %v1448_v20 = vmul.f32 %v2890_v15, %v2890_v15 }
 0x22e   : > { %2268 = vrsqrt.f32 %v1517_v5  ;;  %v1336_v56 = vpop.xlane.xlu0 %1335  ;;  %v1431_v25 = vmul.f32 0.25, %v1389_v4 }
 0x22f   : > { %2270 = vrsqrt.f32 %v1518_v49  ;;  %v2904_v19 = vmul.f32 0.25, %v1336_v56 }
 0x231   : > { %v1413_v22 = vpop.xlane.xlu1 %1412  ;;  %v1456_v33 = vmul.f32 %v2904_v19, %v2904_v19 }
 0x232   : > { %v1439_v57 = vmul.f32 0.25, %v1413_v22  ;;  %v1309_v58 = vpop.xlane.xlu0 %1308 }
 0x233   : > { %v2892_v62 = vmul.f32 0.25, %v1309_v58 }
 0x234   : > { %v2265_v0 = vpop.eup %2264  ;;  %v1471_v23 = vsub.f32 %v1439_v57, %v1455_v14 }
 0x235   : > { %v2267_v3 = vpop.eup %2266  ;;  %v1541_v2 = vmul.f32 %v2265_v0, %v1493_v48  ;;  %v1447_v10 = vmul.f32 %v2892_v62, %v2892_v62  ;;  %v1315_v32 = vpop.xlane.xlu1 %1314 }
 0x236   : > { %v1542_v12 = vmul.f32 %v2267_v3, %v1494_v63  ;;  %v1487_v1 = vmax.f32 %v1471_v23, 0.0  ;;  %v1392_v11 = vpop.xlane.xlu0 %1391  ;;  %v2916_v34 = vmul.f32 0.25, %v1315_v32  ;;  %v1503_v63 = vsub.f32 %v2778_v61, %v2884_v52 }
 0x237   : > { %v1557_v17 = vmax.f32 %v1541_v2, 0.0  ;;  %v1463_v21 = vsub.f32 %v1431_v25, %v1447_v10  ;;  %v1432_v39 = vmul.f32 0.25, %v1392_v11 }
 0x238   : > { %v2269_v26 = vpop.eup %2268  ;;  %v1558_v9 = vmax.f32 %v1542_v12, 0.0  ;;  %v1519_v29 = vadd.f32 1e-05, %v1487_v1  ;;  %v1449_v44 = vmul.f32 %v2916_v34, %v2916_v34 }
 0x239   : > { %v2271_v27 = vpop.eup %2270  ;;  %1573 = vst.msk [vmem:[%s2902_s30] sm:$0xff] %vm1300_vm0, %v1557_v17  ;;  %v1549_v45 = vmul.f32 %v2269_v26, %v1501_v13  ;;  %v1479_v28 = vmax.f32 %v1463_v21, 0.0  ;;  %v1464_v30 = vsub.f32 %v1432_v39, %v1448_v20  ;;  %v1339_v50 = vpop.xlane.xlu1 %1338  ;;  %v1495_v13 = vsub.f32 %v2776_v60, %v2892_v62 }
 0x23a   : > { %1574 = vst.msk [vmem:[%s2902_s30 + $0x8] sm:$0xff] %vm1300_vm0, %v1558_v9  ;;  %v1550_v31 = vmul.f32 %v2271_v27, %v1502_v53  ;;  %2272 = vrsqrt.f32 %v1519_v29  ;;  %v1416_v51 = vpop.xlane.xlu0 %1415  ;;  %v2924_v47 = vmul.f32 0.25, %v1339_v50  ;;  %v1496_v21 = vsub.f32 %v2771_v46, %v2890_v15 }
 0x23b   : > { %v1565_v24 = vmax.f32 %v1549_v45, 0.0  ;;  %v1511_v37 = vadd.f32 1e-05, %v1479_v28  ;;  %v1480_v55 = vmax.f32 %v1464_v30, 0.0  ;;  %v1440_v38 = vmul.f32 0.25, %v1416_v51 }
 0x23c   : > { %v1566_v40 = vmax.f32 %v1550_v31, 0.0  ;;  %v1457_v57 = vmul.f32 %v2924_v47, %v2924_v47  ;;  %v1504_v15 = vsub.f32 %v2773_v36, %v2904_v19  ;;  %v1497_v36 = vsub.f32 %v2794_v7, %v2916_v34 }
 0x23d   : > { %1581 = vst.msk [vmem:[%s2902_s30 + $0x40] sm:$0xff] %vm1300_vm0, %v1565_v24  ;;  %2274 = vrsqrt.f32 %v1511_v37  ;;  %v1512_v59 = vadd.f32 1e-05, %v1480_v55  ;;  %v1472_v42 = vsub.f32 %v1440_v38, %v1456_v33  ;;  %v1395_v43 = vpop.xlane.xlu1 %1394  ;;  %v1505_v7 = vsub.f32 %v2796_v8, %v2924_v47 }
 0x23e   : > { %1582 = vst.msk [vmem:[%s2902_s30 + $0x48] sm:$0xff] %vm1300_vm0, %v1566_v40  ;;  %v1433_v5 = vmul.f32 0.25, %v1395_v43  ;;  %v1318_v49 = vpop.xlane.xlu0 %1317 }
 0x23f   : > { %2276 = vrsqrt.f32 %v1512_v59  ;;  %v1488_v4 = vmax.f32 %v1472_v42, 0.0  ;;  %v2930_v23 = vmul.f32 0.25, %v1318_v49 }
 0x240   : > { %v1465_v56 = vsub.f32 %v1433_v5, %v1449_v44 }
 0x241   : > { %v1520_v22 = vadd.f32 1e-05, %v1488_v4  ;;  %v1419_v14 = vpop.xlane.xlu1 %1418  ;;  %v1450_v61 = vmul.f32 %v2930_v23, %v2930_v23  ;;  %v1498_v8 = vsub.f32 %v2789_v54, %v2930_v23 }
 0x242   : > { %v1481_v58 = vmax.f32 %v1465_v56, 0.0  ;;  %v1441_v48 = vmul.f32 0.25, %v1419_v14  ;;  %v1342_v0 = vpop.xlane.xlu0 %1341 }
 0x243   : > { %2278 = vrsqrt.f32 %v1520_v22  ;;  %v2936_v52 = vmul.f32 0.25, %v1342_v0 }
 0x244   : > { %v2273_v3 = vpop.eup %2272  ;;  %v1513_v2 = vadd.f32 1e-05, %v1481_v58  ;;  %v1473_v25 = vsub.f32 %v1441_v48, %v1457_v57 }
 0x245   : > { %v1551_v10 = vmul.f32 %v2273_v3, %v1503_v63  ;;  %v1321_v32 = vpop.xlane.xlu1 %1320  ;;  %v1458_v28 = vmul.f32 %v2936_v52, %v2936_v52 }
 0x246   : > { %2280 = vrsqrt.f32 %v1513_v2  ;;  %v1489_v12 = vmax.f32 %v1473_v25, 0.0  ;;  %v1398_v1 = vpop.xlane.xlu0 %1397  ;;  %v2942_v27 = vmul.f32 0.25, %v1321_v32 }
 0x247   : > { %v2275_v11 = vpop.eup %2274  ;;  %v1567_v17 = vmax.f32 %v1551_v10, 0.0  ;;  %v1434_v20 = vmul.f32 0.25, %v1398_v1 }
 0x248   : > { %v1543_v39 = vmul.f32 %v2275_v11, %v1495_v13  ;;  %v1521_v26 = vadd.f32 1e-05, %v1489_v12  ;;  %v1451_v55 = vmul.f32 %v2942_v27, %v2942_v27 }
 0x249   : > { %v2277_v53 = vpop.eup %2276  ;;  %1583 = vst.msk [vmem:[%s2902_s30 + $0x50] sm:$0xff] %vm1300_vm0, %v1567_v17  ;;  %v1466_v60 = vsub.f32 %v1434_v20, %v1450_v61  ;;  %v1345_v62 = vpop.xlane.xlu1 %1344 }
 0x24a   : > { %v1559_v9 = vmax.f32 %v1543_v39, 0.0  ;;  %v1544_v29 = vmul.f32 %v2277_v53, %v1496_v21  ;;  %2282 = vrsqrt.f32 %v1521_v26  ;;  %v1422_v45 = vpop.xlane.xlu0 %1421  ;;  %v2954_v38 = vmul.f32 0.25, %v1345_v62 }
 0x24b   : > { %v1482_v30 = vmax.f32 %v1466_v60, 0.0  ;;  %v1442_v46 = vmul.f32 0.25, %v1422_v45  ;;  %v1506_v26 = vsub.f32 %v2791_v6, %v2936_v52 }
 0x24c   : > { %1575 = vst.msk [vmem:[%s2902_s30 + $0x10] sm:$0xff] %vm1300_vm0, %v1559_v9  ;;  %v1560_v50 = vmax.f32 %v1544_v29, 0.0  ;;  %v1459_v56 = vmul.f32 %v2954_v38, %v2954_v38  ;;  %v1499_v9 = vsub.f32 %v2810_v18, %v2942_v27  ;;  %v1507_v6 = vsub.f32 %v2812_v41, %v2954_v38 }
 0x24d   : > { %v2279_v31 = vpop.eup %2278  ;;  %v1514_v33 = vadd.f32 1e-05, %v1482_v30  ;;  %v1474_v51 = vsub.f32 %v1442_v46, %v1458_v28  ;;  %v1401_v24 = vpop.xlane.xlu1 %1400 }
 0x24e   : > { %1576 = vst.msk [vmem:[%s2902_s30 + $0x18] sm:$0xff] %vm1300_vm0, %v1560_v50  ;;  %v1552_v37 = vmul.f32 %v2279_v31, %v1504_v15  ;;  %v1435_v40 = vmul.f32 0.25, %v1401_v24  ;;  %v1324_v59 = vpop.xlane.xlu0 %1323 }
 0x24f   : > { %2284 = vrsqrt.f32 %v1514_v33  ;;  %v1490_v19 = vmax.f32 %v1474_v51, 0.0  ;;  %v1356_v58 = vmul.f32 0.25, %v1324_v59 }
 0x250   : > { %v2281_v42 = vpop.eup %2280  ;;  %v1568_v43 = vmax.f32 %v1552_v37, 0.0  ;;  %v1467_v44 = vsub.f32 %v1435_v40, %v1451_v55 }
 0x251   : > { %v1545_v5 = vmul.f32 %v2281_v42, %v1497_v36  ;;  %v1522_v49 = vadd.f32 1e-05, %v1490_v19  ;;  %v1425_v4 = vpop.xlane.xlu1 %1424  ;;  %v1452_v32 = vmul.f32 %v1356_v58, %v1356_v58  ;;  %v1500_v50 = vsub.f32 %v2805_v16, %v1356_v58 }
 0x252   : > { %1584 = vst.msk [vmem:[%s2902_s30 + $0x58] sm:$0xff] %vm1300_vm0, %v1568_v43  ;;  %v1483_v22 = vmax.f32 %v1467_v44, 0.0  ;;  %v1443_v14 = vmul.f32 0.25, %v1425_v4  ;;  %v1348_v57 = vpop.xlane.xlu0 %1347 }
 0x253   : > { %v1561_v34 = vmax.f32 %v1545_v5, 0.0  ;;  %2286 = vrsqrt.f32 %v1522_v49  ;;  %v1364_v13 = vmul.f32 0.25, %v1348_v57 }
 0x254   : > { %v2283_v48 = vpop.eup %2282  ;;  %v1515_v0 = vadd.f32 1e-05, %v1483_v22  ;;  %v1475_v63 = vsub.f32 %v1443_v14, %v1459_v56 }
 0x255   : > { %1577 = vst.msk [vmem:[%s2902_s30 + $0x20] sm:$0xff] %vm1300_vm0, %v1561_v34  ;;  %v1553_v3 = vmul.f32 %v2283_v48, %v1505_v7  ;;  %v1460_v20 = vmul.f32 %v1364_v13, %v1364_v13  ;;  %v1508_v51 = vsub.f32 %v2807_v35, %v1364_v13 }
 0x256   : > { %2288 = vrsqrt.f32 %v1515_v0  ;;  %v1491_v2 = vmax.f32 %v1475_v63, 0.0  ;;  %v1404_v25 = vpop.xlane.xlu0 %1403 }
 0x257   : > { %v1569_v10 = vmax.f32 %v1553_v3, 0.0  ;;  %v1436_v12 = vmul.f32 0.25, %v1404_v25 }
 0x258   : > { %v1523_v47 = vadd.f32 1e-05, %v1491_v2 }
 0x259   : > { %v2285_v1 = vpop.eup %2284  ;;  %1585 = vst.msk [vmem:[%s2902_s30 + $0x60] sm:$0xff] %vm1300_vm0, %v1569_v10  ;;  %v1468_v11 = vsub.f32 %v1436_v12, %v1452_v32 }
 0x25a   : > { %v1546_v17 = vmul.f32 %v2285_v1, %v1498_v8  ;;  %2290 = vrsqrt.f32 %v1523_v47  ;;  %v1428_v61 = vpop.xlane.xlu0 %1427 }
 0x25b   : > { %v1484_v21 = vmax.f32 %v1468_v11, 0.0  ;;  %v1444_v39 = vmul.f32 0.25, %v1428_v61 }
 0x25c   : > { %v1562_v53 = vmax.f32 %v1546_v17, 0.0 }
 0x25d   : > { %v2287_v60 = vpop.eup %2286  ;;  %v1516_v62 = vadd.f32 1e-05, %v1484_v21  ;;  %v1476_v54 = vsub.f32 %v1444_v39, %v1460_v20 }
 0x25e   : > { %1578 = vst.msk [vmem:[%s2902_s30 + $0x28] sm:$0xff] %vm1300_vm0, %v1562_v53  ;;  %v1554_v23 = vmul.f32 %v2287_v60, %v1506_v26 }
 0x25f   : > { %2292 = vrsqrt.f32 %v1516_v62  ;;  %v1492_v29 = vmax.f32 %v1476_v54, 0.0 }
 0x260   : > { %v2289_v45 = vpop.eup %2288  ;;  %v1570_v28 = vmax.f32 %v1554_v23, 0.0 }
 0x261   : > { %v1547_v30 = vmul.f32 %v2289_v45, %v1499_v9  ;;  %v1524_v46 = vadd.f32 1e-05, %v1492_v29 }
 0x262   : > { %1586 = vst.msk [vmem:[%s2902_s30 + $0x68] sm:$0xff] %vm1300_vm0, %v1570_v28 }
 0x263   : > { %v1563_v52 = vmax.f32 %v1547_v30, 0.0  ;;  %2294 = vrsqrt.f32 %v1524_v46 }
 0x264   : > { %v2291_v15 = vpop.eup %2290 }
 0x265   : > { %1579 = vst.msk [vmem:[%s2902_s30 + $0x30] sm:$0xff] %vm1300_vm0, %v1563_v52  ;;  %v1555_v18 = vmul.f32 %v2291_v15, %v1507_v6 }
 0x267   : > { %v1571_v27 = vmax.f32 %v1555_v18, 0.0 }
 0x269   : > { %v2293_v31 = vpop.eup %2292  ;;  %1587 = vst.msk [vmem:[%s2902_s30 + $0x70] sm:$0xff] %vm1300_vm0, %v1571_v27 }
 0x26a   : > { %v1548_v33 = vmul.f32 %v2293_v31, %v1500_v50 }
 0x26c   : > { %v1564_v24 = vmax.f32 %v1548_v33, 0.0 }
 0x26d   : > { %v2295_v37 = vpop.eup %2294 }
 0x26e   : > { %1580 = vst.msk [vmem:[%s2902_s30 + $0x38] sm:$0xff] %vm1300_vm0, %v1564_v24  ;;  %v1556_v41 = vmul.f32 %v2295_v37, %v1508_v51 }
 0x270   : > { %v1572_v55 = vmax.f32 %v1556_v41, 0.0 }
 0x272   : > { %1588 = vst.msk [vmem:[%s2902_s30 + $0x78] sm:$0xff] %vm1300_vm0, %v1572_v55 }
 0x273 PF: > { %s13_s12 = sadd.s32 1, %s2302_s12  }
 0x274   : > { %p10_p4 = scmp.ge.s32.totalorder %s13_s12, 4  }
 0x276   :  { %12 = sbr.rel (!%p10_p4) target bundleno = 1 (0x1), region = 65 }

// kernel: _forward_impl.39
= control target key start
LH: loop header
LB: loop body
LE: loop exit
PB: predicated region body
PF: predicated region fallthrough
CT: control target
= control target key end

     0   :  { %s2706_s12 = smov 0   ;;  %s3312_s0 = inlined_call_operand.vmem [shape: f32[2,64,2304], index: 0, kind: input, shape index: {}]   ;;  %s3313_s1 = inlined_call_operand.vmem [shape: f32[2,2304,16], index: 1, kind: input, shape index: {}]   ;;  %s3314_s2 = inlined_call_operand.vmem [shape: f32[64,1], index: 2, kind: input, shape index: {}]   ;;  %s3315_s3 = inlined_call_operand.vmem [shape: f32[2,64,16], index: 3, kind: output, shape index: {}]  }
   0x1 LB: > { %s1828_s13 = sadd.s32 4294967295, %s2683_s12   ;;  %p1832_p0 = scmp.ge.s32.totalorder %s2683_s12, 1  ;;  %s2683_s12 = sphi %s2706_s12, %s13_s12  }
   0x2   : > { %p147_p1 = scmp.lt.s32.totalorder %s2683_s12, 3 }
   0x4   : > { %p148_p2 = pnand %p1832_p0, %p147_p1 }
   0x5   : > { %p176_p3 = scmp.lt.s32.totalorder (!%p148_p2), %s1828_s13, 1  ;;  %v623_v0 = vld [vmem:[%s3314_s2] sm:$0xff] (!%p148_p2)  ;;  %v2685_v1 = vmov (!%p148_p2), 0   ;;  %v624_v2 = vld [vmem:[%s3314_s2 + $0x8] sm:$0xff] (!%p148_p2)  ;;  %vm1616_vm0 = vcmask (!%p148_p2), 130048  }
   0x6   : > { %151 = sbr.rel (%p148_p2) target bundleno = 601 (0x259), region = 32  ;;  %2659 = vset.pattern.permute.xlu0 (!%p148_p2), %v2685_v1  ;;  %2660 = vset.pattern.permute.xlu1 (!%p148_p2), %v2685_v1 }
   0x7   : > { %633 = vperm.xlu0 (!%p148_p2), %2659, %v623_v0  }
   0xb   : > { %638 = vperm.xlu0 (!%p148_p2), %2659, %v624_v2  }
   0xd   : > { %s3317_s13 = smov (!%p176_p3, %s1828_s13), 1 }
   0xe   : > { %s2649_s16 = smul.u32 2304, %s3317_s13  ;;  %s1839_s11 = sshll.u32 %s3317_s13, 6 }
   0xf   : > { %s2648_s22 = smul.u32 1152, %s3317_s13 }
  0x10   : > { %s2726_s21 = scalar_lea.vmem %s3313_s1, %s2649_s16  ;;  %s3279_s16 = scalar_lea.vmem %s3315_s3, %s1839_s11 }
  0x11   : > { %v351_v3 = vld [vmem:[%s2726_s21 + $0x80] sm:$0xff]  ;;  %v352_v4 = vld [vmem:[%s2726_s21 + $0x88] sm:$0xff]  ;;  %v353_v14 = vld [vmem:[%s2726_s21 + $0x90] sm:$0xff]  ;;  %s2782_s25 = scalar_lea.vmem %s3312_s0, %s2648_s22 }
  0x12   : > { %v383_v5 = vld [vmem:[%s2726_s21 + $0x180] sm:$0xff]  ;;  %v2344_v6 = vpack.c.bf16 %v352_v4, %v351_v3  ;;  %v384_v7 = vld [vmem:[%s2726_s21 + $0x188] sm:$0xff]  ;;  %v354_v16 = vld [vmem:[%s2726_s21 + $0x98] sm:$0xff] }
  0x13   : > { %v335_v8 = vld [vmem:[%s2726_s21] sm:$0xff]  ;;  %v336_v9 = vld [vmem:[%s2726_s21 + $0x8] sm:$0xff]  ;;  %v2376_v10 = vpack.c.bf16 %v384_v7, %v383_v5  ;;  %v385_v17 = vld [vmem:[%s2726_s21 + $0x190] sm:$0xff]  ;;  %v2348_v19 = vpack.c.bf16 %v354_v16, %v353_v14 }
  0x14   : > { %v2346_v11 = vpack.c.bf16 %v336_v9, %v335_v8  ;;  %v367_v12 = vld [vmem:[%s2726_s21 + $0x100] sm:$0xff]  ;;  %v368_v13 = vld [vmem:[%s2726_s21 + $0x108] sm:$0xff]  ;;  %2345 = vmatprep.subr.bf16.mxu0 %v2344_v6  ;;  %v386_v18 = vld [vmem:[%s2726_s21 + $0x198] sm:$0xff] }
  0x15   : > { %v2378_v15 = vpack.c.bf16 %v368_v13, %v367_v12  ;;  %2377 = vmatprep.subr.bf16.mxu1 %v2376_v10  ;;  %v2380_v20 = vpack.c.bf16 %v386_v18, %v385_v17  ;;  %v337_v21 = vld [vmem:[%s2726_s21 + $0x10] sm:$0xff]  ;;  %v338_v22 = vld [vmem:[%s2726_s21 + $0x18] sm:$0xff]  ;;  %v355_v26 = vld [vmem:[%s2726_s21 + $0xa0] sm:$0xff] }
  0x16   : > { %2347 = vmatpush3.bf16.msra.mxu0 %v2346_v11  ;;  %v369_v23 = vld [vmem:[%s2726_s21 + $0x110] sm:$0xff]  ;;  %v2350_v24 = vpack.c.bf16 %v338_v22, %v337_v21  ;;  %v370_v25 = vld [vmem:[%s2726_s21 + $0x118] sm:$0xff]  ;;  %v356_v27 = vld [vmem:[%s2726_s21 + $0xa8] sm:$0xff] }
  0x17   : > { %2379 = vmatpush3.bf16.msra.mxu1 %v2378_v15  ;;  %2349 = vmatprep.subr.bf16.mxu0 %v2348_v19  ;;  %v2382_v28 = vpack.c.bf16 %v370_v25, %v369_v23  ;;  %v2352_v29 = vpack.c.bf16 %v356_v27, %v355_v26  ;;  %v387_v30 = vld [vmem:[%s2726_s21 + $0x1a0] sm:$0xff]  ;;  %v388_v31 = vld [vmem:[%s2726_s21 + $0x1a8] sm:$0xff]  ;;  %v357_v38 = vld [vmem:[%s2726_s21 + $0xb0] sm:$0xff] }
  0x18   : > { %2381 = vmatprep.subr.bf16.mxu1 %v2380_v20  ;;  %v339_v32 = vld [vmem:[%s2726_s21 + $0x20] sm:$0xff]  ;;  %v2384_v33 = vpack.c.bf16 %v388_v31, %v387_v30  ;;  %v340_v34 = vld [vmem:[%s2726_s21 + $0x28] sm:$0xff]  ;;  %v358_v39 = vld [vmem:[%s2726_s21 + $0xb8] sm:$0xff] }
  0x19   : > { %v371_v35 = vld [vmem:[%s2726_s21 + $0x120] sm:$0xff]  ;;  %v372_v36 = vld [vmem:[%s2726_s21 + $0x128] sm:$0xff]  ;;  %v2354_v37 = vpack.c.bf16 %v340_v34, %v339_v32  ;;  %v389_v40 = vld [vmem:[%s2726_s21 + $0x1b0] sm:$0xff]  ;;  %v2356_v42 = vpack.c.bf16 %v358_v39, %v357_v38 }
  0x1a   : > { %2351 = vmatpush3.bf16.msra.mxu0 %v2350_v24  ;;  %v2386_v41 = vpack.c.bf16 %v372_v36, %v371_v35  ;;  %v390_v43 = vld [vmem:[%s2726_s21 + $0x1b8] sm:$0xff]  ;;  %v341_v44 = vld [vmem:[%s2726_s21 + $0x30] sm:$0xff]  ;;  %v359_v49 = vld [vmem:[%s2726_s21 + $0xc0] sm:$0xff] }
  0x1b   : > { %2383 = vmatpush3.bf16.msra.mxu1 %v2382_v28  ;;  %2353 = vmatprep.subr.bf16.mxu0 %v2352_v29  ;;  %v342_v45 = vld [vmem:[%s2726_s21 + $0x38] sm:$0xff]  ;;  %v2388_v46 = vpack.c.bf16 %v390_v43, %v389_v40  ;;  %v373_v47 = vld [vmem:[%s2726_s21 + $0x130] sm:$0xff]  ;;  %v360_v50 = vld [vmem:[%s2726_s21 + $0xc8] sm:$0xff] }
  0x1c   : > { %2385 = vmatprep.subr.bf16.mxu1 %v2384_v33  ;;  %v374_v48 = vld [vmem:[%s2726_s21 + $0x138] sm:$0xff]  ;;  %v391_v51 = vld [vmem:[%s2726_s21 + $0x1c0] sm:$0xff]  ;;  %v392_v52 = vld [vmem:[%s2726_s21 + $0x1c8] sm:$0xff]  ;;  %v2358_v53 = vpack.c.bf16 %v342_v45, %v341_v44  ;;  %v2360_v55 = vpack.c.bf16 %v360_v50, %v359_v49 }
  0x1d   : > { %v2390_v54 = vpack.c.bf16 %v374_v48, %v373_v47  ;;  %v343_v56 = vld [vmem:[%s2726_s21 + $0x40] sm:$0xff]  ;;  %v344_v57 = vld [vmem:[%s2726_s21 + $0x48] sm:$0xff]  ;;  %v2392_v59 = vpack.c.bf16 %v392_v52, %v391_v51  ;;  %v361_v61 = vld [vmem:[%s2726_s21 + $0xd0] sm:$0xff] }
  0x1e   : > { %2355 = vmatpush3.bf16.msra.mxu0 %v2354_v37  ;;  %v375_v58 = vld [vmem:[%s2726_s21 + $0x140] sm:$0xff]  ;;  %v376_v60 = vld [vmem:[%s2726_s21 + $0x148] sm:$0xff]  ;;  %v362_v62 = vld [vmem:[%s2726_s21 + $0xd8] sm:$0xff]  ;;  %v2362_v1 = vpack.c.bf16 %v344_v57, %v343_v56 }
  0x1f   : > { %2387 = vmatpush3.bf16.msra.mxu1 %v2386_v41  ;;  %2357 = vmatprep.subr.bf16.mxu0 %v2356_v42  ;;  %v393_v63 = vld [vmem:[%s2726_s21 + $0x1d0] sm:$0xff]  ;;  %v394_v0 = vld [vmem:[%s2726_s21 + $0x1d8] sm:$0xff]  ;;  %v2394_v2 = vpack.c.bf16 %v376_v60, %v375_v58  ;;  %v2364_v3 = vpack.c.bf16 %v362_v62, %v361_v61  ;;  %v363_v9 = vld [vmem:[%s2726_s21 + $0xe0] sm:$0xff] }
  0x20   : > { %2389 = vmatprep.subr.bf16.mxu1 %v2388_v46  ;;  %v345_v4 = vld [vmem:[%s2726_s21 + $0x50] sm:$0xff]  ;;  %v346_v5 = vld [vmem:[%s2726_s21 + $0x58] sm:$0xff]  ;;  %v2396_v7 = vpack.c.bf16 %v394_v0, %v393_v63  ;;  %v364_v10 = vld [vmem:[%s2726_s21 + $0xe8] sm:$0xff] }
  0x21   : > { %v377_v6 = vld [vmem:[%s2726_s21 + $0x150] sm:$0xff]  ;;  %v378_v8 = vld [vmem:[%s2726_s21 + $0x158] sm:$0xff]  ;;  %v395_v11 = vld [vmem:[%s2726_s21 + $0x1e0] sm:$0xff]  ;;  %v2366_v13 = vpack.c.bf16 %v346_v5, %v345_v4  ;;  %v2368_v17 = vpack.c.bf16 %v364_v10, %v363_v9 }
  0x22   : > { %2359 = vmatpush3.bf16.msra.mxu0 %v2358_v53  ;;  %v396_v12 = vld [vmem:[%s2726_s21 + $0x1e8] sm:$0xff]  ;;  %v347_v14 = vld [vmem:[%s2726_s21 + $0x60] sm:$0xff]  ;;  %v2398_v16 = vpack.c.bf16 %v378_v8, %v377_v6  ;;  %v194_v20 = vld [vmem:[%s2782_s25 + $0x18] sm:$0xff] }
  0x23   : > { %2391 = vmatpush3.bf16.msra.mxu1 %v2390_v54  ;;  %2361 = vmatprep.subr.bf16.mxu0 %v2360_v55  ;;  %v348_v15 = vld [vmem:[%s2726_s21 + $0x68] sm:$0xff]  ;;  %v379_v18 = vld [vmem:[%s2726_s21 + $0x160] sm:$0xff]  ;;  %v2400_v21 = vpack.c.bf16 %v396_v12, %v395_v11  ;;  %v365_v23 = vld [vmem:[%s2726_s21 + $0xf0] sm:$0xff] }
  0x24   : > { %2393 = vmatprep.subr.bf16.mxu1 %v2392_v59  ;;  %v192_v19 = vld [vmem:[%s2782_s25 + $0x8] sm:$0xff]  ;;  %v366_v24 = vld [vmem:[%s2726_s21 + $0xf8] sm:$0xff]  ;;  %v397_v25 = vld [vmem:[%s2726_s21 + $0x1f0] sm:$0xff]  ;;  %840 = vmatprep.mubr.f32.mxu1 %v194_v20  ;;  %v2370_v27 = vpack.c.bf16 %v348_v15, %v347_v14 }
  0x25   : > { %v380_v22 = vld [vmem:[%s2726_s21 + $0x168] sm:$0xff]  ;;  %735 = vmatprep.mubr.f32.mxu0 %v192_v19  ;;  %v398_v26 = vld [vmem:[%s2726_s21 + $0x1f8] sm:$0xff]  ;;  %v2372_v29 = vpack.c.bf16 %v366_v24, %v365_v23  ;;  %v349_v30 = vld [vmem:[%s2726_s21 + $0x70] sm:$0xff] }
  0x26   : > { %2363 = vmatpush3.bf16.msra.mxu0 %v2362_v1  ;;  %v2402_v28 = vpack.c.bf16 %v380_v22, %v379_v18  ;;  %v350_v31 = vld [vmem:[%s2726_s21 + $0x78] sm:$0xff]  ;;  %v381_v32 = vld [vmem:[%s2726_s21 + $0x170] sm:$0xff]  ;;  %v2404_v33 = vpack.c.bf16 %v398_v26, %v397_v25  ;;  %v415_v35 = vld [vmem:[%s2726_s21 + $0x280] sm:$0xff] }
  0x27   : > { %2395 = vmatpush3.bf16.msra.mxu1 %v2394_v2  ;;  %2365 = vmatprep.subr.bf16.mxu0 %v2364_v3  ;;  %v382_v34 = vld [vmem:[%s2726_s21 + $0x178] sm:$0xff]  ;;  %v416_v36 = vld [vmem:[%s2726_s21 + $0x288] sm:$0xff]  ;;  %v447_v37 = vld [vmem:[%s2726_s21 + $0x380] sm:$0xff]  ;;  %v2374_v39 = vpack.c.bf16 %v350_v31, %v349_v30 }
  0x28   : > { %2397 = vmatprep.subr.bf16.mxu1 %v2396_v7  ;;  %v448_v38 = vld [vmem:[%s2726_s21 + $0x388] sm:$0xff]  ;;  %v2406_v40 = vpack.c.bf16 %v382_v34, %v381_v32  ;;  %v2408_v41 = vpack.c.bf16 %v416_v36, %v415_v35  ;;  %v399_v42 = vld [vmem:[%s2726_s21 + $0x200] sm:$0xff]  ;;  %v417_v47 = vld [vmem:[%s2726_s21 + $0x290] sm:$0xff] }
  0x29   : > { %v400_v43 = vld [vmem:[%s2726_s21 + $0x208] sm:$0xff]  ;;  %v2440_v44 = vpack.c.bf16 %v448_v38, %v447_v37  ;;  %v431_v45 = vld [vmem:[%s2726_s21 + $0x300] sm:$0xff]  ;;  %v418_v48 = vld [vmem:[%s2726_s21 + $0x298] sm:$0xff] }
  0x2a   : > { %2367 = vmatpush3.bf16.msra.mxu0 %v2366_v13  ;;  %v432_v46 = vld [vmem:[%s2726_s21 + $0x308] sm:$0xff]  ;;  %v191_v49 = vld [vmem:[%s2782_s25] sm:$0xff]  ;;  %v2410_v50 = vpack.c.bf16 %v400_v43, %v399_v42  ;;  %v449_v51 = vld [vmem:[%s2726_s21 + $0x390] sm:$0xff]  ;;  %v2412_v58 = vpack.c.bf16 %v418_v48, %v417_v47 }
  0x2b   : > { %2399 = vmatpush3.bf16.msra.mxu1 %v2398_v16  ;;  %2369 = vmatprep.subr.bf16.mxu0 %v2368_v17  ;;  %v450_v52 = vld [vmem:[%s2726_s21 + $0x398] sm:$0xff]  ;;  %v193_v53 = vld [vmem:[%s2782_s25 + $0x10] sm:$0xff]  ;;  %v2442_v54 = vpack.c.bf16 %v432_v46, %v431_v45  ;;  %v212_v61 = vld [vmem:[%s2782_s25 + $0xa8] sm:$0xff] }
  0x2c   : > { %2401 = vmatprep.subr.bf16.mxu1 %v2400_v21  ;;  %v401_v55 = vld [vmem:[%s2726_s21 + $0x210] sm:$0xff]  ;;  %v402_v56 = vld [vmem:[%s2726_s21 + $0x218] sm:$0xff]  ;;  %v2444_v62 = vpack.c.bf16 %v450_v52, %v449_v51  ;;  %v419_v63 = vld [vmem:[%s2726_s21 + $0x2a0] sm:$0xff] }
  0x2d   : > { %v210_v57 = vld [vmem:[%s2782_s25 + $0x98] sm:$0xff]  ;;  %v433_v59 = vld [vmem:[%s2726_s21 + $0x310] sm:$0xff]  ;;  %v420_v0 = vld [vmem:[%s2726_s21 + $0x2a8] sm:$0xff]  ;;  %v2414_v2 = vpack.c.bf16 %v402_v56, %v401_v55 }
  0x2e   : > { %2371 = vmatpush3.bf16.msra.mxu0 %v2370_v27  ;;  %v434_v60 = vld [vmem:[%s2726_s21 + $0x318] sm:$0xff]  ;;  %v209_v1 = vld [vmem:[%s2782_s25 + $0x90] sm:$0xff]  ;;  %v451_v3 = vld [vmem:[%s2726_s21 + $0x3a0] sm:$0xff]  ;;  %v2416_v10 = vpack.c.bf16 %v420_v0, %v419_v63 }
  0x2f   : > { %2403 = vmatpush3.bf16.msra.mxu1 %v2402_v28  ;;  %2373 = vmatprep.subr.bf16.mxu0 %v2372_v29  ;;  %v452_v4 = vld [vmem:[%s2726_s21 + $0x3a8] sm:$0xff]  ;;  %v211_v5 = vld [vmem:[%s2782_s25 + $0xa0] sm:$0xff]  ;;  %v2446_v6 = vpack.c.bf16 %v434_v60, %v433_v59  ;;  %v230_v13 = vld [vmem:[%s2782_s25 + $0x138] sm:$0xff] }
  0x30   : > { %2405 = vmatprep.subr.bf16.mxu1 %v2404_v33  ;;  %v403_v7 = vld [vmem:[%s2726_s21 + $0x220] sm:$0xff]  ;;  %v404_v8 = vld [vmem:[%s2726_s21 + $0x228] sm:$0xff]  ;;  %v2448_v14 = vpack.c.bf16 %v452_v4, %v451_v3  ;;  %v421_v15 = vld [vmem:[%s2726_s21 + $0x2b0] sm:$0xff] }
  0x31   : > { %v228_v9 = vld [vmem:[%s2782_s25 + $0x128] sm:$0xff]  ;;  %v435_v11 = vld [vmem:[%s2726_s21 + $0x320] sm:$0xff]  ;;  %v422_v16 = vld [vmem:[%s2726_s21 + $0x2b8] sm:$0xff]  ;;  %v2418_v18 = vpack.c.bf16 %v404_v8, %v403_v7 }
  0x32   : > { %2375 = vmatpush3.bf16.msra.mxu0 %v2374_v39  ;;  %v436_v12 = vld [vmem:[%s2726_s21 + $0x328] sm:$0xff]  ;;  %v227_v17 = vld [vmem:[%s2782_s25 + $0x120] sm:$0xff]  ;;  %v453_v19 = vld [vmem:[%s2726_s21 + $0x3b0] sm:$0xff]  ;;  %v2420_v26 = vpack.c.bf16 %v422_v16, %v421_v15 }
  0x33   : > { %2407 = vmatpush3.bf16.msra.mxu1 %v2406_v40  ;;  %2409 = vmatprep.subr.bf16.mxu0 %v2408_v41  ;;  %v454_v20 = vld [vmem:[%s2726_s21 + $0x3b8] sm:$0xff]  ;;  %v229_v21 = vld [vmem:[%s2782_s25 + $0x130] sm:$0xff]  ;;  %v2450_v22 = vpack.c.bf16 %v436_v12, %v435_v11  ;;  %v248_v29 = vld [vmem:[%s2782_s25 + $0x1c8] sm:$0xff] }
  0x34   : > { %2441 = vmatprep.subr.bf16.mxu1 %v2440_v44  ;;  %v405_v23 = vld [vmem:[%s2726_s21 + $0x230] sm:$0xff]  ;;  %v406_v24 = vld [vmem:[%s2726_s21 + $0x238] sm:$0xff]  ;;  %v2452_v30 = vpack.c.bf16 %v454_v20, %v453_v19  ;;  %v423_v31 = vld [vmem:[%s2726_s21 + $0x2c0] sm:$0xff] }
  0x35   : > { %736 = vmatmul.mubr.f32.vlgmr.msra.gmra.mrb[0].mxu0 %v191_v49  ;;  %v246_v25 = vld [vmem:[%s2782_s25 + $0x1b8] sm:$0xff]  ;;  %v437_v27 = vld [vmem:[%s2726_s21 + $0x330] sm:$0xff]  ;;  %v424_v32 = vld [vmem:[%s2726_s21 + $0x2c8] sm:$0xff]  ;;  %v2422_v34 = vpack.c.bf16 %v406_v24, %v405_v23 }
  0x36   : > { %841 = vmatmul.mubr.f32.vlgmr.msra.gmra.mrb[0].mxu1 %v193_v53  ;;  %2411 = vmatpush3.bf16.msra.mxu0 %v2410_v50  ;;  %v438_v28 = vld [vmem:[%s2726_s21 + $0x338] sm:$0xff]  ;;  %v245_v33 = vld [vmem:[%s2782_s25 + $0x1b0] sm:$0xff]  ;;  %v455_v35 = vld [vmem:[%s2726_s21 + $0x3c0] sm:$0xff]  ;;  %v2424_v42 = vpack.c.bf16 %v424_v32, %v423_v31 }
  0x37   : > { %2443 = vmatpush3.bf16.msra.mxu1 %v2442_v54  ;;  %740 = vmatprep.mubr.f32.mxu0 %v210_v57  ;;  %v456_v36 = vld [vmem:[%s2726_s21 + $0x3c8] sm:$0xff]  ;;  %v247_v37 = vld [vmem:[%s2782_s25 + $0x1c0] sm:$0xff]  ;;  %v2454_v38 = vpack.c.bf16 %v438_v28, %v437_v27  ;;  %v266_v45 = vld [vmem:[%s2782_s25 + $0x258] sm:$0xff] }
  0x38   : > { %845 = vmatprep.mubr.f32.mxu1 %v212_v61  ;;  %2413 = vmatprep.subr.bf16.mxu0 %v2412_v58  ;;  %v407_v39 = vld [vmem:[%s2726_s21 + $0x240] sm:$0xff]  ;;  %v408_v40 = vld [vmem:[%s2726_s21 + $0x248] sm:$0xff]  ;;  %v2456_v46 = vpack.c.bf16 %v456_v36, %v455_v35  ;;  %v425_v47 = vld [vmem:[%s2726_s21 + $0x2d0] sm:$0xff] }
  0x39   : > { %741 = vmatmul.mubr.f32.gmra.mrb[2].mxu0 %v209_v1  ;;  %2445 = vmatprep.subr.bf16.mxu1 %v2444_v62  ;;  %v264_v41 = vld [vmem:[%s2782_s25 + $0x248] sm:$0xff]  ;;  %v439_v43 = vld [vmem:[%s2726_s21 + $0x340] sm:$0xff]  ;;  %v426_v48 = vld [vmem:[%s2726_s21 + $0x2d8] sm:$0xff]  ;;  %v2426_v50 = vpack.c.bf16 %v408_v40, %v407_v39 }
  0x3a   : > { %846 = vmatmul.mubr.f32.gmra.mrb[2].mxu1 %v211_v5  ;;  %2415 = vmatpush3.bf16.msra.mxu0 %v2414_v2  ;;  %v440_v44 = vld [vmem:[%s2726_s21 + $0x348] sm:$0xff]  ;;  %v263_v49 = vld [vmem:[%s2782_s25 + $0x240] sm:$0xff]  ;;  %v457_v51 = vld [vmem:[%s2726_s21 + $0x3d0] sm:$0xff]  ;;  %v2428_v58 = vpack.c.bf16 %v426_v48, %v425_v47 }
  0x3b   : > { %2447 = vmatpush3.bf16.msra.mxu1 %v2446_v6  ;;  %745 = vmatprep.mubr.f32.mxu0 %v228_v9  ;;  %v458_v52 = vld [vmem:[%s2726_s21 + $0x3d8] sm:$0xff]  ;;  %v265_v53 = vld [vmem:[%s2782_s25 + $0x250] sm:$0xff]  ;;  %v2458_v54 = vpack.c.bf16 %v440_v44, %v439_v43  ;;  %v284_v61 = vld [vmem:[%s2782_s25 + $0x2e8] sm:$0xff] }
  0x3c   : > { %850 = vmatprep.mubr.f32.mxu1 %v230_v13  ;;  %2417 = vmatprep.subr.bf16.mxu0 %v2416_v10  ;;  %v409_v55 = vld [vmem:[%s2726_s21 + $0x250] sm:$0xff]  ;;  %v410_v56 = vld [vmem:[%s2726_s21 + $0x258] sm:$0xff]  ;;  %v2460_v62 = vpack.c.bf16 %v458_v52, %v457_v51  ;;  %v427_v63 = vld [vmem:[%s2726_s21 + $0x2e0] sm:$0xff] }
  0x3d   : > { %746 = vmatmul.mubr.f32.gmra.mrb[4].mxu0 %v227_v17  ;;  %2449 = vmatprep.subr.bf16.mxu1 %v2448_v14  ;;  %v282_v57 = vld [vmem:[%s2782_s25 + $0x2d8] sm:$0xff]  ;;  %v441_v59 = vld [vmem:[%s2726_s21 + $0x350] sm:$0xff]  ;;  %v428_v0 = vld [vmem:[%s2726_s21 + $0x2e8] sm:$0xff]  ;;  %v2430_v2 = vpack.c.bf16 %v410_v56, %v409_v55 }
  0x3e   : > { %851 = vmatmul.mubr.f32.gmra.mrb[4].mxu1 %v229_v21  ;;  %2419 = vmatpush3.bf16.msra.mxu0 %v2418_v18  ;;  %v442_v60 = vld [vmem:[%s2726_s21 + $0x358] sm:$0xff]  ;;  %v281_v1 = vld [vmem:[%s2782_s25 + $0x2d0] sm:$0xff]  ;;  %v459_v3 = vld [vmem:[%s2726_s21 + $0x3e0] sm:$0xff]  ;;  %v2432_v10 = vpack.c.bf16 %v428_v0, %v427_v63 }
  0x3f   : > { %2451 = vmatpush3.bf16.msra.mxu1 %v2450_v22  ;;  %750 = vmatprep.mubr.f32.mxu0 %v246_v25  ;;  %v460_v4 = vld [vmem:[%s2726_s21 + $0x3e8] sm:$0xff]  ;;  %v283_v5 = vld [vmem:[%s2782_s25 + $0x2e0] sm:$0xff]  ;;  %v2462_v6 = vpack.c.bf16 %v442_v60, %v441_v59  ;;  %v302_v13 = vld [vmem:[%s2782_s25 + $0x378] sm:$0xff] }
  0x40   : > { %855 = vmatprep.mubr.f32.mxu1 %v248_v29  ;;  %2421 = vmatprep.subr.bf16.mxu0 %v2420_v26  ;;  %v411_v7 = vld [vmem:[%s2726_s21 + $0x260] sm:$0xff]  ;;  %v412_v8 = vld [vmem:[%s2726_s21 + $0x268] sm:$0xff]  ;;  %v2464_v14 = vpack.c.bf16 %v460_v4, %v459_v3  ;;  %v429_v15 = vld [vmem:[%s2726_s21 + $0x2f0] sm:$0xff] }
  0x41   : > { %751 = vmatmul.mubr.f32.gmra.mrb[6].mxu0 %v245_v33  ;;  %2453 = vmatprep.subr.bf16.mxu1 %v2452_v30  ;;  %v300_v9 = vld [vmem:[%s2782_s25 + $0x368] sm:$0xff]  ;;  %v443_v11 = vld [vmem:[%s2726_s21 + $0x360] sm:$0xff]  ;;  %v430_v16 = vld [vmem:[%s2726_s21 + $0x2f8] sm:$0xff]  ;;  %v2434_v18 = vpack.c.bf16 %v412_v8, %v411_v7 }
  0x42   : > { %856 = vmatmul.mubr.f32.gmra.mrb[6].mxu1 %v247_v37  ;;  %2423 = vmatpush3.bf16.msra.mxu0 %v2422_v34  ;;  %v444_v12 = vld [vmem:[%s2726_s21 + $0x368] sm:$0xff]  ;;  %v299_v17 = vld [vmem:[%s2782_s25 + $0x360] sm:$0xff]  ;;  %v461_v19 = vld [vmem:[%s2726_s21 + $0x3f0] sm:$0xff]  ;;  %v2436_v26 = vpack.c.bf16 %v430_v16, %v429_v15 }
  0x43   : > { %2455 = vmatpush3.bf16.msra.mxu1 %v2454_v38  ;;  %755 = vmatprep.mubr.f32.mxu0 %v264_v41  ;;  %v462_v20 = vld [vmem:[%s2726_s21 + $0x3f8] sm:$0xff]  ;;  %v301_v21 = vld [vmem:[%s2782_s25 + $0x370] sm:$0xff]  ;;  %v2466_v22 = vpack.c.bf16 %v444_v12, %v443_v11  ;;  %v320_v29 = vld [vmem:[%s2782_s25 + $0x408] sm:$0xff] }
  0x44   : > { %860 = vmatprep.mubr.f32.mxu1 %v266_v45  ;;  %2425 = vmatprep.subr.bf16.mxu0 %v2424_v42  ;;  %v413_v23 = vld [vmem:[%s2726_s21 + $0x270] sm:$0xff]  ;;  %v414_v24 = vld [vmem:[%s2726_s21 + $0x278] sm:$0xff]  ;;  %v2468_v30 = vpack.c.bf16 %v462_v20, %v461_v19  ;;  %v479_v31 = vld [vmem:[%s2726_s21 + $0x480] sm:$0xff] }
  0x45   : > { %756 = vmatmul.mubr.f32.gmra.mrb[8].mxu0 %v263_v49  ;;  %2457 = vmatprep.subr.bf16.mxu1 %v2456_v46  ;;  %v318_v25 = vld [vmem:[%s2782_s25 + $0x3f8] sm:$0xff]  ;;  %v445_v27 = vld [vmem:[%s2726_s21 + $0x370] sm:$0xff]  ;;  %v480_v32 = vld [vmem:[%s2726_s21 + $0x488] sm:$0xff]  ;;  %v2438_v34 = vpack.c.bf16 %v414_v24, %v413_v23 }
  0x46   : > { %861 = vmatmul.mubr.f32.gmra.mrb[8].mxu1 %v265_v53  ;;  %2427 = vmatpush3.bf16.msra.mxu0 %v2426_v50  ;;  %v446_v28 = vld [vmem:[%s2726_s21 + $0x378] sm:$0xff]  ;;  %v317_v33 = vld [vmem:[%s2782_s25 + $0x3f0] sm:$0xff]  ;;  %v511_v35 = vld [vmem:[%s2726_s21 + $0x580] sm:$0xff]  ;;  %v2472_v42 = vpack.c.bf16 %v480_v32, %v479_v31 }
  0x47   : > { %2459 = vmatpush3.bf16.msra.mxu1 %v2458_v54  ;;  %760 = vmatprep.mubr.f32.mxu0 %v282_v57  ;;  %v512_v36 = vld [vmem:[%s2726_s21 + $0x588] sm:$0xff]  ;;  %v319_v37 = vld [vmem:[%s2782_s25 + $0x400] sm:$0xff]  ;;  %v2470_v38 = vpack.c.bf16 %v446_v28, %v445_v27  ;;  %v198_v45 = vld [vmem:[%s2782_s25 + $0x38] sm:$0xff] }
  0x48   : > { %865 = vmatprep.mubr.f32.mxu1 %v284_v61  ;;  %2429 = vmatprep.subr.bf16.mxu0 %v2428_v58  ;;  %v463_v39 = vld [vmem:[%s2726_s21 + $0x400] sm:$0xff]  ;;  %v464_v40 = vld [vmem:[%s2726_s21 + $0x408] sm:$0xff]  ;;  %v2504_v46 = vpack.c.bf16 %v512_v36, %v511_v35  ;;  %v481_v47 = vld [vmem:[%s2726_s21 + $0x490] sm:$0xff] }
  0x49   : > { %761 = vmatmul.mubr.f32.gmra.mrb[10].mxu0 %v281_v1  ;;  %2461 = vmatprep.subr.bf16.mxu1 %v2460_v62  ;;  %v196_v41 = vld [vmem:[%s2782_s25 + $0x28] sm:$0xff]  ;;  %v495_v43 = vld [vmem:[%s2726_s21 + $0x500] sm:$0xff]  ;;  %v482_v48 = vld [vmem:[%s2726_s21 + $0x498] sm:$0xff]  ;;  %v2474_v50 = vpack.c.bf16 %v464_v40, %v463_v39 }
  0x4a   : > { %866 = vmatmul.mubr.f32.gmra.mrb[10].mxu1 %v283_v5  ;;  %2431 = vmatpush3.bf16.msra.mxu0 %v2430_v2  ;;  %v496_v44 = vld [vmem:[%s2726_s21 + $0x508] sm:$0xff]  ;;  %v195_v49 = vld [vmem:[%s2782_s25 + $0x20] sm:$0xff]  ;;  %v513_v51 = vld [vmem:[%s2726_s21 + $0x590] sm:$0xff]  ;;  %v2476_v58 = vpack.c.bf16 %v482_v48, %v481_v47 }
  0x4b   : > { %2463 = vmatpush3.bf16.msra.mxu1 %v2462_v6  ;;  %765 = vmatprep.mubr.f32.mxu0 %v300_v9  ;;  %v514_v52 = vld [vmem:[%s2726_s21 + $0x598] sm:$0xff]  ;;  %v197_v53 = vld [vmem:[%s2782_s25 + $0x30] sm:$0xff]  ;;  %v2506_v54 = vpack.c.bf16 %v496_v44, %v495_v43  ;;  %v216_v61 = vld [vmem:[%s2782_s25 + $0xc8] sm:$0xff] }
  0x4c   : > { %870 = vmatprep.mubr.f32.mxu1 %v302_v13  ;;  %2433 = vmatprep.subr.bf16.mxu0 %v2432_v10  ;;  %v465_v55 = vld [vmem:[%s2726_s21 + $0x410] sm:$0xff]  ;;  %v466_v56 = vld [vmem:[%s2726_s21 + $0x418] sm:$0xff]  ;;  %v2508_v62 = vpack.c.bf16 %v514_v52, %v513_v51  ;;  %v483_v63 = vld [vmem:[%s2726_s21 + $0x4a0] sm:$0xff] }
  0x4d   : > { %766 = vmatmul.mubr.f32.gmra.mrb[12].mxu0 %v299_v17  ;;  %2465 = vmatprep.subr.bf16.mxu1 %v2464_v14  ;;  %v214_v57 = vld [vmem:[%s2782_s25 + $0xb8] sm:$0xff]  ;;  %v497_v59 = vld [vmem:[%s2726_s21 + $0x510] sm:$0xff]  ;;  %v484_v0 = vld [vmem:[%s2726_s21 + $0x4a8] sm:$0xff]  ;;  %v2478_v2 = vpack.c.bf16 %v466_v56, %v465_v55 }
  0x4e   : > { %871 = vmatmul.mubr.f32.gmra.mrb[12].mxu1 %v301_v21  ;;  %2435 = vmatpush3.bf16.msra.mxu0 %v2434_v18  ;;  %v498_v60 = vld [vmem:[%s2726_s21 + $0x518] sm:$0xff]  ;;  %v213_v1 = vld [vmem:[%s2782_s25 + $0xb0] sm:$0xff]  ;;  %v515_v3 = vld [vmem:[%s2726_s21 + $0x5a0] sm:$0xff]  ;;  %v2480_v10 = vpack.c.bf16 %v484_v0, %v483_v63 }
  0x4f   : > { %2467 = vmatpush3.bf16.msra.mxu1 %v2466_v22  ;;  %770 = vmatprep.mubr.f32.mxu0 %v318_v25  ;;  %v516_v4 = vld [vmem:[%s2726_s21 + $0x5a8] sm:$0xff]  ;;  %v215_v5 = vld [vmem:[%s2782_s25 + $0xc0] sm:$0xff]  ;;  %v2510_v6 = vpack.c.bf16 %v498_v60, %v497_v59  ;;  %v234_v13 = vld [vmem:[%s2782_s25 + $0x158] sm:$0xff] }
  0x50   : > { %875 = vmatprep.mubr.f32.mxu1 %v320_v29  ;;  %2437 = vmatprep.subr.bf16.mxu0 %v2436_v26  ;;  %v467_v7 = vld [vmem:[%s2726_s21 + $0x420] sm:$0xff]  ;;  %v468_v8 = vld [vmem:[%s2726_s21 + $0x428] sm:$0xff]  ;;  %v2512_v14 = vpack.c.bf16 %v516_v4, %v515_v3  ;;  %v485_v15 = vld [vmem:[%s2726_s21 + $0x4b0] sm:$0xff] }
  0x51   : > { %771 = vmatmul.mubr.f32.gmra.mrb[14].mxu0 %v317_v33  ;;  %2469 = vmatprep.subr.bf16.mxu1 %v2468_v30  ;;  %v232_v9 = vld [vmem:[%s2782_s25 + $0x148] sm:$0xff]  ;;  %v499_v11 = vld [vmem:[%s2726_s21 + $0x520] sm:$0xff]  ;;  %v486_v16 = vld [vmem:[%s2726_s21 + $0x4b8] sm:$0xff]  ;;  %v2482_v18 = vpack.c.bf16 %v468_v8, %v467_v7 }
  0x52   : > { %876 = vmatmul.mubr.f32.gmra.mrb[14].mxu1 %v319_v37  ;;  %2439 = vmatpush3.bf16.msra.mxu0 %v2438_v34  ;;  %v500_v12 = vld [vmem:[%s2726_s21 + $0x528] sm:$0xff]  ;;  %v231_v17 = vld [vmem:[%s2782_s25 + $0x140] sm:$0xff]  ;;  %v517_v19 = vld [vmem:[%s2726_s21 + $0x5b0] sm:$0xff]  ;;  %v2484_v26 = vpack.c.bf16 %v486_v16, %v485_v15 }
  0x53   : > { %2471 = vmatpush3.bf16.msra.mxu1 %v2470_v38  ;;  %945 = vmatprep.mubr.f32.mxu0 %v196_v41  ;;  %v518_v20 = vld [vmem:[%s2726_s21 + $0x5b8] sm:$0xff]  ;;  %v233_v21 = vld [vmem:[%s2782_s25 + $0x150] sm:$0xff]  ;;  %v2514_v22 = vpack.c.bf16 %v500_v12, %v499_v11  ;;  %v252_v29 = vld [vmem:[%s2782_s25 + $0x1e8] sm:$0xff] }
  0x54   : > { %1050 = vmatprep.mubr.f32.mxu1 %v198_v45  ;;  %2473 = vmatprep.subr.bf16.mxu0 %v2472_v42  ;;  %v469_v23 = vld [vmem:[%s2726_s21 + $0x430] sm:$0xff]  ;;  %v470_v24 = vld [vmem:[%s2726_s21 + $0x438] sm:$0xff]  ;;  %v2516_v30 = vpack.c.bf16 %v518_v20, %v517_v19  ;;  %v487_v31 = vld [vmem:[%s2726_s21 + $0x4c0] sm:$0xff] }
  0x55   : > { %946 = vmatmul.mubr.f32.vlgmr.msra.gmra.mrb[16].mxu0 %v195_v49  ;;  %2505 = vmatprep.subr.bf16.mxu1 %v2504_v46  ;;  %v250_v25 = vld [vmem:[%s2782_s25 + $0x1d8] sm:$0xff]  ;;  %v501_v27 = vld [vmem:[%s2726_s21 + $0x530] sm:$0xff]  ;;  %v488_v32 = vld [vmem:[%s2726_s21 + $0x4c8] sm:$0xff]  ;;  %v2486_v34 = vpack.c.bf16 %v470_v24, %v469_v23 }
  0x56   : > { %1051 = vmatmul.mubr.f32.vlgmr.msra.gmra.mrb[16].mxu1 %v197_v53  ;;  %2475 = vmatpush3.bf16.msra.mxu0 %v2474_v50  ;;  %v502_v28 = vld [vmem:[%s2726_s21 + $0x538] sm:$0xff]  ;;  %v249_v33 = vld [vmem:[%s2782_s25 + $0x1d0] sm:$0xff]  ;;  %v519_v35 = vld [vmem:[%s2726_s21 + $0x5c0] sm:$0xff]  ;;  %v2488_v42 = vpack.c.bf16 %v488_v32, %v487_v31 }
  0x57   : > { %2507 = vmatpush3.bf16.msra.mxu1 %v2506_v54  ;;  %950 = vmatprep.mubr.f32.mxu0 %v214_v57  ;;  %v520_v36 = vld [vmem:[%s2726_s21 + $0x5c8] sm:$0xff]  ;;  %v251_v37 = vld [vmem:[%s2782_s25 + $0x1e0] sm:$0xff]  ;;  %v2518_v38 = vpack.c.bf16 %v502_v28, %v501_v27  ;;  %v270_v45 = vld [vmem:[%s2782_s25 + $0x278] sm:$0xff] }
  0x58   : > { %1055 = vmatprep.mubr.f32.mxu1 %v216_v61  ;;  %2477 = vmatprep.subr.bf16.mxu0 %v2476_v58  ;;  %v471_v39 = vld [vmem:[%s2726_s21 + $0x440] sm:$0xff]  ;;  %v472_v40 = vld [vmem:[%s2726_s21 + $0x448] sm:$0xff]  ;;  %v2520_v46 = vpack.c.bf16 %v520_v36, %v519_v35  ;;  %v489_v47 = vld [vmem:[%s2726_s21 + $0x4d0] sm:$0xff] }
  0x59   : > { %951 = vmatmul.mubr.f32.gmra.mrb[18].mxu0 %v213_v1  ;;  %2509 = vmatprep.subr.bf16.mxu1 %v2508_v62  ;;  %v268_v41 = vld [vmem:[%s2782_s25 + $0x268] sm:$0xff]  ;;  %v503_v43 = vld [vmem:[%s2726_s21 + $0x540] sm:$0xff]  ;;  %v490_v48 = vld [vmem:[%s2726_s21 + $0x4d8] sm:$0xff]  ;;  %v2490_v50 = vpack.c.bf16 %v472_v40, %v471_v39 }
  0x5a   : > { %1056 = vmatmul.mubr.f32.gmra.mrb[18].mxu1 %v215_v5  ;;  %2479 = vmatpush3.bf16.msra.mxu0 %v2478_v2  ;;  %v504_v44 = vld [vmem:[%s2726_s21 + $0x548] sm:$0xff]  ;;  %v267_v49 = vld [vmem:[%s2782_s25 + $0x260] sm:$0xff]  ;;  %v521_v51 = vld [vmem:[%s2726_s21 + $0x5d0] sm:$0xff]  ;;  %v2492_v58 = vpack.c.bf16 %v490_v48, %v489_v47 }
  0x5b   : > { %2511 = vmatpush3.bf16.msra.mxu1 %v2510_v6  ;;  %955 = vmatprep.mubr.f32.mxu0 %v232_v9  ;;  %v522_v52 = vld [vmem:[%s2726_s21 + $0x5d8] sm:$0xff]  ;;  %v269_v53 = vld [vmem:[%s2782_s25 + $0x270] sm:$0xff]  ;;  %v2522_v54 = vpack.c.bf16 %v504_v44, %v503_v43  ;;  %v288_v61 = vld [vmem:[%s2782_s25 + $0x308] sm:$0xff] }
  0x5c   : > { %1060 = vmatprep.mubr.f32.mxu1 %v234_v13  ;;  %2481 = vmatprep.subr.bf16.mxu0 %v2480_v10  ;;  %v473_v55 = vld [vmem:[%s2726_s21 + $0x450] sm:$0xff]  ;;  %v474_v56 = vld [vmem:[%s2726_s21 + $0x458] sm:$0xff]  ;;  %v2524_v62 = vpack.c.bf16 %v522_v52, %v521_v51  ;;  %v491_v63 = vld [vmem:[%s2726_s21 + $0x4e0] sm:$0xff] }
  0x5d   : > { %956 = vmatmul.mubr.f32.gmra.mrb[20].mxu0 %v231_v17  ;;  %2513 = vmatprep.subr.bf16.mxu1 %v2512_v14  ;;  %v286_v57 = vld [vmem:[%s2782_s25 + $0x2f8] sm:$0xff]  ;;  %v505_v59 = vld [vmem:[%s2726_s21 + $0x550] sm:$0xff]  ;;  %v492_v0 = vld [vmem:[%s2726_s21 + $0x4e8] sm:$0xff]  ;;  %v2494_v2 = vpack.c.bf16 %v474_v56, %v473_v55 }
  0x5e   : > { %1061 = vmatmul.mubr.f32.gmra.mrb[20].mxu1 %v233_v21  ;;  %2483 = vmatpush3.bf16.msra.mxu0 %v2482_v18  ;;  %v506_v60 = vld [vmem:[%s2726_s21 + $0x558] sm:$0xff]  ;;  %v285_v1 = vld [vmem:[%s2782_s25 + $0x2f0] sm:$0xff]  ;;  %v523_v3 = vld [vmem:[%s2726_s21 + $0x5e0] sm:$0xff]  ;;  %v2496_v10 = vpack.c.bf16 %v492_v0, %v491_v63 }
  0x5f   : > { %2515 = vmatpush3.bf16.msra.mxu1 %v2514_v22  ;;  %960 = vmatprep.mubr.f32.mxu0 %v250_v25  ;;  %v524_v4 = vld [vmem:[%s2726_s21 + $0x5e8] sm:$0xff]  ;;  %v287_v5 = vld [vmem:[%s2782_s25 + $0x300] sm:$0xff]  ;;  %v2526_v6 = vpack.c.bf16 %v506_v60, %v505_v59  ;;  %v306_v13 = vld [vmem:[%s2782_s25 + $0x398] sm:$0xff] }
  0x60   : > { %1065 = vmatprep.mubr.f32.mxu1 %v252_v29  ;;  %2485 = vmatprep.subr.bf16.mxu0 %v2484_v26  ;;  %v475_v7 = vld [vmem:[%s2726_s21 + $0x460] sm:$0xff]  ;;  %v476_v8 = vld [vmem:[%s2726_s21 + $0x468] sm:$0xff]  ;;  %v2528_v14 = vpack.c.bf16 %v524_v4, %v523_v3  ;;  %v493_v15 = vld [vmem:[%s2726_s21 + $0x4f0] sm:$0xff] }
  0x61   : > { %961 = vmatmul.mubr.f32.gmra.mrb[22].mxu0 %v249_v33  ;;  %2517 = vmatprep.subr.bf16.mxu1 %v2516_v30  ;;  %v304_v9 = vld [vmem:[%s2782_s25 + $0x388] sm:$0xff]  ;;  %v507_v11 = vld [vmem:[%s2726_s21 + $0x560] sm:$0xff]  ;;  %v494_v16 = vld [vmem:[%s2726_s21 + $0x4f8] sm:$0xff]  ;;  %v2498_v18 = vpack.c.bf16 %v476_v8, %v475_v7 }
  0x62   : > { %1066 = vmatmul.mubr.f32.gmra.mrb[22].mxu1 %v251_v37  ;;  %2487 = vmatpush3.bf16.msra.mxu0 %v2486_v34  ;;  %v508_v12 = vld [vmem:[%s2726_s21 + $0x568] sm:$0xff]  ;;  %v303_v17 = vld [vmem:[%s2782_s25 + $0x380] sm:$0xff]  ;;  %v525_v19 = vld [vmem:[%s2726_s21 + $0x5f0] sm:$0xff]  ;;  %v2500_v26 = vpack.c.bf16 %v494_v16, %v493_v15 }
  0x63   : > { %2519 = vmatpush3.bf16.msra.mxu1 %v2518_v38  ;;  %965 = vmatprep.mubr.f32.mxu0 %v268_v41  ;;  %v526_v20 = vld [vmem:[%s2726_s21 + $0x5f8] sm:$0xff]  ;;  %v305_v21 = vld [vmem:[%s2782_s25 + $0x390] sm:$0xff]  ;;  %v2530_v22 = vpack.c.bf16 %v508_v12, %v507_v11  ;;  %v324_v29 = vld [vmem:[%s2782_s25 + $0x428] sm:$0xff] }
  0x64   : > { %1070 = vmatprep.mubr.f32.mxu1 %v270_v45  ;;  %2489 = vmatprep.subr.bf16.mxu0 %v2488_v42  ;;  %v477_v23 = vld [vmem:[%s2726_s21 + $0x470] sm:$0xff]  ;;  %v478_v24 = vld [vmem:[%s2726_s21 + $0x478] sm:$0xff]  ;;  %v2532_v30 = vpack.c.bf16 %v526_v20, %v525_v19  ;;  %v543_v31 = vld [vmem:[%s2726_s21 + $0x680] sm:$0xff] }
  0x65   : > { %966 = vmatmul.mubr.f32.gmra.mrb[24].mxu0 %v267_v49  ;;  %2521 = vmatprep.subr.bf16.mxu1 %v2520_v46  ;;  %v322_v25 = vld [vmem:[%s2782_s25 + $0x418] sm:$0xff]  ;;  %v509_v27 = vld [vmem:[%s2726_s21 + $0x570] sm:$0xff]  ;;  %v544_v32 = vld [vmem:[%s2726_s21 + $0x688] sm:$0xff]  ;;  %v2502_v34 = vpack.c.bf16 %v478_v24, %v477_v23 }
  0x66   : > { %1071 = vmatmul.mubr.f32.gmra.mrb[24].mxu1 %v269_v53  ;;  %2491 = vmatpush3.bf16.msra.mxu0 %v2490_v50  ;;  %v510_v28 = vld [vmem:[%s2726_s21 + $0x578] sm:$0xff]  ;;  %v321_v33 = vld [vmem:[%s2782_s25 + $0x410] sm:$0xff]  ;;  %v575_v35 = vld [vmem:[%s2726_s21 + $0x780] sm:$0xff]  ;;  %v2536_v42 = vpack.c.bf16 %v544_v32, %v543_v31 }
  0x67   : > { %2523 = vmatpush3.bf16.msra.mxu1 %v2522_v54  ;;  %970 = vmatprep.mubr.f32.mxu0 %v286_v57  ;;  %v576_v36 = vld [vmem:[%s2726_s21 + $0x788] sm:$0xff]  ;;  %v323_v37 = vld [vmem:[%s2782_s25 + $0x420] sm:$0xff]  ;;  %v2534_v38 = vpack.c.bf16 %v510_v28, %v509_v27  ;;  %v202_v45 = vld [vmem:[%s2782_s25 + $0x58] sm:$0xff] }
  0x68   : > { %1075 = vmatprep.mubr.f32.mxu1 %v288_v61  ;;  %2493 = vmatprep.subr.bf16.mxu0 %v2492_v58  ;;  %v527_v39 = vld [vmem:[%s2726_s21 + $0x600] sm:$0xff]  ;;  %v528_v40 = vld [vmem:[%s2726_s21 + $0x608] sm:$0xff]  ;;  %v2568_v46 = vpack.c.bf16 %v576_v36, %v575_v35  ;;  %v545_v47 = vld [vmem:[%s2726_s21 + $0x690] sm:$0xff] }
  0x69   : > { %971 = vmatmul.mubr.f32.gmra.mrb[26].mxu0 %v285_v1  ;;  %2525 = vmatprep.subr.bf16.mxu1 %v2524_v62  ;;  %v200_v41 = vld [vmem:[%s2782_s25 + $0x48] sm:$0xff]  ;;  %v559_v43 = vld [vmem:[%s2726_s21 + $0x700] sm:$0xff]  ;;  %v546_v48 = vld [vmem:[%s2726_s21 + $0x698] sm:$0xff]  ;;  %v2538_v50 = vpack.c.bf16 %v528_v40, %v527_v39 }
  0x6a   : > { %1076 = vmatmul.mubr.f32.gmra.mrb[26].mxu1 %v287_v5  ;;  %2495 = vmatpush3.bf16.msra.mxu0 %v2494_v2  ;;  %v560_v44 = vld [vmem:[%s2726_s21 + $0x708] sm:$0xff]  ;;  %v199_v49 = vld [vmem:[%s2782_s25 + $0x40] sm:$0xff]  ;;  %v577_v51 = vld [vmem:[%s2726_s21 + $0x790] sm:$0xff]  ;;  %v2540_v58 = vpack.c.bf16 %v546_v48, %v545_v47 }
  0x6b   : > { %2527 = vmatpush3.bf16.msra.mxu1 %v2526_v6  ;;  %975 = vmatprep.mubr.f32.mxu0 %v304_v9  ;;  %v578_v52 = vld [vmem:[%s2726_s21 + $0x798] sm:$0xff]  ;;  %v201_v53 = vld [vmem:[%s2782_s25 + $0x50] sm:$0xff]  ;;  %v2570_v54 = vpack.c.bf16 %v560_v44, %v559_v43  ;;  %v220_v61 = vld [vmem:[%s2782_s25 + $0xe8] sm:$0xff] }
  0x6c   : > { %1080 = vmatprep.mubr.f32.mxu1 %v306_v13  ;;  %2497 = vmatprep.subr.bf16.mxu0 %v2496_v10  ;;  %v529_v55 = vld [vmem:[%s2726_s21 + $0x610] sm:$0xff]  ;;  %v530_v56 = vld [vmem:[%s2726_s21 + $0x618] sm:$0xff]  ;;  %v2572_v62 = vpack.c.bf16 %v578_v52, %v577_v51  ;;  %v547_v63 = vld [vmem:[%s2726_s21 + $0x6a0] sm:$0xff] }
  0x6d   : > { %976 = vmatmul.mubr.f32.gmra.mrb[28].mxu0 %v303_v17  ;;  %2529 = vmatprep.subr.bf16.mxu1 %v2528_v14  ;;  %v218_v57 = vld [vmem:[%s2782_s25 + $0xd8] sm:$0xff]  ;;  %v561_v59 = vld [vmem:[%s2726_s21 + $0x710] sm:$0xff]  ;;  %v548_v0 = vld [vmem:[%s2726_s21 + $0x6a8] sm:$0xff]  ;;  %v2542_v2 = vpack.c.bf16 %v530_v56, %v529_v55 }
  0x6e   : > { %1081 = vmatmul.mubr.f32.gmra.mrb[28].mxu1 %v305_v21  ;;  %2499 = vmatpush3.bf16.msra.mxu0 %v2498_v18  ;;  %v562_v60 = vld [vmem:[%s2726_s21 + $0x718] sm:$0xff]  ;;  %v217_v1 = vld [vmem:[%s2782_s25 + $0xd0] sm:$0xff]  ;;  %v579_v3 = vld [vmem:[%s2726_s21 + $0x7a0] sm:$0xff]  ;;  %v2544_v10 = vpack.c.bf16 %v548_v0, %v547_v63 }
  0x6f   : > { %2531 = vmatpush3.bf16.msra.mxu1 %v2530_v22  ;;  %980 = vmatprep.mubr.f32.mxu0 %v322_v25  ;;  %v580_v4 = vld [vmem:[%s2726_s21 + $0x7a8] sm:$0xff]  ;;  %v219_v5 = vld [vmem:[%s2782_s25 + $0xe0] sm:$0xff]  ;;  %v2574_v6 = vpack.c.bf16 %v562_v60, %v561_v59  ;;  %v238_v13 = vld [vmem:[%s2782_s25 + $0x178] sm:$0xff] }
  0x70   : > { %1085 = vmatprep.mubr.f32.mxu1 %v324_v29  ;;  %2501 = vmatprep.subr.bf16.mxu0 %v2500_v26  ;;  %v531_v7 = vld [vmem:[%s2726_s21 + $0x620] sm:$0xff]  ;;  %v532_v8 = vld [vmem:[%s2726_s21 + $0x628] sm:$0xff]  ;;  %v2576_v14 = vpack.c.bf16 %v580_v4, %v579_v3  ;;  %v549_v15 = vld [vmem:[%s2726_s21 + $0x6b0] sm:$0xff] }
  0x71   : > { %981 = vmatmul.mubr.f32.gmra.mrb[30].mxu0 %v321_v33  ;;  %2533 = vmatprep.subr.bf16.mxu1 %v2532_v30  ;;  %v236_v9 = vld [vmem:[%s2782_s25 + $0x168] sm:$0xff]  ;;  %v563_v11 = vld [vmem:[%s2726_s21 + $0x720] sm:$0xff]  ;;  %v550_v16 = vld [vmem:[%s2726_s21 + $0x6b8] sm:$0xff]  ;;  %v2546_v18 = vpack.c.bf16 %v532_v8, %v531_v7 }
  0x72   : > { %1086 = vmatmul.mubr.f32.gmra.mrb[30].mxu1 %v323_v37  ;;  %2503 = vmatpush3.bf16.msra.mxu0 %v2502_v34  ;;  %v564_v12 = vld [vmem:[%s2726_s21 + $0x728] sm:$0xff]  ;;  %v235_v17 = vld [vmem:[%s2782_s25 + $0x160] sm:$0xff]  ;;  %v581_v19 = vld [vmem:[%s2726_s21 + $0x7b0] sm:$0xff]  ;;  %v2548_v26 = vpack.c.bf16 %v550_v16, %v549_v15 }
  0x73   : > { %2535 = vmatpush3.bf16.msra.mxu1 %v2534_v38  ;;  %1155 = vmatprep.mubr.f32.mxu0 %v200_v41  ;;  %v582_v20 = vld [vmem:[%s2726_s21 + $0x7b8] sm:$0xff]  ;;  %v237_v21 = vld [vmem:[%s2782_s25 + $0x170] sm:$0xff]  ;;  %v2578_v22 = vpack.c.bf16 %v564_v12, %v563_v11  ;;  %v256_v29 = vld [vmem:[%s2782_s25 + $0x208] sm:$0xff] }
  0x74   : > { %1260 = vmatprep.mubr.f32.mxu1 %v202_v45  ;;  %2537 = vmatprep.subr.bf16.mxu0 %v2536_v42  ;;  %v533_v23 = vld [vmem:[%s2726_s21 + $0x630] sm:$0xff]  ;;  %v534_v24 = vld [vmem:[%s2726_s21 + $0x638] sm:$0xff]  ;;  %v2580_v30 = vpack.c.bf16 %v582_v20, %v581_v19  ;;  %v551_v31 = vld [vmem:[%s2726_s21 + $0x6c0] sm:$0xff] }
  0x75   : > { %1156 = vmatmul.mubr.f32.vlgmr.msra.gmra.mrb[32].mxu0 %v199_v49  ;;  %2569 = vmatprep.subr.bf16.mxu1 %v2568_v46  ;;  %v254_v25 = vld [vmem:[%s2782_s25 + $0x1f8] sm:$0xff]  ;;  %v565_v27 = vld [vmem:[%s2726_s21 + $0x730] sm:$0xff]  ;;  %v552_v32 = vld [vmem:[%s2726_s21 + $0x6c8] sm:$0xff]  ;;  %v2550_v34 = vpack.c.bf16 %v534_v24, %v533_v23 }
  0x76   : > { %1261 = vmatmul.mubr.f32.vlgmr.msra.gmra.mrb[32].mxu1 %v201_v53  ;;  %2539 = vmatpush3.bf16.msra.mxu0 %v2538_v50  ;;  %v566_v28 = vld [vmem:[%s2726_s21 + $0x738] sm:$0xff]  ;;  %v253_v33 = vld [vmem:[%s2782_s25 + $0x1f0] sm:$0xff]  ;;  %v583_v35 = vld [vmem:[%s2726_s21 + $0x7c0] sm:$0xff]  ;;  %v2552_v42 = vpack.c.bf16 %v552_v32, %v551_v31 }
  0x77   : > { %2571 = vmatpush3.bf16.msra.mxu1 %v2570_v54  ;;  %1160 = vmatprep.mubr.f32.mxu0 %v218_v57  ;;  %v584_v36 = vld [vmem:[%s2726_s21 + $0x7c8] sm:$0xff]  ;;  %v255_v37 = vld [vmem:[%s2782_s25 + $0x200] sm:$0xff]  ;;  %v2582_v38 = vpack.c.bf16 %v566_v28, %v565_v27  ;;  %v274_v45 = vld [vmem:[%s2782_s25 + $0x298] sm:$0xff] }
  0x78   : > { %1265 = vmatprep.mubr.f32.mxu1 %v220_v61  ;;  %2541 = vmatprep.subr.bf16.mxu0 %v2540_v58  ;;  %v535_v39 = vld [vmem:[%s2726_s21 + $0x640] sm:$0xff]  ;;  %v536_v40 = vld [vmem:[%s2726_s21 + $0x648] sm:$0xff]  ;;  %v2584_v46 = vpack.c.bf16 %v584_v36, %v583_v35  ;;  %v553_v47 = vld [vmem:[%s2726_s21 + $0x6d0] sm:$0xff] }
  0x79   : > { %1161 = vmatmul.mubr.f32.gmra.mrb[34].mxu0 %v217_v1  ;;  %2573 = vmatprep.subr.bf16.mxu1 %v2572_v62  ;;  %v272_v41 = vld [vmem:[%s2782_s25 + $0x288] sm:$0xff]  ;;  %v567_v43 = vld [vmem:[%s2726_s21 + $0x740] sm:$0xff]  ;;  %v554_v48 = vld [vmem:[%s2726_s21 + $0x6d8] sm:$0xff]  ;;  %v2554_v50 = vpack.c.bf16 %v536_v40, %v535_v39 }
  0x7a   : > { %1266 = vmatmul.mubr.f32.gmra.mrb[34].mxu1 %v219_v5  ;;  %2543 = vmatpush3.bf16.msra.mxu0 %v2542_v2  ;;  %v568_v44 = vld [vmem:[%s2726_s21 + $0x748] sm:$0xff]  ;;  %v271_v49 = vld [vmem:[%s2782_s25 + $0x280] sm:$0xff]  ;;  %v585_v51 = vld [vmem:[%s2726_s21 + $0x7d0] sm:$0xff]  ;;  %v2556_v58 = vpack.c.bf16 %v554_v48, %v553_v47 }
  0x7b   : > { %2575 = vmatpush3.bf16.msra.mxu1 %v2574_v6  ;;  %1165 = vmatprep.mubr.f32.mxu0 %v236_v9  ;;  %v586_v52 = vld [vmem:[%s2726_s21 + $0x7d8] sm:$0xff]  ;;  %v273_v53 = vld [vmem:[%s2782_s25 + $0x290] sm:$0xff]  ;;  %v2586_v54 = vpack.c.bf16 %v568_v44, %v567_v43  ;;  %v292_v61 = vld [vmem:[%s2782_s25 + $0x328] sm:$0xff] }
  0x7c   : > { %1270 = vmatprep.mubr.f32.mxu1 %v238_v13  ;;  %2545 = vmatprep.subr.bf16.mxu0 %v2544_v10  ;;  %v537_v55 = vld [vmem:[%s2726_s21 + $0x650] sm:$0xff]  ;;  %v538_v56 = vld [vmem:[%s2726_s21 + $0x658] sm:$0xff]  ;;  %v2588_v62 = vpack.c.bf16 %v586_v52, %v585_v51  ;;  %v555_v63 = vld [vmem:[%s2726_s21 + $0x6e0] sm:$0xff] }
  0x7d   : > { %1166 = vmatmul.mubr.f32.gmra.mrb[36].mxu0 %v235_v17  ;;  %2577 = vmatprep.subr.bf16.mxu1 %v2576_v14  ;;  %v290_v57 = vld [vmem:[%s2782_s25 + $0x318] sm:$0xff]  ;;  %v569_v59 = vld [vmem:[%s2726_s21 + $0x750] sm:$0xff]  ;;  %v556_v0 = vld [vmem:[%s2726_s21 + $0x6e8] sm:$0xff]  ;;  %v2558_v2 = vpack.c.bf16 %v538_v56, %v537_v55 }
  0x7e   : > { %1271 = vmatmul.mubr.f32.gmra.mrb[36].mxu1 %v237_v21  ;;  %2547 = vmatpush3.bf16.msra.mxu0 %v2546_v18  ;;  %v570_v60 = vld [vmem:[%s2726_s21 + $0x758] sm:$0xff]  ;;  %v289_v1 = vld [vmem:[%s2782_s25 + $0x310] sm:$0xff]  ;;  %v587_v3 = vld [vmem:[%s2726_s21 + $0x7e0] sm:$0xff]  ;;  %v2560_v10 = vpack.c.bf16 %v556_v0, %v555_v63 }
  0x7f   : > { %2579 = vmatpush3.bf16.msra.mxu1 %v2578_v22  ;;  %1170 = vmatprep.mubr.f32.mxu0 %v254_v25  ;;  %v588_v4 = vld [vmem:[%s2726_s21 + $0x7e8] sm:$0xff]  ;;  %v291_v5 = vld [vmem:[%s2782_s25 + $0x320] sm:$0xff]  ;;  %v2590_v6 = vpack.c.bf16 %v570_v60, %v569_v59  ;;  %v310_v13 = vld [vmem:[%s2782_s25 + $0x3b8] sm:$0xff] }
  0x80   : > { %1275 = vmatprep.mubr.f32.mxu1 %v256_v29  ;;  %2549 = vmatprep.subr.bf16.mxu0 %v2548_v26  ;;  %v539_v7 = vld [vmem:[%s2726_s21 + $0x660] sm:$0xff]  ;;  %v540_v8 = vld [vmem:[%s2726_s21 + $0x668] sm:$0xff]  ;;  %v2592_v14 = vpack.c.bf16 %v588_v4, %v587_v3  ;;  %v557_v15 = vld [vmem:[%s2726_s21 + $0x6f0] sm:$0xff] }
  0x81   : > { %1171 = vmatmul.mubr.f32.gmra.mrb[38].mxu0 %v253_v33  ;;  %2581 = vmatprep.subr.bf16.mxu1 %v2580_v30  ;;  %v308_v9 = vld [vmem:[%s2782_s25 + $0x3a8] sm:$0xff]  ;;  %v571_v11 = vld [vmem:[%s2726_s21 + $0x760] sm:$0xff]  ;;  %v558_v16 = vld [vmem:[%s2726_s21 + $0x6f8] sm:$0xff]  ;;  %v2562_v18 = vpack.c.bf16 %v540_v8, %v539_v7 }
  0x82   : > { %1276 = vmatmul.mubr.f32.gmra.mrb[38].mxu1 %v255_v37  ;;  %2551 = vmatpush3.bf16.msra.mxu0 %v2550_v34  ;;  %v572_v12 = vld [vmem:[%s2726_s21 + $0x768] sm:$0xff]  ;;  %v307_v17 = vld [vmem:[%s2782_s25 + $0x3a0] sm:$0xff]  ;;  %v589_v19 = vld [vmem:[%s2726_s21 + $0x7f0] sm:$0xff]  ;;  %v2564_v26 = vpack.c.bf16 %v558_v16, %v557_v15 }
  0x83   : > { %2583 = vmatpush3.bf16.msra.mxu1 %v2582_v38  ;;  %1175 = vmatprep.mubr.f32.mxu0 %v272_v41  ;;  %v590_v20 = vld [vmem:[%s2726_s21 + $0x7f8] sm:$0xff]  ;;  %v309_v21 = vld [vmem:[%s2782_s25 + $0x3b0] sm:$0xff]  ;;  %v2594_v22 = vpack.c.bf16 %v572_v12, %v571_v11  ;;  %v328_v29 = vld [vmem:[%s2782_s25 + $0x448] sm:$0xff] }
  0x84   : > { %1280 = vmatprep.mubr.f32.mxu1 %v274_v45  ;;  %2553 = vmatprep.subr.bf16.mxu0 %v2552_v42  ;;  %v541_v23 = vld [vmem:[%s2726_s21 + $0x670] sm:$0xff]  ;;  %v542_v24 = vld [vmem:[%s2726_s21 + $0x678] sm:$0xff]  ;;  %v2596_v30 = vpack.c.bf16 %v590_v20, %v589_v19  ;;  %v607_v33 = vld [vmem:[%s2726_s21 + $0x880] sm:$0xff] }
  0x85   : > { %1176 = vmatmul.mubr.f32.gmra.mrb[40].mxu0 %v271_v49  ;;  %2585 = vmatprep.subr.bf16.mxu1 %v2584_v46  ;;  %v326_v25 = vld [vmem:[%s2782_s25 + $0x438] sm:$0xff]  ;;  %v573_v27 = vld [vmem:[%s2726_s21 + $0x770] sm:$0xff]  ;;  %v2566_v32 = vpack.c.bf16 %v542_v24, %v541_v23  ;;  %v608_v34 = vld [vmem:[%s2726_s21 + $0x888] sm:$0xff] }
  0x86   : > { %1281 = vmatmul.mubr.f32.gmra.mrb[40].mxu1 %v273_v53  ;;  %2555 = vmatpush3.bf16.msra.mxu0 %v2554_v50  ;;  %v574_v28 = vld [vmem:[%s2726_s21 + $0x778] sm:$0xff]  ;;  %v325_v31 = vld [vmem:[%s2782_s25 + $0x430] sm:$0xff]  ;;  %v327_v35 = vld [vmem:[%s2782_s25 + $0x440] sm:$0xff]  ;;  %v2600_v42 = vpack.c.bf16 %v608_v34, %v607_v33 }
  0x87   : > { %2587 = vmatpush3.bf16.msra.mxu1 %v2586_v54  ;;  %1180 = vmatprep.mubr.f32.mxu0 %v290_v57  ;;  %v2598_v36 = vpack.c.bf16 %v574_v28, %v573_v27  ;;  %v625_v37 = vld [vmem:[%s3314_s2 + $0x10] sm:$0xff]  ;;  %v591_v38 = vld [vmem:[%s2726_s21 + $0x800] sm:$0xff]  ;;  %v592_v39 = vld [vmem:[%s2726_s21 + $0x808] sm:$0xff] }
  0x88   : > { %1285 = vmatprep.mubr.f32.mxu1 %v292_v61  ;;  %2557 = vmatprep.subr.bf16.mxu0 %v2556_v58  ;;  %v204_v40 = vld [vmem:[%s2782_s25 + $0x68] sm:$0xff]  ;;  %v206_v41 = vld [vmem:[%s2782_s25 + $0x78] sm:$0xff]  ;;  %v203_v43 = vld [vmem:[%s2782_s25 + $0x60] sm:$0xff]  ;;  %v2602_v45 = vpack.c.bf16 %v592_v39, %v591_v38 }
  0x89   : > { %1181 = vmatmul.mubr.f32.gmra.mrb[42].mxu0 %v289_v1  ;;  %2589 = vmatprep.subr.bf16.mxu1 %v2588_v62  ;;  %v205_v44 = vld [vmem:[%s2782_s25 + $0x70] sm:$0xff]  ;;  %v610_v47 = vld [vmem:[%s2726_s21 + $0x898] sm:$0xff]  ;;  %v224_v52 = vld [vmem:[%s2782_s25 + $0x108] sm:$0xff] }
  0x8a   : > { %1286 = vmatmul.mubr.f32.gmra.mrb[42].mxu1 %v291_v5  ;;  %2559 = vmatpush3.bf16.msra.mxu0 %v2558_v2  ;;  %v609_v46 = vld [vmem:[%s2726_s21 + $0x890] sm:$0xff]  ;;  %v594_v49 = vld [vmem:[%s2726_s21 + $0x818] sm:$0xff]  ;;  %v223_v55 = vld [vmem:[%s2782_s25 + $0x100] sm:$0xff] }
  0x8b   : > { %2591 = vmatpush3.bf16.msra.mxu1 %v2590_v6  ;;  %1185 = vmatprep.mubr.f32.mxu0 %v308_v9  ;;  %v593_v48 = vld [vmem:[%s2726_s21 + $0x810] sm:$0xff]  ;;  %v626_v50 = vld [vmem:[%s3314_s2 + $0x18] sm:$0xff]  ;;  %v2604_v54 = vpack.c.bf16 %v610_v47, %v609_v46  ;;  %v611_v57 = vld [vmem:[%s2726_s21 + $0x8a0] sm:$0xff] }
  0x8c   : > { %1290 = vmatprep.mubr.f32.mxu1 %v310_v13  ;;  %2561 = vmatprep.subr.bf16.mxu0 %v2560_v10  ;;  %v222_v51 = vld [vmem:[%s2782_s25 + $0xf8] sm:$0xff]  ;;  %v221_v53 = vld [vmem:[%s2782_s25 + $0xf0] sm:$0xff]  ;;  %v2606_v56 = vpack.c.bf16 %v594_v49, %v593_v48  ;;  %v612_v58 = vld [vmem:[%s2726_s21 + $0x8a8] sm:$0xff] }
  0x8d   : > { %1186 = vmatmul.mubr.f32.gmra.mrb[44].mxu0 %v307_v17  ;;  %2593 = vmatprep.subr.bf16.mxu1 %v2592_v14  ;;  %v627_v59 = vld [vmem:[%s3314_s2 + $0x20] sm:$0xff]  ;;  %v596_v61 = vld [vmem:[%s2726_s21 + $0x828] sm:$0xff]  ;;  %v242_v63 = vld [vmem:[%s2782_s25 + $0x198] sm:$0xff]  ;;  %v2608_v2 = vpack.c.bf16 %v612_v58, %v611_v57 }
  0x8e   : > { %1291 = vmatmul.mubr.f32.gmra.mrb[44].mxu1 %v309_v21  ;;  %2563 = vmatpush3.bf16.msra.mxu0 %v2562_v18  ;;  %v595_v60 = vld [vmem:[%s2726_s21 + $0x820] sm:$0xff]  ;;  %v240_v62 = vld [vmem:[%s2782_s25 + $0x188] sm:$0xff]  ;;  %v241_v1 = vld [vmem:[%s2782_s25 + $0x190] sm:$0xff] }
  0x8f   : > { %2595 = vmatpush3.bf16.msra.mxu1 %v2594_v22  ;;  %1190 = vmatprep.mubr.f32.mxu0 %v326_v25  ;;  %v239_v0 = vld [vmem:[%s2782_s25 + $0x180] sm:$0xff]  ;;  %v2610_v3 = vpack.c.bf16 %v596_v61, %v595_v60  ;;  %v613_v4 = vld [vmem:[%s2726_s21 + $0x8b0] sm:$0xff]  ;;  %v614_v5 = vld [vmem:[%s2726_s21 + $0x8b8] sm:$0xff] }
  0x90   : > { %1295 = vmatprep.mubr.f32.mxu1 %v328_v29  ;;  %2565 = vmatprep.subr.bf16.mxu0 %v2564_v26  ;;  %v597_v6 = vld [vmem:[%s2726_s21 + $0x830] sm:$0xff]  ;;  %v598_v7 = vld [vmem:[%s2726_s21 + $0x838] sm:$0xff]  ;;  %v628_v8 = vld [vmem:[%s3314_s2 + $0x28] sm:$0xff]  ;;  %v2612_v12 = vpack.c.bf16 %v614_v5, %v613_v4 }
  0x91   : > { %1191 = vmatmul.mubr.f32.gmra.mrb[46].mxu0 %v325_v31  ;;  %2597 = vmatprep.subr.bf16.mxu1 %v2596_v30  ;;  %v258_v9 = vld [vmem:[%s2782_s25 + $0x218] sm:$0xff]  ;;  %v260_v10 = vld [vmem:[%s2782_s25 + $0x228] sm:$0xff]  ;;  %v257_v11 = vld [vmem:[%s2782_s25 + $0x210] sm:$0xff]  ;;  %v2614_v14 = vpack.c.bf16 %v598_v7, %v597_v6 }
  0x92   : > { %1296 = vmatmul.mubr.f32.gmra.mrb[46].mxu1 %v327_v35  ;;  %2567 = vmatpush3.bf16.msra.mxu0 %v2566_v32  ;;  %v259_v13 = vld [vmem:[%s2782_s25 + $0x220] sm:$0xff]  ;;  %v616_v16 = vld [vmem:[%s2726_s21 + $0x8c8] sm:$0xff]  ;;  %v629_v17 = vld [vmem:[%s3314_s2 + $0x30] sm:$0xff] }
  0x93   : > { %2599 = vmatpush3.bf16.msra.mxu1 %v2598_v36  ;;  %643 = vperm.xlu1 %2660, %v625_v37   ;;  %v615_v15 = vld [vmem:[%s2726_s21 + $0x8c0] sm:$0xff]  ;;  %v600_v19 = vld [vmem:[%s2726_s21 + $0x848] sm:$0xff]  ;;  %v278_v21 = vld [vmem:[%s2782_s25 + $0x2b8] sm:$0xff] }
  0x94   : > { %1365 = vmatprep.mubr.f32.mxu0 %v204_v40  ;;  %1470 = vmatprep.mubr.f32.mxu1 %v206_v41  ;;  %v599_v18 = vld [vmem:[%s2726_s21 + $0x840] sm:$0xff]  ;;  %v276_v20 = vld [vmem:[%s2782_s25 + $0x2a8] sm:$0xff]  ;;  %v277_v23 = vld [vmem:[%s2782_s25 + $0x2b0] sm:$0xff]  ;;  %v2616_v24 = vpack.c.bf16 %v616_v16, %v615_v15 }
  0x95   : > { %1366 = vmatmul.mubr.f32.vlgmr.msra.gmra.mrb[48].mxu0 %v203_v43  ;;  %2601 = vmatprep.subr.bf16.mxu0 %v2600_v42  ;;  %v275_v22 = vld [vmem:[%s2782_s25 + $0x2a0] sm:$0xff]  ;;  %v2618_v25 = vpack.c.bf16 %v600_v19, %v599_v18  ;;  %v617_v26 = vld [vmem:[%s2726_s21 + $0x8d0] sm:$0xff]  ;;  %v618_v27 = vld [vmem:[%s2726_s21 + $0x8d8] sm:$0xff] }
  0x96   : > { %1471 = vmatmul.mubr.f32.vlgmr.msra.gmra.mrb[48].mxu1 %v205_v44  ;;  %2632 = vmatprep.subr.bf16.mxu1 %v2600_v42  ;;  %v601_v28 = vld [vmem:[%s2726_s21 + $0x850] sm:$0xff]  ;;  %v602_v29 = vld [vmem:[%s2726_s21 + $0x858] sm:$0xff]  ;;  %v296_v32 = vld [vmem:[%s2782_s25 + $0x348] sm:$0xff]  ;;  %v2620_v34 = vpack.c.bf16 %v618_v27, %v617_v26 }
  0x97   : > { %2603 = vmatpush3.bf16.msra.mxu0 %v2602_v45  ;;  %2640 = vmatpush3.bf16.msra.mxu1 %v2602_v45  ;;  %v630_v30 = vld [vmem:[%s3314_s2 + $0x38] sm:$0xff]  ;;  %v293_v33 = vld [vmem:[%s2782_s25 + $0x330] sm:$0xff]  ;;  %v295_v35 = vld [vmem:[%s2782_s25 + $0x340] sm:$0xff]  ;;  %v2622_v36 = vpack.c.bf16 %v602_v29, %v601_v28 }
  0x98   : > { %648 = vperm.xlu1 %2660, %v626_v50   ;;  %1370 = vmatprep.mubr.f32.mxu0 %v222_v51  ;;  %v294_v31 = vld [vmem:[%s2782_s25 + $0x338] sm:$0xff]  ;;  %v619_v37 = vld [vmem:[%s2726_s21 + $0x8e0] sm:$0xff]  ;;  %v620_v38 = vld [vmem:[%s2726_s21 + $0x8e8] sm:$0xff] }
  0x99   : > { %1475 = vmatprep.mubr.f32.mxu1 %v224_v52  ;;  %1371 = vmatmul.mubr.f32.gmra.mrb[50].mxu0 %v221_v53  ;;  %v603_v39 = vld [vmem:[%s2726_s21 + $0x860] sm:$0xff]  ;;  %v604_v40 = vld [vmem:[%s2726_s21 + $0x868] sm:$0xff]  ;;  %v314_v42 = vld [vmem:[%s2782_s25 + $0x3d8] sm:$0xff]  ;;  %v2624_v44 = vpack.c.bf16 %v620_v38, %v619_v37 }
  0x9a   : > { %1476 = vmatmul.mubr.f32.gmra.mrb[50].mxu1 %v223_v55  ;;  %2605 = vmatprep.subr.bf16.mxu0 %v2604_v54  ;;  %v312_v41 = vld [vmem:[%s2782_s25 + $0x3c8] sm:$0xff]  ;;  %v311_v43 = vld [vmem:[%s2782_s25 + $0x3c0] sm:$0xff]  ;;  %v313_v45 = vld [vmem:[%s2782_s25 + $0x3d0] sm:$0xff]  ;;  %v2626_v46 = vpack.c.bf16 %v604_v40, %v603_v39 }
  0x9b   : > { %2633 = vmatprep.subr.bf16.mxu1 %v2604_v54  ;;  %2607 = vmatpush3.bf16.msra.mxu0 %v2606_v56  ;;  %v621_v47 = vld [vmem:[%s2726_s21 + $0x8f0] sm:$0xff]  ;;  %v622_v48 = vld [vmem:[%s2726_s21 + $0x8f8] sm:$0xff]  ;;  %v332_v52 = vld [vmem:[%s2782_s25 + $0x468] sm:$0xff] }
  0x9c   : > { %2641 = vmatpush3.bf16.msra.mxu1 %v2606_v56  ;;  %653 = vperm.xlu0 %2659, %v627_v59   ;;  %v605_v49 = vld [vmem:[%s2726_s21 + $0x870] sm:$0xff]  ;;  %v606_v50 = vld [vmem:[%s2726_s21 + $0x878] sm:$0xff]  ;;  %v2628_v54 = vpack.c.bf16 %v622_v48, %v621_v47  ;;  %v331_v55 = vld [vmem:[%s2782_s25 + $0x460] sm:$0xff] }
  0x9d   : > { %1375 = vmatprep.mubr.f32.mxu0 %v240_v62  ;;  %1480 = vmatprep.mubr.f32.mxu1 %v242_v63  ;;  %v330_v51 = vld [vmem:[%s2782_s25 + $0x458] sm:$0xff]  ;;  %v329_v53 = vld [vmem:[%s2782_s25 + $0x450] sm:$0xff]  ;;  %v2630_v56 = vpack.c.bf16 %v606_v50, %v605_v49  ;;  %v208_v57 = vld [vmem:[%s2782_s25 + $0x88] sm:$0xff] }
  0x9e   : > { %1376 = vmatmul.mubr.f32.gmra.mrb[52].mxu0 %v239_v0  ;;  %1481 = vmatmul.mubr.f32.gmra.mrb[52].mxu1 %v241_v1  ;;  %v280_v58 = vld [vmem:[%s2782_s25 + $0x2c8] sm:$0xff]  ;;  %v207_v59 = vld [vmem:[%s2782_s25 + $0x80] sm:$0xff]  ;;  %v226_v61 = vld [vmem:[%s2782_s25 + $0x118] sm:$0xff] }
  0x9f   : > { %2609 = vmatprep.subr.bf16.mxu0 %v2608_v2  ;;  %2634 = vmatprep.subr.bf16.mxu1 %v2608_v2  ;;  %v279_v60 = vld [vmem:[%s2782_s25 + $0x2c0] sm:$0xff]  ;;  %v298_v62 = vld [vmem:[%s2782_s25 + $0x358] sm:$0xff]  ;;  %v225_v63 = vld [vmem:[%s2782_s25 + $0x110] sm:$0xff] }
  0xa0   : > { %2611 = vmatpush3.bf16.msra.mxu0 %v2610_v3  ;;  %2642 = vmatpush3.bf16.msra.mxu1 %v2610_v3  ;;  %v297_v0 = vld [vmem:[%s2782_s25 + $0x350] sm:$0xff]  ;;  %v244_v1 = vld [vmem:[%s2782_s25 + $0x1a8] sm:$0xff]  ;;  %v243_v3 = vld [vmem:[%s2782_s25 + $0x1a0] sm:$0xff] }
  0xa1   : > { %658 = vperm.xlu1 %2660, %v628_v8   ;;  %1380 = vmatprep.mubr.f32.mxu0 %v258_v9  ;;  %v316_v2 = vld [vmem:[%s2782_s25 + $0x3e8] sm:$0xff]  ;;  %v315_v4 = vld [vmem:[%s2782_s25 + $0x3e0] sm:$0xff]  ;;  %v262_v5 = vld [vmem:[%s2782_s25 + $0x238] sm:$0xff]  ;;  %v634_v9 = vpop.permute.xlu0 %633 }
  0xa2   : > { %1485 = vmatprep.mubr.f32.mxu1 %v260_v10  ;;  %1381 = vmatmul.mubr.f32.gmra.mrb[54].mxu0 %v257_v11  ;;  %v334_v6 = vld [vmem:[%s2782_s25 + $0x478] sm:$0xff]  ;;  %v261_v7 = vld [vmem:[%s2782_s25 + $0x230] sm:$0xff] }
  0xa3   : > { %1486 = vmatmul.mubr.f32.gmra.mrb[54].mxu1 %v259_v13  ;;  %2613 = vmatprep.subr.bf16.mxu0 %v2612_v12  ;;  %v333_v8 = vld [vmem:[%s2782_s25 + $0x470] sm:$0xff] }
  0xa4   : > { %2635 = vmatprep.subr.bf16.mxu1 %v2612_v12  ;;  %2615 = vmatpush3.bf16.msra.mxu0 %v2614_v14 }
  0xa5   : > { %2643 = vmatpush3.bf16.msra.mxu1 %v2614_v14  ;;  %663 = vperm.xlu0 %2659, %v629_v17   ;;  %v639_v18 = vpop.permute.xlu0 %638 }
  0xa6   : > { %1385 = vmatprep.mubr.f32.mxu0 %v276_v20  ;;  %1490 = vmatprep.mubr.f32.mxu1 %v278_v21 }
  0xa7   : > { %1386 = vmatmul.mubr.f32.gmra.mrb[56].mxu0 %v275_v22  ;;  %1491 = vmatmul.mubr.f32.gmra.mrb[56].mxu1 %v277_v23 }
  0xa8   : > { %2617 = vmatprep.subr.bf16.mxu0 %v2616_v24  ;;  %2636 = vmatprep.subr.bf16.mxu1 %v2616_v24 }
  0xa9   : > { %2619 = vmatpush3.bf16.msra.mxu0 %v2618_v25  ;;  %2644 = vmatpush3.bf16.msra.mxu1 %v2618_v25 }
  0xaa   : > { %668 = vperm.xlu1 %2660, %v630_v30   ;;  %1390 = vmatprep.mubr.f32.mxu0 %v294_v31 }
  0xab   : > { %1495 = vmatprep.mubr.f32.mxu1 %v296_v32  ;;  %1391 = vmatmul.mubr.f32.gmra.mrb[58].mxu0 %v293_v33 }
  0xac   : > { %1496 = vmatmul.mubr.f32.gmra.mrb[58].mxu1 %v295_v35  ;;  %2621 = vmatprep.subr.bf16.mxu0 %v2620_v34 }
  0xad   : > { %2637 = vmatprep.subr.bf16.mxu1 %v2620_v34  ;;  %2623 = vmatpush3.bf16.msra.mxu0 %v2622_v36 }
  0xae   : > { %2645 = vmatpush3.bf16.msra.mxu1 %v2622_v36  ;;  %1395 = vmatprep.mubr.f32.mxu0 %v312_v41 }
  0xaf   : > { %1500 = vmatprep.mubr.f32.mxu1 %v314_v42  ;;  %1396 = vmatmul.mubr.f32.gmra.mrb[60].mxu0 %v311_v43 }
  0xb0   : > { %1501 = vmatmul.mubr.f32.gmra.mrb[60].mxu1 %v313_v45  ;;  %2625 = vmatprep.subr.bf16.mxu0 %v2624_v44 }
  0xb1   : > { %2638 = vmatprep.subr.bf16.mxu1 %v2624_v44  ;;  %2627 = vmatpush3.bf16.msra.mxu0 %v2626_v46 }
  0xb2   : > { %2646 = vmatpush3.bf16.msra.mxu1 %v2626_v46  ;;  %1400 = vmatprep.mubr.f32.mxu0 %v330_v51 }
  0xb3   : > { %1505 = vmatprep.mubr.f32.mxu1 %v332_v52  ;;  %1401 = vmatmul.mubr.f32.gmra.mrb[62].mxu0 %v329_v53 }
  0xb4   : > { %1506 = vmatmul.mubr.f32.gmra.mrb[62].mxu1 %v331_v55  ;;  %2629 = vmatprep.subr.bf16.mxu0 %v2628_v54 }
  0xb5   : > { %2639 = vmatprep.subr.bf16.mxu1 %v2628_v54  ;;  %2631 = vmatpush3.bf16.msra.mxu0 %v2630_v56 }
  0xb6   : > { %2647 = vmatpush3.bf16.msra.mxu1 %v2630_v56  ;;  %1575 = vmatprep.mubr.f32.mxu0 %v208_v57 }
  0xb7   : > { %1595 = vmatprep.mubr.f32.mxu1 %v280_v58 }
  0xb8   : > { %1576 = vmatmul.mubr.f32.vlgmr.msra.gmra.mrb[64].mxu0 %v207_v59 }
  0xb9   : > { %1596 = vmatmul.mubr.f32.vlgmr.msra.gmra.mrb[64].mxu1 %v279_v60  ;;  %1580 = vmatprep.mubr.f32.mxu0 %v226_v61 }
  0xba   : > { %1600 = vmatprep.mubr.f32.mxu1 %v298_v62 }
  0xbc   : > { %1581 = vmatmul.mubr.f32.gmra.mrb[66].mxu0 %v225_v63 }
  0xbd   : > { %1601 = vmatmul.mubr.f32.gmra.mrb[66].mxu1 %v297_v0  ;;  %1585 = vmatprep.mubr.f32.mxu0 %v244_v1 }
  0xbe   : > { %1605 = vmatprep.mubr.f32.mxu1 %v316_v2 }
  0xc0   : > { %1586 = vmatmul.mubr.f32.gmra.mrb[68].mxu0 %v243_v3 }
  0xc1   : > { %1606 = vmatmul.mubr.f32.gmra.mrb[68].mxu1 %v315_v4  ;;  %1590 = vmatprep.mubr.f32.mxu0 %v262_v5 }
  0xc2   : > { %1610 = vmatprep.mubr.f32.mxu1 %v334_v6 }
  0xc4   : > { %1591 = vmatmul.mubr.f32.gmra.mrb[70].mxu0 %v261_v7 }
  0xc5   : > { %1611 = vmatmul.mubr.f32.gmra.mrb[70].mxu1 %v333_v8 }
 0x108   : > { %v1872_v10 = vpop.f32.mrb[0].mxu0 }
 0x109   : > { %v1928_v11 = vpop.f32.mrb[0].mxu1  ;;  %v1873_v12 = vpop.f32.mrb[1].mxu0 }
 0x10a   : > { %v1874_v13 = vadd.f32 %v1873_v12, %v1872_v10  ;;  %v1929_v14 = vpop.f32.mrb[1].mxu1 }
 0x10b   : > { %v1930_v15 = vadd.f32 %v1929_v14, %v1928_v11 }
 0x10c   : > { %v738_v16 = vadd.f32 %v1874_v13, %v634_v9  ;;  %v1875_v17 = vpop.f32.mrb[2].mxu0 }
 0x10d   : > { %v1931_v19 = vpop.f32.mrb[2].mxu1  ;;  %v1876_v20 = vpop.f32.mrb[3].mxu0 }
 0x10e   : > { %v3184_v21 = vadd.f32 %v1930_v15, %v738_v16  ;;  %v1877_v22 = vadd.f32 %v1876_v20, %v1875_v17  ;;  %v1932_v23 = vpop.f32.mrb[3].mxu1 }
 0x10f   : > { %v1933_v24 = vadd.f32 %v1932_v23, %v1931_v19 }
 0x110   : > { %v743_v25 = vadd.f32 %v1877_v22, %v639_v18  ;;  %v1878_v26 = vpop.f32.mrb[4].mxu0 }
 0x111   : > { %v1934_v27 = vpop.f32.mrb[4].mxu1  ;;  %v1879_v28 = vpop.f32.mrb[5].mxu0 }
 0x112   : > { %v3186_v29 = vadd.f32 %v1933_v24, %v743_v25  ;;  %v1880_v30 = vadd.f32 %v1879_v28, %v1878_v26  ;;  %v1935_v31 = vpop.f32.mrb[5].mxu1  ;;  %v644_v32 = vpop.permute.xlu1 %643 }
 0x113   : > { %v1936_v33 = vadd.f32 %v1935_v31, %v1934_v27 }
 0x114   : > { %v748_v34 = vadd.f32 %v1880_v30, %v644_v32  ;;  %v1881_v35 = vpop.f32.mrb[6].mxu0 }
 0x115   : > { %v1937_v36 = vpop.f32.mrb[6].mxu1  ;;  %v1882_v37 = vpop.f32.mrb[7].mxu0 }
 0x116   : > { %v3188_v38 = vadd.f32 %v1936_v33, %v748_v34  ;;  %v1883_v39 = vadd.f32 %v1882_v37, %v1881_v35  ;;  %v1938_v40 = vpop.f32.mrb[7].mxu1 }
 0x117   : > { %v1939_v41 = vadd.f32 %v1938_v40, %v1937_v36  ;;  %v649_v42 = vpop.permute.xlu1 %648 }
 0x118   : > { %v753_v43 = vadd.f32 %v1883_v39, %v649_v42  ;;  %v1884_v44 = vpop.f32.mrb[8].mxu0 }
 0x119   : > { %v1940_v45 = vpop.f32.mrb[8].mxu1  ;;  %v1885_v46 = vpop.f32.mrb[9].mxu0 }
 0x11a   : > { %v3190_v47 = vadd.f32 %v1939_v41, %v753_v43  ;;  %v1886_v48 = vadd.f32 %v1885_v46, %v1884_v44  ;;  %v1941_v49 = vpop.f32.mrb[9].mxu1 }
 0x11b   : > { %v1942_v50 = vadd.f32 %v1941_v49, %v1940_v45  ;;  %v654_v51 = vpop.permute.xlu0 %653 }
 0x11c   : > { %v758_v52 = vadd.f32 %v1886_v48, %v654_v51  ;;  %v1887_v53 = vpop.f32.mrb[10].mxu0 }
 0x11d   : > { %v1943_v54 = vpop.f32.mrb[10].mxu1  ;;  %v1888_v55 = vpop.f32.mrb[11].mxu0 }
 0x11e   : > { %v3192_v56 = vadd.f32 %v1942_v50, %v758_v52  ;;  %v1889_v57 = vadd.f32 %v1888_v55, %v1887_v53  ;;  %v1944_v58 = vpop.f32.mrb[11].mxu1 }
 0x11f   : > { %v1945_v59 = vadd.f32 %v1944_v58, %v1943_v54 }
 0x120   : > { %v659_v60 = vpop.permute.xlu1 %658  ;;  %v1890_v61 = vpop.f32.mrb[12].mxu0 }
 0x121   : > { %v763_v62 = vadd.f32 %v1889_v57, %v659_v60  ;;  %v1946_v63 = vpop.f32.mrb[12].mxu1  ;;  %v1891_v0 = vpop.f32.mrb[13].mxu0 }
 0x122   : > { %v1892_v1 = vadd.f32 %v1891_v0, %v1890_v61  ;;  %v1947_v2 = vpop.f32.mrb[13].mxu1 }
 0x123   : > { %v868_v3 = vadd.f32 %v1945_v59, %v763_v62  ;;  %v1948_v4 = vadd.f32 %v1947_v2, %v1946_v63 }
 0x124   : > { %v664_v5 = vpop.permute.xlu0 %663  ;;  %v1893_v6 = vpop.f32.mrb[14].mxu0 }
 0x125   : > { %v768_v7 = vadd.f32 %v1892_v1, %v664_v5  ;;  %v1949_v8 = vpop.f32.mrb[14].mxu1  ;;  %v1894_v9 = vpop.f32.mrb[15].mxu0 }
 0x126   : > { %v1895_v10 = vadd.f32 %v1894_v9, %v1893_v6  ;;  %v1950_v11 = vpop.f32.mrb[15].mxu1 }
 0x127   : > { %v873_v12 = vadd.f32 %v1948_v4, %v768_v7  ;;  %v1951_v13 = vadd.f32 %v1950_v11, %v1949_v8 }
 0x128   : > { %v1984_v14 = vpop.f32.mrb[16].mxu0 }
 0x129   : > { %v669_v15 = vpop.permute.xlu1 %668  ;;  %v2040_v16 = vpop.f32.mrb[16].mxu1 }
 0x12a   : > { %v773_v17 = vadd.f32 %v1895_v10, %v669_v15  ;;  %v1985_v18 = vpop.f32.mrb[17].mxu0  ;;  %v2041_v19 = vpop.f32.mrb[17].mxu1 }
 0x12b   : > { %v1986_v20 = vadd.f32 %v1985_v18, %v1984_v14  ;;  %v2042_v22 = vadd.f32 %v2041_v19, %v2040_v16 }
 0x12c   : > { %v878_v23 = vadd.f32 %v1951_v13, %v773_v17  ;;  %v1987_v24 = vpop.f32.mrb[18].mxu0 }
 0x12d   : > { %v948_v25 = vadd.f32 %v1986_v20, %v3184_v21  ;;  %v2043_v26 = vpop.f32.mrb[18].mxu1  ;;  %v1988_v27 = vpop.f32.mrb[19].mxu0 }
 0x12e   : > { %v1989_v28 = vadd.f32 %v1988_v27, %v1987_v24  ;;  %v2044_v30 = vpop.f32.mrb[19].mxu1 }
 0x12f   : > { %v1053_v31 = vadd.f32 %v2042_v22, %v948_v25  ;;  %v2045_v32 = vadd.f32 %v2044_v30, %v2043_v26 }
 0x130   : > { %v953_v33 = vadd.f32 %v1989_v28, %v3186_v29  ;;  %v1990_v34 = vpop.f32.mrb[20].mxu0 }
 0x131   : > { %v2046_v35 = vpop.f32.mrb[20].mxu1  ;;  %v1991_v36 = vpop.f32.mrb[21].mxu0 }
 0x132   : > { %v1058_v37 = vadd.f32 %v2045_v32, %v953_v33  ;;  %v1992_v39 = vadd.f32 %v1991_v36, %v1990_v34  ;;  %v2047_v40 = vpop.f32.mrb[21].mxu1 }
 0x133   : > { %v2048_v41 = vadd.f32 %v2047_v40, %v2046_v35 }
 0x134   : > { %v958_v42 = vadd.f32 %v1992_v39, %v3188_v38  ;;  %v1993_v43 = vpop.f32.mrb[22].mxu0 }
 0x135   : > { %v2049_v44 = vpop.f32.mrb[22].mxu1  ;;  %v1994_v21 = vpop.f32.mrb[23].mxu0 }
 0x136   : > { %v1063_v45 = vadd.f32 %v2048_v41, %v958_v42  ;;  %v1995_v46 = vadd.f32 %v1994_v21, %v1993_v43  ;;  %v2050_v48 = vpop.f32.mrb[23].mxu1 }
 0x137   : > { %v2051_v49 = vadd.f32 %v2050_v48, %v2049_v44 }
 0x138   : > { %v963_v50 = vadd.f32 %v1995_v46, %v3190_v47  ;;  %v1996_v51 = vpop.f32.mrb[24].mxu0 }
 0x139   : > { %v2052_v29 = vpop.f32.mrb[24].mxu1  ;;  %v1997_v52 = vpop.f32.mrb[25].mxu0 }
 0x13a   : > { %v1068_v53 = vadd.f32 %v2051_v49, %v963_v50  ;;  %v1998_v54 = vadd.f32 %v1997_v52, %v1996_v51  ;;  %v2053_v55 = vpop.f32.mrb[25].mxu1 }
 0x13b   : > { %v2054_v57 = vadd.f32 %v2053_v55, %v2052_v29 }
 0x13c   : > { %v968_v58 = vadd.f32 %v1998_v54, %v3192_v56  ;;  %v1999_v59 = vpop.f32.mrb[26].mxu0 }
 0x13d   : > { %v2055_v38 = vpop.f32.mrb[26].mxu1  ;;  %v2000_v60 = vpop.f32.mrb[27].mxu0 }
 0x13e   : > { %v1073_v61 = vadd.f32 %v2054_v57, %v968_v58  ;;  %v2001_v62 = vadd.f32 %v2000_v60, %v1999_v59  ;;  %v2056_v63 = vpop.f32.mrb[27].mxu1 }
 0x13f   : > { %v2057_v0 = vadd.f32 %v2056_v63, %v2055_v38 }
 0x140   : > { %v973_v1 = vadd.f32 %v2001_v62, %v868_v3  ;;  %v2002_v2 = vpop.f32.mrb[28].mxu0 }
 0x141   : > { %v2058_v4 = vpop.f32.mrb[28].mxu1  ;;  %v2003_v47 = vpop.f32.mrb[29].mxu0 }
 0x142   : > { %v1078_v5 = vadd.f32 %v2057_v0, %v973_v1  ;;  %v2004_v6 = vadd.f32 %v2003_v47, %v2002_v2  ;;  %v2059_v7 = vpop.f32.mrb[29].mxu1 }
 0x143   : > { %v2060_v8 = vadd.f32 %v2059_v7, %v2058_v4 }
 0x144   : > { %v978_v9 = vadd.f32 %v2004_v6, %v873_v12  ;;  %v2005_v10 = vpop.f32.mrb[30].mxu0 }
 0x145   : > { %v2061_v11 = vpop.f32.mrb[30].mxu1  ;;  %v2006_v13 = vpop.f32.mrb[31].mxu0 }
 0x146   : > { %v1083_v56 = vadd.f32 %v2060_v8, %v978_v9  ;;  %v2007_v14 = vadd.f32 %v2006_v13, %v2005_v10  ;;  %v2062_v15 = vpop.f32.mrb[31].mxu1 }
 0x147   : > { %v2063_v16 = vadd.f32 %v2062_v15, %v2061_v11 }
 0x148   : > { %v983_v17 = vadd.f32 %v2007_v14, %v878_v23  ;;  %v2096_v18 = vpop.f32.mrb[32].mxu0 }
 0x149   : > { %v2152_v19 = vpop.f32.mrb[32].mxu1  ;;  %v2097_v20 = vpop.f32.mrb[33].mxu0 }
 0x14a   : > { %v1088_v3 = vadd.f32 %v2063_v16, %v983_v17  ;;  %v2098_v22 = vadd.f32 %v2097_v20, %v2096_v18  ;;  %v2153_v24 = vpop.f32.mrb[33].mxu1 }
 0x14b   : > { %v2154_v25 = vadd.f32 %v2153_v24, %v2152_v19 }
 0x14c   : > { %v1158_v26 = vadd.f32 %v2098_v22, %v1053_v31  ;;  %v2099_v27 = vpop.f32.mrb[34].mxu0 }
 0x14d   : > { %v2155_v28 = vpop.f32.mrb[34].mxu1  ;;  %v2100_v30 = vpop.f32.mrb[35].mxu0 }
 0x14e   : > { %v1263_v12 = vadd.f32 %v2154_v25, %v1158_v26  ;;  %v2101_v32 = vadd.f32 %v2100_v30, %v2099_v27  ;;  %v2156_v33 = vpop.f32.mrb[35].mxu1 }
 0x14f   : > { %v2157_v34 = vadd.f32 %v2156_v33, %v2155_v28 }
 0x150   : > { %v1163_v35 = vadd.f32 %v2101_v32, %v1058_v37  ;;  %v2102_v36 = vpop.f32.mrb[36].mxu0 }
 0x151   : > { %v2158_v39 = vpop.f32.mrb[36].mxu1  ;;  %v2103_v40 = vpop.f32.mrb[37].mxu0 }
 0x152   : > { %v1268_v23 = vadd.f32 %v2157_v34, %v1163_v35  ;;  %v2104_v41 = vadd.f32 %v2103_v40, %v2102_v36  ;;  %v2159_v42 = vpop.f32.mrb[37].mxu1 }
 0x153   : > { %v2160_v43 = vadd.f32 %v2159_v42, %v2158_v39 }
 0x154   : > { %v1168_v44 = vadd.f32 %v2104_v41, %v1063_v45  ;;  %v2105_v21 = vpop.f32.mrb[38].mxu0 }
 0x155   : > { %v2161_v46 = vpop.f32.mrb[38].mxu1  ;;  %v2106_v48 = vpop.f32.mrb[39].mxu0 }
 0x156   : > { %v1273_v31 = vadd.f32 %v2160_v43, %v1168_v44  ;;  %v2107_v49 = vadd.f32 %v2106_v48, %v2105_v21  ;;  %v2162_v50 = vpop.f32.mrb[39].mxu1 }
 0x157   : > { %v2163_v51 = vadd.f32 %v2162_v50, %v2161_v46 }
 0x158   : > { %v1173_v29 = vadd.f32 %v2107_v49, %v1068_v53  ;;  %v2108_v52 = vpop.f32.mrb[40].mxu0 }
 0x159   : > { %v2164_v54 = vpop.f32.mrb[40].mxu1  ;;  %v2109_v55 = vpop.f32.mrb[41].mxu0 }
 0x15a   : > { %v1278_v37 = vadd.f32 %v2163_v51, %v1173_v29  ;;  %v2110_v57 = vadd.f32 %v2109_v55, %v2108_v52  ;;  %v2165_v58 = vpop.f32.mrb[41].mxu1 }
 0x15b   : > { %v2166_v59 = vadd.f32 %v2165_v58, %v2164_v54 }
 0x15c   : > { %v1178_v38 = vadd.f32 %v2110_v57, %v1073_v61  ;;  %v2111_v60 = vpop.f32.mrb[42].mxu0 }
 0x15d   : > { %v2167_v62 = vpop.f32.mrb[42].mxu1  ;;  %v2112_v63 = vpop.f32.mrb[43].mxu0 }
 0x15e   : > { %v1283_v45 = vadd.f32 %v2166_v59, %v1178_v38  ;;  %v2113_v0 = vadd.f32 %v2112_v63, %v2111_v60  ;;  %v2168_v1 = vpop.f32.mrb[43].mxu1 }
 0x15f   : > { %v2169_v2 = vadd.f32 %v2168_v1, %v2167_v62 }
 0x160   : > { %v1183_v4 = vadd.f32 %v2113_v0, %v1078_v5  ;;  %v2114_v47 = vpop.f32.mrb[44].mxu0 }
 0x161   : > { %v2170_v6 = vpop.f32.mrb[44].mxu1  ;;  %v2115_v7 = vpop.f32.mrb[45].mxu0 }
 0x162   : > { %v1288_v53 = vadd.f32 %v2169_v2, %v1183_v4  ;;  %v2116_v8 = vadd.f32 %v2115_v7, %v2114_v47  ;;  %v2171_v9 = vpop.f32.mrb[45].mxu1 }
 0x163   : > { %v2172_v10 = vadd.f32 %v2171_v9, %v2170_v6 }
 0x164   : > { %v1188_v11 = vadd.f32 %v2116_v8, %v1083_v56  ;;  %v2117_v13 = vpop.f32.mrb[46].mxu0 }
 0x165   : > { %v2173_v14 = vpop.f32.mrb[46].mxu1  ;;  %v2118_v15 = vpop.f32.mrb[47].mxu0 }
 0x166   : > { %v1293_v61 = vadd.f32 %v2172_v10, %v1188_v11  ;;  %v2119_v16 = vadd.f32 %v2118_v15, %v2117_v13  ;;  %v2174_v17 = vpop.f32.mrb[47].mxu1 }
 0x167   : > { %v2175_v18 = vadd.f32 %v2174_v17, %v2173_v14 }
 0x168   : > { %v1193_v19 = vadd.f32 %v2119_v16, %v1088_v3  ;;  %v2208_v20 = vpop.f32.mrb[48].mxu0 }
 0x169   : > { %v2264_v22 = vpop.f32.mrb[48].mxu1  ;;  %v2209_v24 = vpop.f32.mrb[49].mxu0 }
 0x16a   : > { %v1298_v5 = vadd.f32 %v2175_v18, %v1193_v19  ;;  %v2210_v25 = vadd.f32 %v2209_v24, %v2208_v20  ;;  %v2265_v26 = vpop.f32.mrb[49].mxu1 }
 0x16b   : > { %v2266_v27 = vadd.f32 %v2265_v26, %v2264_v22 }
 0x16c   : > { %v1368_v28 = vadd.f32 %v2210_v25, %v1263_v12  ;;  %v2211_v30 = vpop.f32.mrb[50].mxu0 }
 0x16d   : > { %v2267_v32 = vpop.f32.mrb[50].mxu1  ;;  %v2212_v33 = vpop.f32.mrb[51].mxu0 }
 0x16e   : > { %v1473_v56 = vadd.f32 %v2266_v27, %v1368_v28  ;;  %v2213_v34 = vadd.f32 %v2212_v33, %v2211_v30  ;;  %v2268_v35 = vpop.f32.mrb[51].mxu1 }
 0x16f   : > { %v2269_v36 = vadd.f32 %v2268_v35, %v2267_v32 }
 0x170   : > { %v1373_v39 = vadd.f32 %v2213_v34, %v1268_v23 }
 0x171   : > { %v2214_v40 = vpop.f32.mrb[52].mxu0  ;;  %v2270_v41 = vpop.f32.mrb[52].mxu1 }
 0x172   : > { %v3199_v42 = vadd.f32 %v2269_v36, %v1373_v39  ;;  %v2215_v3 = vpop.f32.mrb[53].mxu0  ;;  %v2271_v43 = vpop.f32.mrb[53].mxu1 }
 0x173   : > { %v2216_v44 = vadd.f32 %v2215_v3, %v2214_v40  ;;  %v2272_v21 = vadd.f32 %v2271_v43, %v2270_v41 }
 0x175   : > { %v1378_v46 = vadd.f32 %v2216_v44, %v1273_v31  ;;  %v2217_v48 = vpop.f32.mrb[54].mxu0 }
 0x176   : > { %v2273_v49 = vpop.f32.mrb[54].mxu1  ;;  %v2218_v12 = vpop.f32.mrb[55].mxu0 }
 0x177   : > { %v3201_v50 = vadd.f32 %v2272_v21, %v1378_v46  ;;  %v2219_v51 = vadd.f32 %v2218_v12, %v2217_v48  ;;  %v2274_v29 = vpop.f32.mrb[55].mxu1 }
 0x178   : > { %v2275_v52 = vadd.f32 %v2274_v29, %v2273_v49 }
 0x179   : > { %v1383_v54 = vadd.f32 %v2219_v51, %v1278_v37 }
 0x17a   : > { %v2220_v55 = vpop.f32.mrb[56].mxu0  ;;  %v2276_v23 = vpop.f32.mrb[56].mxu1 }
 0x17b   : > { %v3203_v57 = vadd.f32 %v2275_v52, %v1383_v54  ;;  %v2221_v58 = vpop.f32.mrb[57].mxu0  ;;  %v2277_v59 = vpop.f32.mrb[57].mxu1 }
 0x17c   : > { %v2222_v38 = vadd.f32 %v2221_v58, %v2220_v55  ;;  %v2278_v60 = vadd.f32 %v2277_v59, %v2276_v23 }
 0x17e   : > { %v1388_v62 = vadd.f32 %v2222_v38, %v1283_v45  ;;  %v2223_v63 = vpop.f32.mrb[58].mxu0 }
 0x17f   : > { %v2279_v31 = vpop.f32.mrb[58].mxu1  ;;  %v2224_v0 = vpop.f32.mrb[59].mxu0 }
 0x180   : > { %v1493_v1 = vadd.f32 %v2278_v60, %v1388_v62  ;;  %v2225_v2 = vadd.f32 %v2224_v0, %v2223_v63  ;;  %v2280_v4 = vpop.f32.mrb[59].mxu1 }
 0x181   : > { %v2281_v47 = vadd.f32 %v2280_v4, %v2279_v31 }
 0x182   : > { %v1393_v6 = vadd.f32 %v2225_v2, %v1288_v53  ;;  %v2226_v7 = vpop.f32.mrb[60].mxu0 }
 0x183   : > { %v2282_v8 = vpop.f32.mrb[60].mxu1  ;;  %v2227_v37 = vpop.f32.mrb[61].mxu0 }
 0x184   : > { %v1498_v9 = vadd.f32 %v2281_v47, %v1393_v6  ;;  %v2228_v10 = vadd.f32 %v2227_v37, %v2226_v7  ;;  %v2283_v11 = vpop.f32.mrb[61].mxu1 }
 0x185   : > { %v2284_v13 = vadd.f32 %v2283_v11, %v2282_v8 }
 0x186   : > { %v1398_v14 = vadd.f32 %v2228_v10, %v1293_v61  ;;  %v2229_v15 = vpop.f32.mrb[62].mxu0 }
 0x187   : > { %v2285_v16 = vpop.f32.mrb[62].mxu1  ;;  %v2230_v17 = vpop.f32.mrb[63].mxu0 }
 0x188   : > { %v1503_v45 = vadd.f32 %v2284_v13, %v1398_v14  ;;  %v2231_v18 = vadd.f32 %v2230_v17, %v2229_v15  ;;  %v2286_v19 = vpop.f32.mrb[63].mxu1 }
 0x189   : > { %v2287_v20 = vadd.f32 %v2286_v19, %v2285_v16 }
 0x18a   : > { %v1403_v22 = vadd.f32 %v2231_v18, %v1298_v5 }
 0x18b   : > { %v2320_v24 = vpop.f32.mrb[64].mxu0 }
 0x18c   : > { %v1508_v25 = vadd.f32 %v2287_v20, %v1403_v22  ;;  %v2332_v26 = vpop.f32.mrb[64].mxu1  ;;  %v2321_v53 = vpop.f32.mrb[65].mxu0 }
 0x18d   : > { %v2322_v27 = vadd.f32 %v2321_v53, %v2320_v24  ;;  %v2333_v28 = vpop.f32.mrb[65].mxu1 }
 0x18e   : > { %v2334_v30 = vadd.f32 %v2333_v28, %v2332_v26 }
 0x18f   : > { %v3205_v32 = vadd.f32 %v2322_v27, %v1473_v56  ;;  %v2323_v33 = vpop.f32.mrb[66].mxu0 }
 0x190   : > { %v3207_v61 = vadd.f32 %v2334_v30, %v1493_v1  ;;  %v2335_v34 = vpop.f32.mrb[66].mxu1  ;;  %v2324_v35 = vpop.f32.mrb[67].mxu0 }
 0x191   : > { %v2325_v36 = vadd.f32 %v2324_v35, %v2323_v33  ;;  %v2336_v39 = vpop.f32.mrb[67].mxu1  ;;  %v1617_v5 = vsel %vm1616_vm0, %v3205_v32, 0.0  ;;  %v1649_v3 = vmul.f32 %v3205_v32, %v3205_v32 }
 0x192   : > { %v2337_v40 = vadd.f32 %v2336_v39, %v2335_v34  ;;  %v1629_v41 = vsel %vm1616_vm0, %v3207_v61, 0.0  ;;  %1618 = vadd.xlane.f32.xlu0 %v1617_v5  ;;  %v1653_v12 = vmul.f32 %v3207_v61, %v3207_v61 }
 0x193   : > { %v3216_v56 = vadd.f32 %v2325_v36, %v3199_v42  ;;  %1630 = vadd.xlane.f32.xlu1 %v1629_v41  ;;  %v2326_v43 = vpop.f32.mrb[68].mxu0  ;;  %v1657_v29 = vsel %vm1616_vm0, %v1649_v3, 0.0 }
 0x194   : > { %v3218_v44 = vadd.f32 %v2337_v40, %v1498_v9  ;;  %v2338_v21 = vpop.f32.mrb[68].mxu1  ;;  %v2327_v46 = vpop.f32.mrb[69].mxu0  ;;  %v1669_v63 = vsel %vm1616_vm0, %v1653_v12, 0.0 }
 0x195   : > { %v2328_v48 = vadd.f32 %v2327_v46, %v2326_v43  ;;  %v2339_v49 = vpop.f32.mrb[69].mxu1  ;;  %v1650_v42 = vmul.f32 %v3216_v56, %v3216_v56  ;;  %v1620_v2 = vsel %vm1616_vm0, %v3216_v56, 0.0 }
 0x196   : > { %v2340_v51 = vadd.f32 %v2339_v49, %v2338_v21  ;;  %v1632_v52 = vsel %vm1616_vm0, %v3218_v44, 0.0  ;;  %v1654_v0 = vmul.f32 %v3218_v44, %v3218_v44 }
 0x197   : > { %v3228_v54 = vadd.f32 %v2328_v48, %v3201_v50  ;;  %1658 = vadd.xlane.f32.xlu1 %v1657_v29  ;;  %1633 = vadd.xlane.f32.xlu0 %v1632_v52  ;;  %v2329_v55 = vpop.f32.mrb[70].mxu0  ;;  %v1660_v31 = vsel %vm1616_vm0, %v1650_v42, 0.0 }
 0x198   : > { %v3230_v23 = vadd.f32 %v2340_v51, %v1503_v45  ;;  %v2341_v58 = vpop.f32.mrb[70].mxu1  ;;  %v2330_v59 = vpop.f32.mrb[71].mxu0  ;;  %v1672_v4 = vsel %vm1616_vm0, %v1654_v0, 0.0 }
 0x199   : > { %v2331_v38 = vadd.f32 %v2330_v59, %v2329_v55  ;;  %v2342_v60 = vpop.f32.mrb[71].mxu1  ;;  %v1623_v6 = vsel %vm1616_vm0, %v3228_v54, 0.0 }
 0x19a   : > { %v2343_v62 = vadd.f32 %v2342_v60, %v2341_v58  ;;  %v1635_v47 = vsel %vm1616_vm0, %v3230_v23, 0.0  ;;  %v1655_v37 = vmul.f32 %v3230_v23, %v3230_v23 }
 0x19b   : > { %v3237_v50 = vadd.f32 %v2331_v38, %v3203_v57  ;;  %1670 = vadd.xlane.f32.xlu1 %v1669_v63  ;;  %1661 = vadd.xlane.f32.xlu0 %v1660_v31  ;;  %v1651_v57 = vmul.f32 %v3228_v54, %v3228_v54 }
 0x19c   : > { %v3239_v1 = vadd.f32 %v2343_v62, %v1508_v25  ;;  %v1675_v9 = vsel %vm1616_vm0, %v1655_v37, 0.0 }
 0x19d   : > { %v1663_v7 = vsel %vm1616_vm0, %v1651_v57, 0.0  ;;  %v1626_v8 = vsel %vm1616_vm0, %v3237_v50, 0.0  ;;  %v1652_v11 = vmul.f32 %v3237_v50, %v3237_v50 }
 0x19e   : > { %v1638_v10 = vsel %vm1616_vm0, %v3239_v1, 0.0  ;;  %v1656_v14 = vmul.f32 %v3239_v1, %v3239_v1 }
 0x19f   : > { %1621 = vadd.xlane.f32.xlu1 %v1620_v2  ;;  %1673 = vadd.xlane.f32.xlu0 %v1672_v4  ;;  %v1666_v13 = vsel %vm1616_vm0, %v1652_v11, 0.0 }
 0x1a0   : > { %v1678_v15 = vsel %vm1616_vm0, %v1656_v14, 0.0 }
 0x1a3   : > { %1636 = vadd.xlane.f32.xlu1 %v1635_v47  ;;  %1624 = vadd.xlane.f32.xlu0 %v1623_v6 }
 0x1a7   : > { %1664 = vadd.xlane.f32.xlu1 %v1663_v7  ;;  %1627 = vadd.xlane.f32.xlu0 %v1626_v8 }
 0x1ab   : > { %1676 = vadd.xlane.f32.xlu1 %v1675_v9  ;;  %1639 = vadd.xlane.f32.xlu0 %v1638_v10 }
 0x1af   : > { %1667 = vadd.xlane.f32.xlu0 %v1666_v13 }
 0x1b3   : > { %1679 = vadd.xlane.f32.xlu0 %v1678_v15 }
 0x21f   : > { %v1619_v16 = vpop.xlane.xlu0 %1618 }
 0x220   : > { %v1631_v17 = vpop.xlane.xlu1 %1630  ;;  %v1641_v45 = vmul.f32 0.0625, %v1619_v16 }
 0x221   : > { %v1645_v20 = vmul.f32 0.0625, %v1631_v17 }
 0x222   : > { %v1689_v22 = vmul.f32 %v1641_v45, %v1641_v45  ;;  %v1713_v31 = vsub.f32 %v3205_v32, %v1641_v45 }
 0x223   : > { %v1693_v28 = vmul.f32 %v1645_v20, %v1645_v20  ;;  %v1717_v32 = vsub.f32 %v3207_v61, %v1645_v20 }
 0x224   : > { %v1659_v18 = vpop.xlane.xlu1 %1658  ;;  %v1634_v19 = vpop.xlane.xlu0 %1633 }
 0x225   : > { %v1681_v24 = vmul.f32 0.0625, %v1659_v18  ;;  %v3264_v26 = vmul.f32 0.0625, %v1634_v19 }
 0x227   : > { %v1697_v25 = vsub.f32 %v1681_v24, %v1689_v22  ;;  %v1694_v36 = vmul.f32 %v3264_v26, %v3264_v26  ;;  %v1718_v19 = vsub.f32 %v3218_v44, %v3264_v26 }
 0x228   : > { %v1671_v53 = vpop.xlane.xlu1 %1670  ;;  %v1662_v27 = vpop.xlane.xlu0 %1661 }
 0x229   : > { %v1705_v30 = vmax.f32 %v1697_v25, 0.0  ;;  %v1685_v33 = vmul.f32 0.0625, %v1671_v53  ;;  %v1682_v21 = vmul.f32 0.0625, %v1662_v27 }
 0x22b   : > { %v1721_v34 = vadd.f32 1e-05, %v1705_v30  ;;  %v1701_v35 = vsub.f32 %v1685_v33, %v1693_v28 }
 0x22c   : > { %v1622_v39 = vpop.xlane.xlu1 %1621  ;;  %v1674_v5 = vpop.xlane.xlu0 %1673 }
 0x22d   : > { %2661 = vrsqrt.f32 %v1721_v34  ;;  %v1709_v40 = vmax.f32 %v1701_v35, 0.0  ;;  %v1642_v41 = vmul.f32 0.0625, %v1622_v39  ;;  %v1686_v3 = vmul.f32 0.0625, %v1674_v5 }
 0x22f   : > { %v1725_v43 = vadd.f32 1e-05, %v1709_v40  ;;  %v1690_v46 = vmul.f32 %v1642_v41, %v1642_v41  ;;  %v1702_v48 = vsub.f32 %v1686_v3, %v1694_v36  ;;  %v1714_v25 = vsub.f32 %v3216_v56, %v1642_v41 }
 0x230   : > { %v1637_v49 = vpop.xlane.xlu1 %1636  ;;  %v1625_v12 = vpop.xlane.xlu0 %1624 }
 0x231   : > { %2663 = vrsqrt.f32 %v1725_v43  ;;  %v1698_v51 = vsub.f32 %v1682_v21, %v1690_v46  ;;  %v1710_v29 = vmax.f32 %v1702_v48, 0.0  ;;  %v3268_v52 = vmul.f32 0.0625, %v1625_v12 }
 0x232   : > { %v3270_v58 = vmul.f32 0.0625, %v1637_v49 }
 0x233   : > { %v1706_v42 = vmax.f32 %v1698_v51, 0.0  ;;  %v1726_v55 = vadd.f32 1e-05, %v1710_v29  ;;  %v1691_v62 = vmul.f32 %v3268_v52, %v3268_v52  ;;  %v1715_v56 = vsub.f32 %v3228_v54, %v3268_v52 }
 0x234   : > { %v1665_v59 = vpop.xlane.xlu1 %1664  ;;  %v1628_v38 = vpop.xlane.xlu0 %1627  ;;  %v1695_v7 = vmul.f32 %v3270_v58, %v3270_v58  ;;  %v1719_v43 = vsub.f32 %v3230_v23, %v3270_v58 }
 0x235   : > { %v1722_v60 = vadd.f32 1e-05, %v1706_v42  ;;  %2665 = vrsqrt.f32 %v1726_v55  ;;  %v1683_v63 = vmul.f32 0.0625, %v1665_v59  ;;  %v1644_v47 = vmul.f32 0.0625, %v1628_v38 }
 0x237   : > { %v2662_v0 = vpop.eup %2661  ;;  %2667 = vrsqrt.f32 %v1722_v60  ;;  %v1699_v2 = vsub.f32 %v1683_v63, %v1691_v62  ;;  %v1692_v15 = vmul.f32 %v1644_v47, %v1644_v47  ;;  %v1716_v49 = vsub.f32 %v3237_v50, %v1644_v47 }
 0x238   : > { %v1737_v4 = vmul.f32 %v2662_v0, %v1713_v31  ;;  %v1677_v6 = vpop.xlane.xlu1 %1676  ;;  %v1640_v57 = vpop.xlane.xlu0 %1639 }
 0x239   : > { %v1707_v8 = vmax.f32 %v1699_v2, 0.0  ;;  %v1687_v37 = vmul.f32 0.0625, %v1677_v6  ;;  %v1648_v45 = vmul.f32 0.0625, %v1640_v57 }
 0x23a   : > { %v1745_v9 = vmax.f32 %v1737_v4, 0.0 }
 0x23b   : > { %v2664_v10 = vpop.eup %2663  ;;  %v1723_v11 = vadd.f32 1e-05, %v1707_v8  ;;  %v1703_v13 = vsub.f32 %v1687_v37, %v1695_v7  ;;  %v1696_v30 = vmul.f32 %v1648_v45, %v1648_v45  ;;  %v1720_v29 = vsub.f32 %v3239_v1, %v1648_v45 }
 0x23c   : > { %1753 = vst.msk [vmem:[%s3279_s16] sm:$0xff] %vm1616_vm0, %v1745_v9  ;;  %v1741_v14 = vmul.f32 %v2664_v10, %v1717_v32  ;;  %v1668_v16 = vpop.xlane.xlu0 %1667 }
 0x23d   : > { %2669 = vrsqrt.f32 %v1723_v11  ;;  %v1711_v17 = vmax.f32 %v1703_v13, 0.0  ;;  %v1684_v18 = vmul.f32 0.0625, %v1668_v16 }
 0x23e   : > { %v1749_v22 = vmax.f32 %v1741_v14, 0.0 }
 0x23f   : > { %v2666_v24 = vpop.eup %2665  ;;  %v1727_v61 = vadd.f32 1e-05, %v1711_v17  ;;  %v1700_v20 = vsub.f32 %v1684_v18, %v1692_v15 }
 0x240   : > { %1757 = vst.msk [vmem:[%s3279_s16 + $0x20] sm:$0xff] %vm1616_vm0, %v1749_v22  ;;  %v1742_v53 = vmul.f32 %v2666_v24, %v1718_v19  ;;  %v1680_v27 = vpop.xlane.xlu0 %1679 }
 0x241   : > { %v2668_v28 = vpop.eup %2667  ;;  %2671 = vrsqrt.f32 %v1727_v61  ;;  %v1708_v33 = vmax.f32 %v1700_v20, 0.0  ;;  %v1688_v34 = vmul.f32 0.0625, %v1680_v27 }
 0x242   : > { %v1738_v35 = vmul.f32 %v2668_v28, %v1714_v25  ;;  %v1750_v36 = vmax.f32 %v1742_v53, 0.0 }
 0x243   : > { %v1724_v44 = vadd.f32 1e-05, %v1708_v33  ;;  %v1704_v26 = vsub.f32 %v1688_v34, %v1696_v30 }
 0x244   : > { %v1746_v39 = vmax.f32 %v1738_v35, 0.0  ;;  %1758 = vst.msk [vmem:[%s3279_s16 + $0x28] sm:$0xff] %vm1616_vm0, %v1750_v36 }
 0x245   : > { %2673 = vrsqrt.f32 %v1724_v44  ;;  %v1712_v5 = vmax.f32 %v1704_v26, 0.0 }
 0x246   : > { %1754 = vst.msk [vmem:[%s3279_s16 + $0x8] sm:$0xff] %vm1616_vm0, %v1746_v39 }
 0x247   : > { %v2670_v40 = vpop.eup %2669  ;;  %v1728_v41 = vadd.f32 1e-05, %v1712_v5 }
 0x248   : > { %v1739_v3 = vmul.f32 %v2670_v40, %v1715_v56 }
 0x249   : > { %2675 = vrsqrt.f32 %v1728_v41 }
 0x24a   : > { %v1747_v21 = vmax.f32 %v1739_v3, 0.0 }
 0x24b   : > { %v2672_v46 = vpop.eup %2671 }
 0x24c   : > { %1755 = vst.msk [vmem:[%s3279_s16 + $0x10] sm:$0xff] %vm1616_vm0, %v1747_v21  ;;  %v1743_v48 = vmul.f32 %v2672_v46, %v1719_v43 }
 0x24e   : > { %v1751_v12 = vmax.f32 %v1743_v48, 0.0 }
 0x24f   : > { %v2674_v51 = vpop.eup %2673 }
 0x250   : > { %1759 = vst.msk [vmem:[%s3279_s16 + $0x30] sm:$0xff] %vm1616_vm0, %v1751_v12  ;;  %v1740_v54 = vmul.f32 %v2674_v51, %v1716_v49 }
 0x252   : > { %v1748_v52 = vmax.f32 %v1740_v54, 0.0 }
 0x253   : > { %v2676_v42 = vpop.eup %2675 }
 0x254   : > { %1756 = vst.msk [vmem:[%s3279_s16 + $0x18] sm:$0xff] %vm1616_vm0, %v1748_v52  ;;  %v1744_v23 = vmul.f32 %v2676_v42, %v1720_v29 }
 0x256   : > { %v1752_v55 = vmax.f32 %v1744_v23, 0.0 }
 0x258   : > { %1760 = vst.msk [vmem:[%s3279_s16 + $0x38] sm:$0xff] %vm1616_vm0, %v1752_v55 }
 0x259 PF: > { %s13_s12 = sadd.s32 1, %s2683_s12  }
 0x25a   : > { %p10_p4 = scmp.ge.s32.totalorder %s13_s12, 4  }
 0x25c   :  { %12 = sbr.rel (!%p10_p4) target bundleno = 1 (0x1), region = 65 }

// kernel: _forward_impl.40
= control target key start
LH: loop header
LB: loop body
LE: loop exit
PB: predicated region body
PF: predicated region fallthrough
CT: control target
= control target key end

     0   :  { %s1432_s12 = smov 0   ;;  %s1689_s0 = inlined_call_operand.vmem [shape: f32[2,32,1152], index: 0, kind: input, shape index: {}]   ;;  %s1690_s1 = inlined_call_operand.vmem [shape: f32[2,1152,64], index: 1, kind: input, shape index: {}]   ;;  %s1691_s2 = inlined_call_operand.vmem [shape: f32[32,1], index: 2, kind: input, shape index: {}]   ;;  %s1692_s3 = inlined_call_operand.vmem [shape: f32[2,32,64], index: 3, kind: output, shape index: {}]  }
   0x1 LB: > { %s960_s13 = sadd.s32 4294967295, %s1409_s12   ;;  %p964_p0 = scmp.ge.s32.totalorder %s1409_s12, 1  ;;  %s1409_s12 = sphi %s1432_s12, %s13_s12  }
   0x2   : > { %p147_p1 = scmp.lt.s32.totalorder %s1409_s12, 3 }
   0x4   : > { %p148_p2 = pnand %p964_p0, %p147_p1 }
   0x5   : > { %p176_p3 = scmp.lt.s32.totalorder (!%p148_p2), %s960_s13, 1  ;;  %v371_v0 = vld [vmem:[%s1691_s2] sm:$0xff] (!%p148_p2)  ;;  %v373_v1 = vld [vmem:[%s1691_s2 + $0x10] sm:$0xff] (!%p148_p2)  ;;  %v1411_v2 = vmov (!%p148_p2), 0   ;;  %v372_v3 = vld [vmem:[%s1691_s2 + $0x8] sm:$0xff] (!%p148_p2)  ;;  %vm820_vm0 = vcmask (!%p148_p2), 523264  }
   0x6   : > { %151 = sbr.rel (%p148_p2) target bundleno = 515 (0x203), region = 32  ;;  %1393 = vset.pattern.permute.xlu0 (!%p148_p2), %v1411_v2  ;;  %1394 = vset.pattern.permute.xlu1 (!%p148_p2), %v1411_v2  ;;  %v374_v4 = vld [vmem:[%s1691_s2 + $0x18] sm:$0xff] (!%p148_p2) }
   0x7   : > { %377 = vperm.xlu0 (!%p148_p2), %1393, %v371_v0   ;;  %387 = vperm.xlu1 (!%p148_p2), %1394, %v373_v1  }
   0xb   : > { %382 = vperm.xlu0 (!%p148_p2), %1393, %v372_v3   ;;  %392 = vperm.xlu1 (!%p148_p2), %1394, %v374_v4  }
   0xd   : > { %s1694_s13 = smov (!%p176_p3, %s960_s13), 1 }
   0xe   : > { %s1383_s22 = smul.u32 1152, %s1694_s13  ;;  %s971_s30 = sshll.u32 %s1694_s13, 5 }
   0xf   : > { %s1382_s26 = smul.u32 288, %s1694_s13  ;;  %s190_s6 = scalar_lea.vmem %s1692_s3, %s971_s30 }
  0x10   : > { %s1458_s25 = scalar_lea.vmem %s1690_s1, %s1383_s22 }
  0x11   : > { %v243_v5 = vld [vmem:[%s1458_s25 + $0x80] sm:$0xff]  ;;  %v244_v6 = vld [vmem:[%s1458_s25 + $0x88] sm:$0xff]  ;;  %v245_v16 = vld [vmem:[%s1458_s25 + $0x90] sm:$0xff]  ;;  %s1514_s29 = scalar_lea.vmem %s1689_s0, %s1382_s26 }
  0x12   : > { %v275_v7 = vld [vmem:[%s1458_s25 + $0x180] sm:$0xff]  ;;  %v1206_v8 = vpack.c.bf16 %v244_v6, %v243_v5  ;;  %v276_v9 = vld [vmem:[%s1458_s25 + $0x188] sm:$0xff]  ;;  %v246_v18 = vld [vmem:[%s1458_s25 + $0x98] sm:$0xff] }
  0x13   : > { %v227_v10 = vld [vmem:[%s1458_s25] sm:$0xff]  ;;  %v228_v11 = vld [vmem:[%s1458_s25 + $0x8] sm:$0xff]  ;;  %v1238_v12 = vpack.c.bf16 %v276_v9, %v275_v7  ;;  %v277_v19 = vld [vmem:[%s1458_s25 + $0x190] sm:$0xff]  ;;  %v1210_v21 = vpack.c.bf16 %v246_v18, %v245_v16 }
  0x14   : > { %v1208_v13 = vpack.c.bf16 %v228_v11, %v227_v10  ;;  %v259_v14 = vld [vmem:[%s1458_s25 + $0x100] sm:$0xff]  ;;  %v260_v15 = vld [vmem:[%s1458_s25 + $0x108] sm:$0xff]  ;;  %1207 = vmatprep.subr.bf16.mxu0 %v1206_v8  ;;  %v278_v20 = vld [vmem:[%s1458_s25 + $0x198] sm:$0xff] }
  0x15   : > { %v1240_v17 = vpack.c.bf16 %v260_v15, %v259_v14  ;;  %1239 = vmatprep.subr.bf16.mxu1 %v1238_v12  ;;  %v1242_v22 = vpack.c.bf16 %v278_v20, %v277_v19  ;;  %v229_v23 = vld [vmem:[%s1458_s25 + $0x10] sm:$0xff]  ;;  %v230_v24 = vld [vmem:[%s1458_s25 + $0x18] sm:$0xff]  ;;  %v247_v28 = vld [vmem:[%s1458_s25 + $0xa0] sm:$0xff] }
  0x16   : > { %1209 = vmatpush3.bf16.msra.mxu0 %v1208_v13  ;;  %v261_v25 = vld [vmem:[%s1458_s25 + $0x110] sm:$0xff]  ;;  %v1212_v26 = vpack.c.bf16 %v230_v24, %v229_v23  ;;  %v262_v27 = vld [vmem:[%s1458_s25 + $0x118] sm:$0xff]  ;;  %v248_v29 = vld [vmem:[%s1458_s25 + $0xa8] sm:$0xff] }
  0x17   : > { %1241 = vmatpush3.bf16.msra.mxu1 %v1240_v17  ;;  %1211 = vmatprep.subr.bf16.mxu0 %v1210_v21  ;;  %v1244_v30 = vpack.c.bf16 %v262_v27, %v261_v25  ;;  %v1214_v31 = vpack.c.bf16 %v248_v29, %v247_v28  ;;  %v279_v32 = vld [vmem:[%s1458_s25 + $0x1a0] sm:$0xff]  ;;  %v280_v33 = vld [vmem:[%s1458_s25 + $0x1a8] sm:$0xff]  ;;  %v249_v40 = vld [vmem:[%s1458_s25 + $0xb0] sm:$0xff] }
  0x18   : > { %1243 = vmatprep.subr.bf16.mxu1 %v1242_v22  ;;  %v231_v34 = vld [vmem:[%s1458_s25 + $0x20] sm:$0xff]  ;;  %v1246_v35 = vpack.c.bf16 %v280_v33, %v279_v32  ;;  %v232_v36 = vld [vmem:[%s1458_s25 + $0x28] sm:$0xff]  ;;  %v250_v41 = vld [vmem:[%s1458_s25 + $0xb8] sm:$0xff] }
  0x19   : > { %v263_v37 = vld [vmem:[%s1458_s25 + $0x120] sm:$0xff]  ;;  %v264_v38 = vld [vmem:[%s1458_s25 + $0x128] sm:$0xff]  ;;  %v1216_v39 = vpack.c.bf16 %v232_v36, %v231_v34  ;;  %v281_v42 = vld [vmem:[%s1458_s25 + $0x1b0] sm:$0xff]  ;;  %v1218_v44 = vpack.c.bf16 %v250_v41, %v249_v40 }
  0x1a   : > { %1213 = vmatpush3.bf16.msra.mxu0 %v1212_v26  ;;  %v1248_v43 = vpack.c.bf16 %v264_v38, %v263_v37  ;;  %v282_v45 = vld [vmem:[%s1458_s25 + $0x1b8] sm:$0xff]  ;;  %v233_v46 = vld [vmem:[%s1458_s25 + $0x30] sm:$0xff]  ;;  %v251_v51 = vld [vmem:[%s1458_s25 + $0xc0] sm:$0xff] }
  0x1b   : > { %1245 = vmatpush3.bf16.msra.mxu1 %v1244_v30  ;;  %1215 = vmatprep.subr.bf16.mxu0 %v1214_v31  ;;  %v234_v47 = vld [vmem:[%s1458_s25 + $0x38] sm:$0xff]  ;;  %v1250_v48 = vpack.c.bf16 %v282_v45, %v281_v42  ;;  %v265_v49 = vld [vmem:[%s1458_s25 + $0x130] sm:$0xff]  ;;  %v252_v52 = vld [vmem:[%s1458_s25 + $0xc8] sm:$0xff] }
  0x1c   : > { %1247 = vmatprep.subr.bf16.mxu1 %v1246_v35  ;;  %v266_v50 = vld [vmem:[%s1458_s25 + $0x138] sm:$0xff]  ;;  %v283_v53 = vld [vmem:[%s1458_s25 + $0x1c0] sm:$0xff]  ;;  %v284_v54 = vld [vmem:[%s1458_s25 + $0x1c8] sm:$0xff]  ;;  %v1220_v55 = vpack.c.bf16 %v234_v47, %v233_v46  ;;  %v1222_v57 = vpack.c.bf16 %v252_v52, %v251_v51 }
  0x1d   : > { %v1252_v56 = vpack.c.bf16 %v266_v50, %v265_v49  ;;  %v235_v58 = vld [vmem:[%s1458_s25 + $0x40] sm:$0xff]  ;;  %v236_v59 = vld [vmem:[%s1458_s25 + $0x48] sm:$0xff]  ;;  %v1254_v61 = vpack.c.bf16 %v284_v54, %v283_v53  ;;  %v253_v63 = vld [vmem:[%s1458_s25 + $0xd0] sm:$0xff] }
  0x1e   : > { %1217 = vmatpush3.bf16.msra.mxu0 %v1216_v39  ;;  %v267_v60 = vld [vmem:[%s1458_s25 + $0x140] sm:$0xff]  ;;  %v268_v62 = vld [vmem:[%s1458_s25 + $0x148] sm:$0xff]  ;;  %v254_v0 = vld [vmem:[%s1458_s25 + $0xd8] sm:$0xff]  ;;  %v1224_v3 = vpack.c.bf16 %v236_v59, %v235_v58 }
  0x1f   : > { %1249 = vmatpush3.bf16.msra.mxu1 %v1248_v43  ;;  %1219 = vmatprep.subr.bf16.mxu0 %v1218_v44  ;;  %v285_v1 = vld [vmem:[%s1458_s25 + $0x1d0] sm:$0xff]  ;;  %v286_v2 = vld [vmem:[%s1458_s25 + $0x1d8] sm:$0xff]  ;;  %v1256_v4 = vpack.c.bf16 %v268_v62, %v267_v60  ;;  %v1226_v5 = vpack.c.bf16 %v254_v0, %v253_v63  ;;  %v255_v11 = vld [vmem:[%s1458_s25 + $0xe0] sm:$0xff] }
  0x20   : > { %1251 = vmatprep.subr.bf16.mxu1 %v1250_v48  ;;  %v237_v6 = vld [vmem:[%s1458_s25 + $0x50] sm:$0xff]  ;;  %v238_v7 = vld [vmem:[%s1458_s25 + $0x58] sm:$0xff]  ;;  %v1258_v9 = vpack.c.bf16 %v286_v2, %v285_v1  ;;  %v256_v12 = vld [vmem:[%s1458_s25 + $0xe8] sm:$0xff] }
  0x21   : > { %v269_v8 = vld [vmem:[%s1458_s25 + $0x150] sm:$0xff]  ;;  %v270_v10 = vld [vmem:[%s1458_s25 + $0x158] sm:$0xff]  ;;  %v287_v13 = vld [vmem:[%s1458_s25 + $0x1e0] sm:$0xff]  ;;  %v1228_v15 = vpack.c.bf16 %v238_v7, %v237_v6  ;;  %v1230_v19 = vpack.c.bf16 %v256_v12, %v255_v11 }
  0x22   : > { %1221 = vmatpush3.bf16.msra.mxu0 %v1220_v55  ;;  %v288_v14 = vld [vmem:[%s1458_s25 + $0x1e8] sm:$0xff]  ;;  %v239_v16 = vld [vmem:[%s1458_s25 + $0x60] sm:$0xff]  ;;  %v1260_v18 = vpack.c.bf16 %v270_v10, %v269_v8  ;;  %v194_v22 = vld [vmem:[%s1514_s29 + $0x18] sm:$0xff] }
  0x23   : > { %1253 = vmatpush3.bf16.msra.mxu1 %v1252_v56  ;;  %1223 = vmatprep.subr.bf16.mxu0 %v1222_v57  ;;  %v240_v17 = vld [vmem:[%s1458_s25 + $0x68] sm:$0xff]  ;;  %v271_v20 = vld [vmem:[%s1458_s25 + $0x160] sm:$0xff]  ;;  %v1262_v23 = vpack.c.bf16 %v288_v14, %v287_v13  ;;  %v257_v25 = vld [vmem:[%s1458_s25 + $0xf0] sm:$0xff] }
  0x24   : > { %1255 = vmatprep.subr.bf16.mxu1 %v1254_v61  ;;  %v192_v21 = vld [vmem:[%s1514_s29 + $0x8] sm:$0xff]  ;;  %v258_v26 = vld [vmem:[%s1458_s25 + $0xf8] sm:$0xff]  ;;  %v289_v27 = vld [vmem:[%s1458_s25 + $0x1f0] sm:$0xff]  ;;  %544 = vmatprep.mubr.f32.mxu1 %v194_v22  ;;  %v1232_v29 = vpack.c.bf16 %v240_v17, %v239_v16 }
  0x25   : > { %v272_v24 = vld [vmem:[%s1458_s25 + $0x168] sm:$0xff]  ;;  %459 = vmatprep.mubr.f32.mxu0 %v192_v21  ;;  %v290_v28 = vld [vmem:[%s1458_s25 + $0x1f8] sm:$0xff]  ;;  %v1234_v31 = vpack.c.bf16 %v258_v26, %v257_v25  ;;  %v241_v32 = vld [vmem:[%s1458_s25 + $0x70] sm:$0xff] }
  0x26   : > { %1225 = vmatpush3.bf16.msra.mxu0 %v1224_v3  ;;  %v1264_v30 = vpack.c.bf16 %v272_v24, %v271_v20  ;;  %v242_v33 = vld [vmem:[%s1458_s25 + $0x78] sm:$0xff]  ;;  %v273_v34 = vld [vmem:[%s1458_s25 + $0x170] sm:$0xff]  ;;  %v1266_v35 = vpack.c.bf16 %v290_v28, %v289_v27  ;;  %v307_v37 = vld [vmem:[%s1458_s25 + $0x280] sm:$0xff] }
  0x27   : > { %1257 = vmatpush3.bf16.msra.mxu1 %v1256_v4  ;;  %1227 = vmatprep.subr.bf16.mxu0 %v1226_v5  ;;  %v274_v36 = vld [vmem:[%s1458_s25 + $0x178] sm:$0xff]  ;;  %v308_v38 = vld [vmem:[%s1458_s25 + $0x288] sm:$0xff]  ;;  %v339_v39 = vld [vmem:[%s1458_s25 + $0x380] sm:$0xff]  ;;  %v1236_v41 = vpack.c.bf16 %v242_v33, %v241_v32 }
  0x28   : > { %1259 = vmatprep.subr.bf16.mxu1 %v1258_v9  ;;  %v340_v40 = vld [vmem:[%s1458_s25 + $0x388] sm:$0xff]  ;;  %v1268_v42 = vpack.c.bf16 %v274_v36, %v273_v34  ;;  %v1270_v43 = vpack.c.bf16 %v308_v38, %v307_v37  ;;  %v291_v44 = vld [vmem:[%s1458_s25 + $0x200] sm:$0xff]  ;;  %v309_v49 = vld [vmem:[%s1458_s25 + $0x290] sm:$0xff] }
  0x29   : > { %v292_v45 = vld [vmem:[%s1458_s25 + $0x208] sm:$0xff]  ;;  %v323_v46 = vld [vmem:[%s1458_s25 + $0x300] sm:$0xff]  ;;  %v1302_v47 = vpack.c.bf16 %v340_v40, %v339_v39  ;;  %v310_v50 = vld [vmem:[%s1458_s25 + $0x298] sm:$0xff] }
  0x2a   : > { %1229 = vmatpush3.bf16.msra.mxu0 %v1228_v15  ;;  %v324_v48 = vld [vmem:[%s1458_s25 + $0x308] sm:$0xff]  ;;  %v341_v51 = vld [vmem:[%s1458_s25 + $0x390] sm:$0xff]  ;;  %v342_v52 = vld [vmem:[%s1458_s25 + $0x398] sm:$0xff]  ;;  %v1272_v55 = vpack.c.bf16 %v292_v45, %v291_v44  ;;  %v1274_v57 = vpack.c.bf16 %v310_v50, %v309_v49 }
  0x2b   : > { %1261 = vmatpush3.bf16.msra.mxu1 %v1260_v18  ;;  %1231 = vmatprep.subr.bf16.mxu0 %v1230_v19  ;;  %v191_v53 = vld [vmem:[%s1514_s29] sm:$0xff]  ;;  %v193_v54 = vld [vmem:[%s1514_s29 + $0x10] sm:$0xff]  ;;  %v1304_v56 = vpack.c.bf16 %v324_v48, %v323_v46  ;;  %v294_v59 = vld [vmem:[%s1458_s25 + $0x218] sm:$0xff]  ;;  %v1306_v61 = vpack.c.bf16 %v342_v52, %v341_v51 }
  0x2c   : > { %1263 = vmatprep.subr.bf16.mxu1 %v1262_v23  ;;  %v293_v58 = vld [vmem:[%s1458_s25 + $0x210] sm:$0xff]  ;;  %v326_v62 = vld [vmem:[%s1458_s25 + $0x318] sm:$0xff]  ;;  %v311_v63 = vld [vmem:[%s1458_s25 + $0x2a0] sm:$0xff] }
  0x2d   : > { %v325_v60 = vld [vmem:[%s1458_s25 + $0x310] sm:$0xff]  ;;  %v312_v0 = vld [vmem:[%s1458_s25 + $0x2a8] sm:$0xff]  ;;  %v343_v1 = vld [vmem:[%s1458_s25 + $0x3a0] sm:$0xff]  ;;  %v1276_v4 = vpack.c.bf16 %v294_v59, %v293_v58 }
  0x2e   : > { %1233 = vmatpush3.bf16.msra.mxu0 %v1232_v29  ;;  %v344_v2 = vld [vmem:[%s1458_s25 + $0x3a8] sm:$0xff]  ;;  %v201_v3 = vld [vmem:[%s1514_s29 + $0x50] sm:$0xff]  ;;  %v295_v5 = vld [vmem:[%s1458_s25 + $0x220] sm:$0xff]  ;;  %v1308_v8 = vpack.c.bf16 %v326_v62, %v325_v60  ;;  %v1278_v9 = vpack.c.bf16 %v312_v0, %v311_v63 }
  0x2f   : > { %1265 = vmatpush3.bf16.msra.mxu1 %v1264_v30  ;;  %1235 = vmatprep.subr.bf16.mxu0 %v1234_v31  ;;  %v200_v6 = vld [vmem:[%s1514_s29 + $0x48] sm:$0xff]  ;;  %v203_v7 = vld [vmem:[%s1514_s29 + $0x60] sm:$0xff]  ;;  %v202_v12 = vld [vmem:[%s1514_s29 + $0x58] sm:$0xff]  ;;  %v1310_v13 = vpack.c.bf16 %v344_v2, %v343_v1 }
  0x30   : > { %1267 = vmatprep.subr.bf16.mxu1 %v1266_v35  ;;  %v296_v10 = vld [vmem:[%s1458_s25 + $0x228] sm:$0xff]  ;;  %v327_v11 = vld [vmem:[%s1458_s25 + $0x320] sm:$0xff]  ;;  %v313_v15 = vld [vmem:[%s1458_s25 + $0x2b0] sm:$0xff] }
  0x31   : > { %v328_v14 = vld [vmem:[%s1458_s25 + $0x328] sm:$0xff]  ;;  %v314_v16 = vld [vmem:[%s1458_s25 + $0x2b8] sm:$0xff]  ;;  %v345_v17 = vld [vmem:[%s1458_s25 + $0x3b0] sm:$0xff]  ;;  %v1280_v20 = vpack.c.bf16 %v296_v10, %v295_v5 }
  0x32   : > { %1237 = vmatpush3.bf16.msra.mxu0 %v1236_v41  ;;  %v346_v18 = vld [vmem:[%s1458_s25 + $0x3b8] sm:$0xff]  ;;  %v297_v21 = vld [vmem:[%s1458_s25 + $0x230] sm:$0xff]  ;;  %v212_v23 = vld [vmem:[%s1514_s29 + $0xa8] sm:$0xff]  ;;  %v1312_v24 = vpack.c.bf16 %v328_v14, %v327_v11  ;;  %v1282_v25 = vpack.c.bf16 %v314_v16, %v313_v15 }
  0x33   : > { %1269 = vmatpush3.bf16.msra.mxu1 %v1268_v42  ;;  %1271 = vmatprep.subr.bf16.mxu0 %v1270_v43  ;;  %v210_v19 = vld [vmem:[%s1514_s29 + $0x98] sm:$0xff]  ;;  %v209_v22 = vld [vmem:[%s1514_s29 + $0x90] sm:$0xff]  ;;  %v211_v28 = vld [vmem:[%s1514_s29 + $0xa0] sm:$0xff]  ;;  %v1314_v29 = vpack.c.bf16 %v346_v18, %v345_v17 }
  0x34   : > { %1303 = vmatprep.subr.bf16.mxu1 %v1302_v47  ;;  %v298_v26 = vld [vmem:[%s1458_s25 + $0x238] sm:$0xff]  ;;  %v329_v27 = vld [vmem:[%s1458_s25 + $0x330] sm:$0xff]  ;;  %v315_v31 = vld [vmem:[%s1458_s25 + $0x2c0] sm:$0xff] }
  0x35   : > { %460 = vmatmul.mubr.f32.vlgmr.msra.gmra.mrb[0].mxu0 %v191_v53  ;;  %v330_v30 = vld [vmem:[%s1458_s25 + $0x338] sm:$0xff]  ;;  %v316_v32 = vld [vmem:[%s1458_s25 + $0x2c8] sm:$0xff]  ;;  %v347_v33 = vld [vmem:[%s1458_s25 + $0x3c0] sm:$0xff]  ;;  %v1284_v36 = vpack.c.bf16 %v298_v26, %v297_v21 }
  0x36   : > { %545 = vmatmul.mubr.f32.vlgmr.msra.gmra.mrb[0].mxu1 %v193_v54  ;;  %1273 = vmatpush3.bf16.msra.mxu0 %v1272_v55  ;;  %v348_v34 = vld [vmem:[%s1458_s25 + $0x3c8] sm:$0xff]  ;;  %v219_v35 = vld [vmem:[%s1514_s29 + $0xe0] sm:$0xff]  ;;  %v218_v38 = vld [vmem:[%s1514_s29 + $0xd8] sm:$0xff]  ;;  %v1316_v40 = vpack.c.bf16 %v330_v30, %v329_v27  ;;  %v1286_v41 = vpack.c.bf16 %v316_v32, %v315_v31 }
  0x37   : > { %1305 = vmatpush3.bf16.msra.mxu1 %v1304_v56  ;;  %1275 = vmatprep.subr.bf16.mxu0 %v1274_v57  ;;  %v299_v37 = vld [vmem:[%s1458_s25 + $0x240] sm:$0xff]  ;;  %v221_v39 = vld [vmem:[%s1514_s29 + $0xf0] sm:$0xff]  ;;  %v300_v42 = vld [vmem:[%s1458_s25 + $0x248] sm:$0xff]  ;;  %v1318_v45 = vpack.c.bf16 %v348_v34, %v347_v33 }
  0x38   : > { %1307 = vmatprep.subr.bf16.mxu1 %v1306_v61  ;;  %464 = vmatprep.mubr.f32.mxu0 %v201_v3  ;;  %v331_v43 = vld [vmem:[%s1458_s25 + $0x340] sm:$0xff]  ;;  %v220_v44 = vld [vmem:[%s1514_s29 + $0xe8] sm:$0xff]  ;;  %v317_v47 = vld [vmem:[%s1458_s25 + $0x2d0] sm:$0xff]  ;;  %v1288_v51 = vpack.c.bf16 %v300_v42, %v299_v37 }
  0x39   : > { %465 = vmatmul.mubr.f32.gmra.mrb[2].mxu0 %v200_v6  ;;  %549 = vmatprep.mubr.f32.mxu1 %v203_v7  ;;  %v332_v46 = vld [vmem:[%s1458_s25 + $0x348] sm:$0xff]  ;;  %v318_v48 = vld [vmem:[%s1458_s25 + $0x2d8] sm:$0xff]  ;;  %v349_v49 = vld [vmem:[%s1458_s25 + $0x3d0] sm:$0xff] }
  0x3a   : > { %1277 = vmatpush3.bf16.msra.mxu0 %v1276_v4  ;;  %550 = vmatmul.mubr.f32.gmra.mrb[2].mxu1 %v202_v12  ;;  %v350_v50 = vld [vmem:[%s1458_s25 + $0x3d8] sm:$0xff]  ;;  %v196_v52 = vld [vmem:[%s1514_s29 + $0x28] sm:$0xff]  ;;  %v1320_v54 = vpack.c.bf16 %v332_v46, %v331_v43  ;;  %v1290_v55 = vpack.c.bf16 %v318_v48, %v317_v47  ;;  %v301_v56 = vld [vmem:[%s1458_s25 + $0x250] sm:$0xff] }
  0x3b   : > { %1309 = vmatpush3.bf16.msra.mxu1 %v1308_v8  ;;  %1279 = vmatprep.subr.bf16.mxu0 %v1278_v9  ;;  %v198_v53 = vld [vmem:[%s1514_s29 + $0x38] sm:$0xff]  ;;  %v333_v58 = vld [vmem:[%s1458_s25 + $0x350] sm:$0xff]  ;;  %v1322_v59 = vpack.c.bf16 %v350_v50, %v349_v49  ;;  %v319_v61 = vld [vmem:[%s1458_s25 + $0x2e0] sm:$0xff] }
  0x3c   : > { %1311 = vmatprep.subr.bf16.mxu1 %v1310_v13  ;;  %469 = vmatprep.mubr.f32.mxu0 %v210_v19  ;;  %v302_v57 = vld [vmem:[%s1458_s25 + $0x258] sm:$0xff]  ;;  %v320_v62 = vld [vmem:[%s1458_s25 + $0x2e8] sm:$0xff]  ;;  %v351_v63 = vld [vmem:[%s1458_s25 + $0x3e0] sm:$0xff] }
  0x3d   : > { %470 = vmatmul.mubr.f32.gmra.mrb[4].mxu0 %v209_v22  ;;  %554 = vmatprep.mubr.f32.mxu1 %v212_v23  ;;  %v334_v60 = vld [vmem:[%s1458_s25 + $0x358] sm:$0xff]  ;;  %v352_v0 = vld [vmem:[%s1458_s25 + $0x3e8] sm:$0xff]  ;;  %v1292_v1 = vpack.c.bf16 %v302_v57, %v301_v56  ;;  %v1294_v3 = vpack.c.bf16 %v320_v62, %v319_v61  ;;  %v303_v4 = vld [vmem:[%s1458_s25 + $0x260] sm:$0xff] }
  0x3e   : > { %1281 = vmatpush3.bf16.msra.mxu0 %v1280_v20  ;;  %555 = vmatmul.mubr.f32.gmra.mrb[4].mxu1 %v211_v28  ;;  %v1324_v2 = vpack.c.bf16 %v334_v60, %v333_v58  ;;  %v304_v5 = vld [vmem:[%s1458_s25 + $0x268] sm:$0xff]  ;;  %v335_v6 = vld [vmem:[%s1458_s25 + $0x360] sm:$0xff]  ;;  %v1326_v7 = vpack.c.bf16 %v352_v0, %v351_v63  ;;  %v321_v9 = vld [vmem:[%s1458_s25 + $0x2f0] sm:$0xff] }
  0x3f   : > { %1313 = vmatpush3.bf16.msra.mxu1 %v1312_v24  ;;  %1283 = vmatprep.subr.bf16.mxu0 %v1282_v25  ;;  %v336_v8 = vld [vmem:[%s1458_s25 + $0x368] sm:$0xff]  ;;  %v322_v10 = vld [vmem:[%s1458_s25 + $0x2f8] sm:$0xff]  ;;  %v353_v11 = vld [vmem:[%s1458_s25 + $0x3f0] sm:$0xff]  ;;  %v1296_v13 = vpack.c.bf16 %v304_v5, %v303_v4 }
  0x40   : > { %1315 = vmatprep.subr.bf16.mxu1 %v1314_v29  ;;  %474 = vmatprep.mubr.f32.mxu0 %v219_v35  ;;  %v354_v12 = vld [vmem:[%s1458_s25 + $0x3f8] sm:$0xff]  ;;  %v1328_v14 = vpack.c.bf16 %v336_v8, %v335_v6  ;;  %v1298_v15 = vpack.c.bf16 %v322_v10, %v321_v9  ;;  %v305_v16 = vld [vmem:[%s1458_s25 + $0x270] sm:$0xff]  ;;  %v355_v21 = vld [vmem:[%s1458_s25 + $0x400] sm:$0xff] }
  0x41   : > { %475 = vmatmul.mubr.f32.gmra.mrb[6].mxu0 %v218_v38  ;;  %559 = vmatprep.mubr.f32.mxu1 %v221_v39  ;;  %v306_v17 = vld [vmem:[%s1458_s25 + $0x278] sm:$0xff]  ;;  %v337_v18 = vld [vmem:[%s1458_s25 + $0x370] sm:$0xff]  ;;  %v1330_v19 = vpack.c.bf16 %v354_v12, %v353_v11  ;;  %v356_v22 = vld [vmem:[%s1458_s25 + $0x408] sm:$0xff] }
  0x42   : > { %1285 = vmatpush3.bf16.msra.mxu0 %v1284_v36  ;;  %560 = vmatmul.mubr.f32.gmra.mrb[6].mxu1 %v220_v44  ;;  %v338_v20 = vld [vmem:[%s1458_s25 + $0x378] sm:$0xff]  ;;  %v1300_v23 = vpack.c.bf16 %v306_v17, %v305_v16  ;;  %v1334_v25 = vpack.c.bf16 %v356_v22, %v355_v21  ;;  %v357_v26 = vld [vmem:[%s1458_s25 + $0x410] sm:$0xff]  ;;  %v195_v28 = vld [vmem:[%s1514_s29 + $0x20] sm:$0xff] }
  0x43   : > { %1317 = vmatpush3.bf16.msra.mxu1 %v1316_v40  ;;  %1287 = vmatprep.subr.bf16.mxu0 %v1286_v41  ;;  %v1332_v24 = vpack.c.bf16 %v338_v20, %v337_v18  ;;  %v358_v27 = vld [vmem:[%s1458_s25 + $0x418] sm:$0xff]  ;;  %v197_v29 = vld [vmem:[%s1514_s29 + $0x30] sm:$0xff]  ;;  %v359_v32 = vld [vmem:[%s1458_s25 + $0x420] sm:$0xff] }
  0x44   : > { %1319 = vmatprep.subr.bf16.mxu1 %v1318_v45  ;;  %629 = vmatprep.mubr.f32.mxu0 %v196_v52  ;;  %v205_v30 = vld [vmem:[%s1514_s29 + $0x70] sm:$0xff]  ;;  %v1338_v31 = vpack.c.bf16 %v358_v27, %v357_v26  ;;  %v360_v33 = vld [vmem:[%s1458_s25 + $0x428] sm:$0xff]  ;;  %v207_v35 = vld [vmem:[%s1514_s29 + $0x80] sm:$0xff] }
  0x45   : > { %714 = vmatprep.mubr.f32.mxu1 %v198_v53  ;;  %v204_v34 = vld [vmem:[%s1514_s29 + $0x68] sm:$0xff]  ;;  %v206_v36 = vld [vmem:[%s1514_s29 + $0x78] sm:$0xff]  ;;  %v1342_v38 = vpack.c.bf16 %v360_v33, %v359_v32  ;;  %v361_v39 = vld [vmem:[%s1458_s25 + $0x430] sm:$0xff] }
  0x46   : > { %1289 = vmatpush3.bf16.msra.mxu0 %v1288_v51  ;;  %v214_v37 = vld [vmem:[%s1514_s29 + $0xb8] sm:$0xff]  ;;  %v213_v41 = vld [vmem:[%s1514_s29 + $0xb0] sm:$0xff]  ;;  %v216_v42 = vld [vmem:[%s1514_s29 + $0xc8] sm:$0xff] }
  0x47   : > { %1321 = vmatpush3.bf16.msra.mxu1 %v1320_v54  ;;  %1291 = vmatprep.subr.bf16.mxu0 %v1290_v55  ;;  %v362_v40 = vld [vmem:[%s1458_s25 + $0x438] sm:$0xff]  ;;  %v215_v43 = vld [vmem:[%s1514_s29 + $0xc0] sm:$0xff]  ;;  %v364_v47 = vld [vmem:[%s1458_s25 + $0x448] sm:$0xff] }
  0x48   : > { %1323 = vmatprep.subr.bf16.mxu1 %v1322_v59  ;;  %v223_v44 = vld [vmem:[%s1514_s29 + $0x100] sm:$0xff]  ;;  %v1346_v45 = vpack.c.bf16 %v362_v40, %v361_v39  ;;  %v222_v48 = vld [vmem:[%s1514_s29 + $0xf8] sm:$0xff]  ;;  %v225_v49 = vld [vmem:[%s1514_s29 + $0x110] sm:$0xff] }
  0x49   : > { %v363_v46 = vld [vmem:[%s1458_s25 + $0x440] sm:$0xff]  ;;  %v224_v50 = vld [vmem:[%s1514_s29 + $0x108] sm:$0xff]  ;;  %v365_v52 = vld [vmem:[%s1458_s25 + $0x450] sm:$0xff] }
  0x4a   : > { %1293 = vmatpush3.bf16.msra.mxu0 %v1292_v1  ;;  %v1350_v51 = vpack.c.bf16 %v364_v47, %v363_v46  ;;  %v366_v53 = vld [vmem:[%s1458_s25 + $0x458] sm:$0xff]  ;;  %v199_v54 = vld [vmem:[%s1514_s29 + $0x40] sm:$0xff]  ;;  %v217_v55 = vld [vmem:[%s1514_s29 + $0xd0] sm:$0xff] }
  0x4b   : > { %1325 = vmatpush3.bf16.msra.mxu1 %v1324_v2  ;;  %1295 = vmatprep.subr.bf16.mxu0 %v1294_v3  ;;  %v1354_v56 = vpack.c.bf16 %v366_v53, %v365_v52  ;;  %v367_v57 = vld [vmem:[%s1458_s25 + $0x460] sm:$0xff]  ;;  %v368_v58 = vld [vmem:[%s1458_s25 + $0x468] sm:$0xff]  ;;  %v369_v60 = vld [vmem:[%s1458_s25 + $0x470] sm:$0xff] }
  0x4c   : > { %1327 = vmatprep.subr.bf16.mxu1 %v1326_v7  ;;  %v1358_v59 = vpack.c.bf16 %v368_v58, %v367_v57  ;;  %v370_v61 = vld [vmem:[%s1458_s25 + $0x478] sm:$0xff]  ;;  %v208_v63 = vld [vmem:[%s1514_s29 + $0x88] sm:$0xff] }
  0x4d   : > { %v1362_v62 = vpack.c.bf16 %v370_v61, %v369_v60  ;;  %v226_v0 = vld [vmem:[%s1514_s29 + $0x118] sm:$0xff] }
  0x4e   : > { %1297 = vmatpush3.bf16.msra.mxu0 %v1296_v13 }
  0x4f   : > { %1329 = vmatpush3.bf16.msra.mxu1 %v1328_v14  ;;  %1299 = vmatprep.subr.bf16.mxu0 %v1298_v15 }
  0x50   : > { %1331 = vmatprep.subr.bf16.mxu1 %v1330_v19 }
  0x52   : > { %1301 = vmatpush3.bf16.msra.mxu0 %v1300_v23 }
  0x53   : > { %1333 = vmatpush3.bf16.msra.mxu1 %v1332_v24  ;;  %1335 = vmatprep.subr.bf16.mxu0 %v1334_v25 }
  0x54   : > { %1366 = vmatprep.subr.bf16.mxu1 %v1334_v25 }
  0x55   : > { %630 = vmatmul.mubr.f32.vlgmr.msra.gmra.mrb[8].mxu0 %v195_v28 }
  0x56   : > { %715 = vmatmul.mubr.f32.vlgmr.msra.gmra.mrb[8].mxu1 %v197_v29  ;;  %1337 = vmatpush3.bf16.msra.mxu0 %v1334_v25 }
  0x57   : > { %1374 = vmatpush3.bf16.msra.mxu1 %v1334_v25  ;;  %634 = vmatprep.mubr.f32.mxu0 %v205_v30 }
  0x58   : > { %1339 = vmatprep.subr.bf16.mxu0 %v1338_v31  ;;  %1367 = vmatprep.subr.bf16.mxu1 %v1338_v31 }
  0x59   : > { %635 = vmatmul.mubr.f32.gmra.mrb[10].mxu0 %v204_v34  ;;  %719 = vmatprep.mubr.f32.mxu1 %v207_v35 }
  0x5a   : > { %1341 = vmatpush3.bf16.msra.mxu0 %v1338_v31  ;;  %720 = vmatmul.mubr.f32.gmra.mrb[10].mxu1 %v206_v36 }
  0x5b   : > { %1375 = vmatpush3.bf16.msra.mxu1 %v1338_v31  ;;  %639 = vmatprep.mubr.f32.mxu0 %v214_v37 }
  0x5c   : > { %1343 = vmatprep.subr.bf16.mxu0 %v1342_v38  ;;  %1368 = vmatprep.subr.bf16.mxu1 %v1342_v38 }
  0x5d   : > { %640 = vmatmul.mubr.f32.gmra.mrb[12].mxu0 %v213_v41  ;;  %724 = vmatprep.mubr.f32.mxu1 %v216_v42 }
  0x5e   : > { %1345 = vmatpush3.bf16.msra.mxu0 %v1342_v38  ;;  %725 = vmatmul.mubr.f32.gmra.mrb[12].mxu1 %v215_v43 }
  0x5f   : > { %1376 = vmatpush3.bf16.msra.mxu1 %v1342_v38  ;;  %644 = vmatprep.mubr.f32.mxu0 %v223_v44 }
  0x60   : > { %1347 = vmatprep.subr.bf16.mxu0 %v1346_v45  ;;  %1369 = vmatprep.subr.bf16.mxu1 %v1346_v45 }
  0x61   : > { %645 = vmatmul.mubr.f32.gmra.mrb[14].mxu0 %v222_v48  ;;  %729 = vmatprep.mubr.f32.mxu1 %v225_v49 }
  0x62   : > { %1349 = vmatpush3.bf16.msra.mxu0 %v1346_v45  ;;  %730 = vmatmul.mubr.f32.gmra.mrb[14].mxu1 %v224_v50 }
  0x63   : > { %1377 = vmatpush3.bf16.msra.mxu1 %v1346_v45  ;;  %1351 = vmatprep.subr.bf16.mxu0 %v1350_v51 }
  0x64   : > { %1370 = vmatprep.subr.bf16.mxu1 %v1350_v51  ;;  %1200 = vmatprep.mubr.f32.mxu0 %v199_v54 }
  0x65   : > { %1203 = vmatprep.mubr.f32.mxu1 %v217_v55 }
  0x66   : > { %1353 = vmatpush3.bf16.msra.mxu0 %v1350_v51 }
  0x67   : > { %1378 = vmatpush3.bf16.msra.mxu1 %v1350_v51  ;;  %1355 = vmatprep.subr.bf16.mxu0 %v1354_v56 }
  0x68   : > { %1371 = vmatprep.subr.bf16.mxu1 %v1354_v56 }
  0x6a   : > { %1357 = vmatpush3.bf16.msra.mxu0 %v1354_v56 }
  0x6b   : > { %1379 = vmatpush3.bf16.msra.mxu1 %v1354_v56  ;;  %1359 = vmatprep.subr.bf16.mxu0 %v1358_v59 }
  0x6c   : > { %1372 = vmatprep.subr.bf16.mxu1 %v1358_v59 }
  0x6e   : > { %1361 = vmatpush3.bf16.msra.mxu0 %v1358_v59 }
  0x6f   : > { %1380 = vmatpush3.bf16.msra.mxu1 %v1358_v59  ;;  %1363 = vmatprep.subr.bf16.mxu0 %v1362_v62 }
  0x70   : > { %1373 = vmatprep.subr.bf16.mxu1 %v1362_v62 }
  0x72   : > { %1365 = vmatpush3.bf16.msra.mxu0 %v1362_v62 }
  0x73   : > { %1381 = vmatpush3.bf16.msra.mxu1 %v1362_v62 }
  0x75   : > { %1201 = vmatmul.mubr.f32.vlgmr.msra.gmra.mrb[16].mxu0 %v208_v63 }
  0x76   : > { %1204 = vmatmul.mubr.f32.vlgmr.msra.gmra.mrb[16].mxu1 %v226_v0 }
  0x86   : > { %v378_v2 = vpop.permute.xlu0 %377  ;;  %v388_v16 = vpop.permute.xlu1 %387 }
  0x8a   : > { %v383_v10 = vpop.permute.xlu0 %382  ;;  %v393_v28 = vpop.permute.xlu1 %392 }
 0x108   : > { %v1004_v1 = vpop.f32.mrb[0].mxu0 }
 0x109   : > { %v1048_v3 = vpop.f32.mrb[0].mxu1  ;;  %v1005_v4 = vpop.f32.mrb[1].mxu0 }
 0x10a   : > { %v1006_v5 = vadd.f32 %v1005_v4, %v1004_v1  ;;  %v1049_v6 = vpop.f32.mrb[1].mxu1 }
 0x10b   : > { %v1050_v7 = vadd.f32 %v1049_v6, %v1048_v3 }
 0x10c   : > { %v462_v8 = vadd.f32 %v1006_v5, %v378_v2  ;;  %v1007_v9 = vpop.f32.mrb[2].mxu0 }
 0x10d   : > { %v1008_v11 = vpop.f32.mrb[3].mxu0  ;;  %v1051_v12 = vpop.f32.mrb[2].mxu1 }
 0x10e   : > { %v547_v13 = vadd.f32 %v1050_v7, %v462_v8  ;;  %v1009_v14 = vadd.f32 %v1008_v11, %v1007_v9  ;;  %v1052_v15 = vpop.f32.mrb[3].mxu1 }
 0x10f   : > { %v1053_v17 = vadd.f32 %v1052_v15, %v1051_v12 }
 0x110   : > { %v467_v18 = vadd.f32 %v1009_v14, %v383_v10  ;;  %v1010_v19 = vpop.f32.mrb[4].mxu0 }
 0x111   : > { %v1011_v20 = vpop.f32.mrb[5].mxu0  ;;  %v1054_v21 = vpop.f32.mrb[4].mxu1 }
 0x112   : > { %v552_v22 = vadd.f32 %v1053_v17, %v467_v18  ;;  %v1012_v23 = vadd.f32 %v1011_v20, %v1010_v19  ;;  %v1055_v24 = vpop.f32.mrb[5].mxu1 }
 0x113   : > { %v1056_v25 = vadd.f32 %v1055_v24, %v1054_v21 }
 0x114   : > { %v472_v26 = vadd.f32 %v1012_v23, %v388_v16  ;;  %v1013_v27 = vpop.f32.mrb[6].mxu0 }
 0x115   : > { %v1014_v29 = vpop.f32.mrb[7].mxu0  ;;  %v1057_v30 = vpop.f32.mrb[6].mxu1 }
 0x116   : > { %v557_v31 = vadd.f32 %v1056_v25, %v472_v26  ;;  %v1015_v32 = vadd.f32 %v1014_v29, %v1013_v27  ;;  %v1058_v33 = vpop.f32.mrb[7].mxu1 }
 0x117   : > { %v1059_v34 = vadd.f32 %v1058_v33, %v1057_v30 }
 0x118   : > { %v477_v35 = vadd.f32 %v1015_v32, %v393_v28 }
 0x11a   : > { %v562_v36 = vadd.f32 %v1059_v34, %v477_v35 }
 0x128   : > { %v1092_v37 = vpop.f32.mrb[8].mxu0 }
 0x129   : > { %v1136_v38 = vpop.f32.mrb[8].mxu1  ;;  %v1093_v39 = vpop.f32.mrb[9].mxu0 }
 0x12a   : > { %v1094_v40 = vadd.f32 %v1093_v39, %v1092_v37  ;;  %v1137_v41 = vpop.f32.mrb[9].mxu1 }
 0x12b   : > { %v1138_v42 = vadd.f32 %v1137_v41, %v1136_v38 }
 0x12c   : > { %v632_v43 = vadd.f32 %v1094_v40, %v547_v13  ;;  %v1095_v44 = vpop.f32.mrb[10].mxu0 }
 0x12d   : > { %v1096_v45 = vpop.f32.mrb[11].mxu0  ;;  %v1139_v46 = vpop.f32.mrb[10].mxu1 }
 0x12e   : > { %v1097_v47 = vadd.f32 %v1096_v45, %v1095_v44  ;;  %v1140_v48 = vpop.f32.mrb[11].mxu1  ;;  %v717_v49 = vadd.f32 %v1138_v42, %v632_v43 }
 0x12f   : > { %v1141_v50 = vadd.f32 %v1140_v48, %v1139_v46 }
 0x130   : > { %v637_v51 = vadd.f32 %v1097_v47, %v552_v22  ;;  %v1098_v52 = vpop.f32.mrb[12].mxu0 }
 0x131   : > { %v1099_v53 = vpop.f32.mrb[13].mxu0  ;;  %v1142_v54 = vpop.f32.mrb[12].mxu1 }
 0x132   : > { %v1100_v55 = vadd.f32 %v1099_v53, %v1098_v52  ;;  %v1143_v56 = vpop.f32.mrb[13].mxu1  ;;  %v722_v57 = vadd.f32 %v1141_v50, %v637_v51 }
 0x133   : > { %v1144_v58 = vadd.f32 %v1143_v56, %v1142_v54 }
 0x134   : > { %v642_v59 = vadd.f32 %v1100_v55, %v557_v31  ;;  %v1101_v60 = vpop.f32.mrb[14].mxu0 }
 0x135   : > { %v1102_v61 = vpop.f32.mrb[15].mxu0  ;;  %v1145_v62 = vpop.f32.mrb[14].mxu1 }
 0x136   : > { %v1103_v63 = vadd.f32 %v1102_v61, %v1101_v60  ;;  %v1146_v0 = vpop.f32.mrb[15].mxu1  ;;  %v727_v1 = vadd.f32 %v1144_v58, %v642_v59 }
 0x137   : > { %v1147_v2 = vadd.f32 %v1146_v0, %v1145_v62 }
 0x138   : > { %v647_v3 = vadd.f32 %v1103_v63, %v562_v36 }
 0x13a   : > { %v732_v4 = vadd.f32 %v1147_v2, %v647_v3 }
 0x148   : > { %v1202_v5 = vpop.f32.mrb[16].mxu0 }
 0x149   : > { %v1646_v6 = vadd.f32 %v1202_v5, %v722_v57  ;;  %v1205_v7 = vpop.f32.mrb[16].mxu1  ;;  %v801_v8 = vpop.f32.mrb[17].mxu0 }
 0x14a   : > { %v1648_v9 = vadd.f32 %v1205_v7, %v732_v4  ;;  %v1650_v10 = vadd.f32 %v801_v8, %v717_v49  ;;  %v811_v11 = vpop.f32.mrb[17].mxu1 }
 0x14b   : > { %v1652_v12 = vadd.f32 %v811_v11, %v727_v1  ;;  %v824_v13 = vsel %vm820_vm0, %v1646_v6, 0.0  ;;  %v838_v21 = vmul.f32 %v1646_v6, %v1646_v6 }
 0x14c   : > { %v830_v14 = vsel %vm820_vm0, %v1648_v9, 0.0  ;;  %825 = vadd.xlane.f32.xlu1 %v824_v13  ;;  %v837_v15 = vmul.f32 %v1650_v10, %v1650_v10  ;;  %v821_v18 = vsel %vm820_vm0, %v1650_v10, 0.0  ;;  %v840_v23 = vmul.f32 %v1648_v9, %v1648_v9 }
 0x14d   : > { %831 = vadd.xlane.f32.xlu0 %v830_v14  ;;  %v839_v17 = vmul.f32 %v1652_v12, %v1652_v12  ;;  %v827_v20 = vsel %vm820_vm0, %v1652_v12, 0.0  ;;  %v844_v22 = vsel %vm820_vm0, %v838_v21, 0.0 }
 0x14e   : > { %v841_v16 = vsel %vm820_vm0, %v837_v15, 0.0  ;;  %v850_v24 = vsel %vm820_vm0, %v840_v23, 0.0 }
 0x14f   : > { %v847_v19 = vsel %vm820_vm0, %v839_v17, 0.0 }
 0x150   : > { %842 = vadd.xlane.f32.xlu1 %v841_v16 }
 0x151   : > { %822 = vadd.xlane.f32.xlu0 %v821_v18 }
 0x154   : > { %848 = vadd.xlane.f32.xlu1 %v847_v19 }
 0x155   : > { %828 = vadd.xlane.f32.xlu0 %v827_v20 }
 0x159   : > { %845 = vadd.xlane.f32.xlu0 %v844_v22 }
 0x15d   : > { %851 = vadd.xlane.f32.xlu0 %v850_v24 }
 0x1d9   : > { %v826_v25 = vpop.xlane.xlu1 %825 }
 0x1da   : > { %v832_v26 = vpop.xlane.xlu0 %831  ;;  %v834_v34 = vmul.f32 0.015625, %v826_v25 }
 0x1db   : > { %v836_v40 = vmul.f32 0.015625, %v832_v26 }
 0x1dc   : > { %v858_v42 = vmul.f32 %v834_v34, %v834_v34  ;;  %v870_v63 = vsub.f32 %v1646_v6, %v834_v34 }
 0x1dd   : > { %v843_v27 = vpop.xlane.xlu1 %842  ;;  %v860_v49 = vmul.f32 %v836_v40, %v836_v40  ;;  %v872_v4 = vsub.f32 %v1648_v9, %v836_v40 }
 0x1de   : > { %v823_v28 = vpop.xlane.xlu0 %822  ;;  %v853_v30 = vmul.f32 0.015625, %v843_v27 }
 0x1df   : > { %v833_v29 = vmul.f32 0.015625, %v823_v28 }
 0x1e1   : > { %v857_v31 = vmul.f32 %v833_v29, %v833_v29  ;;  %v849_v32 = vpop.xlane.xlu1 %848  ;;  %v869_v57 = vsub.f32 %v1650_v10, %v833_v29 }
 0x1e2   : > { %v829_v33 = vpop.xlane.xlu0 %828  ;;  %v855_v38 = vmul.f32 0.015625, %v849_v32 }
 0x1e3   : > { %v861_v35 = vsub.f32 %v853_v30, %v857_v31  ;;  %v835_v36 = vmul.f32 0.015625, %v829_v33 }
 0x1e5   : > { %v865_v37 = vmax.f32 %v861_v35, 0.0  ;;  %v859_v39 = vmul.f32 %v835_v36, %v835_v36  ;;  %v871_v61 = vsub.f32 %v1652_v12, %v835_v36 }
 0x1e6   : > { %v846_v41 = vpop.xlane.xlu0 %845 }
 0x1e7   : > { %v873_v43 = vadd.f32 1e-05, %v865_v37  ;;  %v863_v44 = vsub.f32 %v855_v38, %v859_v39  ;;  %v854_v45 = vmul.f32 0.015625, %v846_v41 }
 0x1e9   : > { %1395 = vrsqrt.f32 %v873_v43  ;;  %v867_v46 = vmax.f32 %v863_v44, 0.0  ;;  %v862_v47 = vsub.f32 %v854_v45, %v858_v42 }
 0x1ea   : > { %v852_v48 = vpop.xlane.xlu0 %851 }
 0x1eb   : > { %v875_v50 = vadd.f32 1e-05, %v867_v46  ;;  %v866_v51 = vmax.f32 %v862_v47, 0.0  ;;  %v856_v52 = vmul.f32 0.015625, %v852_v48 }
 0x1ed   : > { %1397 = vrsqrt.f32 %v875_v50  ;;  %v874_v53 = vadd.f32 1e-05, %v866_v51  ;;  %v864_v54 = vsub.f32 %v856_v52, %v860_v49 }
 0x1ef   : > { %1399 = vrsqrt.f32 %v874_v53  ;;  %v868_v55 = vmax.f32 %v864_v54, 0.0 }
 0x1f1   : > { %v876_v56 = vadd.f32 1e-05, %v868_v55 }
 0x1f3   : > { %v1396_v58 = vpop.eup %1395  ;;  %1401 = vrsqrt.f32 %v876_v56 }
 0x1f4   : > { %v881_v59 = vmul.f32 %v1396_v58, %v869_v57 }
 0x1f6   : > { %v885_v60 = vmax.f32 %v881_v59, 0.0 }
 0x1f7   : > { %v1398_v62 = vpop.eup %1397 }
 0x1f8   : > { %889 = vst.msk [vmem:[%s190_s6] sm:$0xff] %vm820_vm0, %v885_v60  ;;  %v883_v0 = vmul.f32 %v1398_v62, %v871_v61 }
 0x1f9   : > { %v1400_v1 = vpop.eup %1399 }
 0x1fa   : > { %v887_v2 = vmax.f32 %v883_v0, 0.0  ;;  %v882_v3 = vmul.f32 %v1400_v1, %v870_v63 }
 0x1fc   : > { %891 = vst.msk [vmem:[%s190_s6 + $0x10] sm:$0xff] %vm820_vm0, %v887_v2  ;;  %v886_v5 = vmax.f32 %v882_v3, 0.0 }
 0x1fd   : > { %v1402_v7 = vpop.eup %1401 }
 0x1fe   : > { %890 = vst.msk [vmem:[%s190_s6 + $0x8] sm:$0xff] %vm820_vm0, %v886_v5  ;;  %v884_v8 = vmul.f32 %v1402_v7, %v872_v4 }
 0x200   : > { %v888_v10 = vmax.f32 %v884_v8, 0.0 }
 0x202   : > { %892 = vst.msk [vmem:[%s190_s6 + $0x18] sm:$0xff] %vm820_vm0, %v888_v10 }
 0x203 PF: > { %s13_s12 = sadd.s32 1, %s1409_s12  }
 0x204   : > { %p10_p4 = scmp.ge.s32.totalorder %s13_s12, 4  }
 0x206   :  { %12 = sbr.rel (!%p10_p4) target bundleno = 1 (0x1), region = 65 }

// kernel: _forward_impl.41
= control target key start
LH: loop header
LB: loop body
LE: loop exit
PB: predicated region body
PF: predicated region fallthrough
CT: control target
= control target key end

     0   :  { %s1256_s18 = smov 0   ;;  %s1515_s0 = inlined_call_operand.vmem [shape: f32[2,32,576], index: 0, kind: input, shape index: {}]   ;;  %s1516_s1 = inlined_call_operand.vmem [shape: f32[2,576,256], index: 1, kind: input, shape index: {}]   ;;  %s1517_s2 = inlined_call_operand.vmem [shape: f32[32,1], index: 2, kind: input, shape index: {}]   ;;  %s1518_s3 = inlined_call_operand.vmem [shape: f32[1,32], index: 3, kind: input, shape index: {}]   ;;  %s1519_s4 = inlined_call_operand.vmem [shape: f32[2,1,256], index: 4, kind: input, shape index: {}]   ;;  %s1520_s5 = inlined_call_operand.vmem [shape: f32[2,1,256], index: 5, kind: output, shape index: {}]  }
   0x1 LB: > { %s1000_s19 = sadd.s32 4294967295, %s1221_s18   ;;  %p1004_p0 = scmp.ge.s32.totalorder %s1221_s18, 1  ;;  %s1221_s18 = sphi %s1256_s18, %s15_s18  }
   0x2   : > { %p206_p1 = scmp.lt.s32.totalorder %s1221_s18, 3 }
   0x4   : > { %p207_p2 = pnand %p1004_p0, %p206_p1 }
   0x5   : > { %p242_p3 = scmp.lt.s32.totalorder (!%p207_p2), %s1000_s19, 1  ;;  %v424_v0 = vld [vmem:[%s1517_s2] sm:$0xff] (!%p207_p2)  ;;  %v1223_v1 = vmov (!%p207_p2), 0   ;;  %v426_v2 = vld [vmem:[%s1517_s2 + $0x10] sm:$0xff] (!%p207_p2)  ;;  %v425_v3 = vld [vmem:[%s1517_s2 + $0x8] sm:$0xff] (!%p207_p2)  ;;  %vm448_vm0 = vcmask (!%p207_p2), 523264  }
   0x6   : > { %210 = sbr.rel (%p207_p2) target bundleno = 726 (0x2d6), region = 40  ;;  %1205 = vset.pattern.permute.xlu0 (!%p207_p2), %v1223_v1  ;;  %1206 = vset.pattern.permute.xlu1 (!%p207_p2), %v1223_v1  ;;  %v427_v4 = vld [vmem:[%s1517_s2 + $0x18] sm:$0xff] (!%p207_p2)  ;;  %vm825_vm1 = vcmask (!%p207_p2), 261120  }
   0x7   : > { %430 = vperm.xlu0 (!%p207_p2), %1205, %v424_v0   ;;  %440 = vperm.xlu1 (!%p207_p2), %1206, %v426_v2  }
   0xb   : > { %435 = vperm.xlu0 (!%p207_p2), %1205, %v425_v3   ;;  %445 = vperm.xlu1 (!%p207_p2), %1206, %v427_v4  }
   0xd   : > { %s1522_s19 = smov (!%p242_p3, %s1000_s19), 1 }
   0xe   : > { %s1193_s28 = smul.u32 1152, %s1522_s19  ;;  %s1007_s13 = sshll.u32 %s1522_s19, 1 }
   0xf   : > { %s1192_s7 = smul.u32 160, %s1522_s19  ;;  %s255_s16 = scalar_lea.vmem %s1519_s4, %s1007_s13 }
  0x10   : > { %s1282_s6 = scalar_lea.vmem %s1516_s1, %s1193_s28  ;;  %s259_s20 = scalar_lea.vmem %s1520_s5, %s1007_s13 }
  0x11   : > { %v345_v5 = vld [vmem:[%s1282_s6 + $0x208] sm:$0xff]  ;;  %v347_v6 = vld [vmem:[%s1282_s6 + $0x218] sm:$0xff]  ;;  %v344_v7 = vld [vmem:[%s1282_s6 + $0x200] sm:$0xff]  ;;  %s1373_s10 = scalar_lea.vmem %s1515_s0, %s1192_s7 }
  0x12   : > { %v1080_v8 = vpack.c.bf16 %v347_v6, %v345_v5  ;;  %v346_v9 = vld [vmem:[%s1282_s6 + $0x210] sm:$0xff]  ;;  %v349_v10 = vld [vmem:[%s1282_s6 + $0x228] sm:$0xff]  ;;  %v351_v11 = vld [vmem:[%s1282_s6 + $0x238] sm:$0xff] }
  0x13   : > { %v1082_v12 = vpack.c.bf16 %v346_v9, %v344_v7  ;;  %v1084_v13 = vpack.c.bf16 %v351_v11, %v349_v10  ;;  %v348_v14 = vld [vmem:[%s1282_s6 + $0x220] sm:$0xff]  ;;  %v350_v15 = vld [vmem:[%s1282_s6 + $0x230] sm:$0xff]  ;;  %v353_v16 = vld [vmem:[%s1282_s6 + $0x248] sm:$0xff] }
  0x14   : > { %1081 = vmatprep.subr.bf16.mxu0 %v1080_v8  ;;  %v355_v17 = vld [vmem:[%s1282_s6 + $0x258] sm:$0xff]  ;;  %v1086_v18 = vpack.c.bf16 %v350_v15, %v348_v14  ;;  %v281_v19 = vld [vmem:[%s1282_s6 + $0x8] sm:$0xff]  ;;  %v280_v21 = vld [vmem:[%s1282_s6] sm:$0xff] }
  0x15   : > { %1083 = vmatpush1.bf16.msra.mxu0 %v1082_v12  ;;  %v283_v20 = vld [vmem:[%s1282_s6 + $0x18] sm:$0xff]  ;;  %v1088_v22 = vpack.c.bf16 %v355_v17, %v353_v16  ;;  %v352_v23 = vld [vmem:[%s1282_s6 + $0x240] sm:$0xff]  ;;  %v354_v24 = vld [vmem:[%s1282_s6 + $0x250] sm:$0xff] }
  0x16   : > { %1085 = vmatprep.subr.bf16.mxu0 %v1084_v13  ;;  %v1016_v25 = vpack.c.bf16 %v283_v20, %v281_v19  ;;  %v282_v26 = vld [vmem:[%s1282_s6 + $0x10] sm:$0xff]  ;;  %v357_v28 = vld [vmem:[%s1282_s6 + $0x268] sm:$0xff]  ;;  %v359_v29 = vld [vmem:[%s1282_s6 + $0x278] sm:$0xff]  ;;  %v1090_v34 = vpack.c.bf16 %v354_v24, %v352_v23 }
  0x17   : > { %v1018_v27 = vpack.c.bf16 %v282_v26, %v280_v21  ;;  %v285_v30 = vld [vmem:[%s1282_s6 + $0x28] sm:$0xff]  ;;  %v287_v31 = vld [vmem:[%s1282_s6 + $0x38] sm:$0xff]  ;;  %v284_v32 = vld [vmem:[%s1282_s6 + $0x20] sm:$0xff]  ;;  %v1092_v39 = vpack.c.bf16 %v359_v29, %v357_v28 }
  0x18   : > { %1017 = vmatprep.subr.bf16.mxu1 %v1016_v25  ;;  %v286_v33 = vld [vmem:[%s1282_s6 + $0x30] sm:$0xff]  ;;  %v356_v35 = vld [vmem:[%s1282_s6 + $0x260] sm:$0xff]  ;;  %v1020_v37 = vpack.c.bf16 %v287_v31, %v285_v30  ;;  %v361_v40 = vld [vmem:[%s1282_s6 + $0x288] sm:$0xff] }
  0x19   : > { %1087 = vmatpush1.bf16.msra.mxu0 %v1086_v18  ;;  %1019 = vmatpush1.bf16.msra.mxu1 %v1018_v27  ;;  %v358_v36 = vld [vmem:[%s1282_s6 + $0x270] sm:$0xff]  ;;  %v1022_v38 = vpack.c.bf16 %v286_v33, %v284_v32  ;;  %v289_v41 = vld [vmem:[%s1282_s6 + $0x48] sm:$0xff]  ;;  %v291_v42 = vld [vmem:[%s1282_s6 + $0x58] sm:$0xff] }
  0x1a   : > { %1089 = vmatprep.subr.bf16.mxu0 %v1088_v22  ;;  %1021 = vmatprep.subr.bf16.mxu1 %v1020_v37  ;;  %v363_v43 = vld [vmem:[%s1282_s6 + $0x298] sm:$0xff]  ;;  %v1024_v44 = vpack.c.bf16 %v291_v42, %v289_v41  ;;  %v288_v45 = vld [vmem:[%s1282_s6 + $0x40] sm:$0xff]  ;;  %v290_v46 = vld [vmem:[%s1282_s6 + $0x50] sm:$0xff]  ;;  %v1094_v47 = vpack.c.bf16 %v358_v36, %v356_v35 }
  0x1b   : > { %v360_v48 = vld [vmem:[%s1282_s6 + $0x280] sm:$0xff]  ;;  %v1026_v49 = vpack.c.bf16 %v290_v46, %v288_v45  ;;  %v293_v50 = vld [vmem:[%s1282_s6 + $0x68] sm:$0xff]  ;;  %v295_v51 = vld [vmem:[%s1282_s6 + $0x78] sm:$0xff]  ;;  %v1096_v52 = vpack.c.bf16 %v363_v43, %v361_v40 }
  0x1c   : > { %v362_v53 = vld [vmem:[%s1282_s6 + $0x290] sm:$0xff]  ;;  %v1028_v54 = vpack.c.bf16 %v295_v51, %v293_v50  ;;  %v292_v55 = vld [vmem:[%s1282_s6 + $0x60] sm:$0xff]  ;;  %v365_v57 = vld [vmem:[%s1282_s6 + $0x2a8] sm:$0xff] }
  0x1d   : > { %1091 = vmatpush1.bf16.msra.mxu0 %v1090_v34  ;;  %1023 = vmatpush1.bf16.msra.mxu1 %v1022_v38  ;;  %v294_v56 = vld [vmem:[%s1282_s6 + $0x70] sm:$0xff]  ;;  %v367_v58 = vld [vmem:[%s1282_s6 + $0x2b8] sm:$0xff]  ;;  %v297_v59 = vld [vmem:[%s1282_s6 + $0x88] sm:$0xff]  ;;  %v1098_v61 = vpack.c.bf16 %v362_v53, %v360_v48 }
  0x1e   : > { %1093 = vmatprep.subr.bf16.mxu0 %v1092_v39  ;;  %1025 = vmatprep.subr.bf16.mxu1 %v1024_v44  ;;  %v299_v60 = vld [vmem:[%s1282_s6 + $0x98] sm:$0xff]  ;;  %v364_v62 = vld [vmem:[%s1282_s6 + $0x2a0] sm:$0xff]  ;;  %v366_v63 = vld [vmem:[%s1282_s6 + $0x2b0] sm:$0xff]  ;;  %v1030_v0 = vpack.c.bf16 %v294_v56, %v292_v55  ;;  %v1100_v1 = vpack.c.bf16 %v367_v58, %v365_v57 }
  0x1f   : > { %v369_v2 = vld [vmem:[%s1282_s6 + $0x2c8] sm:$0xff]  ;;  %v1032_v3 = vpack.c.bf16 %v299_v60, %v297_v59  ;;  %v296_v4 = vld [vmem:[%s1282_s6 + $0x80] sm:$0xff]  ;;  %v298_v5 = vld [vmem:[%s1282_s6 + $0x90] sm:$0xff]  ;;  %v1102_v9 = vpack.c.bf16 %v366_v63, %v364_v62 }
  0x20   : > { %v371_v6 = vld [vmem:[%s1282_s6 + $0x2d8] sm:$0xff]  ;;  %v301_v7 = vld [vmem:[%s1282_s6 + $0xa8] sm:$0xff]  ;;  %v368_v10 = vld [vmem:[%s1282_s6 + $0x2c0] sm:$0xff]  ;;  %v1034_v12 = vpack.c.bf16 %v298_v5, %v296_v4 }
  0x21   : > { %1095 = vmatpush1.bf16.msra.mxu0 %v1094_v47  ;;  %1027 = vmatpush1.bf16.msra.mxu1 %v1026_v49  ;;  %v303_v8 = vld [vmem:[%s1282_s6 + $0xb8] sm:$0xff]  ;;  %v370_v11 = vld [vmem:[%s1282_s6 + $0x2d0] sm:$0xff]  ;;  %v1104_v13 = vpack.c.bf16 %v371_v6, %v369_v2  ;;  %v373_v14 = vld [vmem:[%s1282_s6 + $0x2e8] sm:$0xff] }
  0x22   : > { %1097 = vmatprep.subr.bf16.mxu0 %v1096_v52  ;;  %1029 = vmatprep.subr.bf16.mxu1 %v1028_v54  ;;  %v1036_v15 = vpack.c.bf16 %v303_v8, %v301_v7  ;;  %v300_v16 = vld [vmem:[%s1282_s6 + $0xa0] sm:$0xff]  ;;  %v302_v17 = vld [vmem:[%s1282_s6 + $0xb0] sm:$0xff]  ;;  %v375_v18 = vld [vmem:[%s1282_s6 + $0x2f8] sm:$0xff]  ;;  %v1106_v21 = vpack.c.bf16 %v370_v11, %v368_v10 }
  0x23   : > { %v305_v19 = vld [vmem:[%s1282_s6 + $0xc8] sm:$0xff]  ;;  %v307_v20 = vld [vmem:[%s1282_s6 + $0xd8] sm:$0xff]  ;;  %v372_v22 = vld [vmem:[%s1282_s6 + $0x2e0] sm:$0xff]  ;;  %v1038_v24 = vpack.c.bf16 %v302_v17, %v300_v16  ;;  %v1108_v25 = vpack.c.bf16 %v375_v18, %v373_v14 }
  0x24   : > { %v374_v23 = vld [vmem:[%s1282_s6 + $0x2f0] sm:$0xff]  ;;  %v377_v26 = vld [vmem:[%s1282_s6 + $0x308] sm:$0xff]  ;;  %v1040_v27 = vpack.c.bf16 %v307_v20, %v305_v19  ;;  %v304_v28 = vld [vmem:[%s1282_s6 + $0xc0] sm:$0xff] }
  0x25   : > { %1099 = vmatpush1.bf16.msra.mxu0 %v1098_v61  ;;  %1031 = vmatpush1.bf16.msra.mxu1 %v1030_v0  ;;  %v306_v29 = vld [vmem:[%s1282_s6 + $0xd0] sm:$0xff]  ;;  %v379_v30 = vld [vmem:[%s1282_s6 + $0x318] sm:$0xff]  ;;  %v309_v31 = vld [vmem:[%s1282_s6 + $0xe8] sm:$0xff]  ;;  %v1110_v33 = vpack.c.bf16 %v374_v23, %v372_v22 }
  0x26   : > { %1101 = vmatprep.subr.bf16.mxu0 %v1100_v1  ;;  %1033 = vmatprep.subr.bf16.mxu1 %v1032_v3  ;;  %v311_v32 = vld [vmem:[%s1282_s6 + $0xf8] sm:$0xff]  ;;  %v376_v34 = vld [vmem:[%s1282_s6 + $0x300] sm:$0xff]  ;;  %v378_v35 = vld [vmem:[%s1282_s6 + $0x310] sm:$0xff]  ;;  %v1042_v36 = vpack.c.bf16 %v306_v29, %v304_v28  ;;  %v1112_v37 = vpack.c.bf16 %v379_v30, %v377_v26 }
  0x27   : > { %v381_v38 = vld [vmem:[%s1282_s6 + $0x328] sm:$0xff]  ;;  %v1044_v39 = vpack.c.bf16 %v311_v32, %v309_v31  ;;  %v308_v40 = vld [vmem:[%s1282_s6 + $0xe0] sm:$0xff]  ;;  %v310_v41 = vld [vmem:[%s1282_s6 + $0xf0] sm:$0xff]  ;;  %v1114_v45 = vpack.c.bf16 %v378_v35, %v376_v34 }
  0x28   : > { %v383_v42 = vld [vmem:[%s1282_s6 + $0x338] sm:$0xff]  ;;  %v313_v43 = vld [vmem:[%s1282_s6 + $0x108] sm:$0xff]  ;;  %v380_v46 = vld [vmem:[%s1282_s6 + $0x320] sm:$0xff]  ;;  %v1046_v48 = vpack.c.bf16 %v310_v41, %v308_v40 }
  0x29   : > { %1103 = vmatpush1.bf16.msra.mxu0 %v1102_v9  ;;  %1035 = vmatpush1.bf16.msra.mxu1 %v1034_v12  ;;  %v315_v44 = vld [vmem:[%s1282_s6 + $0x118] sm:$0xff]  ;;  %v382_v47 = vld [vmem:[%s1282_s6 + $0x330] sm:$0xff]  ;;  %v1116_v49 = vpack.c.bf16 %v383_v42, %v381_v38  ;;  %v385_v50 = vld [vmem:[%s1282_s6 + $0x348] sm:$0xff] }
  0x2a   : > { %1105 = vmatprep.subr.bf16.mxu0 %v1104_v13  ;;  %1037 = vmatprep.subr.bf16.mxu1 %v1036_v15  ;;  %v1048_v51 = vpack.c.bf16 %v315_v44, %v313_v43  ;;  %v312_v52 = vld [vmem:[%s1282_s6 + $0x100] sm:$0xff]  ;;  %v314_v53 = vld [vmem:[%s1282_s6 + $0x110] sm:$0xff]  ;;  %v387_v54 = vld [vmem:[%s1282_s6 + $0x358] sm:$0xff]  ;;  %v1118_v57 = vpack.c.bf16 %v382_v47, %v380_v46 }
  0x2b   : > { %v317_v55 = vld [vmem:[%s1282_s6 + $0x128] sm:$0xff]  ;;  %v319_v56 = vld [vmem:[%s1282_s6 + $0x138] sm:$0xff]  ;;  %v384_v58 = vld [vmem:[%s1282_s6 + $0x340] sm:$0xff]  ;;  %v1050_v60 = vpack.c.bf16 %v314_v53, %v312_v52  ;;  %v1120_v61 = vpack.c.bf16 %v387_v54, %v385_v50 }
  0x2c   : > { %v386_v59 = vld [vmem:[%s1282_s6 + $0x350] sm:$0xff]  ;;  %v389_v62 = vld [vmem:[%s1282_s6 + $0x368] sm:$0xff]  ;;  %v1052_v63 = vpack.c.bf16 %v319_v56, %v317_v55  ;;  %v316_v0 = vld [vmem:[%s1282_s6 + $0x120] sm:$0xff] }
  0x2d   : > { %1107 = vmatpush1.bf16.msra.mxu0 %v1106_v21  ;;  %1039 = vmatpush1.bf16.msra.mxu1 %v1038_v24  ;;  %v318_v1 = vld [vmem:[%s1282_s6 + $0x130] sm:$0xff]  ;;  %v391_v2 = vld [vmem:[%s1282_s6 + $0x378] sm:$0xff]  ;;  %v321_v3 = vld [vmem:[%s1282_s6 + $0x148] sm:$0xff]  ;;  %v1122_v5 = vpack.c.bf16 %v386_v59, %v384_v58 }
  0x2e   : > { %1109 = vmatprep.subr.bf16.mxu0 %v1108_v25  ;;  %1041 = vmatprep.subr.bf16.mxu1 %v1040_v27  ;;  %v323_v4 = vld [vmem:[%s1282_s6 + $0x158] sm:$0xff]  ;;  %v388_v6 = vld [vmem:[%s1282_s6 + $0x360] sm:$0xff]  ;;  %v390_v7 = vld [vmem:[%s1282_s6 + $0x370] sm:$0xff]  ;;  %v1054_v8 = vpack.c.bf16 %v318_v1, %v316_v0  ;;  %v1124_v10 = vpack.c.bf16 %v391_v2, %v389_v62 }
  0x2f   : > { %v263_v9 = vld [vmem:[%s1373_s10 + $0x18] sm:$0xff]  ;;  %v393_v11 = vld [vmem:[%s1282_s6 + $0x388] sm:$0xff]  ;;  %v1056_v12 = vpack.c.bf16 %v323_v4, %v321_v3  ;;  %v320_v13 = vld [vmem:[%s1282_s6 + $0x140] sm:$0xff]  ;;  %v1126_v18 = vpack.c.bf16 %v390_v7, %v388_v6 }
  0x30   : > { %v322_v14 = vld [vmem:[%s1282_s6 + $0x150] sm:$0xff]  ;;  %v395_v15 = vld [vmem:[%s1282_s6 + $0x398] sm:$0xff]  ;;  %v325_v16 = vld [vmem:[%s1282_s6 + $0x168] sm:$0xff]  ;;  %614 = vmatprep.mubr.f32.mxu0 %v263_v9 }
  0x31   : > { %1111 = vmatpush1.bf16.msra.mxu0 %v1110_v33  ;;  %1043 = vmatpush1.bf16.msra.mxu1 %v1042_v36  ;;  %v327_v17 = vld [vmem:[%s1282_s6 + $0x178] sm:$0xff]  ;;  %v392_v19 = vld [vmem:[%s1282_s6 + $0x380] sm:$0xff]  ;;  %v394_v20 = vld [vmem:[%s1282_s6 + $0x390] sm:$0xff]  ;;  %v1058_v21 = vpack.c.bf16 %v322_v14, %v320_v13  ;;  %v1128_v22 = vpack.c.bf16 %v395_v15, %v393_v11 }
  0x32   : > { %1113 = vmatprep.subr.bf16.mxu0 %v1112_v37  ;;  %1045 = vmatprep.subr.bf16.mxu1 %v1044_v39  ;;  %v397_v23 = vld [vmem:[%s1282_s6 + $0x3a8] sm:$0xff]  ;;  %v1060_v24 = vpack.c.bf16 %v327_v17, %v325_v16  ;;  %v324_v25 = vld [vmem:[%s1282_s6 + $0x160] sm:$0xff]  ;;  %v326_v26 = vld [vmem:[%s1282_s6 + $0x170] sm:$0xff]  ;;  %v1130_v30 = vpack.c.bf16 %v394_v20, %v392_v19 }
  0x33   : > { %v399_v27 = vld [vmem:[%s1282_s6 + $0x3b8] sm:$0xff]  ;;  %v329_v28 = vld [vmem:[%s1282_s6 + $0x188] sm:$0xff]  ;;  %v396_v31 = vld [vmem:[%s1282_s6 + $0x3a0] sm:$0xff]  ;;  %v1062_v33 = vpack.c.bf16 %v326_v26, %v324_v25 }
  0x34   : > { %v331_v29 = vld [vmem:[%s1282_s6 + $0x198] sm:$0xff]  ;;  %v398_v32 = vld [vmem:[%s1282_s6 + $0x3b0] sm:$0xff]  ;;  %v261_v34 = vld [vmem:[%s1373_s10 + $0x8] sm:$0xff]  ;;  %v1132_v35 = vpack.c.bf16 %v399_v27, %v397_v23 }
  0x35   : > { %1115 = vmatpush1.bf16.msra.mxu0 %v1114_v45  ;;  %1047 = vmatpush1.bf16.msra.mxu1 %v1046_v48  ;;  %v401_v36 = vld [vmem:[%s1282_s6 + $0x3c8] sm:$0xff]  ;;  %v1064_v37 = vpack.c.bf16 %v331_v29, %v329_v28  ;;  %v328_v38 = vld [vmem:[%s1282_s6 + $0x180] sm:$0xff]  ;;  %v330_v39 = vld [vmem:[%s1282_s6 + $0x190] sm:$0xff]  ;;  %v1134_v43 = vpack.c.bf16 %v398_v32, %v396_v31 }
  0x36   : > { %1117 = vmatprep.subr.bf16.mxu0 %v1116_v49  ;;  %1049 = vmatprep.subr.bf16.mxu1 %v1048_v51  ;;  %v403_v40 = vld [vmem:[%s1282_s6 + $0x3d8] sm:$0xff]  ;;  %v333_v41 = vld [vmem:[%s1282_s6 + $0x1a8] sm:$0xff]  ;;  %v400_v44 = vld [vmem:[%s1282_s6 + $0x3c0] sm:$0xff]  ;;  %v1066_v46 = vpack.c.bf16 %v330_v39, %v328_v38 }
  0x37   : > { %v335_v42 = vld [vmem:[%s1282_s6 + $0x1b8] sm:$0xff]  ;;  %525 = vmatprep.mubr.f32.mxu1 %v261_v34  ;;  %v402_v45 = vld [vmem:[%s1282_s6 + $0x3d0] sm:$0xff]  ;;  %v1136_v47 = vpack.c.bf16 %v403_v40, %v401_v36  ;;  %v405_v48 = vld [vmem:[%s1282_s6 + $0x3e8] sm:$0xff] }
  0x38   : > { %v1068_v49 = vpack.c.bf16 %v335_v42, %v333_v41  ;;  %v332_v50 = vld [vmem:[%s1282_s6 + $0x1a0] sm:$0xff]  ;;  %v334_v51 = vld [vmem:[%s1282_s6 + $0x1b0] sm:$0xff]  ;;  %v407_v52 = vld [vmem:[%s1282_s6 + $0x3f8] sm:$0xff]  ;;  %v1138_v55 = vpack.c.bf16 %v402_v45, %v400_v44  ;;  %v1224_v44 = vmov 0.0  }
  0x39   : > { %1119 = vmatpush1.bf16.msra.mxu0 %v1118_v57  ;;  %1051 = vmatpush1.bf16.msra.mxu1 %v1050_v60  ;;  %v337_v53 = vld [vmem:[%s1282_s6 + $0x1c8] sm:$0xff]  ;;  %v339_v54 = vld [vmem:[%s1282_s6 + $0x1d8] sm:$0xff]  ;;  %v404_v56 = vld [vmem:[%s1282_s6 + $0x3e0] sm:$0xff]  ;;  %v1070_v58 = vpack.c.bf16 %v334_v51, %v332_v50  ;;  %v1140_v59 = vpack.c.bf16 %v407_v52, %v405_v48 }
  0x3a   : > { %1121 = vmatprep.subr.bf16.mxu0 %v1120_v61  ;;  %1053 = vmatprep.subr.bf16.mxu1 %v1052_v63  ;;  %v406_v57 = vld [vmem:[%s1282_s6 + $0x3f0] sm:$0xff]  ;;  %v409_v60 = vld [vmem:[%s1282_s6 + $0x408] sm:$0xff]  ;;  %v1072_v61 = vpack.c.bf16 %v339_v54, %v337_v53  ;;  %v336_v62 = vld [vmem:[%s1282_s6 + $0x1c0] sm:$0xff] }
  0x3b   : > { %v338_v63 = vld [vmem:[%s1282_s6 + $0x1d0] sm:$0xff]  ;;  %v411_v0 = vld [vmem:[%s1282_s6 + $0x418] sm:$0xff]  ;;  %v341_v1 = vld [vmem:[%s1282_s6 + $0x1e8] sm:$0xff]  ;;  %v1142_v3 = vpack.c.bf16 %v406_v57, %v404_v56 }
  0x3c   : > { %v343_v2 = vld [vmem:[%s1282_s6 + $0x1f8] sm:$0xff]  ;;  %v1074_v4 = vpack.c.bf16 %v338_v63, %v336_v62  ;;  %v408_v6 = vld [vmem:[%s1282_s6 + $0x400] sm:$0xff]  ;;  %v410_v7 = vld [vmem:[%s1282_s6 + $0x410] sm:$0xff] }
  0x3d   : > { %1123 = vmatpush1.bf16.msra.mxu0 %v1122_v5  ;;  %1055 = vmatpush1.bf16.msra.mxu1 %v1054_v8  ;;  %v1144_v5 = vpack.c.bf16 %v411_v0, %v409_v60  ;;  %v413_v8 = vld [vmem:[%s1282_s6 + $0x428] sm:$0xff]  ;;  %v1076_v9 = vpack.c.bf16 %v343_v2, %v341_v1  ;;  %v340_v11 = vld [vmem:[%s1282_s6 + $0x1e0] sm:$0xff]  ;;  %v262_v13 = vld [vmem:[%s1373_s10 + $0x10] sm:$0xff]  ;;  %v1146_v14 = vpack.c.bf16 %v410_v7, %v408_v6 }
  0x3e   : > { %1125 = vmatprep.subr.bf16.mxu0 %v1124_v10  ;;  %1057 = vmatprep.subr.bf16.mxu1 %v1056_v12  ;;  %v415_v10 = vld [vmem:[%s1282_s6 + $0x438] sm:$0xff]  ;;  %v342_v12 = vld [vmem:[%s1282_s6 + $0x1f0] sm:$0xff]  ;;  %v268_v15 = vld [vmem:[%s1373_s10 + $0x40] sm:$0xff] }
  0x3f   : > { %v1148_v16 = vpack.c.bf16 %v415_v10, %v413_v8  ;;  %v412_v17 = vld [vmem:[%s1282_s6 + $0x420] sm:$0xff]  ;;  %v1078_v19 = vpack.c.bf16 %v342_v12, %v340_v11  ;;  %v417_v20 = vld [vmem:[%s1282_s6 + $0x448] sm:$0xff]  ;;  %v418_v27 = vld [vmem:[%s1282_s6 + $0x450] sm:$0xff] }
  0x40   : > { %v416_v26 = vld [vmem:[%s1282_s6 + $0x440] sm:$0xff]  ;;  %v421_v29 = vld [vmem:[%s1282_s6 + $0x468] sm:$0xff]  ;;  %v266_v31 = vld [vmem:[%s1373_s10 + $0x30] sm:$0xff] }
  0x41   : > { %1127 = vmatpush1.bf16.msra.mxu0 %v1126_v18  ;;  %1059 = vmatpush1.bf16.msra.mxu1 %v1058_v21  ;;  %v414_v18 = vld [vmem:[%s1282_s6 + $0x430] sm:$0xff]  ;;  %v419_v21 = vld [vmem:[%s1282_s6 + $0x458] sm:$0xff]  ;;  %v260_v28 = vld [vmem:[%s1373_s10] sm:$0xff] }
  0x42   : > { %1129 = vmatprep.subr.bf16.mxu0 %v1128_v22  ;;  %1061 = vmatprep.subr.bf16.mxu1 %v1060_v24  ;;  %v267_v22 = vld [vmem:[%s1373_s10 + $0x38] sm:$0xff]  ;;  %v1150_v23 = vpack.c.bf16 %v414_v18, %v412_v17  ;;  %v273_v24 = vld [vmem:[%s1373_s10 + $0x68] sm:$0xff]  ;;  %v1152_v25 = vpack.c.bf16 %v419_v21, %v417_v20  ;;  %v272_v32 = vld [vmem:[%s1373_s10 + $0x60] sm:$0xff] }
  0x43   : > { %v278_v34 = vld [vmem:[%s1373_s10 + $0x90] sm:$0xff]  ;;  %v420_v36 = vld [vmem:[%s1282_s6 + $0x460] sm:$0xff]  ;;  %v265_v38 = vld [vmem:[%s1373_s10 + $0x28] sm:$0xff] }
  0x44   : > { %v271_v39 = vld [vmem:[%s1373_s10 + $0x58] sm:$0xff]  ;;  %v277_v40 = vld [vmem:[%s1373_s10 + $0x88] sm:$0xff]  ;;  %v270_v42 = vld [vmem:[%s1373_s10 + $0x50] sm:$0xff] }
  0x45   : > { %1131 = vmatpush1.bf16.msra.mxu0 %v1130_v30  ;;  %1063 = vmatpush1.bf16.msra.mxu1 %v1062_v33  ;;  %v423_v30 = vld [vmem:[%s1282_s6 + $0x478] sm:$0xff]  ;;  %v1154_v33 = vpack.c.bf16 %v418_v27, %v416_v26  ;;  %v264_v45 = vld [vmem:[%s1373_s10 + $0x20] sm:$0xff]  ;;  %v274_v48 = vld [vmem:[%s1373_s10 + $0x70] sm:$0xff] }
  0x46   : > { %1133 = vmatprep.subr.bf16.mxu0 %v1132_v35  ;;  %1065 = vmatprep.subr.bf16.mxu1 %v1064_v37  ;;  %v1156_v35 = vpack.c.bf16 %v423_v30, %v421_v29  ;;  %v422_v37 = vld [vmem:[%s1282_s6 + $0x470] sm:$0xff] }
  0x47   : > { %v1158_v41 = vpack.c.bf16 %v422_v37, %v420_v36 }
  0x49   : > { %1135 = vmatpush1.bf16.msra.mxu0 %v1134_v43  ;;  %1067 = vmatpush1.bf16.msra.mxu1 %v1066_v46  ;;  %v276_v43 = vld [vmem:[%s1373_s10 + $0x80] sm:$0xff]  ;;  %v275_v46 = vld [vmem:[%s1373_s10 + $0x78] sm:$0xff] }
  0x4a   : > { %1137 = vmatprep.subr.bf16.mxu0 %v1136_v47  ;;  %1069 = vmatprep.subr.bf16.mxu1 %v1068_v49  ;;  %v269_v47 = vld [vmem:[%s1373_s10 + $0x48] sm:$0xff]  ;;  %v279_v49 = vld [vmem:[%s1373_s10 + $0x98] sm:$0xff] }
  0x4d   : > { %1139 = vmatpush1.bf16.msra.mxu0 %v1138_v55  ;;  %1071 = vmatpush1.bf16.msra.mxu1 %v1070_v58 }
  0x4e   : > { %1141 = vmatprep.subr.bf16.mxu0 %v1140_v59  ;;  %1073 = vmatprep.subr.bf16.mxu1 %v1072_v61 }
  0x51   : > { %1143 = vmatpush1.bf16.msra.mxu0 %v1142_v3  ;;  %1075 = vmatpush1.bf16.msra.mxu1 %v1074_v4 }
  0x52   : > { %1145 = vmatprep.subr.bf16.mxu0 %v1144_v5  ;;  %1077 = vmatprep.subr.bf16.mxu1 %v1076_v9 }
  0x54   : > { %615 = vmatmul.mubr.f32.vlgmr.msra.gmra.mrb[0].mxu0 %v262_v13 }
  0x55   : > { %1147 = vmatpush1.bf16.msra.mxu0 %v1146_v14  ;;  %620 = vmatprep.mubr.f32.mxu0 %v268_v15 }
  0x56   : > { %1149 = vmatprep.subr.bf16.mxu0 %v1148_v16  ;;  %1079 = vmatpush1.bf16.msra.mxu1 %v1078_v19 }
  0x58   : > { %621 = vmatmul.mubr.f32.gmra.mrb[2].mxu0 %v267_v22 }
  0x59   : > { %1151 = vmatpush1.bf16.msra.mxu0 %v1150_v23  ;;  %626 = vmatprep.mubr.f32.mxu0 %v273_v24 }
  0x5a   : > { %1153 = vmatprep.subr.bf16.mxu0 %v1152_v25  ;;  %526 = vmatmul.mubr.f32.vlgmr.msra.gmra.mrb[0].mxu1 %v260_v28 }
  0x5b   : > { %531 = vmatprep.mubr.f32.mxu1 %v266_v31 }
  0x5c   : > { %627 = vmatmul.mubr.f32.gmra.mrb[4].mxu0 %v272_v32 }
  0x5d   : > { %1155 = vmatpush1.bf16.msra.mxu0 %v1154_v33  ;;  %632 = vmatprep.mubr.f32.mxu0 %v278_v34 }
  0x5e   : > { %1157 = vmatprep.subr.bf16.mxu0 %v1156_v35  ;;  %532 = vmatmul.mubr.f32.gmra.mrb[2].mxu1 %v265_v38 }
  0x5f   : > { %537 = vmatprep.mubr.f32.mxu1 %v271_v39 }
  0x60   : > { %633 = vmatmul.mubr.f32.gmra.mrb[6].mxu0 %v277_v40 }
  0x61   : > { %1159 = vmatpush1.bf16.msra.mxu0 %v1158_v41  ;;  %703 = vmatprep.mubr.f32.mxu0 %v1224_v44 }
  0x62   : > { %538 = vmatmul.mubr.f32.gmra.mrb[4].mxu1 %v270_v42 }
  0x63   : > { %543 = vmatprep.mubr.f32.mxu1 %v276_v43 }
  0x64   : > { %1009 = vmatmul.mubr.msk.f32.vlgmr.msra.gmra.mrb[0].mxu0 %vm448_vm0, %v264_v45 }
  0x65   : > { %709 = vmatprep.mubr.f32.mxu0 %v1224_v44 }
  0x66   : > { %544 = vmatmul.mubr.f32.gmra.mrb[6].mxu1 %v275_v46 }
  0x67   : > { %893 = vmatprep.mubr.f32.mxu1 %v1224_v44 }
  0x68   : > { %1010 = vmatmul.mubr.msk.f32.gmra.mrb[2].mxu0 %vm448_vm0, %v269_v47 }
  0x69   : > { %715 = vmatprep.mubr.f32.mxu0 %v1224_v44 }
  0x6c   : > { %1011 = vmatmul.mubr.msk.f32.gmra.mrb[4].mxu0 %vm448_vm0, %v274_v48 }
  0x6d   : > { %721 = vmatprep.mubr.f32.mxu0 %v1224_v44 }
  0x70   : > { %1012 = vmatmul.mubr.msk.f32.gmra.mrb[6].mxu0 %vm448_vm0, %v279_v49 }
  0x86   : > { %v431_v52 = vpop.permute.xlu0 %430  ;;  %v441_v0 = vpop.permute.xlu1 %440 }
  0x8a   : > { %v436_v59 = vpop.permute.xlu0 %435  ;;  %v446_v14 = vpop.permute.xlu1 %445 }
 0x12d   : > { %v527_v50 = vpop.f32.mrb[0].mxu1 }
 0x12e   : > { %v529_v51 = vpop.f32.mrb[1].mxu1  ;;  %v528_v55 = vadd.f32 %v527_v50, %v431_v52 }
 0x12f   : > { %v530_v56 = vadd.f32 %v529_v51, %v431_v52 }
 0x131   : > { %v533_v53 = vpop.f32.mrb[2].mxu1 }
 0x132   : > { %v535_v54 = vpop.f32.mrb[3].mxu1  ;;  %v534_v2 = vadd.f32 %v533_v53, %v436_v59 }
 0x133   : > { %v536_v4 = vadd.f32 %v535_v54, %v436_v59 }
 0x135   : > { %v539_v57 = vpop.f32.mrb[4].mxu1 }
 0x136   : > { %v541_v58 = vpop.f32.mrb[5].mxu1  ;;  %v540_v9 = vadd.f32 %v539_v57, %v441_v0 }
 0x137   : > { %v705_v60 = vpop.f32.mrb[0].mxu0  ;;  %v542_v12 = vadd.f32 %v541_v58, %v441_v0 }
 0x138   : > { %v1454_v61 = vadd.f32 %v705_v60, %v528_v55  ;;  %v707_v62 = vpop.f32.mrb[1].mxu0 }
 0x139   : > { %v1456_v63 = vadd.f32 %v707_v62, %v530_v56  ;;  %v545_v1 = vpop.f32.mrb[6].mxu1 }
 0x13a   : > { %v547_v3 = vpop.f32.mrb[7].mxu1  ;;  %v744_v7 = vmul.f32 %v1454_v61, %v1454_v61  ;;  %v546_v23 = vadd.f32 %v545_v1, %v446_v14 }
 0x13b   : > { %v711_v5 = vpop.f32.mrb[2].mxu0  ;;  %v728_v6 = vadd.f32 %v1456_v63, %v1454_v61  ;;  %v745_v8 = vmul.f32 %v1456_v63, %v1456_v63  ;;  %v548_v24 = vadd.f32 %v547_v3, %v446_v14 }
 0x13c   : > { %v1464_v10 = vadd.f32 %v711_v5, %v534_v2  ;;  %v713_v11 = vpop.f32.mrb[3].mxu0 }
 0x13d   : > { %v1466_v13 = vadd.f32 %v713_v11, %v536_v4  ;;  %729 = vadd.xlane.f32.xlu0 %v728_v6  ;;  %v752_v17 = vadd.f32 %v745_v8, %v744_v7 }
 0x13e   : > { %v746_v18 = vmul.f32 %v1464_v10, %v1464_v10 }
 0x13f   : > { %v717_v15 = vpop.f32.mrb[4].mxu0  ;;  %v731_v16 = vadd.f32 %v1466_v13, %v1464_v10  ;;  %v747_v19 = vmul.f32 %v1466_v13, %v1466_v13 }
 0x140   : > { %v1474_v20 = vadd.f32 %v717_v15, %v540_v9  ;;  %v719_v21 = vpop.f32.mrb[5].mxu0 }
 0x141   : > { %v1476_v22 = vadd.f32 %v719_v21, %v542_v12  ;;  %732 = vadd.xlane.f32.xlu1 %v731_v16  ;;  %753 = vadd.xlane.f32.xlu0 %v752_v17  ;;  %v755_v27 = vadd.f32 %v747_v19, %v746_v18 }
 0x142   : > { %v748_v28 = vmul.f32 %v1474_v20, %v1474_v20 }
 0x143   : > { %v723_v25 = vpop.f32.mrb[6].mxu0  ;;  %v734_v26 = vadd.f32 %v1476_v22, %v1474_v20  ;;  %v749_v29 = vmul.f32 %v1476_v22, %v1476_v22 }
 0x144   : > { %v1484_v30 = vadd.f32 %v723_v25, %v546_v23  ;;  %v725_v31 = vpop.f32.mrb[7].mxu0 }
 0x145   : > { %v1486_v32 = vadd.f32 %v725_v31, %v548_v24  ;;  %735 = vadd.xlane.f32.xlu1 %v734_v26  ;;  %756 = vadd.xlane.f32.xlu0 %v755_v27  ;;  %v758_v33 = vadd.f32 %v749_v29, %v748_v28 }
 0x146   : > { %v750_v35 = vmul.f32 %v1484_v30, %v1484_v30 }
 0x147   : > { %v737_v34 = vadd.f32 %v1486_v32, %v1484_v30  ;;  %v751_v36 = vmul.f32 %v1486_v32, %v1486_v32 }
 0x149   : > { %759 = vadd.xlane.f32.xlu1 %v758_v33  ;;  %738 = vadd.xlane.f32.xlu0 %v737_v34  ;;  %v761_v37 = vadd.f32 %v751_v36, %v750_v35 }
 0x14d   : > { %762 = vadd.xlane.f32.xlu0 %v761_v37 }
 0x1ca   : > { %v730_v38 = vpop.xlane.xlu0 %729 }
 0x1cb   : > { %v740_v39 = vmul.f32 0.00390625, %v730_v38 }
 0x1cd   : > { %v768_v43 = vmul.f32 %v740_v39, %v740_v39  ;;  %v780_v9 = vsub.f32 %v1454_v61, %v740_v39  ;;  %v781_v11 = vsub.f32 %v1456_v63, %v740_v39 }
 0x1ce   : > { %v733_v40 = vpop.xlane.xlu1 %732  ;;  %v754_v41 = vpop.xlane.xlu0 %753 }
 0x1cf   : > { %v741_v42 = vmul.f32 0.00390625, %v733_v40  ;;  %v764_v44 = vmul.f32 0.00390625, %v754_v41 }
 0x1d1   : > { %v772_v45 = vsub.f32 %v764_v44, %v768_v43  ;;  %v769_v50 = vmul.f32 %v741_v42, %v741_v42  ;;  %v782_v12 = vsub.f32 %v1464_v10, %v741_v42  ;;  %v783_v14 = vsub.f32 %v1466_v13, %v741_v42  ;;  %v813_v42 = vld [vmem:[%s255_s16] sm:$0x3] }
 0x1d2   : > { %v736_v46 = vpop.xlane.xlu1 %735  ;;  %v757_v47 = vpop.xlane.xlu0 %756  ;;  %v1225_v44 = vmov 1966171168  }
 0x1d3   : > { %v776_v48 = vmax.f32 %v772_v45, 0.0  ;;  %v742_v49 = vmul.f32 0.00390625, %v736_v46  ;;  %v765_v51 = vmul.f32 0.00390625, %v757_v47  ;;  %v904_v45 = vunpack.c.l.s4 %v1225_v44 }
 0x1d5   : > { %v788_v52 = vadd.f32 1e-05, %v776_v48  ;;  %v773_v53 = vsub.f32 %v765_v51, %v769_v50  ;;  %v770_v54 = vmul.f32 %v742_v49, %v742_v49  ;;  %v784_v27 = vsub.f32 %v1474_v20, %v742_v49 }
 0x1d6   : > { %v760_v55 = vpop.xlane.xlu1 %759  ;;  %v739_v56 = vpop.xlane.xlu0 %738  ;;  %v785_v61 = vsub.f32 %v1476_v22, %v742_v49  ;;  %v905_v48 = vunpack.c.0.s8 %v904_v45 }
 0x1d7   : > { %1207 = vrsqrt.f32 %v788_v52  ;;  %v777_v57 = vmax.f32 %v773_v53, 0.0  ;;  %v766_v58 = vmul.f32 0.00390625, %v760_v55  ;;  %v743_v59 = vmul.f32 0.00390625, %v739_v56 }
 0x1d9   : > { %v789_v60 = vadd.f32 1e-05, %v777_v57  ;;  %v774_v62 = vsub.f32 %v766_v58, %v770_v54  ;;  %v771_v2 = vmul.f32 %v743_v59, %v743_v59  ;;  %v786_v10 = vsub.f32 %v1484_v30, %v743_v59  ;;  %v812_v30 = vld [vmem:[%s1518_s3] sm:$0x1] }
 0x1da   : > { %v763_v0 = vpop.xlane.xlu0 %762  ;;  %v787_v13 = vsub.f32 %v1486_v32, %v743_v59  ;;  %v815_v32 = vlaneseq }
 0x1db   : > { %1209 = vrsqrt.f32 %v789_v60  ;;  %v778_v1 = vmax.f32 %v774_v62, 0.0  ;;  %v767_v3 = vmul.f32 0.00390625, %v763_v0 }
 0x1dc   : > { %v816_v40 = vshrl.u32 %v815_v32, 7  ;;  %vm920_vm2 = vcmp.lt.s32.totalorder %v815_v32, 256 }
 0x1dd   : > { %v790_v4 = vadd.f32 1e-05, %v778_v1  ;;  %v775_v5 = vsub.f32 %v767_v3, %v771_v2 }
 0x1de   : > { %v817_v41 = vsub.s32 0, %v816_v40  ;;  %v821_v43 = vsub.s32 1, %v816_v40  ;;  %v908_v53 = vsub.s32 %v905_v48, %v816_v40 }
 0x1df   : > { %1211 = vrsqrt.f32 %v790_v4  ;;  %v779_v6 = vmax.f32 %v775_v5, 0.0 }
 0x1e0   : > { %v818_v46 = vrot.slane %v813_v42, %v817_v41  ;;  %v822_v47 = vrot.slane %v813_v42, %v821_v43 }
 0x1e1   : > { %v1208_v7 = vpop.eup %1207  ;;  %v791_v8 = vadd.f32 1e-05, %v779_v6 }
 0x1e2   : > { %v797_v15 = vmul.f32 %v1208_v7, %v781_v11  ;;  %v796_v16 = vmul.f32 %v1208_v7, %v780_v9 }
 0x1e3   : > { %1213 = vrsqrt.f32 %v791_v8 }
 0x1e4   : > { %v805_v21 = vmax.f32 %v797_v15, 0.0  ;;  %v804_v24 = vmax.f32 %v796_v16, 0.0 }
 0x1e5   : > { %v1210_v17 = vpop.eup %1209 }
 0x1e6   : > { %v799_v18 = vmul.f32 %v1210_v17, %v783_v14  ;;  %v798_v19 = vmul.f32 %v1210_v17, %v782_v12 }
 0x1e8   : > { %v807_v23 = vmax.f32 %v799_v18, 0.0  ;;  %v806_v25 = vmax.f32 %v798_v19, 0.0 }
 0x1e9   : > { %v1212_v26 = vpop.eup %1211 }
 0x1ea   : > { %v1160_v63 = vpack.c.bf16 %v807_v23, %v805_v21  ;;  %v1162_v28 = vpack.c.bf16 %v806_v25, %v804_v24  ;;  %v801_v29 = vmul.f32 %v1212_v26, %v785_v61  ;;  %v800_v31 = vmul.f32 %v1212_v26, %v784_v27 }
 0x1ec   : > { %1161 = vmatprep.subr.bf16.mxu1 %v1160_v63  ;;  %v809_v36 = vmax.f32 %v801_v29, 0.0  ;;  %v808_v38 = vmax.f32 %v800_v31, 0.0 }
 0x1ed   : > { %v1214_v33 = vpop.eup %1213  ;;  %1163 = vmatpush1.bf16.msra.mxu1 %v1162_v28 }
 0x1ee   : > { %v803_v34 = vmul.f32 %v1214_v33, %v787_v13  ;;  %v802_v35 = vmul.f32 %v1214_v33, %v786_v10 }
 0x1f0   : > { %v811_v37 = vmax.f32 %v803_v34, 0.0  ;;  %v810_v20 = vmax.f32 %v802_v35, 0.0 }
 0x1f2   : > { %v1164_v39 = vpack.c.bf16 %v811_v37, %v809_v36  ;;  %v1166_v22 = vpack.c.bf16 %v810_v20, %v808_v38 }
 0x1f4   : > { %1165 = vmatprep.subr.bf16.mxu1 %v1164_v39 }
 0x1f5   : > { %1167 = vmatpush1.bf16.msra.mxu1 %v1166_v22 }
 0x1f8   : > { %1013 = vmatmul.mubr.msk.f32.vlgmr.msra.gmra.mrb[8].mxu1 %vm825_vm1, %v812_v30 }
 0x2cb   : > { %v895_v49 = vpop.f32.mrb[8].mxu1 }
 0x2cc   : > { %v896_v50 = vadd.f32 %v895_v49, %v818_v46  ;;  %v897_v51 = vpop.f32.mrb[9].mxu1 }
 0x2cd   : > { %v898_v52 = vadd.f32 %v897_v51, %v822_v47 }
 0x2cf   : > { %v902_v54 = vcombine.low %v896_v50, %v898_v52 }
 0x2d1   : > { %v909_v55 = vrot.slane %v902_v54, %v908_v53 }
 0x2d3   : > { %v916_v56 = vrot.slane %v909_v55, %v908_v53 }
 0x2d5   : > { %922 = vst.msk [vmem:[%s259_s20] sm:$0x3] %vm920_vm2, %v916_v56 }
 0x2d6 PF: > { %s15_s18 = sadd.s32 1, %s1221_s18  }
 0x2d7   : > { %p12_p4 = scmp.ge.s32.totalorder %s15_s18, 4  }
 0x2d9   :  { %14 = sbr.rel (!%p12_p4) target bundleno = 1 (0x1), region = 76 }

</bundles_post_ra>
